<compile_context>
chip_gen: v5e
topology: v5e:2x2
jax: 0.10.0
libtpu: 0.0.40
codegen_flags: <defaults>
</compile_context>

<pallas_src>
import math

import numpy as np
import jax
import jax.numpy as jnp
from jax.experimental import pallas as pl
from jax.experimental.pallas import tpu as pltpu

# ---- model configuration (torch module defaults for board_size=4) ----
BOARD = 4                      # board_size
DIM = 16                       # default dim
NHEAD = 2
NUM_LAYERS = BOARD             # torch default: num_layers = board_size
INPUT_DIM = 6
PADW = BOARD + 2               # padded board width (6)
SEQ = PADW * PADW              # 36
SEQ_PAD = 40                   # padded to a multiple of 8 sublanes (5 tiles / board)
HEAD_DIM = DIM // NHEAD
LN_EPS = 1e-5
FP16_MAX = 65504.0             # torch.finfo(torch.float16).max
NEG_BIG = -1e30
MAX_B_TILE = 16                # boards per grid step (raised per v5e/v6e feedback)


def _layernorm(v, w, b):
    mu = jnp.mean(v, axis=-1, keepdims=True)
    var = jnp.mean((v - mu) ** 2, axis=-1, keepdims=True)
    return (v - mu) * jax.lax.rsqrt(var + LN_EPS) * w + b


def hex_fused_kernel(x_ref, pos_ref, base_ref, wl_ref, bl_ref, whead_ref,
                     sels_ref, out_ref):
    f32, bf16 = jnp.float32, jnp.bfloat16
    b_tile = out_ref.shape[1]
    rows = b_tile * SEQ_PAD

    xin = x_ref[...]                                             # (rows, 6) f32

    # base: Linear(6 -> dim, no bias) + positional embedding + LayerNorm
    emb = jnp.dot(xin.astype(bf16), base_ref[0:INPUT_DIM, :].astype(bf16),
                  preferred_element_type=f32)                    # (rows, 16)
    h3 = emb.reshape(b_tile, SEQ_PAD, DIM) + pos_ref[...]        # per-board pos add
    h3 = _layernorm(h3, base_ref[INPUT_DIM:INPUT_DIM + 1, :],
                    base_ref[INPUT_DIM + 1:INPUT_DIM + 2, :])
    h = h3.reshape(rows, DIM)

    # additive key-mask for the 4 zero-pad positions of every board (hoisted once)
    kbias = jnp.where(
        jax.lax.broadcasted_iota(jnp.int32, (1, SEQ_PAD, SEQ_PAD), 2) < SEQ,
        0.0, NEG_BIG).astype(f32)                                # (1, 40, 40)

    for l in range(NUM_LAYERS):
        wl = wl_ref[l]                                           # (16, 96): [wq|wk|wv|wo|w1|w2]
        bl = bl_ref[l]                                           # (1, 128): [bq|bk|bv|bo|lnw|lnb|b1|b2]
        lnw, lnb = bl[:, 64:80], bl[:, 80:96]

        # ---- multi-head self-attention (eval mode: no dropout) ----
        qkv = jnp.dot(h.astype(bf16), wl[:, 0:3 * DIM].astype(bf16),
                      preferred_element_type=f32) + bl[:, 0:3 * DIM]
        qkv3 = qkv.reshape(b_tile, SEQ_PAD, 3 * DIM)             # per-board view

        attn = bl[:, 48:64]                                      # out-proj bias (broadcast)
        for hh in range(NHEAD):
            lo = hh * HEAD_DIM
            q = qkv3[..., lo:lo + HEAD_DIM]                      # 1/sqrt(d) folded into Wq/bq
            k = qkv3[..., DIM + lo:DIM + lo + HEAD_DIM]
            v = qkv3[..., 2 * DIM + lo:2 * DIM + lo + HEAD_DIM]
            s = jnp.einsum('bqd,bkd->bqk', q.astype(bf16), k.astype(bf16),
                           preferred_element_type=f32) + kbias   # (b, 40, 40)
            s = s - jnp.max(s, axis=-1, keepdims=True)
            p = jnp.exp(s)
            p = p * pl.reciprocal(jnp.sum(p, axis=-1, keepdims=True), approx=True)
            o = jnp.einsum('bqk,bkd->bqd', p.astype(bf16), v.astype(bf16),
                           preferred_element_type=f32)           # (b, 40, 8)
            attn = attn + jnp.dot(o.reshape(rows, HEAD_DIM).astype(bf16),
                                  wl[lo:lo + HEAD_DIM, 3 * DIM:4 * DIM].astype(bf16),
                                  preferred_element_type=f32)
        h = _layernorm(h + attn, lnw, lnb)

        # ---- feed forward (Linear -> SiLU -> Linear), dropouts = identity ----
        ff = jnp.dot(h.astype(bf16), wl[:, 64:80].astype(bf16),
                     preferred_element_type=f32) + bl[:, 96:112]
        ff = ff * jax.nn.sigmoid(ff)                             # SiLU
        ff = jnp.dot(ff.astype(bf16), wl[:, 80:96].astype(bf16),
                     preferred_element_type=f32) + bl[:, 112:128]
        h = _layernorm(h + ff, lnw, lnb)                         # torch block reuses the same self.norm

    # ---- fused policy / value heads (per-board masks, no replication) ----
    head = jnp.dot(h.astype(bf16), whead_ref[...].astype(bf16),
                   preferred_element_type=f32)                   # lanes 0:9 conv taps, lane 9 value
    head3 = head.reshape(b_tile, SEQ_PAD, DIM)
    xin3 = xin.reshape(b_tile, SEQ_PAD, INPUT_DIM)

    r = (xin3[..., 0:1] + xin3[..., 1:2]) * sels_ref[9]          # occupancy penalty (-FP16_MAX mask)
    r = r + head3[..., 9:10] * sels_ref[10]                      # value contributions -> lane 16
    for t in range(9):
        r = r + head3[..., t:t + 1] * sels_ref[t]                # conv tap t -> its output-cell lane
    seg = jnp.sum(r, axis=1) + bl_ref[NUM_LAYERS]                # (b, 128) + head biases

    lane = jax.lax.broadcasted_iota(jnp.int32, seg.shape, 1)
    z = jnp.where(lane < BOARD * BOARD, seg, NEG_BIG)
    z = z - jnp.max(z, axis=-1, keepdims=True)
    e = jnp.exp(z)
    pol = e / jnp.sum(e, axis=-1, keepdims=True)                 # exact div for the tiny final softmax
    val = jnp.where(lane == BOARD * BOARD, jnp.tanh(seg), 0.0)
    out_ref[...] = (pol + val).reshape(1, b_tile, 128)           # lane-dense store


# ---------- geometry constants (built once with numpy, SEQ padded to 40) ----------
def _geometry_masks():
    pb = np.zeros((9, SEQ_PAD, 128), np.float32)                 # tap -> output cell selection
    for t in range(9):
        ki, kj = t // 3, t % 3
        for c in range(BOARD * BOARD):
            i, j = c // BOARD, c % BOARD
            pb[t, (i + ki) * PADW + (j + kj), c] = 1.0
    occ = np.zeros((1, SEQ_PAD, 128), np.float32)                # interior-cell occupancy penalty
    for c in range(BOARD * BOARD):
        i, j = c // BOARD, c % BOARD
        occ[0, (i + 1) * PADW + (j + 1), c] = -FP16_MAX
    return np.concatenate([pb, occ], axis=0)                     # (10, SEQ_PAD, 128)


_GEO = _geometry_masks()


def init_params(key):
    ks = jax.random.split(key, 20)

    def rnd(k, shape, s=0.1):
        return s * jax.random.normal(k, shape, dtype=jnp.float32)

    return dict(
        wemb=rnd(ks[0], (INPUT_DIM, DIM)),                                    # Linear(6, dim, bias=False).weight.T
        pos=(2.0 / 3.0) * jax.random.normal(ks[1], (SEQ, DIM), jnp.float32),  # HexPositionalEmbedding
        ln0w=jnp.ones((1, DIM), jnp.float32),
        ln0b=jnp.zeros((1, DIM), jnp.float32),
        wq=rnd(ks[2], (NUM_LAYERS, DIM, DIM)),
        wk=rnd(ks[3], (NUM_LAYERS, DIM, DIM)),
        wv=rnd(ks[4], (NUM_LAYERS, DIM, DIM)),
        wo=rnd(ks[5], (NUM_LAYERS, DIM, DIM)),
        bq=rnd(ks[6], (NUM_LAYERS, 1, DIM)),
        bk=rnd(ks[7], (NUM_LAYERS, 1, DIM)),
        bv=rnd(ks[8], (NUM_LAYERS, 1, DIM)),
        bo=rnd(ks[9], (NUM_LAYERS, 1, DIM)),
        lnw=jnp.ones((NUM_LAYERS, 1, DIM), jnp.float32),
        lnb=jnp.zeros((NUM_LAYERS, 1, DIM), jnp.float32),
        w1=rnd(ks[10], (NUM_LAYERS, DIM, DIM)),
        b1=rnd(ks[11], (NUM_LAYERS, 1, DIM)),
        w2=rnd(ks[12], (NUM_LAYERS, DIM, DIM)),
        b2=rnd(ks[13], (NUM_LAYERS, 1, DIM)),
        wc=rnd(ks[14], (DIM, 9)),        # Conv2d(dim, 1, 3).weight reshaped to (dim, 9)
        cb=rnd(ks[15], (1, 1)),          # conv bias
        vw1=rnd(ks[16], (DIM, 1)),
        vb1=rnd(ks[17], (1, 1)),
        vw2=rnd(ks[18], (SEQ, 1)),
        vb2=rnd(ks[19], (1, 1)),
    )


def hex_transformer_forward(x, p, max_b_tile=MAX_B_TILE):
    batch = x.shape[0]
    # >=2 grid steps whenever batch >= 2 so the "parallel" axis can use both TCs (v7x)
    b_tile = max(1, min(max_b_tile, (batch + 1) // 2))
    n_tiles = (batch + b_tile - 1) // b_tile
    padded = n_tiles * b_tile

    x = x.astype(jnp.float32)
    if padded != batch:
        x = jnp.concatenate([x, jnp.zeros((padded - batch, SEQ, INPUT_DIM), jnp.float32)], 0)
    x = jnp.pad(x, ((0, 0), (0, SEQ_PAD - SEQ), (0, 0)))                      # seq 36 -> 40
    x_flat = x.reshape(padded * SEQ_PAD, INPUT_DIM)

    # ---- pack parameters into a few lane-dense slabs (cheap XLA ops) ----
    scale = 1.0 / math.sqrt(HEAD_DIM)                                         # fold into Wq/bq
    w_layers = jnp.concatenate([p["wq"] * scale, p["wk"], p["wv"], p["wo"],
                                p["w1"], p["w2"]], axis=-1)                   # (L, 16, 96)
    b_layers = jnp.concatenate([p["bq"] * scale, p["bk"], p["bv"], p["bo"],
                                p["lnw"], p["lnb"], p["b1"], p["b2"]], axis=-1)  # (L, 1, 128)
    vbias = p["vb1"][0, 0] * jnp.sum(p["vw2"]) + p["vb2"][0, 0]
    hbias = jnp.concatenate([jnp.full((1, 1, BOARD * BOARD), p["cb"][0, 0]),
                             jnp.reshape(vbias, (1, 1, 1)),
                             jnp.zeros((1, 1, 128 - BOARD * BOARD - 1), jnp.float32)],
                            axis=-1)
    b_layers = jnp.concatenate([b_layers, hbias], axis=0)                     # (L+1, 1, 128)

    w_base = jnp.concatenate([p["wemb"], p["ln0w"], p["ln0b"]], axis=0)       # (8, 16)
    pos_pad = jnp.pad(p["pos"], ((0, SEQ_PAD - SEQ), (0, 0)))                 # (40, 16)
    w_head = jnp.concatenate([p["wc"], p["vw1"],
                              jnp.zeros((DIM, DIM - 10), jnp.float32)], axis=-1)  # (16, 16)

    vw2m = jnp.zeros((1, SEQ_PAD, 128), jnp.float32).at[0, :SEQ, BOARD * BOARD].set(p["vw2"][:, 0])
    sels = jnp.concatenate([jnp.asarray(_GEO), vw2m], axis=0)                 # (11, 40, 128)

    out = pl.pallas_call(
        hex_fused_kernel,
        grid=(n_tiles,),
        in_specs=[
            pl.BlockSpec((b_tile * SEQ_PAD, INPUT_DIM), lambda i: (i, 0)),    # x (flat per-tile)
            pl.BlockSpec((SEQ_PAD, DIM), lambda i: (0, 0)),                   # positional emb (not replicated)
            pl.BlockSpec((INPUT_DIM + 2, DIM), lambda i: (0, 0)),             # base slab
            pl.BlockSpec((NUM_LAYERS, DIM, 6 * DIM), lambda i: (0, 0, 0)),    # per-layer weights
            pl.BlockSpec((NUM_LAYERS + 1, 1, 128), lambda i: (0, 0, 0)),      # per-layer biases + head bias
            pl.BlockSpec((DIM, DIM), lambda i: (0, 0)),                       # head weights
            pl.BlockSpec((11, SEQ_PAD, 128), lambda i: (0, 0, 0)),            # per-board selection masks
        ],
        out_specs=pl.BlockSpec((1, b_tile, 128), lambda i: (i, 0, 0)),
        out_shape=jax.ShapeDtypeStruct((n_tiles, b_tile, 128), jnp.float32),
        compiler_params=pltpu.CompilerParams(
            dimension_semantics=("parallel",),
            vmem_limit_bytes=32 * 1024 * 1024),
    )(x_flat, pos_pad, w_base, w_layers, b_layers, w_head, sels)

    out = out.reshape(padded, 128)
    policy = out[:batch, :BOARD * BOARD]
    value = out[:batch, BOARD * BOARD:BOARD * BOARD + 1]
    return policy, value


if __name__ == "__main__":
    key = jax.random.PRNGKey(0)
    kx, kp = jax.random.split(key)
    batch = 2
    x = jax.random.normal(kx, (batch, SEQ, INPUT_DIM), dtype=jnp.float32)
    params = init_params(kp)

    policy, value = jax.jit(hex_transformer_forward)(x, params)
    jax.block_until_ready((policy, value))

    assert policy.shape == (batch, BOARD * BOARD)
    assert value.shape == (batch, 1)
    assert bool(jnp.all(jnp.isfinite(policy))) and bool(jnp.all(jnp.isfinite(value)))
    assert bool(jnp.all(jnp.abs(jnp.sum(policy, axis=1) - 1.0) < 1e-3))
    print("KERNEL_OK")
</pallas_src>

<mosaic_0001>
module attributes {stable_mosaic.version = 11 : i64} {
  func.func @hex_fused_kernel(%arg0: i32, %arg1: memref<40x6xf32, #tpu.memory_space<vmem>>, %arg2: memref<40x16xf32, #tpu.memory_space<vmem>>, %arg3: memref<8x16xf32, #tpu.memory_space<vmem>>, %arg4: memref<4x16x96xf32, #tpu.memory_space<vmem>>, %arg5: memref<5x1x128xf32, #tpu.memory_space<vmem>>, %arg6: memref<16x16xf32, #tpu.memory_space<vmem>>, %arg7: memref<11x40x128xf32, #tpu.memory_space<vmem>>, %arg8: memref<1x1x128xf32, #tpu.memory_space<vmem>>) attributes {dimension_semantics = [#tpu.dimension_semantics<parallel>], iteration_bounds = array<i64: 2>, scalar_prefetch = 0 : i64, scratch_operands = 0 : i64, tpu.core_type = #tpu.core_type<tc>, window_params = [{transform_indices = @transform_0, window_bounds = array<i64: 40, 6>}, {pipeline_mode = #tpu.pipeline_mode<synchronous>, transform_indices = @transform_1, window_bounds = array<i64: 40, 16>}, {pipeline_mode = #tpu.pipeline_mode<synchronous>, transform_indices = @transform_2, window_bounds = array<i64: 8, 16>}, {pipeline_mode = #tpu.pipeline_mode<synchronous>, transform_indices = @transform_3, window_bounds = array<i64: 4, 16, 96>}, {pipeline_mode = #tpu.pipeline_mode<synchronous>, transform_indices = @transform_4, window_bounds = array<i64: 5, 1, 128>}, {pipeline_mode = #tpu.pipeline_mode<synchronous>, transform_indices = @transform_5, window_bounds = array<i64: 16, 16>}, {pipeline_mode = #tpu.pipeline_mode<synchronous>, transform_indices = @transform_6, window_bounds = array<i64: 11, 40, 128>}, {transform_indices = @transform_7, window_bounds = array<i64: 1, 1, 128>}]} {
    %c0 = arith.constant 0 : index
    %c0_0 = arith.constant 0 : index
    %0 = vector.load %arg1[%c0, %c0_0] : memref<40x6xf32, #tpu.memory_space<vmem>>, vector<40x6xf32>
    %1 = arith.truncf %0 : vector<40x6xf32> to vector<40x6xbf16>
    %c0_1 = arith.constant 0 : index
    %c0_2 = arith.constant 0 : index
    %2 = vector.load %arg3[%c0_1, %c0_2] : memref<8x16xf32, #tpu.memory_space<vmem>>, vector<6x16xf32>
    %3 = arith.truncf %2 : vector<6x16xf32> to vector<6x16xbf16>
    %cst = arith.constant dense<0.000000e+00> : vector<40x16xf32>
    %4 = tpu.matmul %1, %3, %cst {dimension_numbers = #tpu.dot_dimension_numbers<[1], [0], [0], [1], [0, 0, 1, 1], [], []>} : vector<40x6xbf16>, vector<6x16xbf16>, vector<40x16xf32> -> vector<40x16xf32>
    %5 = vector.shape_cast %4 : vector<40x16xf32> to vector<1x40x16xf32>
    %c0_3 = arith.constant 0 : index
    %c0_4 = arith.constant 0 : index
    %6 = vector.load %arg2[%c0_3, %c0_4] : memref<40x16xf32, #tpu.memory_space<vmem>>, vector<40x16xf32>
    %7 = vector.shape_cast %6 : vector<40x16xf32> to vector<1x40x16xf32>
    %8 = arith.addf %5, %7 : vector<1x40x16xf32>
    %c6 = arith.constant 6 : index
    %c0_5 = arith.constant 0 : index
    %9 = vector.load %arg3[%c6, %c0_5] : memref<8x16xf32, #tpu.memory_space<vmem>>, vector<1x16xf32>
    %c7 = arith.constant 7 : index
    %c0_6 = arith.constant 0 : index
    %10 = vector.load %arg3[%c7, %c0_6] : memref<8x16xf32, #tpu.memory_space<vmem>>, vector<1x16xf32>
    %cst_7 = arith.constant dense<0.000000e+00> : vector<1x40xf32>
    %11 = vector.multi_reduction <add>, %8, %cst_7 [2] : vector<1x40x16xf32> to vector<1x40xf32>
    %12 = vector.shape_cast %11 : vector<1x40xf32> to vector<1x40x1xf32>
    %cst_8 = arith.constant 1.600000e+01 : f32
    %13 = vector.broadcast %cst_8 : f32 to vector<1x40x1xf32>
    %14 = arith.divf %12, %13 : vector<1x40x1xf32>
    %15 = vector.broadcast %14 : vector<1x40x1xf32> to vector<1x40x16xf32>
    %16 = arith.subf %8, %15 : vector<1x40x16xf32>
    %17 = arith.mulf %16, %16 : vector<1x40x16xf32>
    %cst_9 = arith.constant dense<0.000000e+00> : vector<1x40xf32>
    %18 = vector.multi_reduction <add>, %17, %cst_9 [2] : vector<1x40x16xf32> to vector<1x40xf32>
    %19 = vector.shape_cast %18 : vector<1x40xf32> to vector<1x40x1xf32>
    %cst_10 = arith.constant 1.600000e+01 : f32
    %20 = vector.broadcast %cst_10 : f32 to vector<1x40x1xf32>
    %21 = arith.divf %19, %20 : vector<1x40x1xf32>
    %22 = vector.broadcast %14 : vector<1x40x1xf32> to vector<1x40x16xf32>
    %23 = arith.subf %8, %22 : vector<1x40x16xf32>
    %cst_11 = arith.constant 9.99999974E-6 : f32
    %24 = vector.broadcast %cst_11 : f32 to vector<1x40x1xf32>
    %25 = arith.addf %21, %24 : vector<1x40x1xf32>
    %26 = math.rsqrt %25 : vector<1x40x1xf32>
    %27 = vector.broadcast %26 : vector<1x40x1xf32> to vector<1x40x16xf32>
    %28 = arith.mulf %23, %27 : vector<1x40x16xf32>
    %29 = vector.shape_cast %9 : vector<1x16xf32> to vector<1x1x16xf32>
    %30 = vector.broadcast %29 : vector<1x1x16xf32> to vector<1x40x16xf32>
    %31 = arith.mulf %28, %30 : vector<1x40x16xf32>
    %32 = vector.shape_cast %10 : vector<1x16xf32> to vector<1x1x16xf32>
    %33 = vector.broadcast %32 : vector<1x1x16xf32> to vector<1x40x16xf32>
    %34 = arith.addf %31, %33 : vector<1x40x16xf32>
    %35 = vector.shape_cast %34 : vector<1x40x16xf32> to vector<40x16xf32>
    %36 = tpu.iota {dimensions = array<i32: 2>} : vector<1x40x40xi32>
    %c36_i32 = arith.constant 36 : i32
    %37 = vector.broadcast %c36_i32 : i32 to vector<1x40x40xi32>
    %38 = arith.cmpi slt, %36, %37 : vector<1x40x40xi32>
    %cst_12 = arith.constant 0.000000e+00 : f32
    %cst_13 = arith.constant -1.000000e+30 : f32
    %39 = vector.broadcast %cst_12 : f32 to vector<1x40x40xf32>
    %40 = vector.broadcast %cst_13 : f32 to vector<1x40x40xf32>
    %41 = arith.select %38, %39, %40 : vector<1x40x40xi1>, vector<1x40x40xf32>
    %c0_14 = arith.constant 0 : index
    %c0_15 = arith.constant 0 : index
    %c0_16 = arith.constant 0 : index
    %42 = vector.load %arg4[%c0_14, %c0_15, %c0_16] : memref<4x16x96xf32, #tpu.memory_space<vmem>>, vector<1x16x96xf32>
    %43 = vector.shape_cast %42 : vector<1x16x96xf32> to vector<16x96xf32>
    %c0_17 = arith.constant 0 : index
    %c0_18 = arith.constant 0 : index
    %c0_19 = arith.constant 0 : index
    %44 = vector.load %arg5[%c0_17, %c0_18, %c0_19] : memref<5x1x128xf32, #tpu.memory_space<vmem>>, vector<1x1x128xf32>
    %45 = vector.shape_cast %44 : vector<1x1x128xf32> to vector<1x128xf32>
    %46 = vector.extract_strided_slice %45 {offsets = [0, 64], sizes = [1, 16], strides = [1, 1]} : vector<1x128xf32> to vector<1x16xf32>
    %47 = vector.extract_strided_slice %45 {offsets = [0, 80], sizes = [1, 16], strides = [1, 1]} : vector<1x128xf32> to vector<1x16xf32>
    %48 = arith.truncf %35 : vector<40x16xf32> to vector<40x16xbf16>
    %49 = vector.extract_strided_slice %43 {offsets = [0, 0], sizes = [16, 48], strides = [1, 1]} : vector<16x96xf32> to vector<16x48xf32>
    %50 = arith.truncf %49 : vector<16x48xf32> to vector<16x48xbf16>
    %cst_20 = arith.constant dense<0.000000e+00> : vector<40x48xf32>
    %51 = tpu.matmul %48, %50, %cst_20 {dimension_numbers = #tpu.dot_dimension_numbers<[1], [0], [0], [1], [0, 0, 1, 1], [], []>} : vector<40x16xbf16>, vector<16x48xbf16>, vector<40x48xf32> -> vector<40x48xf32>
    %52 = vector.extract_strided_slice %45 {offsets = [0, 0], sizes = [1, 48], strides = [1, 1]} : vector<1x128xf32> to vector<1x48xf32>
    %53 = vector.broadcast %52 : vector<1x48xf32> to vector<40x48xf32>
    %54 = arith.addf %51, %53 : vector<40x48xf32>
    %55 = vector.shape_cast %54 : vector<40x48xf32> to vector<1x40x48xf32>
    %56 = vector.extract_strided_slice %45 {offsets = [0, 48], sizes = [1, 16], strides = [1, 1]} : vector<1x128xf32> to vector<1x16xf32>
    %57 = vector.extract_strided_slice %55 {offsets = [0, 0, 0], sizes = [1, 40, 8], strides = [1, 1, 1]} : vector<1x40x48xf32> to vector<1x40x8xf32>
    %58 = vector.extract_strided_slice %55 {offsets = [0, 0, 16], sizes = [1, 40, 8], strides = [1, 1, 1]} : vector<1x40x48xf32> to vector<1x40x8xf32>
    %59 = vector.extract_strided_slice %55 {offsets = [0, 0, 32], sizes = [1, 40, 8], strides = [1, 1, 1]} : vector<1x40x48xf32> to vector<1x40x8xf32>
    %60 = arith.truncf %57 : vector<1x40x8xf32> to vector<1x40x8xbf16>
    %61 = arith.truncf %58 : vector<1x40x8xf32> to vector<1x40x8xbf16>
    "tpu.trace_start"() <{level = 10 : i32, message = "bqd,bkd->bqk"}> : () -> ()
    %cst_21 = arith.constant dense<0.000000e+00> : vector<1x40x40xf32>
    %62 = tpu.matmul %60, %61, %cst_21 {dimension_numbers = #tpu.dot_dimension_numbers<[2], [2], [1], [1], [0, 0, 0, 1, 1, 1], [0], [0]>} : vector<1x40x8xbf16>, vector<1x40x8xbf16>, vector<1x40x40xf32> -> vector<1x40x40xf32>
    "tpu.trace_stop"() : () -> ()
    %63 = arith.addf %62, %41 : vector<1x40x40xf32>
    %cst_22 = arith.constant dense<0xFF800000> : vector<1x40xf32>
    %64 = vector.multi_reduction <maximumf>, %63, %cst_22 [2] : vector<1x40x40xf32> to vector<1x40xf32>
    %65 = vector.shape_cast %64 : vector<1x40xf32> to vector<1x40x1xf32>
    %66 = vector.broadcast %65 : vector<1x40x1xf32> to vector<1x40x40xf32>
    %67 = arith.subf %63, %66 : vector<1x40x40xf32>
    %68 = math.exp %67 : vector<1x40x40xf32>
    %cst_23 = arith.constant dense<0.000000e+00> : vector<1x40xf32>
    %69 = vector.multi_reduction <add>, %68, %cst_23 [2] : vector<1x40x40xf32> to vector<1x40xf32>
    %70 = vector.shape_cast %69 : vector<1x40xf32> to vector<1x40x1xf32>
    %71 = tpu.reciprocal %70 {approx = true} : vector<1x40x1xf32> -> vector<1x40x1xf32>
    %72 = vector.broadcast %71 : vector<1x40x1xf32> to vector<1x40x40xf32>
    %73 = arith.mulf %68, %72 : vector<1x40x40xf32>
    %74 = arith.truncf %73 : vector<1x40x40xf32> to vector<1x40x40xbf16>
    %75 = arith.truncf %59 : vector<1x40x8xf32> to vector<1x40x8xbf16>
    "tpu.trace_start"() <{level = 10 : i32, message = "bqk,bkd->bqd"}> : () -> ()
    %cst_24 = arith.constant dense<0.000000e+00> : vector<1x40x8xf32>
    %76 = tpu.matmul %74, %75, %cst_24 {dimension_numbers = #tpu.dot_dimension_numbers<[2], [1], [1], [2], [0, 0, 0, 1, 1, 2], [0], [0]>} : vector<1x40x40xbf16>, vector<1x40x8xbf16>, vector<1x40x8xf32> -> vector<1x40x8xf32>
    "tpu.trace_stop"() : () -> ()
    %77 = vector.shape_cast %76 : vector<1x40x8xf32> to vector<40x8xf32>
    %78 = arith.truncf %77 : vector<40x8xf32> to vector<40x8xbf16>
    %79 = vector.extract_strided_slice %43 {offsets = [0, 48], sizes = [8, 16], strides = [1, 1]} : vector<16x96xf32> to vector<8x16xf32>
    %80 = arith.truncf %79 : vector<8x16xf32> to vector<8x16xbf16>
    %cst_25 = arith.constant dense<0.000000e+00> : vector<40x16xf32>
    %81 = tpu.matmul %78, %80, %cst_25 {dimension_numbers = #tpu.dot_dimension_numbers<[1], [0], [0], [1], [0, 0, 1, 1], [], []>} : vector<40x8xbf16>, vector<8x16xbf16>, vector<40x16xf32> -> vector<40x16xf32>
    %82 = vector.broadcast %56 : vector<1x16xf32> to vector<40x16xf32>
    %83 = arith.addf %82, %81 : vector<40x16xf32>
    %84 = vector.extract_strided_slice %55 {offsets = [0, 0, 8], sizes = [1, 40, 8], strides = [1, 1, 1]} : vector<1x40x48xf32> to vector<1x40x8xf32>
    %85 = vector.extract_strided_slice %55 {offsets = [0, 0, 24], sizes = [1, 40, 8], strides = [1, 1, 1]} : vector<1x40x48xf32> to vector<1x40x8xf32>
    %86 = vector.extract_strided_slice %55 {offsets = [0, 0, 40], sizes = [1, 40, 8], strides = [1, 1, 1]} : vector<1x40x48xf32> to vector<1x40x8xf32>
    %87 = arith.truncf %84 : vector<1x40x8xf32> to vector<1x40x8xbf16>
    %88 = arith.truncf %85 : vector<1x40x8xf32> to vector<1x40x8xbf16>
    "tpu.trace_start"() <{level = 10 : i32, message = "bqd,bkd->bqk"}> : () -> ()
    %cst_26 = arith.constant dense<0.000000e+00> : vector<1x40x40xf32>
    %89 = tpu.matmul %87, %88, %cst_26 {dimension_numbers = #tpu.dot_dimension_numbers<[2], [2], [1], [1], [0, 0, 0, 1, 1, 1], [0], [0]>} : vector<1x40x8xbf16>, vector<1x40x8xbf16>, vector<1x40x40xf32> -> vector<1x40x40xf32>
    "tpu.trace_stop"() : () -> ()
    %90 = arith.addf %89, %41 : vector<1x40x40xf32>
    %cst_27 = arith.constant dense<0xFF800000> : vector<1x40xf32>
    %91 = vector.multi_reduction <maximumf>, %90, %cst_27 [2] : vector<1x40x40xf32> to vector<1x40xf32>
    %92 = vector.shape_cast %91 : vector<1x40xf32> to vector<1x40x1xf32>
    %93 = vector.broadcast %92 : vector<1x40x1xf32> to vector<1x40x40xf32>
    %94 = arith.subf %90, %93 : vector<1x40x40xf32>
    %95 = math.exp %94 : vector<1x40x40xf32>
    %cst_28 = arith.constant dense<0.000000e+00> : vector<1x40xf32>
    %96 = vector.multi_reduction <add>, %95, %cst_28 [2] : vector<1x40x40xf32> to vector<1x40xf32>
    %97 = vector.shape_cast %96 : vector<1x40xf32> to vector<1x40x1xf32>
    %98 = tpu.reciprocal %97 {approx = true} : vector<1x40x1xf32> -> vector<1x40x1xf32>
    %99 = vector.broadcast %98 : vector<1x40x1xf32> to vector<1x40x40xf32>
    %100 = arith.mulf %95, %99 : vector<1x40x40xf32>
    %101 = arith.truncf %100 : vector<1x40x40xf32> to vector<1x40x40xbf16>
    %102 = arith.truncf %86 : vector<1x40x8xf32> to vector<1x40x8xbf16>
    "tpu.trace_start"() <{level = 10 : i32, message = "bqk,bkd->bqd"}> : () -> ()
    %cst_29 = arith.constant dense<0.000000e+00> : vector<1x40x8xf32>
    %103 = tpu.matmul %101, %102, %cst_29 {dimension_numbers = #tpu.dot_dimension_numbers<[2], [1], [1], [2], [0, 0, 0, 1, 1, 2], [0], [0]>} : vector<1x40x40xbf16>, vector<1x40x8xbf16>, vector<1x40x8xf32> -> vector<1x40x8xf32>
    "tpu.trace_stop"() : () -> ()
    %104 = vector.shape_cast %103 : vector<1x40x8xf32> to vector<40x8xf32>
    %105 = arith.truncf %104 : vector<40x8xf32> to vector<40x8xbf16>
    %106 = vector.extract_strided_slice %43 {offsets = [8, 48], sizes = [8, 16], strides = [1, 1]} : vector<16x96xf32> to vector<8x16xf32>
    %107 = arith.truncf %106 : vector<8x16xf32> to vector<8x16xbf16>
    %cst_30 = arith.constant dense<0.000000e+00> : vector<40x16xf32>
    %108 = tpu.matmul %105, %107, %cst_30 {dimension_numbers = #tpu.dot_dimension_numbers<[1], [0], [0], [1], [0, 0, 1, 1], [], []>} : vector<40x8xbf16>, vector<8x16xbf16>, vector<40x16xf32> -> vector<40x16xf32>
    %109 = arith.addf %83, %108 : vector<40x16xf32>
    %110 = arith.addf %35, %109 : vector<40x16xf32>
    %cst_31 = arith.constant dense<0.000000e+00> : vector<40xf32>
    %111 = vector.multi_reduction <add>, %110, %cst_31 [1] : vector<40x16xf32> to vector<40xf32>
    %112 = vector.shape_cast %111 : vector<40xf32> to vector<40x1xf32>
    %cst_32 = arith.constant 1.600000e+01 : f32
    %113 = vector.broadcast %cst_32 : f32 to vector<40x1xf32>
    %114 = arith.divf %112, %113 : vector<40x1xf32>
    %115 = vector.broadcast %114 : vector<40x1xf32> to vector<40x16xf32>
    %116 = arith.subf %110, %115 : vector<40x16xf32>
    %117 = arith.mulf %116, %116 : vector<40x16xf32>
    %cst_33 = arith.constant dense<0.000000e+00> : vector<40xf32>
    %118 = vector.multi_reduction <add>, %117, %cst_33 [1] : vector<40x16xf32> to vector<40xf32>
    %119 = vector.shape_cast %118 : vector<40xf32> to vector<40x1xf32>
    %cst_34 = arith.constant 1.600000e+01 : f32
    %120 = vector.broadcast %cst_34 : f32 to vector<40x1xf32>
    %121 = arith.divf %119, %120 : vector<40x1xf32>
    %122 = vector.broadcast %114 : vector<40x1xf32> to vector<40x16xf32>
    %123 = arith.subf %110, %122 : vector<40x16xf32>
    %cst_35 = arith.constant 9.99999974E-6 : f32
    %124 = vector.broadcast %cst_35 : f32 to vector<40x1xf32>
    %125 = arith.addf %121, %124 : vector<40x1xf32>
    %126 = math.rsqrt %125 : vector<40x1xf32>
    %127 = vector.broadcast %126 : vector<40x1xf32> to vector<40x16xf32>
    %128 = arith.mulf %123, %127 : vector<40x16xf32>
    %129 = vector.broadcast %46 : vector<1x16xf32> to vector<40x16xf32>
    %130 = arith.mulf %128, %129 : vector<40x16xf32>
    %131 = vector.broadcast %47 : vector<1x16xf32> to vector<40x16xf32>
    %132 = arith.addf %130, %131 : vector<40x16xf32>
    %133 = arith.truncf %132 : vector<40x16xf32> to vector<40x16xbf16>
    %134 = vector.extract_strided_slice %43 {offsets = [0, 64], sizes = [16, 16], strides = [1, 1]} : vector<16x96xf32> to vector<16x16xf32>
    %135 = arith.truncf %134 : vector<16x16xf32> to vector<16x16xbf16>
    %cst_36 = arith.constant dense<0.000000e+00> : vector<40x16xf32>
    %136 = tpu.matmul %133, %135, %cst_36 {dimension_numbers = #tpu.dot_dimension_numbers<[1], [0], [0], [1], [0, 0, 1, 1], [], []>} : vector<40x16xbf16>, vector<16x16xbf16>, vector<40x16xf32> -> vector<40x16xf32>
    %137 = vector.extract_strided_slice %45 {offsets = [0, 96], sizes = [1, 16], strides = [1, 1]} : vector<1x128xf32> to vector<1x16xf32>
    %138 = vector.broadcast %137 : vector<1x16xf32> to vector<40x16xf32>
    %139 = arith.addf %136, %138 : vector<40x16xf32>
    %140 = arith.negf %139 : vector<40x16xf32>
    %141 = math.exp %140 : vector<40x16xf32>
    %cst_37 = arith.constant 1.000000e+00 : f32
    %142 = vector.broadcast %cst_37 : f32 to vector<40x16xf32>
    %143 = arith.addf %142, %141 : vector<40x16xf32>
    %144 = arith.divf %142, %143 : vector<40x16xf32>
    %145 = arith.mulf %139, %144 : vector<40x16xf32>
    %146 = arith.truncf %145 : vector<40x16xf32> to vector<40x16xbf16>
    %147 = vector.extract_strided_slice %43 {offsets = [0, 80], sizes = [16, 16], strides = [1, 1]} : vector<16x96xf32> to vector<16x16xf32>
    %148 = arith.truncf %147 : vector<16x16xf32> to vector<16x16xbf16>
    %cst_38 = arith.constant dense<0.000000e+00> : vector<40x16xf32>
    %149 = tpu.matmul %146, %148, %cst_38 {dimension_numbers = #tpu.dot_dimension_numbers<[1], [0], [0], [1], [0, 0, 1, 1], [], []>} : vector<40x16xbf16>, vector<16x16xbf16>, vector<40x16xf32> -> vector<40x16xf32>
    %150 = vector.extract_strided_slice %45 {offsets = [0, 112], sizes = [1, 16], strides = [1, 1]} : vector<1x128xf32> to vector<1x16xf32>
    %151 = vector.broadcast %150 : vector<1x16xf32> to vector<40x16xf32>
    %152 = arith.addf %149, %151 : vector<40x16xf32>
    %153 = arith.addf %132, %152 : vector<40x16xf32>
    %cst_39 = arith.constant dense<0.000000e+00> : vector<40xf32>
    %154 = vector.multi_reduction <add>, %153, %cst_39 [1] : vector<40x16xf32> to vector<40xf32>
    %155 = vector.shape_cast %154 : vector<40xf32> to vector<40x1xf32>
    %cst_40 = arith.constant 1.600000e+01 : f32
    %156 = vector.broadcast %cst_40 : f32 to vector<40x1xf32>
    %157 = arith.divf %155, %156 : vector<40x1xf32>
    %158 = vector.broadcast %157 : vector<40x1xf32> to vector<40x16xf32>
    %159 = arith.subf %153, %158 : vector<40x16xf32>
    %160 = arith.mulf %159, %159 : vector<40x16xf32>
    %cst_41 = arith.constant dense<0.000000e+00> : vector<40xf32>
    %161 = vector.multi_reduction <add>, %160, %cst_41 [1] : vector<40x16xf32> to vector<40xf32>
    %162 = vector.shape_cast %161 : vector<40xf32> to vector<40x1xf32>
    %cst_42 = arith.constant 1.600000e+01 : f32
    %163 = vector.broadcast %cst_42 : f32 to vector<40x1xf32>
    %164 = arith.divf %162, %163 : vector<40x1xf32>
    %165 = vector.broadcast %157 : vector<40x1xf32> to vector<40x16xf32>
    %166 = arith.subf %153, %165 : vector<40x16xf32>
    %cst_43 = arith.constant 9.99999974E-6 : f32
    %167 = vector.broadcast %cst_43 : f32 to vector<40x1xf32>
    %168 = arith.addf %164, %167 : vector<40x1xf32>
    %169 = math.rsqrt %168 : vector<40x1xf32>
    %170 = vector.broadcast %169 : vector<40x1xf32> to vector<40x16xf32>
    %171 = arith.mulf %166, %170 : vector<40x16xf32>
    %172 = vector.broadcast %46 : vector<1x16xf32> to vector<40x16xf32>
    %173 = arith.mulf %171, %172 : vector<40x16xf32>
    %174 = vector.broadcast %47 : vector<1x16xf32> to vector<40x16xf32>
    %175 = arith.addf %173, %174 : vector<40x16xf32>
    %c1 = arith.constant 1 : index
    %c0_44 = arith.constant 0 : index
    %c0_45 = arith.constant 0 : index
    %176 = vector.load %arg4[%c1, %c0_44, %c0_45] : memref<4x16x96xf32, #tpu.memory_space<vmem>>, vector<1x16x96xf32>
    %177 = vector.shape_cast %176 : vector<1x16x96xf32> to vector<16x96xf32>
    %c1_46 = arith.constant 1 : index
    %c0_47 = arith.constant 0 : index
    %c0_48 = arith.constant 0 : index
    %178 = vector.load %arg5[%c1_46, %c0_47, %c0_48] : memref<5x1x128xf32, #tpu.memory_space<vmem>>, vector<1x1x128xf32>
    %179 = vector.shape_cast %178 : vector<1x1x128xf32> to vector<1x128xf32>
    %180 = vector.extract_strided_slice %179 {offsets = [0, 64], sizes = [1, 16], strides = [1, 1]} : vector<1x128xf32> to vector<1x16xf32>
    %181 = vector.extract_strided_slice %179 {offsets = [0, 80], sizes = [1, 16], strides = [1, 1]} : vector<1x128xf32> to vector<1x16xf32>
    %182 = arith.truncf %175 : vector<40x16xf32> to vector<40x16xbf16>
    %183 = vector.extract_strided_slice %177 {offsets = [0, 0], sizes = [16, 48], strides = [1, 1]} : vector<16x96xf32> to vector<16x48xf32>
    %184 = arith.truncf %183 : vector<16x48xf32> to vector<16x48xbf16>
    %cst_49 = arith.constant dense<0.000000e+00> : vector<40x48xf32>
    %185 = tpu.matmul %182, %184, %cst_49 {dimension_numbers = #tpu.dot_dimension_numbers<[1], [0], [0], [1], [0, 0, 1, 1], [], []>} : vector<40x16xbf16>, vector<16x48xbf16>, vector<40x48xf32> -> vector<40x48xf32>
    %186 = vector.extract_strided_slice %179 {offsets = [0, 0], sizes = [1, 48], strides = [1, 1]} : vector<1x128xf32> to vector<1x48xf32>
    %187 = vector.broadcast %186 : vector<1x48xf32> to vector<40x48xf32>
    %188 = arith.addf %185, %187 : vector<40x48xf32>
    %189 = vector.shape_cast %188 : vector<40x48xf32> to vector<1x40x48xf32>
    %190 = vector.extract_strided_slice %179 {offsets = [0, 48], sizes = [1, 16], strides = [1, 1]} : vector<1x128xf32> to vector<1x16xf32>
    %191 = vector.extract_strided_slice %189 {offsets = [0, 0, 0], sizes = [1, 40, 8], strides = [1, 1, 1]} : vector<1x40x48xf32> to vector<1x40x8xf32>
    %192 = vector.extract_strided_slice %189 {offsets = [0, 0, 16], sizes = [1, 40, 8], strides = [1, 1, 1]} : vector<1x40x48xf32> to vector<1x40x8xf32>
    %193 = vector.extract_strided_slice %189 {offsets = [0, 0, 32], sizes = [1, 40, 8], strides = [1, 1, 1]} : vector<1x40x48xf32> to vector<1x40x8xf32>
    %194 = arith.truncf %191 : vector<1x40x8xf32> to vector<1x40x8xbf16>
    %195 = arith.truncf %192 : vector<1x40x8xf32> to vector<1x40x8xbf16>
    "tpu.trace_start"() <{level = 10 : i32, message = "bqd,bkd->bqk"}> : () -> ()
    %cst_50 = arith.constant dense<0.000000e+00> : vector<1x40x40xf32>
    %196 = tpu.matmul %194, %195, %cst_50 {dimension_numbers = #tpu.dot_dimension_numbers<[2], [2], [1], [1], [0, 0, 0, 1, 1, 1], [0], [0]>} : vector<1x40x8xbf16>, vector<1x40x8xbf16>, vector<1x40x40xf32> -> vector<1x40x40xf32>
    "tpu.trace_stop"() : () -> ()
    %197 = arith.addf %196, %41 : vector<1x40x40xf32>
    %cst_51 = arith.constant dense<0xFF800000> : vector<1x40xf32>
    %198 = vector.multi_reduction <maximumf>, %197, %cst_51 [2] : vector<1x40x40xf32> to vector<1x40xf32>
    %199 = vector.shape_cast %198 : vector<1x40xf32> to vector<1x40x1xf32>
    %200 = vector.broadcast %199 : vector<1x40x1xf32> to vector<1x40x40xf32>
    %201 = arith.subf %197, %200 : vector<1x40x40xf32>
    %202 = math.exp %201 : vector<1x40x40xf32>
    %cst_52 = arith.constant dense<0.000000e+00> : vector<1x40xf32>
    %203 = vector.multi_reduction <add>, %202, %cst_52 [2] : vector<1x40x40xf32> to vector<1x40xf32>
    %204 = vector.shape_cast %203 : vector<1x40xf32> to vector<1x40x1xf32>
    %205 = tpu.reciprocal %204 {approx = true} : vector<1x40x1xf32> -> vector<1x40x1xf32>
    %206 = vector.broadcast %205 : vector<1x40x1xf32> to vector<1x40x40xf32>
    %207 = arith.mulf %202, %206 : vector<1x40x40xf32>
    %208 = arith.truncf %207 : vector<1x40x40xf32> to vector<1x40x40xbf16>
    %209 = arith.truncf %193 : vector<1x40x8xf32> to vector<1x40x8xbf16>
    "tpu.trace_start"() <{level = 10 : i32, message = "bqk,bkd->bqd"}> : () -> ()
    %cst_53 = arith.constant dense<0.000000e+00> : vector<1x40x8xf32>
    %210 = tpu.matmul %208, %209, %cst_53 {dimension_numbers = #tpu.dot_dimension_numbers<[2], [1], [1], [2], [0, 0, 0, 1, 1, 2], [0], [0]>} : vector<1x40x40xbf16>, vector<1x40x8xbf16>, vector<1x40x8xf32> -> vector<1x40x8xf32>
    "tpu.trace_stop"() : () -> ()
    %211 = vector.shape_cast %210 : vector<1x40x8xf32> to vector<40x8xf32>
    %212 = arith.truncf %211 : vector<40x8xf32> to vector<40x8xbf16>
    %213 = vector.extract_strided_slice %177 {offsets = [0, 48], sizes = [8, 16], strides = [1, 1]} : vector<16x96xf32> to vector<8x16xf32>
    %214 = arith.truncf %213 : vector<8x16xf32> to vector<8x16xbf16>
    %cst_54 = arith.constant dense<0.000000e+00> : vector<40x16xf32>
    %215 = tpu.matmul %212, %214, %cst_54 {dimension_numbers = #tpu.dot_dimension_numbers<[1], [0], [0], [1], [0, 0, 1, 1], [], []>} : vector<40x8xbf16>, vector<8x16xbf16>, vector<40x16xf32> -> vector<40x16xf32>
    %216 = vector.broadcast %190 : vector<1x16xf32> to vector<40x16xf32>
    %217 = arith.addf %216, %215 : vector<40x16xf32>
    %218 = vector.extract_strided_slice %189 {offsets = [0, 0, 8], sizes = [1, 40, 8], strides = [1, 1, 1]} : vector<1x40x48xf32> to vector<1x40x8xf32>
    %219 = vector.extract_strided_slice %189 {offsets = [0, 0, 24], sizes = [1, 40, 8], strides = [1, 1, 1]} : vector<1x40x48xf32> to vector<1x40x8xf32>
    %220 = vector.extract_strided_slice %189 {offsets = [0, 0, 40], sizes = [1, 40, 8], strides = [1, 1, 1]} : vector<1x40x48xf32> to vector<1x40x8xf32>
    %221 = arith.truncf %218 : vector<1x40x8xf32> to vector<1x40x8xbf16>
    %222 = arith.truncf %219 : vector<1x40x8xf32> to vector<1x40x8xbf16>
    "tpu.trace_start"() <{level = 10 : i32, message = "bqd,bkd->bqk"}> : () -> ()
    %cst_55 = arith.constant dense<0.000000e+00> : vector<1x40x40xf32>
    %223 = tpu.matmul %221, %222, %cst_55 {dimension_numbers = #tpu.dot_dimension_numbers<[2], [2], [1], [1], [0, 0, 0, 1, 1, 1], [0], [0]>} : vector<1x40x8xbf16>, vector<1x40x8xbf16>, vector<1x40x40xf32> -> vector<1x40x40xf32>
    "tpu.trace_stop"() : () -> ()
    %224 = arith.addf %223, %41 : vector<1x40x40xf32>
    %cst_56 = arith.constant dense<0xFF800000> : vector<1x40xf32>
    %225 = vector.multi_reduction <maximumf>, %224, %cst_56 [2] : vector<1x40x40xf32> to vector<1x40xf32>
    %226 = vector.shape_cast %225 : vector<1x40xf32> to vector<1x40x1xf32>
    %227 = vector.broadcast %226 : vector<1x40x1xf32> to vector<1x40x40xf32>
    %228 = arith.subf %224, %227 : vector<1x40x40xf32>
    %229 = math.exp %228 : vector<1x40x40xf32>
    %cst_57 = arith.constant dense<0.000000e+00> : vector<1x40xf32>
    %230 = vector.multi_reduction <add>, %229, %cst_57 [2] : vector<1x40x40xf32> to vector<1x40xf32>
    %231 = vector.shape_cast %230 : vector<1x40xf32> to vector<1x40x1xf32>
    %232 = tpu.reciprocal %231 {approx = true} : vector<1x40x1xf32> -> vector<1x40x1xf32>
    %233 = vector.broadcast %232 : vector<1x40x1xf32> to vector<1x40x40xf32>
    %234 = arith.mulf %229, %233 : vector<1x40x40xf32>
    %235 = arith.truncf %234 : vector<1x40x40xf32> to vector<1x40x40xbf16>
    %236 = arith.truncf %220 : vector<1x40x8xf32> to vector<1x40x8xbf16>
    "tpu.trace_start"() <{level = 10 : i32, message = "bqk,bkd->bqd"}> : () -> ()
    %cst_58 = arith.constant dense<0.000000e+00> : vector<1x40x8xf32>
    %237 = tpu.matmul %235, %236, %cst_58 {dimension_numbers = #tpu.dot_dimension_numbers<[2], [1], [1], [2], [0, 0, 0, 1, 1, 2], [0], [0]>} : vector<1x40x40xbf16>, vector<1x40x8xbf16>, vector<1x40x8xf32> -> vector<1x40x8xf32>
    "tpu.trace_stop"() : () -> ()
    %238 = vector.shape_cast %237 : vector<1x40x8xf32> to vector<40x8xf32>
    %239 = arith.truncf %238 : vector<40x8xf32> to vector<40x8xbf16>
    %240 = vector.extract_strided_slice %177 {offsets = [8, 48], sizes = [8, 16], strides = [1, 1]} : vector<16x96xf32> to vector<8x16xf32>
    %241 = arith.truncf %240 : vector<8x16xf32> to vector<8x16xbf16>
    %cst_59 = arith.constant dense<0.000000e+00> : vector<40x16xf32>
    %242 = tpu.matmul %239, %241, %cst_59 {dimension_numbers = #tpu.dot_dimension_numbers<[1], [0], [0], [1], [0, 0, 1, 1], [], []>} : vector<40x8xbf16>, vector<8x16xbf16>, vector<40x16xf32> -> vector<40x16xf32>
    %243 = arith.addf %217, %242 : vector<40x16xf32>
    %244 = arith.addf %175, %243 : vector<40x16xf32>
    %cst_60 = arith.constant dense<0.000000e+00> : vector<40xf32>
    %245 = vector.multi_reduction <add>, %244, %cst_60 [1] : vector<40x16xf32> to vector<40xf32>
    %246 = vector.shape_cast %245 : vector<40xf32> to vector<40x1xf32>
    %cst_61 = arith.constant 1.600000e+01 : f32
    %247 = vector.broadcast %cst_61 : f32 to vector<40x1xf32>
    %248 = arith.divf %246, %247 : vector<40x1xf32>
    %249 = vector.broadcast %248 : vector<40x1xf32> to vector<40x16xf32>
    %250 = arith.subf %244, %249 : vector<40x16xf32>
    %251 = arith.mulf %250, %250 : vector<40x16xf32>
    %cst_62 = arith.constant dense<0.000000e+00> : vector<40xf32>
    %252 = vector.multi_reduction <add>, %251, %cst_62 [1] : vector<40x16xf32> to vector<40xf32>
    %253 = vector.shape_cast %252 : vector<40xf32> to vector<40x1xf32>
    %cst_63 = arith.constant 1.600000e+01 : f32
    %254 = vector.broadcast %cst_63 : f32 to vector<40x1xf32>
    %255 = arith.divf %253, %254 : vector<40x1xf32>
    %256 = vector.broadcast %248 : vector<40x1xf32> to vector<40x16xf32>
    %257 = arith.subf %244, %256 : vector<40x16xf32>
    %cst_64 = arith.constant 9.99999974E-6 : f32
    %258 = vector.broadcast %cst_64 : f32 to vector<40x1xf32>
    %259 = arith.addf %255, %258 : vector<40x1xf32>
    %260 = math.rsqrt %259 : vector<40x1xf32>
    %261 = vector.broadcast %260 : vector<40x1xf32> to vector<40x16xf32>
    %262 = arith.mulf %257, %261 : vector<40x16xf32>
    %263 = vector.broadcast %180 : vector<1x16xf32> to vector<40x16xf32>
    %264 = arith.mulf %262, %263 : vector<40x16xf32>
    %265 = vector.broadcast %181 : vector<1x16xf32> to vector<40x16xf32>
    %266 = arith.addf %264, %265 : vector<40x16xf32>
    %267 = arith.truncf %266 : vector<40x16xf32> to vector<40x16xbf16>
    %268 = vector.extract_strided_slice %177 {offsets = [0, 64], sizes = [16, 16], strides = [1, 1]} : vector<16x96xf32> to vector<16x16xf32>
    %269 = arith.truncf %268 : vector<16x16xf32> to vector<16x16xbf16>
    %cst_65 = arith.constant dense<0.000000e+00> : vector<40x16xf32>
    %270 = tpu.matmul %267, %269, %cst_65 {dimension_numbers = #tpu.dot_dimension_numbers<[1], [0], [0], [1], [0, 0, 1, 1], [], []>} : vector<40x16xbf16>, vector<16x16xbf16>, vector<40x16xf32> -> vector<40x16xf32>
    %271 = vector.extract_strided_slice %179 {offsets = [0, 96], sizes = [1, 16], strides = [1, 1]} : vector<1x128xf32> to vector<1x16xf32>
    %272 = vector.broadcast %271 : vector<1x16xf32> to vector<40x16xf32>
    %273 = arith.addf %270, %272 : vector<40x16xf32>
    %274 = arith.negf %273 : vector<40x16xf32>
    %275 = math.exp %274 : vector<40x16xf32>
    %cst_66 = arith.constant 1.000000e+00 : f32
    %276 = vector.broadcast %cst_66 : f32 to vector<40x16xf32>
    %277 = arith.addf %276, %275 : vector<40x16xf32>
    %278 = arith.divf %276, %277 : vector<40x16xf32>
    %279 = arith.mulf %273, %278 : vector<40x16xf32>
    %280 = arith.truncf %279 : vector<40x16xf32> to vector<40x16xbf16>
    %281 = vector.extract_strided_slice %177 {offsets = [0, 80], sizes = [16, 16], strides = [1, 1]} : vector<16x96xf32> to vector<16x16xf32>
    %282 = arith.truncf %281 : vector<16x16xf32> to vector<16x16xbf16>
    %cst_67 = arith.constant dense<0.000000e+00> : vector<40x16xf32>
    %283 = tpu.matmul %280, %282, %cst_67 {dimension_numbers = #tpu.dot_dimension_numbers<[1], [0], [0], [1], [0, 0, 1, 1], [], []>} : vector<40x16xbf16>, vector<16x16xbf16>, vector<40x16xf32> -> vector<40x16xf32>
    %284 = vector.extract_strided_slice %179 {offsets = [0, 112], sizes = [1, 16], strides = [1, 1]} : vector<1x128xf32> to vector<1x16xf32>
    %285 = vector.broadcast %284 : vector<1x16xf32> to vector<40x16xf32>
    %286 = arith.addf %283, %285 : vector<40x16xf32>
    %287 = arith.addf %266, %286 : vector<40x16xf32>
    %cst_68 = arith.constant dense<0.000000e+00> : vector<40xf32>
    %288 = vector.multi_reduction <add>, %287, %cst_68 [1] : vector<40x16xf32> to vector<40xf32>
    %289 = vector.shape_cast %288 : vector<40xf32> to vector<40x1xf32>
    %cst_69 = arith.constant 1.600000e+01 : f32
    %290 = vector.broadcast %cst_69 : f32 to vector<40x1xf32>
    %291 = arith.divf %289, %290 : vector<40x1xf32>
    %292 = vector.broadcast %291 : vector<40x1xf32> to vector<40x16xf32>
    %293 = arith.subf %287, %292 : vector<40x16xf32>
    %294 = arith.mulf %293, %293 : vector<40x16xf32>
    %cst_70 = arith.constant dense<0.000000e+00> : vector<40xf32>
    %295 = vector.multi_reduction <add>, %294, %cst_70 [1] : vector<40x16xf32> to vector<40xf32>
    %296 = vector.shape_cast %295 : vector<40xf32> to vector<40x1xf32>
    %cst_71 = arith.constant 1.600000e+01 : f32
    %297 = vector.broadcast %cst_71 : f32 to vector<40x1xf32>
    %298 = arith.divf %296, %297 : vector<40x1xf32>
    %299 = vector.broadcast %291 : vector<40x1xf32> to vector<40x16xf32>
    %300 = arith.subf %287, %299 : vector<40x16xf32>
    %cst_72 = arith.constant 9.99999974E-6 : f32
    %301 = vector.broadcast %cst_72 : f32 to vector<40x1xf32>
    %302 = arith.addf %298, %301 : vector<40x1xf32>
    %303 = math.rsqrt %302 : vector<40x1xf32>
    %304 = vector.broadcast %303 : vector<40x1xf32> to vector<40x16xf32>
    %305 = arith.mulf %300, %304 : vector<40x16xf32>
    %306 = vector.broadcast %180 : vector<1x16xf32> to vector<40x16xf32>
    %307 = arith.mulf %305, %306 : vector<40x16xf32>
    %308 = vector.broadcast %181 : vector<1x16xf32> to vector<40x16xf32>
    %309 = arith.addf %307, %308 : vector<40x16xf32>
    %c2 = arith.constant 2 : index
    %c0_73 = arith.constant 0 : index
    %c0_74 = arith.constant 0 : index
    %310 = vector.load %arg4[%c2, %c0_73, %c0_74] : memref<4x16x96xf32, #tpu.memory_space<vmem>>, vector<1x16x96xf32>
    %311 = vector.shape_cast %310 : vector<1x16x96xf32> to vector<16x96xf32>
    %c2_75 = arith.constant 2 : index
    %c0_76 = arith.constant 0 : index
    %c0_77 = arith.constant 0 : index
    %312 = vector.load %arg5[%c2_75, %c0_76, %c0_77] : memref<5x1x128xf32, #tpu.memory_space<vmem>>, vector<1x1x128xf32>
    %313 = vector.shape_cast %312 : vector<1x1x128xf32> to vector<1x128xf32>
    %314 = vector.extract_strided_slice %313 {offsets = [0, 64], sizes = [1, 16], strides = [1, 1]} : vector<1x128xf32> to vector<1x16xf32>
    %315 = vector.extract_strided_slice %313 {offsets = [0, 80], sizes = [1, 16], strides = [1, 1]} : vector<1x128xf32> to vector<1x16xf32>
    %316 = arith.truncf %309 : vector<40x16xf32> to vector<40x16xbf16>
    %317 = vector.extract_strided_slice %311 {offsets = [0, 0], sizes = [16, 48], strides = [1, 1]} : vector<16x96xf32> to vector<16x48xf32>
    %318 = arith.truncf %317 : vector<16x48xf32> to vector<16x48xbf16>
    %cst_78 = arith.constant dense<0.000000e+00> : vector<40x48xf32>
    %319 = tpu.matmul %316, %318, %cst_78 {dimension_numbers = #tpu.dot_dimension_numbers<[1], [0], [0], [1], [0, 0, 1, 1], [], []>} : vector<40x16xbf16>, vector<16x48xbf16>, vector<40x48xf32> -> vector<40x48xf32>
    %320 = vector.extract_strided_slice %313 {offsets = [0, 0], sizes = [1, 48], strides = [1, 1]} : vector<1x128xf32> to vector<1x48xf32>
    %321 = vector.broadcast %320 : vector<1x48xf32> to vector<40x48xf32>
    %322 = arith.addf %319, %321 : vector<40x48xf32>
    %323 = vector.shape_cast %322 : vector<40x48xf32> to vector<1x40x48xf32>
    %324 = vector.extract_strided_slice %313 {offsets = [0, 48], sizes = [1, 16], strides = [1, 1]} : vector<1x128xf32> to vector<1x16xf32>
    %325 = vector.extract_strided_slice %323 {offsets = [0, 0, 0], sizes = [1, 40, 8], strides = [1, 1, 1]} : vector<1x40x48xf32> to vector<1x40x8xf32>
    %326 = vector.extract_strided_slice %323 {offsets = [0, 0, 16], sizes = [1, 40, 8], strides = [1, 1, 1]} : vector<1x40x48xf32> to vector<1x40x8xf32>
    %327 = vector.extract_strided_slice %323 {offsets = [0, 0, 32], sizes = [1, 40, 8], strides = [1, 1, 1]} : vector<1x40x48xf32> to vector<1x40x8xf32>
    %328 = arith.truncf %325 : vector<1x40x8xf32> to vector<1x40x8xbf16>
    %329 = arith.truncf %326 : vector<1x40x8xf32> to vector<1x40x8xbf16>
    "tpu.trace_start"() <{level = 10 : i32, message = "bqd,bkd->bqk"}> : () -> ()
    %cst_79 = arith.constant dense<0.000000e+00> : vector<1x40x40xf32>
    %330 = tpu.matmul %328, %329, %cst_79 {dimension_numbers = #tpu.dot_dimension_numbers<[2], [2], [1], [1], [0, 0, 0, 1, 1, 1], [0], [0]>} : vector<1x40x8xbf16>, vector<1x40x8xbf16>, vector<1x40x40xf32> -> vector<1x40x40xf32>
    "tpu.trace_stop"() : () -> ()
    %331 = arith.addf %330, %41 : vector<1x40x40xf32>
    %cst_80 = arith.constant dense<0xFF800000> : vector<1x40xf32>
    %332 = vector.multi_reduction <maximumf>, %331, %cst_80 [2] : vector<1x40x40xf32> to vector<1x40xf32>
    %333 = vector.shape_cast %332 : vector<1x40xf32> to vector<1x40x1xf32>
    %334 = vector.broadcast %333 : vector<1x40x1xf32> to vector<1x40x40xf32>
    %335 = arith.subf %331, %334 : vector<1x40x40xf32>
    %336 = math.exp %335 : vector<1x40x40xf32>
    %cst_81 = arith.constant dense<0.000000e+00> : vector<1x40xf32>
    %337 = vector.multi_reduction <add>, %336, %cst_81 [2] : vector<1x40x40xf32> to vector<1x40xf32>
    %338 = vector.shape_cast %337 : vector<1x40xf32> to vector<1x40x1xf32>
    %339 = tpu.reciprocal %338 {approx = true} : vector<1x40x1xf32> -> vector<1x40x1xf32>
    %340 = vector.broadcast %339 : vector<1x40x1xf32> to vector<1x40x40xf32>
    %341 = arith.mulf %336, %340 : vector<1x40x40xf32>
    %342 = arith.truncf %341 : vector<1x40x40xf32> to vector<1x40x40xbf16>
    %343 = arith.truncf %327 : vector<1x40x8xf32> to vector<1x40x8xbf16>
    "tpu.trace_start"() <{level = 10 : i32, message = "bqk,bkd->bqd"}> : () -> ()
    %cst_82 = arith.constant dense<0.000000e+00> : vector<1x40x8xf32>
    %344 = tpu.matmul %342, %343, %cst_82 {dimension_numbers = #tpu.dot_dimension_numbers<[2], [1], [1], [2], [0, 0, 0, 1, 1, 2], [0], [0]>} : vector<1x40x40xbf16>, vector<1x40x8xbf16>, vector<1x40x8xf32> -> vector<1x40x8xf32>
    "tpu.trace_stop"() : () -> ()
    %345 = vector.shape_cast %344 : vector<1x40x8xf32> to vector<40x8xf32>
    %346 = arith.truncf %345 : vector<40x8xf32> to vector<40x8xbf16>
    %347 = vector.extract_strided_slice %311 {offsets = [0, 48], sizes = [8, 16], strides = [1, 1]} : vector<16x96xf32> to vector<8x16xf32>
    %348 = arith.truncf %347 : vector<8x16xf32> to vector<8x16xbf16>
    %cst_83 = arith.constant dense<0.000000e+00> : vector<40x16xf32>
    %349 = tpu.matmul %346, %348, %cst_83 {dimension_numbers = #tpu.dot_dimension_numbers<[1], [0], [0], [1], [0, 0, 1, 1], [], []>} : vector<40x8xbf16>, vector<8x16xbf16>, vector<40x16xf32> -> vector<40x16xf32>
    %350 = vector.broadcast %324 : vector<1x16xf32> to vector<40x16xf32>
    %351 = arith.addf %350, %349 : vector<40x16xf32>
    %352 = vector.extract_strided_slice %323 {offsets = [0, 0, 8], sizes = [1, 40, 8], strides = [1, 1, 1]} : vector<1x40x48xf32> to vector<1x40x8xf32>
    %353 = vector.extract_strided_slice %323 {offsets = [0, 0, 24], sizes = [1, 40, 8], strides = [1, 1, 1]} : vector<1x40x48xf32> to vector<1x40x8xf32>
    %354 = vector.extract_strided_slice %323 {offsets = [0, 0, 40], sizes = [1, 40, 8], strides = [1, 1, 1]} : vector<1x40x48xf32> to vector<1x40x8xf32>
    %355 = arith.truncf %352 : vector<1x40x8xf32> to vector<1x40x8xbf16>
    %356 = arith.truncf %353 : vector<1x40x8xf32> to vector<1x40x8xbf16>
    "tpu.trace_start"() <{level = 10 : i32, message = "bqd,bkd->bqk"}> : () -> ()
    %cst_84 = arith.constant dense<0.000000e+00> : vector<1x40x40xf32>
    %357 = tpu.matmul %355, %356, %cst_84 {dimension_numbers = #tpu.dot_dimension_numbers<[2], [2], [1], [1], [0, 0, 0, 1, 1, 1], [0], [0]>} : vector<1x40x8xbf16>, vector<1x40x8xbf16>, vector<1x40x40xf32> -> vector<1x40x40xf32>
    "tpu.trace_stop"() : () -> ()
    %358 = arith.addf %357, %41 : vector<1x40x40xf32>
    %cst_85 = arith.constant dense<0xFF800000> : vector<1x40xf32>
    %359 = vector.multi_reduction <maximumf>, %358, %cst_85 [2] : vector<1x40x40xf32> to vector<1x40xf32>
    %360 = vector.shape_cast %359 : vector<1x40xf32> to vector<1x40x1xf32>
    %361 = vector.broadcast %360 : vector<1x40x1xf32> to vector<1x40x40xf32>
    %362 = arith.subf %358, %361 : vector<1x40x40xf32>
    %363 = math.exp %362 : vector<1x40x40xf32>
    %cst_86 = arith.constant dense<0.000000e+00> : vector<1x40xf32>
    %364 = vector.multi_reduction <add>, %363, %cst_86 [2] : vector<1x40x40xf32> to vector<1x40xf32>
    %365 = vector.shape_cast %364 : vector<1x40xf32> to vector<1x40x1xf32>
    %366 = tpu.reciprocal %365 {approx = true} : vector<1x40x1xf32> -> vector<1x40x1xf32>
    %367 = vector.broadcast %366 : vector<1x40x1xf32> to vector<1x40x40xf32>
    %368 = arith.mulf %363, %367 : vector<1x40x40xf32>
    %369 = arith.truncf %368 : vector<1x40x40xf32> to vector<1x40x40xbf16>
    %370 = arith.truncf %354 : vector<1x40x8xf32> to vector<1x40x8xbf16>
    "tpu.trace_start"() <{level = 10 : i32, message = "bqk,bkd->bqd"}> : () -> ()
    %cst_87 = arith.constant dense<0.000000e+00> : vector<1x40x8xf32>
    %371 = tpu.matmul %369, %370, %cst_87 {dimension_numbers = #tpu.dot_dimension_numbers<[2], [1], [1], [2], [0, 0, 0, 1, 1, 2], [0], [0]>} : vector<1x40x40xbf16>, vector<1x40x8xbf16>, vector<1x40x8xf32> -> vector<1x40x8xf32>
    "tpu.trace_stop"() : () -> ()
    %372 = vector.shape_cast %371 : vector<1x40x8xf32> to vector<40x8xf32>
    %373 = arith.truncf %372 : vector<40x8xf32> to vector<40x8xbf16>
    %374 = vector.extract_strided_slice %311 {offsets = [8, 48], sizes = [8, 16], strides = [1, 1]} : vector<16x96xf32> to vector<8x16xf32>
    %375 = arith.truncf %374 : vector<8x16xf32> to vector<8x16xbf16>
    %cst_88 = arith.constant dense<0.000000e+00> : vector<40x16xf32>
    %376 = tpu.matmul %373, %375, %cst_88 {dimension_numbers = #tpu.dot_dimension_numbers<[1], [0], [0], [1], [0, 0, 1, 1], [], []>} : vector<40x8xbf16>, vector<8x16xbf16>, vector<40x16xf32> -> vector<40x16xf32>
    %377 = arith.addf %351, %376 : vector<40x16xf32>
    %378 = arith.addf %309, %377 : vector<40x16xf32>
    %cst_89 = arith.constant dense<0.000000e+00> : vector<40xf32>
    %379 = vector.multi_reduction <add>, %378, %cst_89 [1] : vector<40x16xf32> to vector<40xf32>
    %380 = vector.shape_cast %379 : vector<40xf32> to vector<40x1xf32>
    %cst_90 = arith.constant 1.600000e+01 : f32
    %381 = vector.broadcast %cst_90 : f32 to vector<40x1xf32>
    %382 = arith.divf %380, %381 : vector<40x1xf32>
    %383 = vector.broadcast %382 : vector<40x1xf32> to vector<40x16xf32>
    %384 = arith.subf %378, %383 : vector<40x16xf32>
    %385 = arith.mulf %384, %384 : vector<40x16xf32>
    %cst_91 = arith.constant dense<0.000000e+00> : vector<40xf32>
    %386 = vector.multi_reduction <add>, %385, %cst_91 [1] : vector<40x16xf32> to vector<40xf32>
    %387 = vector.shape_cast %386 : vector<40xf32> to vector<40x1xf32>
    %cst_92 = arith.constant 1.600000e+01 : f32
    %388 = vector.broadcast %cst_92 : f32 to vector<40x1xf32>
    %389 = arith.divf %387, %388 : vector<40x1xf32>
    %390 = vector.broadcast %382 : vector<40x1xf32> to vector<40x16xf32>
    %391 = arith.subf %378, %390 : vector<40x16xf32>
    %cst_93 = arith.constant 9.99999974E-6 : f32
    %392 = vector.broadcast %cst_93 : f32 to vector<40x1xf32>
    %393 = arith.addf %389, %392 : vector<40x1xf32>
    %394 = math.rsqrt %393 : vector<40x1xf32>
    %395 = vector.broadcast %394 : vector<40x1xf32> to vector<40x16xf32>
    %396 = arith.mulf %391, %395 : vector<40x16xf32>
    %397 = vector.broadcast %314 : vector<1x16xf32> to vector<40x16xf32>
    %398 = arith.mulf %396, %397 : vector<40x16xf32>
    %399 = vector.broadcast %315 : vector<1x16xf32> to vector<40x16xf32>
    %400 = arith.addf %398, %399 : vector<40x16xf32>
    %401 = arith.truncf %400 : vector<40x16xf32> to vector<40x16xbf16>
    %402 = vector.extract_strided_slice %311 {offsets = [0, 64], sizes = [16, 16], strides = [1, 1]} : vector<16x96xf32> to vector<16x16xf32>
    %403 = arith.truncf %402 : vector<16x16xf32> to vector<16x16xbf16>
    %cst_94 = arith.constant dense<0.000000e+00> : vector<40x16xf32>
    %404 = tpu.matmul %401, %403, %cst_94 {dimension_numbers = #tpu.dot_dimension_numbers<[1], [0], [0], [1], [0, 0, 1, 1], [], []>} : vector<40x16xbf16>, vector<16x16xbf16>, vector<40x16xf32> -> vector<40x16xf32>
    %405 = vector.extract_strided_slice %313 {offsets = [0, 96], sizes = [1, 16], strides = [1, 1]} : vector<1x128xf32> to vector<1x16xf32>
    %406 = vector.broadcast %405 : vector<1x16xf32> to vector<40x16xf32>
    %407 = arith.addf %404, %406 : vector<40x16xf32>
    %408 = arith.negf %407 : vector<40x16xf32>
    %409 = math.exp %408 : vector<40x16xf32>
    %cst_95 = arith.constant 1.000000e+00 : f32
    %410 = vector.broadcast %cst_95 : f32 to vector<40x16xf32>
    %411 = arith.addf %410, %409 : vector<40x16xf32>
    %412 = arith.divf %410, %411 : vector<40x16xf32>
    %413 = arith.mulf %407, %412 : vector<40x16xf32>
    %414 = arith.truncf %413 : vector<40x16xf32> to vector<40x16xbf16>
    %415 = vector.extract_strided_slice %311 {offsets = [0, 80], sizes = [16, 16], strides = [1, 1]} : vector<16x96xf32> to vector<16x16xf32>
    %416 = arith.truncf %415 : vector<16x16xf32> to vector<16x16xbf16>
    %cst_96 = arith.constant dense<0.000000e+00> : vector<40x16xf32>
    %417 = tpu.matmul %414, %416, %cst_96 {dimension_numbers = #tpu.dot_dimension_numbers<[1], [0], [0], [1], [0, 0, 1, 1], [], []>} : vector<40x16xbf16>, vector<16x16xbf16>, vector<40x16xf32> -> vector<40x16xf32>
    %418 = vector.extract_strided_slice %313 {offsets = [0, 112], sizes = [1, 16], strides = [1, 1]} : vector<1x128xf32> to vector<1x16xf32>
    %419 = vector.broadcast %418 : vector<1x16xf32> to vector<40x16xf32>
    %420 = arith.addf %417, %419 : vector<40x16xf32>
    %421 = arith.addf %400, %420 : vector<40x16xf32>
    %cst_97 = arith.constant dense<0.000000e+00> : vector<40xf32>
    %422 = vector.multi_reduction <add>, %421, %cst_97 [1] : vector<40x16xf32> to vector<40xf32>
    %423 = vector.shape_cast %422 : vector<40xf32> to vector<40x1xf32>
    %cst_98 = arith.constant 1.600000e+01 : f32
    %424 = vector.broadcast %cst_98 : f32 to vector<40x1xf32>
    %425 = arith.divf %423, %424 : vector<40x1xf32>
    %426 = vector.broadcast %425 : vector<40x1xf32> to vector<40x16xf32>
    %427 = arith.subf %421, %426 : vector<40x16xf32>
    %428 = arith.mulf %427, %427 : vector<40x16xf32>
    %cst_99 = arith.constant dense<0.000000e+00> : vector<40xf32>
    %429 = vector.multi_reduction <add>, %428, %cst_99 [1] : vector<40x16xf32> to vector<40xf32>
    %430 = vector.shape_cast %429 : vector<40xf32> to vector<40x1xf32>
    %cst_100 = arith.constant 1.600000e+01 : f32
    %431 = vector.broadcast %cst_100 : f32 to vector<40x1xf32>
    %432 = arith.divf %430, %431 : vector<40x1xf32>
    %433 = vector.broadcast %425 : vector<40x1xf32> to vector<40x16xf32>
    %434 = arith.subf %421, %433 : vector<40x16xf32>
    %cst_101 = arith.constant 9.99999974E-6 : f32
    %435 = vector.broadcast %cst_101 : f32 to vector<40x1xf32>
    %436 = arith.addf %432, %435 : vector<40x1xf32>
    %437 = math.rsqrt %436 : vector<40x1xf32>
    %438 = vector.broadcast %437 : vector<40x1xf32> to vector<40x16xf32>
    %439 = arith.mulf %434, %438 : vector<40x16xf32>
    %440 = vector.broadcast %314 : vector<1x16xf32> to vector<40x16xf32>
    %441 = arith.mulf %439, %440 : vector<40x16xf32>
    %442 = vector.broadcast %315 : vector<1x16xf32> to vector<40x16xf32>
    %443 = arith.addf %441, %442 : vector<40x16xf32>
    %c3 = arith.constant 3 : index
    %c0_102 = arith.constant 0 : index
    %c0_103 = arith.constant 0 : index
    %444 = vector.load %arg4[%c3, %c0_102, %c0_103] : memref<4x16x96xf32, #tpu.memory_space<vmem>>, vector<1x16x96xf32>
    %445 = vector.shape_cast %444 : vector<1x16x96xf32> to vector<16x96xf32>
    %c3_104 = arith.constant 3 : index
    %c0_105 = arith.constant 0 : index
    %c0_106 = arith.constant 0 : index
    %446 = vector.load %arg5[%c3_104, %c0_105, %c0_106] : memref<5x1x128xf32, #tpu.memory_space<vmem>>, vector<1x1x128xf32>
    %447 = vector.shape_cast %446 : vector<1x1x128xf32> to vector<1x128xf32>
    %448 = vector.extract_strided_slice %447 {offsets = [0, 64], sizes = [1, 16], strides = [1, 1]} : vector<1x128xf32> to vector<1x16xf32>
    %449 = vector.extract_strided_slice %447 {offsets = [0, 80], sizes = [1, 16], strides = [1, 1]} : vector<1x128xf32> to vector<1x16xf32>
    %450 = arith.truncf %443 : vector<40x16xf32> to vector<40x16xbf16>
    %451 = vector.extract_strided_slice %445 {offsets = [0, 0], sizes = [16, 48], strides = [1, 1]} : vector<16x96xf32> to vector<16x48xf32>
    %452 = arith.truncf %451 : vector<16x48xf32> to vector<16x48xbf16>
    %cst_107 = arith.constant dense<0.000000e+00> : vector<40x48xf32>
    %453 = tpu.matmul %450, %452, %cst_107 {dimension_numbers = #tpu.dot_dimension_numbers<[1], [0], [0], [1], [0, 0, 1, 1], [], []>} : vector<40x16xbf16>, vector<16x48xbf16>, vector<40x48xf32> -> vector<40x48xf32>
    %454 = vector.extract_strided_slice %447 {offsets = [0, 0], sizes = [1, 48], strides = [1, 1]} : vector<1x128xf32> to vector<1x48xf32>
    %455 = vector.broadcast %454 : vector<1x48xf32> to vector<40x48xf32>
    %456 = arith.addf %453, %455 : vector<40x48xf32>
    %457 = vector.shape_cast %456 : vector<40x48xf32> to vector<1x40x48xf32>
    %458 = vector.extract_strided_slice %447 {offsets = [0, 48], sizes = [1, 16], strides = [1, 1]} : vector<1x128xf32> to vector<1x16xf32>
    %459 = vector.extract_strided_slice %457 {offsets = [0, 0, 0], sizes = [1, 40, 8], strides = [1, 1, 1]} : vector<1x40x48xf32> to vector<1x40x8xf32>
    %460 = vector.extract_strided_slice %457 {offsets = [0, 0, 16], sizes = [1, 40, 8], strides = [1, 1, 1]} : vector<1x40x48xf32> to vector<1x40x8xf32>
    %461 = vector.extract_strided_slice %457 {offsets = [0, 0, 32], sizes = [1, 40, 8], strides = [1, 1, 1]} : vector<1x40x48xf32> to vector<1x40x8xf32>
    %462 = arith.truncf %459 : vector<1x40x8xf32> to vector<1x40x8xbf16>
    %463 = arith.truncf %460 : vector<1x40x8xf32> to vector<1x40x8xbf16>
    "tpu.trace_start"() <{level = 10 : i32, message = "bqd,bkd->bqk"}> : () -> ()
    %cst_108 = arith.constant dense<0.000000e+00> : vector<1x40x40xf32>
    %464 = tpu.matmul %462, %463, %cst_108 {dimension_numbers = #tpu.dot_dimension_numbers<[2], [2], [1], [1], [0, 0, 0, 1, 1, 1], [0], [0]>} : vector<1x40x8xbf16>, vector<1x40x8xbf16>, vector<1x40x40xf32> -> vector<1x40x40xf32>
    "tpu.trace_stop"() : () -> ()
    %465 = arith.addf %464, %41 : vector<1x40x40xf32>
    %cst_109 = arith.constant dense<0xFF800000> : vector<1x40xf32>
    %466 = vector.multi_reduction <maximumf>, %465, %cst_109 [2] : vector<1x40x40xf32> to vector<1x40xf32>
    %467 = vector.shape_cast %466 : vector<1x40xf32> to vector<1x40x1xf32>
    %468 = vector.broadcast %467 : vector<1x40x1xf32> to vector<1x40x40xf32>
    %469 = arith.subf %465, %468 : vector<1x40x40xf32>
    %470 = math.exp %469 : vector<1x40x40xf32>
    %cst_110 = arith.constant dense<0.000000e+00> : vector<1x40xf32>
    %471 = vector.multi_reduction <add>, %470, %cst_110 [2] : vector<1x40x40xf32> to vector<1x40xf32>
    %472 = vector.shape_cast %471 : vector<1x40xf32> to vector<1x40x1xf32>
    %473 = tpu.reciprocal %472 {approx = true} : vector<1x40x1xf32> -> vector<1x40x1xf32>
    %474 = vector.broadcast %473 : vector<1x40x1xf32> to vector<1x40x40xf32>
    %475 = arith.mulf %470, %474 : vector<1x40x40xf32>
    %476 = arith.truncf %475 : vector<1x40x40xf32> to vector<1x40x40xbf16>
    %477 = arith.truncf %461 : vector<1x40x8xf32> to vector<1x40x8xbf16>
    "tpu.trace_start"() <{level = 10 : i32, message = "bqk,bkd->bqd"}> : () -> ()
    %cst_111 = arith.constant dense<0.000000e+00> : vector<1x40x8xf32>
    %478 = tpu.matmul %476, %477, %cst_111 {dimension_numbers = #tpu.dot_dimension_numbers<[2], [1], [1], [2], [0, 0, 0, 1, 1, 2], [0], [0]>} : vector<1x40x40xbf16>, vector<1x40x8xbf16>, vector<1x40x8xf32> -> vector<1x40x8xf32>
    "tpu.trace_stop"() : () -> ()
    %479 = vector.shape_cast %478 : vector<1x40x8xf32> to vector<40x8xf32>
    %480 = arith.truncf %479 : vector<40x8xf32> to vector<40x8xbf16>
    %481 = vector.extract_strided_slice %445 {offsets = [0, 48], sizes = [8, 16], strides = [1, 1]} : vector<16x96xf32> to vector<8x16xf32>
    %482 = arith.truncf %481 : vector<8x16xf32> to vector<8x16xbf16>
    %cst_112 = arith.constant dense<0.000000e+00> : vector<40x16xf32>
    %483 = tpu.matmul %480, %482, %cst_112 {dimension_numbers = #tpu.dot_dimension_numbers<[1], [0], [0], [1], [0, 0, 1, 1], [], []>} : vector<40x8xbf16>, vector<8x16xbf16>, vector<40x16xf32> -> vector<40x16xf32>
    %484 = vector.broadcast %458 : vector<1x16xf32> to vector<40x16xf32>
    %485 = arith.addf %484, %483 : vector<40x16xf32>
    %486 = vector.extract_strided_slice %457 {offsets = [0, 0, 8], sizes = [1, 40, 8], strides = [1, 1, 1]} : vector<1x40x48xf32> to vector<1x40x8xf32>
    %487 = vector.extract_strided_slice %457 {offsets = [0, 0, 24], sizes = [1, 40, 8], strides = [1, 1, 1]} : vector<1x40x48xf32> to vector<1x40x8xf32>
    %488 = vector.extract_strided_slice %457 {offsets = [0, 0, 40], sizes = [1, 40, 8], strides = [1, 1, 1]} : vector<1x40x48xf32> to vector<1x40x8xf32>
    %489 = arith.truncf %486 : vector<1x40x8xf32> to vector<1x40x8xbf16>
    %490 = arith.truncf %487 : vector<1x40x8xf32> to vector<1x40x8xbf16>
    "tpu.trace_start"() <{level = 10 : i32, message = "bqd,bkd->bqk"}> : () -> ()
    %cst_113 = arith.constant dense<0.000000e+00> : vector<1x40x40xf32>
    %491 = tpu.matmul %489, %490, %cst_113 {dimension_numbers = #tpu.dot_dimension_numbers<[2], [2], [1], [1], [0, 0, 0, 1, 1, 1], [0], [0]>} : vector<1x40x8xbf16>, vector<1x40x8xbf16>, vector<1x40x40xf32> -> vector<1x40x40xf32>
    "tpu.trace_stop"() : () -> ()
    %492 = arith.addf %491, %41 : vector<1x40x40xf32>
    %cst_114 = arith.constant dense<0xFF800000> : vector<1x40xf32>
    %493 = vector.multi_reduction <maximumf>, %492, %cst_114 [2] : vector<1x40x40xf32> to vector<1x40xf32>
    %494 = vector.shape_cast %493 : vector<1x40xf32> to vector<1x40x1xf32>
    %495 = vector.broadcast %494 : vector<1x40x1xf32> to vector<1x40x40xf32>
    %496 = arith.subf %492, %495 : vector<1x40x40xf32>
    %497 = math.exp %496 : vector<1x40x40xf32>
    %cst_115 = arith.constant dense<0.000000e+00> : vector<1x40xf32>
    %498 = vector.multi_reduction <add>, %497, %cst_115 [2] : vector<1x40x40xf32> to vector<1x40xf32>
    %499 = vector.shape_cast %498 : vector<1x40xf32> to vector<1x40x1xf32>
    %500 = tpu.reciprocal %499 {approx = true} : vector<1x40x1xf32> -> vector<1x40x1xf32>
    %501 = vector.broadcast %500 : vector<1x40x1xf32> to vector<1x40x40xf32>
    %502 = arith.mulf %497, %501 : vector<1x40x40xf32>
    %503 = arith.truncf %502 : vector<1x40x40xf32> to vector<1x40x40xbf16>
    %504 = arith.truncf %488 : vector<1x40x8xf32> to vector<1x40x8xbf16>
    "tpu.trace_start"() <{level = 10 : i32, message = "bqk,bkd->bqd"}> : () -> ()
    %cst_116 = arith.constant dense<0.000000e+00> : vector<1x40x8xf32>
    %505 = tpu.matmul %503, %504, %cst_116 {dimension_numbers = #tpu.dot_dimension_numbers<[2], [1], [1], [2], [0, 0, 0, 1, 1, 2], [0], [0]>} : vector<1x40x40xbf16>, vector<1x40x8xbf16>, vector<1x40x8xf32> -> vector<1x40x8xf32>
    "tpu.trace_stop"() : () -> ()
    %506 = vector.shape_cast %505 : vector<1x40x8xf32> to vector<40x8xf32>
    %507 = arith.truncf %506 : vector<40x8xf32> to vector<40x8xbf16>
    %508 = vector.extract_strided_slice %445 {offsets = [8, 48], sizes = [8, 16], strides = [1, 1]} : vector<16x96xf32> to vector<8x16xf32>
    %509 = arith.truncf %508 : vector<8x16xf32> to vector<8x16xbf16>
    %cst_117 = arith.constant dense<0.000000e+00> : vector<40x16xf32>
    %510 = tpu.matmul %507, %509, %cst_117 {dimension_numbers = #tpu.dot_dimension_numbers<[1], [0], [0], [1], [0, 0, 1, 1], [], []>} : vector<40x8xbf16>, vector<8x16xbf16>, vector<40x16xf32> -> vector<40x16xf32>
    %511 = arith.addf %485, %510 : vector<40x16xf32>
    %512 = arith.addf %443, %511 : vector<40x16xf32>
    %cst_118 = arith.constant dense<0.000000e+00> : vector<40xf32>
    %513 = vector.multi_reduction <add>, %512, %cst_118 [1] : vector<40x16xf32> to vector<40xf32>
    %514 = vector.shape_cast %513 : vector<40xf32> to vector<40x1xf32>
    %cst_119 = arith.constant 1.600000e+01 : f32
    %515 = vector.broadcast %cst_119 : f32 to vector<40x1xf32>
    %516 = arith.divf %514, %515 : vector<40x1xf32>
    %517 = vector.broadcast %516 : vector<40x1xf32> to vector<40x16xf32>
    %518 = arith.subf %512, %517 : vector<40x16xf32>
    %519 = arith.mulf %518, %518 : vector<40x16xf32>
    %cst_120 = arith.constant dense<0.000000e+00> : vector<40xf32>
    %520 = vector.multi_reduction <add>, %519, %cst_120 [1] : vector<40x16xf32> to vector<40xf32>
    %521 = vector.shape_cast %520 : vector<40xf32> to vector<40x1xf32>
    %cst_121 = arith.constant 1.600000e+01 : f32
    %522 = vector.broadcast %cst_121 : f32 to vector<40x1xf32>
    %523 = arith.divf %521, %522 : vector<40x1xf32>
    %524 = vector.broadcast %516 : vector<40x1xf32> to vector<40x16xf32>
    %525 = arith.subf %512, %524 : vector<40x16xf32>
    %cst_122 = arith.constant 9.99999974E-6 : f32
    %526 = vector.broadcast %cst_122 : f32 to vector<40x1xf32>
    %527 = arith.addf %523, %526 : vector<40x1xf32>
    %528 = math.rsqrt %527 : vector<40x1xf32>
    %529 = vector.broadcast %528 : vector<40x1xf32> to vector<40x16xf32>
    %530 = arith.mulf %525, %529 : vector<40x16xf32>
    %531 = vector.broadcast %448 : vector<1x16xf32> to vector<40x16xf32>
    %532 = arith.mulf %530, %531 : vector<40x16xf32>
    %533 = vector.broadcast %449 : vector<1x16xf32> to vector<40x16xf32>
    %534 = arith.addf %532, %533 : vector<40x16xf32>
    %535 = arith.truncf %534 : vector<40x16xf32> to vector<40x16xbf16>
    %536 = vector.extract_strided_slice %445 {offsets = [0, 64], sizes = [16, 16], strides = [1, 1]} : vector<16x96xf32> to vector<16x16xf32>
    %537 = arith.truncf %536 : vector<16x16xf32> to vector<16x16xbf16>
    %cst_123 = arith.constant dense<0.000000e+00> : vector<40x16xf32>
    %538 = tpu.matmul %535, %537, %cst_123 {dimension_numbers = #tpu.dot_dimension_numbers<[1], [0], [0], [1], [0, 0, 1, 1], [], []>} : vector<40x16xbf16>, vector<16x16xbf16>, vector<40x16xf32> -> vector<40x16xf32>
    %539 = vector.extract_strided_slice %447 {offsets = [0, 96], sizes = [1, 16], strides = [1, 1]} : vector<1x128xf32> to vector<1x16xf32>
    %540 = vector.broadcast %539 : vector<1x16xf32> to vector<40x16xf32>
    %541 = arith.addf %538, %540 : vector<40x16xf32>
    %542 = arith.negf %541 : vector<40x16xf32>
    %543 = math.exp %542 : vector<40x16xf32>
    %cst_124 = arith.constant 1.000000e+00 : f32
    %544 = vector.broadcast %cst_124 : f32 to vector<40x16xf32>
    %545 = arith.addf %544, %543 : vector<40x16xf32>
    %546 = arith.divf %544, %545 : vector<40x16xf32>
    %547 = arith.mulf %541, %546 : vector<40x16xf32>
    %548 = arith.truncf %547 : vector<40x16xf32> to vector<40x16xbf16>
    %549 = vector.extract_strided_slice %445 {offsets = [0, 80], sizes = [16, 16], strides = [1, 1]} : vector<16x96xf32> to vector<16x16xf32>
    %550 = arith.truncf %549 : vector<16x16xf32> to vector<16x16xbf16>
    %cst_125 = arith.constant dense<0.000000e+00> : vector<40x16xf32>
    %551 = tpu.matmul %548, %550, %cst_125 {dimension_numbers = #tpu.dot_dimension_numbers<[1], [0], [0], [1], [0, 0, 1, 1], [], []>} : vector<40x16xbf16>, vector<16x16xbf16>, vector<40x16xf32> -> vector<40x16xf32>
    %552 = vector.extract_strided_slice %447 {offsets = [0, 112], sizes = [1, 16], strides = [1, 1]} : vector<1x128xf32> to vector<1x16xf32>
    %553 = vector.broadcast %552 : vector<1x16xf32> to vector<40x16xf32>
    %554 = arith.addf %551, %553 : vector<40x16xf32>
    %555 = arith.addf %534, %554 : vector<40x16xf32>
    %cst_126 = arith.constant dense<0.000000e+00> : vector<40xf32>
    %556 = vector.multi_reduction <add>, %555, %cst_126 [1] : vector<40x16xf32> to vector<40xf32>
    %557 = vector.shape_cast %556 : vector<40xf32> to vector<40x1xf32>
    %cst_127 = arith.constant 1.600000e+01 : f32
    %558 = vector.broadcast %cst_127 : f32 to vector<40x1xf32>
    %559 = arith.divf %557, %558 : vector<40x1xf32>
    %560 = vector.broadcast %559 : vector<40x1xf32> to vector<40x16xf32>
    %561 = arith.subf %555, %560 : vector<40x16xf32>
    %562 = arith.mulf %561, %561 : vector<40x16xf32>
    %cst_128 = arith.constant dense<0.000000e+00> : vector<40xf32>
    %563 = vector.multi_reduction <add>, %562, %cst_128 [1] : vector<40x16xf32> to vector<40xf32>
    %564 = vector.shape_cast %563 : vector<40xf32> to vector<40x1xf32>
    %cst_129 = arith.constant 1.600000e+01 : f32
    %565 = vector.broadcast %cst_129 : f32 to vector<40x1xf32>
    %566 = arith.divf %564, %565 : vector<40x1xf32>
    %567 = vector.broadcast %559 : vector<40x1xf32> to vector<40x16xf32>
    %568 = arith.subf %555, %567 : vector<40x16xf32>
    %cst_130 = arith.constant 9.99999974E-6 : f32
    %569 = vector.broadcast %cst_130 : f32 to vector<40x1xf32>
    %570 = arith.addf %566, %569 : vector<40x1xf32>
    %571 = math.rsqrt %570 : vector<40x1xf32>
    %572 = vector.broadcast %571 : vector<40x1xf32> to vector<40x16xf32>
    %573 = arith.mulf %568, %572 : vector<40x16xf32>
    %574 = vector.broadcast %448 : vector<1x16xf32> to vector<40x16xf32>
    %575 = arith.mulf %573, %574 : vector<40x16xf32>
    %576 = vector.broadcast %449 : vector<1x16xf32> to vector<40x16xf32>
    %577 = arith.addf %575, %576 : vector<40x16xf32>
    %578 = arith.truncf %577 : vector<40x16xf32> to vector<40x16xbf16>
    %c0_131 = arith.constant 0 : index
    %c0_132 = arith.constant 0 : index
    %579 = vector.load %arg6[%c0_131, %c0_132] : memref<16x16xf32, #tpu.memory_space<vmem>>, vector<16x16xf32>
    %580 = arith.truncf %579 : vector<16x16xf32> to vector<16x16xbf16>
    %cst_133 = arith.constant dense<0.000000e+00> : vector<40x16xf32>
    %581 = tpu.matmul %578, %580, %cst_133 {dimension_numbers = #tpu.dot_dimension_numbers<[1], [0], [0], [1], [0, 0, 1, 1], [], []>} : vector<40x16xbf16>, vector<16x16xbf16>, vector<40x16xf32> -> vector<40x16xf32>
    %582 = vector.shape_cast %581 : vector<40x16xf32> to vector<1x40x16xf32>
    %583 = vector.shape_cast %0 : vector<40x6xf32> to vector<1x40x6xf32>
    %584 = vector.extract_strided_slice %583 {offsets = [0, 0, 0], sizes = [1, 40, 1], strides = [1, 1, 1]} : vector<1x40x6xf32> to vector<1x40x1xf32>
    %585 = vector.extract_strided_slice %583 {offsets = [0, 0, 1], sizes = [1, 40, 1], strides = [1, 1, 1]} : vector<1x40x6xf32> to vector<1x40x1xf32>
    %586 = arith.addf %584, %585 : vector<1x40x1xf32>
    %c9 = arith.constant 9 : index
    %c0_134 = arith.constant 0 : index
    %c0_135 = arith.constant 0 : index
    %587 = vector.load %arg7[%c9, %c0_134, %c0_135] : memref<11x40x128xf32, #tpu.memory_space<vmem>>, vector<1x40x128xf32>
    %588 = vector.shape_cast %587 : vector<1x40x128xf32> to vector<40x128xf32>
    %589 = vector.shape_cast %588 : vector<40x128xf32> to vector<1x40x128xf32>
    %590 = vector.broadcast %586 : vector<1x40x1xf32> to vector<1x40x128xf32>
    %591 = arith.mulf %590, %589 : vector<1x40x128xf32>
    %592 = vector.extract_strided_slice %582 {offsets = [0, 0, 9], sizes = [1, 40, 1], strides = [1, 1, 1]} : vector<1x40x16xf32> to vector<1x40x1xf32>
    %c10 = arith.constant 10 : index
    %c0_136 = arith.constant 0 : index
    %c0_137 = arith.constant 0 : index
    %593 = vector.load %arg7[%c10, %c0_136, %c0_137] : memref<11x40x128xf32, #tpu.memory_space<vmem>>, vector<1x40x128xf32>
    %594 = vector.shape_cast %593 : vector<1x40x128xf32> to vector<40x128xf32>
    %595 = vector.shape_cast %594 : vector<40x128xf32> to vector<1x40x128xf32>
    %596 = vector.broadcast %592 : vector<1x40x1xf32> to vector<1x40x128xf32>
    %597 = arith.mulf %596, %595 : vector<1x40x128xf32>
    %598 = arith.addf %591, %597 : vector<1x40x128xf32>
    %599 = vector.extract_strided_slice %582 {offsets = [0, 0, 0], sizes = [1, 40, 1], strides = [1, 1, 1]} : vector<1x40x16xf32> to vector<1x40x1xf32>
    %c0_138 = arith.constant 0 : index
    %c0_139 = arith.constant 0 : index
    %c0_140 = arith.constant 0 : index
    %600 = vector.load %arg7[%c0_138, %c0_139, %c0_140] : memref<11x40x128xf32, #tpu.memory_space<vmem>>, vector<1x40x128xf32>
    %601 = vector.shape_cast %600 : vector<1x40x128xf32> to vector<40x128xf32>
    %602 = vector.shape_cast %601 : vector<40x128xf32> to vector<1x40x128xf32>
    %603 = vector.broadcast %599 : vector<1x40x1xf32> to vector<1x40x128xf32>
    %604 = arith.mulf %603, %602 : vector<1x40x128xf32>
    %605 = arith.addf %598, %604 : vector<1x40x128xf32>
    %606 = vector.extract_strided_slice %582 {offsets = [0, 0, 1], sizes = [1, 40, 1], strides = [1, 1, 1]} : vector<1x40x16xf32> to vector<1x40x1xf32>
    %c1_141 = arith.constant 1 : index
    %c0_142 = arith.constant 0 : index
    %c0_143 = arith.constant 0 : index
    %607 = vector.load %arg7[%c1_141, %c0_142, %c0_143] : memref<11x40x128xf32, #tpu.memory_space<vmem>>, vector<1x40x128xf32>
    %608 = vector.shape_cast %607 : vector<1x40x128xf32> to vector<40x128xf32>
    %609 = vector.shape_cast %608 : vector<40x128xf32> to vector<1x40x128xf32>
    %610 = vector.broadcast %606 : vector<1x40x1xf32> to vector<1x40x128xf32>
    %611 = arith.mulf %610, %609 : vector<1x40x128xf32>
    %612 = arith.addf %605, %611 : vector<1x40x128xf32>
    %613 = vector.extract_strided_slice %582 {offsets = [0, 0, 2], sizes = [1, 40, 1], strides = [1, 1, 1]} : vector<1x40x16xf32> to vector<1x40x1xf32>
    %c2_144 = arith.constant 2 : index
    %c0_145 = arith.constant 0 : index
    %c0_146 = arith.constant 0 : index
    %614 = vector.load %arg7[%c2_144, %c0_145, %c0_146] : memref<11x40x128xf32, #tpu.memory_space<vmem>>, vector<1x40x128xf32>
    %615 = vector.shape_cast %614 : vector<1x40x128xf32> to vector<40x128xf32>
    %616 = vector.shape_cast %615 : vector<40x128xf32> to vector<1x40x128xf32>
    %617 = vector.broadcast %613 : vector<1x40x1xf32> to vector<1x40x128xf32>
    %618 = arith.mulf %617, %616 : vector<1x40x128xf32>
    %619 = arith.addf %612, %618 : vector<1x40x128xf32>
    %620 = vector.extract_strided_slice %582 {offsets = [0, 0, 3], sizes = [1, 40, 1], strides = [1, 1, 1]} : vector<1x40x16xf32> to vector<1x40x1xf32>
    %c3_147 = arith.constant 3 : index
    %c0_148 = arith.constant 0 : index
    %c0_149 = arith.constant 0 : index
    %621 = vector.load %arg7[%c3_147, %c0_148, %c0_149] : memref<11x40x128xf32, #tpu.memory_space<vmem>>, vector<1x40x128xf32>
    %622 = vector.shape_cast %621 : vector<1x40x128xf32> to vector<40x128xf32>
    %623 = vector.shape_cast %622 : vector<40x128xf32> to vector<1x40x128xf32>
    %624 = vector.broadcast %620 : vector<1x40x1xf32> to vector<1x40x128xf32>
    %625 = arith.mulf %624, %623 : vector<1x40x128xf32>
    %626 = arith.addf %619, %625 : vector<1x40x128xf32>
    %627 = vector.extract_strided_slice %582 {offsets = [0, 0, 4], sizes = [1, 40, 1], strides = [1, 1, 1]} : vector<1x40x16xf32> to vector<1x40x1xf32>
    %c4 = arith.constant 4 : index
    %c0_150 = arith.constant 0 : index
    %c0_151 = arith.constant 0 : index
    %628 = vector.load %arg7[%c4, %c0_150, %c0_151] : memref<11x40x128xf32, #tpu.memory_space<vmem>>, vector<1x40x128xf32>
    %629 = vector.shape_cast %628 : vector<1x40x128xf32> to vector<40x128xf32>
    %630 = vector.shape_cast %629 : vector<40x128xf32> to vector<1x40x128xf32>
    %631 = vector.broadcast %627 : vector<1x40x1xf32> to vector<1x40x128xf32>
    %632 = arith.mulf %631, %630 : vector<1x40x128xf32>
    %633 = arith.addf %626, %632 : vector<1x40x128xf32>
    %634 = vector.extract_strided_slice %582 {offsets = [0, 0, 5], sizes = [1, 40, 1], strides = [1, 1, 1]} : vector<1x40x16xf32> to vector<1x40x1xf32>
    %c5 = arith.constant 5 : index
    %c0_152 = arith.constant 0 : index
    %c0_153 = arith.constant 0 : index
    %635 = vector.load %arg7[%c5, %c0_152, %c0_153] : memref<11x40x128xf32, #tpu.memory_space<vmem>>, vector<1x40x128xf32>
    %636 = vector.shape_cast %635 : vector<1x40x128xf32> to vector<40x128xf32>
    %637 = vector.shape_cast %636 : vector<40x128xf32> to vector<1x40x128xf32>
    %638 = vector.broadcast %634 : vector<1x40x1xf32> to vector<1x40x128xf32>
    %639 = arith.mulf %638, %637 : vector<1x40x128xf32>
    %640 = arith.addf %633, %639 : vector<1x40x128xf32>
    %641 = vector.extract_strided_slice %582 {offsets = [0, 0, 6], sizes = [1, 40, 1], strides = [1, 1, 1]} : vector<1x40x16xf32> to vector<1x40x1xf32>
    %c6_154 = arith.constant 6 : index
    %c0_155 = arith.constant 0 : index
    %c0_156 = arith.constant 0 : index
    %642 = vector.load %arg7[%c6_154, %c0_155, %c0_156] : memref<11x40x128xf32, #tpu.memory_space<vmem>>, vector<1x40x128xf32>
    %643 = vector.shape_cast %642 : vector<1x40x128xf32> to vector<40x128xf32>
    %644 = vector.shape_cast %643 : vector<40x128xf32> to vector<1x40x128xf32>
    %645 = vector.broadcast %641 : vector<1x40x1xf32> to vector<1x40x128xf32>
    %646 = arith.mulf %645, %644 : vector<1x40x128xf32>
    %647 = arith.addf %640, %646 : vector<1x40x128xf32>
    %648 = vector.extract_strided_slice %582 {offsets = [0, 0, 7], sizes = [1, 40, 1], strides = [1, 1, 1]} : vector<1x40x16xf32> to vector<1x40x1xf32>
    %c7_157 = arith.constant 7 : index
    %c0_158 = arith.constant 0 : index
    %c0_159 = arith.constant 0 : index
    %649 = vector.load %arg7[%c7_157, %c0_158, %c0_159] : memref<11x40x128xf32, #tpu.memory_space<vmem>>, vector<1x40x128xf32>
    %650 = vector.shape_cast %649 : vector<1x40x128xf32> to vector<40x128xf32>
    %651 = vector.shape_cast %650 : vector<40x128xf32> to vector<1x40x128xf32>
    %652 = vector.broadcast %648 : vector<1x40x1xf32> to vector<1x40x128xf32>
    %653 = arith.mulf %652, %651 : vector<1x40x128xf32>
    %654 = arith.addf %647, %653 : vector<1x40x128xf32>
    %655 = vector.extract_strided_slice %582 {offsets = [0, 0, 8], sizes = [1, 40, 1], strides = [1, 1, 1]} : vector<1x40x16xf32> to vector<1x40x1xf32>
    %c8 = arith.constant 8 : index
    %c0_160 = arith.constant 0 : index
    %c0_161 = arith.constant 0 : index
    %656 = vector.load %arg7[%c8, %c0_160, %c0_161] : memref<11x40x128xf32, #tpu.memory_space<vmem>>, vector<1x40x128xf32>
    %657 = vector.shape_cast %656 : vector<1x40x128xf32> to vector<40x128xf32>
    %658 = vector.shape_cast %657 : vector<40x128xf32> to vector<1x40x128xf32>
    %659 = vector.broadcast %655 : vector<1x40x1xf32> to vector<1x40x128xf32>
    %660 = arith.mulf %659, %658 : vector<1x40x128xf32>
    %661 = arith.addf %654, %660 : vector<1x40x128xf32>
    %cst_162 = arith.constant dense<0.000000e+00> : vector<1x128xf32>
    %662 = vector.multi_reduction <add>, %661, %cst_162 [1] : vector<1x40x128xf32> to vector<1x128xf32>
    %c4_163 = arith.constant 4 : index
    %c0_164 = arith.constant 0 : index
    %c0_165 = arith.constant 0 : index
    %663 = vector.load %arg5[%c4_163, %c0_164, %c0_165] : memref<5x1x128xf32, #tpu.memory_space<vmem>>, vector<1x1x128xf32>
    %664 = vector.shape_cast %663 : vector<1x1x128xf32> to vector<1x128xf32>
    %665 = arith.addf %662, %664 : vector<1x128xf32>
    %666 = tpu.iota {dimensions = array<i32: 1>} : vector<1x128xi32>
    %c16_i32 = arith.constant 16 : i32
    %667 = vector.broadcast %c16_i32 : i32 to vector<1x128xi32>
    %668 = arith.cmpi slt, %666, %667 : vector<1x128xi32>
    %cst_166 = arith.constant -1.000000e+30 : f32
    %669 = vector.broadcast %cst_166 : f32 to vector<1x128xf32>
    %670 = arith.select %668, %665, %669 : vector<1x128xi1>, vector<1x128xf32>
    %cst_167 = arith.constant dense<0xFF800000> : vector<1xf32>
    %671 = vector.multi_reduction <maximumf>, %670, %cst_167 [1] : vector<1x128xf32> to vector<1xf32>
    %672 = vector.shape_cast %671 : vector<1xf32> to vector<1x1xf32>
    %673 = vector.broadcast %672 : vector<1x1xf32> to vector<1x128xf32>
    %674 = arith.subf %670, %673 : vector<1x128xf32>
    %675 = math.exp %674 : vector<1x128xf32>
    %cst_168 = arith.constant dense<0.000000e+00> : vector<1xf32>
    %676 = vector.multi_reduction <add>, %675, %cst_168 [1] : vector<1x128xf32> to vector<1xf32>
    %677 = vector.shape_cast %676 : vector<1xf32> to vector<1x1xf32>
    %678 = vector.broadcast %677 : vector<1x1xf32> to vector<1x128xf32>
    %679 = arith.divf %675, %678 : vector<1x128xf32>
    %c16_i32_169 = arith.constant 16 : i32
    %680 = vector.broadcast %c16_i32_169 : i32 to vector<1x128xi32>
    %681 = arith.cmpi eq, %666, %680 : vector<1x128xi32>
    %682 = math.tanh %665 : vector<1x128xf32>
    %cst_170 = arith.constant 0.000000e+00 : f32
    %683 = vector.broadcast %cst_170 : f32 to vector<1x128xf32>
    %684 = arith.select %681, %682, %683 : vector<1x128xi1>, vector<1x128xf32>
    %685 = arith.addf %679, %684 : vector<1x128xf32>
    %686 = vector.shape_cast %685 : vector<1x128xf32> to vector<1x1x128xf32>
    %c0_171 = arith.constant 0 : index
    %c0_172 = arith.constant 0 : index
    %c0_173 = arith.constant 0 : index
    %687 = vector.load %arg8[%c0_171, %c0_172, %c0_173] : memref<1x1x128xf32, #tpu.memory_space<vmem>>, vector<1x1x128xf32>
    tpu.vector_store %arg8[%c0_171, %c0_172, %c0_173], %686 {strides = array<i32>} : memref<1x1x128xf32, #tpu.memory_space<vmem>>, vector<1x1x128xf32>,
    return
  }
  func.func @transform_0(%arg0: i32) -> (i32, i32) {
    %c0_i32 = arith.constant 0 : i32
    %c0_i32_0 = arith.constant 0 : i32
    return %arg0, %c0_i32 : i32, i32
  }
  func.func @transform_1(%arg0: i32) -> (i32, i32) {
    %c0_i32 = arith.constant 0 : i32
    %c0_i32_0 = arith.constant 0 : i32
    %c0_i32_1 = arith.constant 0 : i32
    return %c0_i32, %c0_i32_0 : i32, i32
  }
  func.func @transform_2(%arg0: i32) -> (i32, i32) {
    %c0_i32 = arith.constant 0 : i32
    %c0_i32_0 = arith.constant 0 : i32
    %c0_i32_1 = arith.constant 0 : i32
    return %c0_i32, %c0_i32_0 : i32, i32
  }
  func.func @transform_3(%arg0: i32) -> (i32, i32, i32) {
    %c0_i32 = arith.constant 0 : i32
    %c0_i32_0 = arith.constant 0 : i32
    %c0_i32_1 = arith.constant 0 : i32
    %c0_i32_2 = arith.constant 0 : i32
    return %c0_i32, %c0_i32_0, %c0_i32_1 : i32, i32, i32
  }
  func.func @transform_4(%arg0: i32) -> (i32, i32, i32) {
    %c0_i32 = arith.constant 0 : i32
    %c0_i32_0 = arith.constant 0 : i32
    %c0_i32_1 = arith.constant 0 : i32
    %c0_i32_2 = arith.constant 0 : i32
    return %c0_i32, %c0_i32_0, %c0_i32_1 : i32, i32, i32
  }
  func.func @transform_5(%arg0: i32) -> (i32, i32) {
    %c0_i32 = arith.constant 0 : i32
    %c0_i32_0 = arith.constant 0 : i32
    %c0_i32_1 = arith.constant 0 : i32
    return %c0_i32, %c0_i32_0 : i32, i32
  }
  func.func @transform_6(%arg0: i32) -> (i32, i32, i32) {
    %c0_i32 = arith.constant 0 : i32
    %c0_i32_0 = arith.constant 0 : i32
    %c0_i32_1 = arith.constant 0 : i32
    %c0_i32_2 = arith.constant 0 : i32
    return %c0_i32, %c0_i32_0, %c0_i32_1 : i32, i32, i32
  }
  func.func @transform_7(%arg0: i32) -> (i32, i32, i32) {
    %c0_i32 = arith.constant 0 : i32
    %c0_i32_0 = arith.constant 0 : i32
    %c0_i32_1 = arith.constant 0 : i32
    return %arg0, %c0_i32, %c0_i32_0 : i32, i32, i32
  }
}

</mosaic_0001>

<bundles_post_ra>
// kernel: hex_transformer_forward.1
= control target key start
LH: loop header
LB: loop body
LE: loop exit
PB: predicated region body
PF: predicated region fallthrough
CT: control target
= control target key end

     0   :  { %s5680_s24 = smov 0   ;;  %s7615_s0 = inlined_call_operand.vmem [shape: f32[80,6], index: 0, kind: input, shape index: {}]   ;;  %s7616_s1 = inlined_call_operand.vmem [shape: f32[40,16], index: 1, kind: input, shape index: {}]   ;;  %s7617_s2 = inlined_call_operand.vmem [shape: f32[8,16], index: 2, kind: input, shape index: {}]   ;;  %s7618_s3 = inlined_call_operand.vmem [shape: f32[4,16,96], index: 3, kind: input, shape index: {}]   ;;  %s7619_s4 = inlined_call_operand.vmem [shape: f32[5,1,128], index: 4, kind: input, shape index: {}]   ;;  %s7620_s5 = inlined_call_operand.vmem [shape: f32[16,16], index: 5, kind: input, shape index: {}]   ;;  %s7621_s6 = inlined_call_operand.vmem [shape: f32[11,40,128], index: 6, kind: input, shape index: {}]   ;;  %s7622_s7 = inlined_call_operand.vmem [shape: f32[2,1,128], index: 7, kind: output, shape index: {}]  }
   0x1 LB: > { %s5686_s25 = sadd.s32 4294967295, %s5615_s24   ;;  %p4979_p0 = scmp.ge.s32.totalorder %s5615_s24, 1  ;;  %s5615_s24 = sphi %s5680_s24, %s17_s24  }
   0x2   : > { %p238_p1 = scmp.lt.s32.totalorder %s5615_s24, 3 }
   0x4   : > { %p239_p2 = pnand %p4979_p0, %p238_p1 }
   0x5   : > { %s268_s28 = smul.u32 (!%p239_p2), 5, %s5686_s25  ;;  %s5618_s10 = smov (!%p239_p2), 112  }
   0x6   : > { %242 = sbr.rel (%p239_p2) target bundleno = 9810 (0x2652), region = 48  ;;  %s5619_s11 = smov (!%p239_p2), 104  }
   0x7   : > { %p269_p3 = scmp.lt.s32.totalorder (!%p239_p2), %s268_s28, 9  ;;  %s5620_s12 = smov (!%p239_p2), 120  }
   0x8   : > { %s5622_s13 = smov (!%p239_p2), 96   ;;  %s5623_s14 = smov (!%p239_p2), 88  }
   0x9   : > { %s5624_s15 = smov (!%p239_p2), 80   ;;  %s5625_s16 = smov (!%p239_p2), 48  }
   0xa   : > { %s5626_s17 = smov (!%p239_p2), 64   ;;  %s5627_s18 = smov (!%p239_p2), 32  }
   0xb   : > { %v286_v0 = vld [vmem:[%s7617_s2] sm:$0x3f]  ;;  %vm298_vm0 = vcmask 1042432   ;;  %s7624_s28 = smov (!%p269_p3, %s268_s28), 9  ;;  %vm288_vm1 = vcmask 48128   ;;  %v327_v11 = vld [vmem:[%s7616_s1 + $0x10] sm:$0xff] }
   0xc   : > { %v287_v1 = vpack.c.bf16 %v286_v0, %v286_v0  ;;  %s4980_s29 = sshll.u32 %s7624_s28, 3  ;;  %vm337_vm2 = vcmask 130048   ;;  %v326_v16 = vld [vmem:[%s7616_s1 + $0x8] sm:$0xff]  ;;  %v328_v17 = vld [vmem:[%s7616_s1 + $0x18] sm:$0xff]  ;;  %v329_v24 = vld [vmem:[%s7616_s1 + $0x20] sm:$0xff]  ;;  %v5617_v32 = vmov 16.0  }
   0xd   : > { %s5697_s9 = scalar_lea.vmem %s7615_s0, %s4980_s29  ;;  %v325_v27 = vld [vmem:[%s7616_s1] sm:$0xff]  ;;  %5266 = vrcp.f32 %v5617_v32  ;;  %s5628_s19 = smov 16  }
   0xe   : > { %v300_v2 = vsel %vm298_vm0, %v287_v1, 0  ;;  %v278_v3 = vld [vmem:[%s5697_s9] sm:$0xff]  ;;  %v279_v4 = vld [vmem:[%s5697_s9 + $0x8] sm:$0xff]  ;;  %v280_v5 = vld [vmem:[%s5697_s9 + $0x10] sm:$0xff]  ;;  %p274_p4 = scmp.lt.s32.totalorder %s5686_s25, 1 }
   0xf   : > { %309 = vmatpush.bf16.msra.mxu2 %v300_v2  ;;  %5177 = vmatpush.bf16.msra.mxu3 %v300_v2  ;;  %v283_v6 = vpack.c.bf16 %v279_v4, %v278_v3  ;;  %v281_v7 = vld [vmem:[%s5697_s9 + $0x18] sm:$0xff]  ;;  %v282_v9 = vld [vmem:[%s5697_s9 + $0x20] sm:$0xff]  ;;  %v5765_v3 = vld [vmem:[%s7618_s3 + $0x8] sm:$0xff] }
  0x10   : > { %v284_v8 = vpack.c.bf16 %v281_v7, %v280_v5  ;;  %v285_v10 = vpack.c.bf16 %v282_v9, %v282_v9  ;;  %v5760_v2 = vld [vmem:[%s7618_s3] sm:$0xff]  ;;  %s7626_s25 = smov (!%p274_p4, %s5686_s25), 1 }
  0x11   : > { %v5769_v5 = vpack.c.bf16 %v5765_v3, %v5760_v2  ;;  %v5260_v32 = vld [vmem:[%s7617_s2 + $0x6] ss:$0 sm:$0xff]  ;;  %s276_s21 = scalar_lea.vmem %s7622_s7, %s7626_s25 }
  0x12   : > { %4981 = vmatmul.msk.bf16.vlgmr.msra.gmra.mxu2 %vm288_vm1, %v283_v6  ;;  %4982 = vmatmul.msk.bf16.vlgmr.msra.gmra.mxu3 %vm288_vm1, %v284_v8 }
  0x13   : > { %v5267_v33 = vpop.eup %5266  ;;  %5178 = vmatpush.bf16.msra.mxu1 %v5769_v5  ;;  %497 = vmatpush.bf16.msra.mxu0 %v5769_v5 }
  0x14   : > { %v354_v34 = vmul.f32 16.0, %v5267_v33  ;;  %vm358_vm3 = vweird.f32 %v5267_v33 }
  0x16   : > { %v355_v35 = vsub.f32 1.0, %v354_v34 }
  0x18   : > { %v356_v36 = vmul.f32 %v5267_v33, %v355_v35 }
  0x1a   : > { %v357_v37 = vadd.f32 %v5267_v33, %v356_v36 }
  0x1c   : > { %v5724_v38 = vsel %vm358_vm3, %v5267_v33, %v357_v37 }
  0x22   : > { %4983 = vmatmul.msk.bf16.gmra.mxu3 %vm288_vm1, %v285_v10 }
  0x95   : > { %v311_v12 = vpop.f32.mrf.mxu2  ;;  %v316_v13 = vpop.f32.mrf.mxu3 }
  0x96   : > { %v332_v14 = vadd.f32 %v327_v11, %v316_v13  ;;  %v330_v29 = vadd.f32 %v325_v27, %v311_v12 }
  0x98   : > { %v344_v15 = vsel %vm337_vm2, %v332_v14, 0.0  ;;  %v338_v31 = vsel %vm337_vm2, %v330_v29, 0.0 }
  0x99   : > { %345 = vadd.xlane.f32.xlu0 %v344_v15 }
  0x9d   : > { %v313_v18 = vpop.f32.mrf.mxu2  ;;  %v318_v19 = vpop.f32.mrf.mxu3 }
  0x9e   : > { %v331_v20 = vadd.f32 %v326_v16, %v313_v18  ;;  %v333_v21 = vadd.f32 %v328_v17, %v318_v19 }
  0xa0   : > { %v341_v22 = vsel %vm337_vm2, %v331_v20, 0.0  ;;  %v347_v23 = vsel %vm337_vm2, %v333_v21, 0.0 }
  0xa1   : > { %342 = vadd.xlane.f32.xlu2 %v341_v22  ;;  %348 = vadd.xlane.f32.xlu0 %v347_v23 }
  0xa5   : > { %v321_v25 = vpop.f32.mrf.mxu3 }
  0xa6   : > { %v334_v26 = vadd.f32 %v329_v24, %v321_v25 }
  0xa8   : > { %v350_v28 = vsel %vm337_vm2, %v334_v26, 0.0 }
  0xa9   : > { %351 = vadd.xlane.f32.xlu1 %v350_v28 }
  0xad   : > { %v323_v30 = vpop.f32.mrf.mxu3 }
  0xb1   : > { %339 = vadd.xlane.f32.xlu1 %v338_v31 }
 0x10c   : > { %v346_v39 = vpop.xlane.xlu0 %345 }
 0x10d   : > { %v362_v40 = vmul.f32 %v5724_v38, %v346_v39 }
 0x10f   : > { %v5727_v41 = vsub.f32 %v332_v14, %v362_v40 }
 0x111   : > { %v372_v42 = vmul.f32 %v5727_v41, %v5727_v41 }
 0x113   : > { %v381_v43 = vsel %vm337_vm2, %v372_v42, 0.0 }
 0x114   : > { %v349_v44 = vpop.xlane.xlu0 %348  ;;  %382 = vadd.xlane.f32.xlu2 %v381_v43  ;;  %v343_v45 = vpop.xlane.xlu2 %342 }
 0x115   : > { %v363_v46 = vmul.f32 %v5724_v38, %v349_v44  ;;  %v361_v48 = vmul.f32 %v5724_v38, %v343_v45 }
 0x117   : > { %v5733_v47 = vsub.f32 %v333_v21, %v363_v46  ;;  %v5738_v50 = vsub.f32 %v331_v20, %v361_v48 }
 0x119   : > { %v373_v49 = vmul.f32 %v5733_v47, %v5733_v47  ;;  %v371_v55 = vmul.f32 %v5738_v50, %v5738_v50 }
 0x11b   : > { %v384_v51 = vsel %vm337_vm2, %v373_v49, 0.0  ;;  %v378_v58 = vsel %vm337_vm2, %v371_v55, 0.0 }
 0x11c   : > { %385 = vadd.xlane.f32.xlu0 %v384_v51  ;;  %v352_v52 = vpop.xlane.xlu1 %351 }
 0x11d   : > { %v364_v53 = vmul.f32 %v5724_v38, %v352_v52 }
 0x11f   : > { %v5742_v54 = vsub.f32 %v334_v26, %v364_v53 }
 0x121   : > { %v374_v56 = vmul.f32 %v5742_v54, %v5742_v54 }
 0x123   : > { %v387_v57 = vsel %vm337_vm2, %v374_v56, 0.0 }
 0x124   : > { %388 = vadd.xlane.f32.xlu1 %v387_v57  ;;  %v340_v59 = vpop.xlane.xlu1 %339  ;;  %379 = vadd.xlane.f32.xlu0 %v378_v58 }
 0x125   : > { %v360_v60 = vmul.f32 %v5724_v38, %v340_v59 }
 0x127   : > { %v5751_v61 = vsub.f32 %v330_v29, %v360_v60 }
 0x129   : > { %v370_v62 = vmul.f32 %v5751_v61, %v5751_v61 }
 0x12b   : > { %v375_v63 = vsel %vm337_vm2, %v370_v62, 0.0 }
 0x12c   : > { %376 = vadd.xlane.f32.xlu2 %v375_v63 }
 0x187   : > { %v383_v0 = vpop.xlane.xlu2 %382 }
 0x188   : > { %v392_v1 = vmul.f32 %v383_v0, %v5724_v38 }
 0x18a   : > { %v397_v4 = vadd.f32 1e-05, %v392_v1 }
 0x18c   : > { %5268 = vrsqrt.f32 %v397_v4  ;;  %vm426_vm5 = vweird.f32 %v397_v4 }
 0x18f   : > { %v386_v6 = vpop.xlane.xlu0 %385 }
 0x190   : > { %v393_v7 = vmul.f32 %v386_v6, %v5724_v38 }
 0x192   : > { %v5269_v8 = vpop.eup %5268  ;;  %v398_v9 = vadd.f32 1e-05, %v393_v7 }
 0x193   : > { %v421_v10 = vmul.f32 %v5269_v8, %v397_v4  ;;  %vm427_vm4 = vweird.f32 %v5269_v8 }
 0x194   : > { %5270 = vrsqrt.f32 %v398_v9  ;;  %vm428_vm6 = vmor %vm426_vm5, %vm427_vm4  ;;  %vm436_vm8 = vweird.f32 %v398_v9  ;;  %vm537_vm4 = vcmask 64512  }
 0x195   : > { %v422_v11 = vmul.f32 %v5269_v8, %v421_v10 }
 0x197   : > { %v423_v12 = vmul.f32 0.5, %v422_v11  ;;  %v389_v13 = vpop.xlane.xlu1 %388  ;;  %v380_v14 = vpop.xlane.xlu0 %379 }
 0x198   : > { %v394_v15 = vmul.f32 %v389_v13, %v5724_v38  ;;  %v391_v16 = vmul.f32 %v380_v14, %v5724_v38 }
 0x199   : > { %v424_v17 = vsub.f32 1.5, %v423_v12 }
 0x19a   : > { %v5271_v18 = vpop.eup %5270  ;;  %v399_v19 = vadd.f32 1e-05, %v394_v15  ;;  %v396_v20 = vadd.f32 1e-05, %v391_v16 }
 0x19b   : > { %v425_v21 = vmul.f32 %v5269_v8, %v424_v17  ;;  %v431_v22 = vmul.f32 %v5271_v18, %v398_v9  ;;  %vm437_vm7 = vweird.f32 %v5271_v18 }
 0x19c   : > { %5272 = vrsqrt.f32 %v399_v19  ;;  %vm438_vm9 = vmor %vm436_vm8, %vm437_vm7  ;;  %vm446_vm11 = vweird.f32 %v399_v19  ;;  %vm416_vm14 = vweird.f32 %v396_v20  ;;  %vm670_vm7 = vcmask 1043456  }
 0x19d   : > { %v432_v23 = vmul.f32 %v5271_v18, %v431_v22  ;;  %5274 = vrsqrt.f32 %v396_v20  ;;  %v429_v24 = vsel %vm428_vm6, %v5269_v8, %v425_v21  ;;  %vm579_vm6 = vcmask 326656  }
 0x19e   : > { %v452_v31 = vmul.f32 %v429_v24, %v5727_v41  ;;  %v5261_v41 = vld [vmem:[%s7617_s2 + $0x7] ss:$0 sm:$0xff] }
 0x19f   : > { %v433_v25 = vmul.f32 0.5, %v432_v23  ;;  %v377_v26 = vpop.xlane.xlu2 %376 }
 0x1a0   : > { %v390_v27 = vmul.f32 %v377_v26, %v5724_v38  ;;  %v458_v43 = vmul.f32 %v5260_v32, %v452_v31 }
 0x1a1   : > { %v434_v28 = vsub.f32 1.5, %v433_v25 }
 0x1a2   : > { %v5273_v29 = vpop.eup %5272  ;;  %v395_v30 = vadd.f32 1e-05, %v390_v27  ;;  %v5785_v52 = vadd.f32 %v5261_v41, %v458_v43 }
 0x1a3   : > { %v5275_v33 = vpop.eup %5274  ;;  %v435_v34 = vmul.f32 %v5271_v18, %v434_v28  ;;  %v441_v35 = vmul.f32 %v5273_v29, %v399_v19  ;;  %vm447_vm10 = vweird.f32 %v5273_v29 }
 0x1a4   : > { %v411_v36 = vmul.f32 %v5275_v33, %v396_v20  ;;  %5276 = vrsqrt.f32 %v395_v30  ;;  %vm417_vm12 = vweird.f32 %v5275_v33  ;;  %vm448_vm13 = vmor %vm446_vm11, %vm447_vm10  ;;  %vm406_vm1 = vweird.f32 %v395_v30 }
 0x1a5   : > { %v439_v37 = vsel %vm438_vm9, %v5271_v18, %v435_v34  ;;  %v442_v39 = vmul.f32 %v5273_v29, %v441_v35  ;;  %vm418_vm15 = vmor %vm416_vm14, %vm417_vm12 }
 0x1a6   : > { %v412_v40 = vmul.f32 %v5275_v33, %v411_v36  ;;  %v453_v42 = vmul.f32 %v439_v37, %v5733_v47 }
 0x1a7   : > { %v443_v44 = vmul.f32 0.5, %v442_v39 }
 0x1a8   : > { %v413_v45 = vmul.f32 0.5, %v412_v40  ;;  %v459_v46 = vmul.f32 %v5260_v32, %v453_v42 }
 0x1a9   : > { %v444_v48 = vsub.f32 1.5, %v443_v44 }
 0x1aa   : > { %v5277_v49 = vpop.eup %5276  ;;  %v414_v51 = vsub.f32 1.5, %v413_v45  ;;  %v5787_v53 = vadd.f32 %v5261_v41, %v459_v46 }
 0x1ab   : > { %v445_v55 = vmul.f32 %v5273_v29, %v444_v48  ;;  %v401_v47 = vmul.f32 %v5277_v49, %v395_v30  ;;  %vm407_vm0 = vweird.f32 %v5277_v49 }
 0x1ac   : > { %v415_v56 = vmul.f32 %v5275_v33, %v414_v51  ;;  %v475_v57 = vpack.c.bf16 %v5787_v53, %v5785_v52  ;;  %vm408_vm3 = vmor %vm406_vm1, %vm407_vm0 }
 0x1ad   : > { %v449_v58 = vsel %vm448_vm13, %v5273_v29, %v445_v55  ;;  %v402_v59 = vmul.f32 %v5277_v49, %v401_v47 }
 0x1ae   : > { %4985 = vmatmul.msk.bf16.vlgmr.msra.gmra.mxu1 %vm337_vm2, %v475_v57  ;;  %v419_v60 = vsel %vm418_vm15, %v5275_v33, %v415_v56  ;;  %v454_v63 = vmul.f32 %v449_v58, %v5742_v54  ;;  %v467_v58 = vlaneseq }
 0x1af   : > { %v403_v62 = vmul.f32 0.5, %v402_v59  ;;  %v451_v1 = vmul.f32 %v419_v60, %v5738_v50  ;;  %v5621_v60 = vmov -1e+30  }
 0x1b0   : > { %v460_v6 = vmul.f32 %v5260_v32, %v454_v63  ;;  %v5856_v59 = vand.u32 127, %v467_v58 }
 0x1b1   : > { %v404_v0 = vsub.f32 1.5, %v403_v62  ;;  %v457_v9 = vmul.f32 %v5260_v32, %v451_v1 }
 0x1b2   : > { %v5795_v11 = vadd.f32 %v5261_v41, %v460_v6  ;;  %vm469_vm5 = vcmp.lt.s32.totalorder %v5856_v59, 36 }
 0x1b3   : > { %v405_v4 = vmul.f32 %v5277_v49, %v404_v0  ;;  %v5799_v13 = vadd.f32 %v5261_v41, %v457_v9  ;;  %v5859_v62 = vsel %vm469_vm5, 0.0, %v5621_v60 }
 0x1b4   : > { %v476_v50 = vpack.c.bf16 %v5795_v11, %v5795_v11 }
 0x1b5   : > { %v409_v7 = vsel %vm408_vm3, %v5277_v49, %v405_v4 }
 0x1b6   : > { %v450_v8 = vmul.f32 %v409_v7, %v5751_v61  ;;  %v5810_v61 = vld [vmem:[%s7619_s4] ss:$0 sm:$0xff] }
 0x1b8   : > { %v456_v10 = vmul.f32 %v5260_v32, %v450_v8 }
 0x1ba   : > { %v5797_v12 = vadd.f32 %v5261_v41, %v456_v10 }
 0x1bc   : > { %v474_v54 = vpack.c.bf16 %v5799_v13, %v5797_v12 }
 0x1be   : > { %4984 = vmatmul.msk.bf16.vlgmr.msra.gmra.mxu0 %vm337_vm2, %v474_v54  ;;  %4986 = vmatmul.msk.bf16.gmra.mxu1 %vm337_vm2, %v476_v50 }
 0x22b   : > { %v504_v14 = vpop.f32.mrf.mxu1 }
 0x22c   : > { %v505_v15 = vadd.f32 %v5810_v61, %v504_v14 }
 0x22e   : > { %v515_v17 = vpack.c.bf16 %v505_v15, %v505_v15 }
 0x230   : > { %v525_v20 = vunpack.c.l.b16 %v515_v17 }
 0x233   : > { %v506_v16 = vpop.f32.mrf.mxu1 }
 0x234   : > { %v507_v18 = vadd.f32 %v5810_v61, %v506_v16 }
 0x236   : > { %v516_v19 = vpack.c.bf16 %v507_v18, %v507_v18 }
 0x238   : > { %v526_v21 = vunpack.c.l.b16 %v516_v19 }
 0x23a   : > { %v5814_v22 = vpack.c.b16 %v526_v21, %v525_v20 }
 0x23b   : > { %v499_v23 = vpop.f32.mrf.mxu0  ;;  %v509_v24 = vpop.f32.mrf.mxu1 }
 0x23c   : > { %v510_v25 = vadd.f32 %v5810_v61, %v509_v24  ;;  %533 = vrot.lane.b32.xlu2 %v5814_v22, %s5618_s10  ;;  %v500_v27 = vadd.f32 %v5810_v61, %v499_v23 }
 0x23e   : > { %v517_v26 = vpack.c.bf16 %v510_v25, %v510_v25  ;;  %v513_v32 = vpack.c.bf16 %v500_v27, %v500_v27 }
 0x240   : > { %v527_v28 = vunpack.c.l.b16 %v517_v26  ;;  %v523_v35 = vunpack.c.l.b16 %v513_v32 }
 0x242   : > { %v5820_v29 = vpack.c.b16 %v527_v28, %v527_v28 }
 0x243   : > { %v501_v30 = vpop.f32.mrf.mxu0  ;;  %v511_v31 = vpop.f32.mrf.mxu1 }
 0x244   : > { %v502_v33 = vadd.f32 %v5810_v61, %v501_v30  ;;  %535 = vrot.lane.b32.xlu1 %v5820_v29, %s5618_s10  ;;  %774 = vrot.lane.b32.xlu2 %v5820_v29, %s5619_s11 }
 0x246   : > { %v514_v34 = vpack.c.bf16 %v502_v33, %v502_v33 }
 0x248   : > { %v524_v36 = vunpack.c.l.b16 %v514_v34 }
 0x24a   : > { %v5827_v37 = vpack.c.b16 %v524_v36, %v523_v35 }
 0x24c   : > { %772 = vrot.lane.b32.xlu1 %v5814_v22, %s5619_s11  ;;  %764 = vrot.lane.b32.xlu2 %v5827_v37, %s5620_s12 }
 0x24d   : > { %531 = vrot.lane.b32.xlu0 %v5827_v37, %s5618_s10 }
 0x254   : > { %766 = vrot.lane.b32.xlu1 %v5814_v22, %s5620_s12 }
 0x255   : > { %770 = vrot.lane.b32.xlu0 %v5827_v37, %s5619_s11 }
 0x25d   : > { %768 = vrot.lane.b32.xlu0 %v5820_v29, %s5620_s12 }
 0x296   : > { %v534_v39 = vpop.permute.xlu2 %533 }
 0x297   : > { %v551_v46 = vsel %vm537_vm4, %v534_v39, 0 }
 0x29e   : > { %v775_v40 = vpop.permute.xlu2 %774 }
 0x29f   : > { %v792_v42 = vsel %vm537_vm4, %v775_v40, 0 }
 0x2a0   : > { %799 = vmatpush.bf16.xpose.msrb.mxu1 %v792_v42 }
 0x2a6   : > { %v765_v47 = vpop.permute.xlu2 %764 }
 0x2b6   : > { %v536_v43 = vpop.permute.xlu1 %535 }
 0x2b7   : > { %v554_v41 = vsel %vm537_vm4, %v536_v43, 0 }
 0x2b8   : > { %561 = vmatpush.bf16.xpose.msrb.mxu2 %v554_v41 }
 0x2be   : > { %v773_v44 = vpop.permute.xlu1 %772 }
 0x2bf   : > { %v532_v45 = vpop.permute.xlu0 %531  ;;  %v789_v48 = vsel %vm537_vm4, %v773_v44, 0 }
 0x2c0   : > { %562 = vmatpush.bf16.xpose.msrb.mxu2 %v551_v46  ;;  %800 = vmatpush.bf16.xpose.msrb.mxu1 %v789_v48  ;;  %v548_v51 = vsel %vm537_vm4, %v532_v45, 0 }
 0x2c6   : > { %v767_v56 = vpop.permute.xlu1 %766 }
 0x2c7   : > { %v771_v49 = vpop.permute.xlu0 %770 }
 0x2c8   : > { %563 = vmatpush.bf16.xpose.msrb.mxu2 %v548_v51  ;;  %v786_v55 = vsel %vm537_vm4, %v771_v49, 0 }
 0x2c9   : > { %801 = vmatpush.bf16.xpose.msrb.mxu1 %v786_v55 }
 0x2cf   : > { %4987 = vmatmul.msk.bf16.vlgmr.msrb.gmra.mxu2 %vm537_vm4, %v5827_v37  ;;  %v769_v57 = vpop.permute.xlu0 %768 }
 0x2d0   : > { %4996 = vmatmul.msk.bf16.vlgmr.msrb.gmra.mxu1 %vm537_vm4, %v765_v47 }
 0x2df   : > { %4988 = vmatmul.msk.bf16.gmra.mxu2 %vm537_vm4, %v5814_v22 }
 0x2e0   : > { %4997 = vmatmul.msk.bf16.gmra.mxu1 %vm537_vm4, %v767_v56 }
 0x2ef   : > { %4989 = vmatmul.msk.bf16.gmra.mxu2 %vm537_vm4, %v5820_v29 }
 0x2f0   : > { %4998 = vmatmul.msk.bf16.gmra.mxu1 %vm537_vm4, %v769_v57 }
 0x34d   : > { %v803_v63 = vpop.f32.mrf.mxu1 }
 0x34e   : > { %v804_v0 = vadd.f32 %v803_v63, %v5859_v62 }
 0x350   : > { %v817_v1 = vsel %vm579_vm6, %v804_v0, -inf }
 0x351   : > { %818 = vmax.xlane.f32.xlu0 %v817_v1 }
 0x352   : > { %v565_v4 = vpop.f32.mrf.mxu2 }
 0x353   : > { %v566_v6 = vadd.f32 %v565_v4, %v5859_v62 }
 0x355   : > { %v805_v7 = vpop.f32.mrf.mxu1  ;;  %v580_v8 = vsel %vm579_vm6, %v566_v6, -inf }
 0x356   : > { %581 = vmax.xlane.f32.xlu2 %v580_v8  ;;  %v806_v9 = vadd.f32 %v805_v7, %v5859_v62 }
 0x358   : > { %v820_v15 = vsel %vm579_vm6, %v806_v9, -inf }
 0x35a   : > { %v567_v10 = vpop.f32.mrf.mxu2 }
 0x35b   : > { %v568_v54 = vadd.f32 %v567_v10, %v5859_v62 }
 0x35d   : > { %v808_v50 = vpop.f32.mrf.mxu1  ;;  %v583_v14 = vsel %vm579_vm6, %v568_v54, -inf }
 0x35e   : > { %584 = vmax.xlane.f32.xlu1 %v583_v14  ;;  %821 = vmax.xlane.f32.xlu2 %v820_v15  ;;  %v5872_v20 = vadd.f32 %v808_v50, %v5859_v62 }
 0x360   : > { %v823_v26 = vsel %vm579_vm6, %v5872_v20, -inf }
 0x362   : > { %v570_v16 = vpop.f32.mrf.mxu2 }
 0x363   : > { %v571_v17 = vadd.f32 %v570_v16, %v5859_v62 }
 0x365   : > { %v810_v18 = vpop.f32.mrf.mxu1  ;;  %v586_v19 = vsel %vm579_vm6, %v571_v17, -inf }
 0x366   : > { %587 = vmax.xlane.f32.xlu0 %v586_v19  ;;  %v5881_v27 = vadd.f32 %v810_v18, %v5859_v62 }
 0x368   : > { %v826_v31 = vsel %vm579_vm6, %v5881_v27, -inf }
 0x36a   : > { %v572_v21 = vpop.f32.mrf.mxu2 }
 0x36b   : > { %v573_v23 = vadd.f32 %v572_v21, %v5859_v62 }
 0x36d   : > { %v5875_v24 = vpop.f32.mrf.mxu1  ;;  %v589_v25 = vsel %vm579_vm6, %v573_v23, -inf }
 0x36e   : > { %590 = vmax.xlane.f32.xlu2 %v589_v25  ;;  %824 = vmax.xlane.f32.xlu0 %v823_v26 }
 0x372   : > { %v575_v28 = vpop.f32.mrf.mxu2 }
 0x373   : > { %v576_v33 = vadd.f32 %v575_v28, %v5859_v62 }
 0x375   : > { %v815_v30 = vpop.f32.mrf.mxu1  ;;  %v592_v34 = vsel %vm579_vm6, %v576_v33, -inf }
 0x376   : > { %827 = vmax.xlane.f32.xlu0 %v826_v31 }
 0x377   : > { %655 = vrot.lane.b32.xlu1 %v5814_v22, %s5622_s13 }
 0x37a   : > { %v577_v32 = vpop.f32.mrf.mxu2 }
 0x386   : > { %657 = vrot.lane.b32.xlu2 %v5820_v29, %s5622_s13 }
 0x3a1   : > { %593 = vmax.xlane.f32.xlu1 %v592_v34 }
 0x3c4   : > { %v819_v35 = vpop.xlane.xlu0 %818 }
 0x3c5   : > { %v832_v36 = vsub.f32 %v804_v0, %v819_v35 }
 0x3c7   : > { %v837_v39 = vmul.f32 1.442695, %v832_v36 }
 0x3c9   : > { %5278 = vpow2.f32 %v837_v39  ;;  %v582_v40 = vpop.xlane.xlu2 %581 }
 0x3ca   : > { %v595_v42 = vsub.f32 %v566_v6, %v582_v40 }
 0x3cc   : > { %v600_v43 = vmul.f32 1.442695, %v595_v42 }
 0x3ce   : > { %5280 = vpow2.f32 %v600_v43 }
 0x3cf   : > { %v5891_v41 = vpop.eup %5278 }
 0x3d0   : > { %v847_v44 = vsel %vm579_vm6, %v5891_v41, 0.0 }
 0x3d1   : > { %848 = vadd.xlane.f32.xlu2 %v847_v44  ;;  %v585_v45 = vpop.xlane.xlu1 %584  ;;  %v822_v46 = vpop.xlane.xlu2 %821 }
 0x3d2   : > { %v596_v48 = vsub.f32 %v568_v54, %v585_v45  ;;  %v833_v49 = vsub.f32 %v806_v9, %v822_v46  ;;  %v700_v45 = vpack.c.bf16 %v5760_v2, %v5760_v2 }
 0x3d4   : > { %v5895_v51 = vpop.eup %5280  ;;  %v602_v55 = vmul.f32 1.442695, %v596_v48  ;;  %v839_v47 = vmul.f32 1.442695, %v833_v49 }
 0x3d5   : > { %v610_v56 = vsel %vm579_vm6, %v5895_v51, 0.0 }
 0x3d6   : > { %5282 = vpow2.f32 %v602_v55  ;;  %611 = vadd.xlane.f32.xlu1 %v610_v56 }
 0x3d7   : > { %5284 = vpow2.f32 %v839_v47 }
 0x3d9   : > { %v588_v57 = vpop.xlane.xlu0 %587 }
 0x3da   : > { %v597_v58 = vsub.f32 %v571_v17, %v588_v57 }
 0x3dc   : > { %v5283_v60 = vpop.eup %5282  ;;  %v604_v63 = vmul.f32 1.442695, %v597_v58 }
 0x3dd   : > { %v5899_v0 = vpop.eup %5284  ;;  %v613_v1 = vsel %vm579_vm6, %v5283_v60, 0.0 }
 0x3de   : > { %5286 = vpow2.f32 %v604_v63  ;;  %614 = vadd.xlane.f32.xlu0 %v613_v1  ;;  %v850_v4 = vsel %vm579_vm6, %v5899_v0, 0.0 }
 0x3df   : > { %851 = vadd.xlane.f32.xlu1 %v850_v4 }
 0x3e1   : > { %v591_v6 = vpop.xlane.xlu2 %590  ;;  %v825_v17 = vpop.xlane.xlu0 %824 }
 0x3e2   : > { %v598_v7 = vsub.f32 %v573_v23, %v591_v6  ;;  %v834_v19 = vsub.f32 %v5872_v20, %v825_v17  ;;  %v5922_v23 = vadd.f32 %v5875_v24, %v5859_v62 }
 0x3e4   : > { %v5904_v8 = vpop.eup %5286  ;;  %v606_v9 = vmul.f32 1.442695, %v598_v7  ;;  %v841_v26 = vmul.f32 1.442695, %v834_v19  ;;  %v829_v28 = vsel %vm579_vm6, %v5922_v23, -inf }
 0x3e5   : > { %v616_v10 = vsel %vm579_vm6, %v5904_v8, 0.0 }
 0x3e6   : > { %617 = vadd.xlane.f32.xlu2 %v616_v10  ;;  %5288 = vpow2.f32 %v606_v9 }
 0x3e9   : > { %v658_v54 = vpop.permute.xlu2 %657  ;;  %v656_v16 = vpop.permute.xlu1 %655 }
 0x3ea   : > { %v672_v50 = vsel %vm670_vm7, %v658_v54, 0 }
 0x3eb   : > { %679 = vmatpush.bf16.msrb.mxu3 %v672_v50 }
 0x3ec   : > { %v5909_v14 = vpop.eup %5288 }
 0x3ed   : > { %v619_v15 = vsel %vm579_vm6, %v5909_v14, 0.0 }
 0x3ee   : > { %620 = vadd.xlane.f32.xlu1 %v619_v15 }
 0x3ef   : > { %680 = vmatpush.bf16.msrb.mxu3 %v656_v16 }
 0x3f2   : > { %653 = vrot.lane.b32.xlu0 %v5827_v37, %s5622_s13 }
 0x3fe   : > { %894 = vrot.lane.b32.xlu2 %v5820_v29, %s5623_s14  ;;  %v828_v29 = vpop.xlane.xlu0 %827 }
 0x407   : > { %892 = vrot.lane.b32.xlu1 %v5814_v22, %s5623_s14  ;;  %v835_v22 = vsub.f32 %v5881_v27, %v828_v29 }
 0x409   : > { %v843_v24 = vmul.f32 1.442695, %v835_v22 }
 0x414   : > { %v594_v18 = vpop.xlane.xlu1 %593 }
 0x415   : > { %v599_v21 = vsub.f32 %v576_v33, %v594_v18 }
 0x417   : > { %v608_v25 = vmul.f32 1.442695, %v599_v21 }
 0x419   : > { %5290 = vpow2.f32 %v608_v25 }
 0x41a   : > { %5292 = vpow2.f32 %v841_v26 }
 0x41b   : > { %5294 = vpow2.f32 %v843_v24 }
 0x41c   : > { %830 = vmax.xlane.f32.xlu0 %v829_v28 }
 0x41f   : > { %v5926_v30 = vpop.eup %5290 }
 0x420   : > { %v5929_v31 = vpop.eup %5292  ;;  %v622_v20 = vsel %vm579_vm6, %v5926_v30, 0.0 }
 0x421   : > { %v853_v32 = vsel %vm579_vm6, %v5929_v31, 0.0  ;;  %v5935_v33 = vpop.eup %5294 }
 0x422   : > { %v856_v34 = vsel %vm579_vm6, %v5935_v33, 0.0 }
 0x424   : > { %623 = vadd.xlane.f32.xlu0 %v622_v20 }
 0x427   : > { %854 = vadd.xlane.f32.xlu2 %v853_v32 }
 0x431   : > { %857 = vadd.xlane.f32.xlu1 %v856_v34 }
 0x438   : > { %890 = vrot.lane.b32.xlu0 %v5827_v37, %s5623_s14 }
 0x444   : > { %v849_v35 = vpop.xlane.xlu2 %848 }
 0x449   : > { %v612_v27 = vpop.xlane.xlu1 %611 }
 0x44a   : > { %702 = vrot.lane.b32.xlu1 %v700_v45, %s5624_s15 }
 0x451   : > { %v615_v36 = vpop.xlane.xlu0 %614 }
 0x452   : > { %5296 = vrcp.f32 %v615_v36  ;;  %v852_v44 = vpop.xlane.xlu1 %851 }
 0x453   : > { %5298 = vrcp.f32 %v612_v27 }
 0x458   : > { %v5297_v39 = vpop.eup %5296 }
 0x459   : > { %v5299_v40 = vpop.eup %5298  ;;  %v618_v42 = vpop.xlane.xlu2 %617  ;;  %v631_v43 = vmul.f32 %v5297_v39, %v5283_v60 }
 0x45a   : > { %v630_v46 = vmul.f32 %v5299_v40, %v5895_v51  ;;  %5300 = vrcp.f32 %v618_v42 }
 0x45b   : > { %v636_v48 = vpack.c.bf16 %v631_v43, %v631_v43 }
 0x45c   : > { %v635_v37 = vpack.c.bf16 %v630_v46, %v630_v46 }
 0x45d   : > { %v646_v47 = vunpack.c.l.b16 %v636_v48 }
 0x45e   : > { %v645_v57 = vunpack.c.l.b16 %v635_v37 }
 0x460   : > { %v650_v60 = vpack.c.b16 %v646_v47, %v645_v57  ;;  %v5301_v2 = vpop.eup %5300 }
 0x461   : > { %v621_v49 = vpop.xlane.xlu1 %620  ;;  %v895_v55 = vpop.permute.xlu2 %894  ;;  %v632_v1 = vmul.f32 %v5301_v2, %v5904_v8 }
 0x462   : > { %5302 = vrcp.f32 %v621_v49  ;;  %v908_v58 = vsel %vm670_vm7, %v895_v55, 0 }
 0x463   : > { %v637_v6 = vpack.c.bf16 %v632_v1, %v632_v1 }
 0x464   : > { %v654_v56 = vpop.permute.xlu0 %653 }
 0x465   : > { %681 = vmatpush.bf16.msrb.mxu3 %v654_v56  ;;  %v647_v9 = vunpack.c.l.b16 %v637_v6 }
 0x468   : > { %4990 = vmatmul.msk.bf16.vlgmr.msrb.gmra.mxu3 %vm579_vm6, %v650_v60  ;;  %v5303_v51 = vpop.eup %5302 }
 0x469   : > { %915 = vmatpush.bf16.msra.mxu3 %v908_v58  ;;  %v633_v63 = vmul.f32 %v5303_v51, %v5909_v14 }
 0x46b   : > { %v638_v4 = vpack.c.bf16 %v633_v63, %v633_v63 }
 0x46d   : > { %v648_v7 = vunpack.c.l.b16 %v638_v4 }
 0x46f   : > { %v651_v10 = vpack.c.b16 %v648_v7, %v647_v9 }
 0x478   : > { %4991 = vmatmul.msk.bf16.gmra.mxu3 %vm579_vm6, %v651_v10 }
 0x479   : > { %v893_v54 = vpop.permute.xlu1 %892 }
 0x47a   : > { %916 = vmatpush.bf16.msra.mxu3 %v893_v54 }
 0x48f   : > { %v831_v50 = vpop.xlane.xlu0 %830 }
 0x490   : > { %v836_v15 = vsub.f32 %v5922_v23, %v831_v50  ;;  %v936_v23 = vpack.c.bf16 %v5765_v3, %v5765_v3 }
 0x492   : > { %v845_v16 = vmul.f32 1.442695, %v836_v15  ;;  %938 = vrot.lane.b32.xlu2 %v936_v23, %s5624_s15 }
 0x494   : > { %5304 = vpow2.f32 %v845_v16 }
 0x497   : > { %v624_v17 = vpop.xlane.xlu0 %623 }
 0x498   : > { %5306 = vrcp.f32 %v624_v17 }
 0x499   : > { %5308 = vrcp.f32 %v852_v44 }
 0x49a   : > { %v5305_v18 = vpop.eup %5304  ;;  %5310 = vrcp.f32 %v849_v35  ;;  %v855_v27 = vpop.xlane.xlu2 %854 }
 0x49b   : > { %v859_v14 = vsel %vm579_vm6, %v5305_v18, 0.0 }
 0x49c   : > { %860 = vadd.xlane.f32.xlu0 %v859_v14 }
 0x49e   : > { %v5307_v8 = vpop.eup %5306 }
 0x49f   : > { %v634_v19 = vmul.f32 %v5307_v8, %v5926_v30  ;;  %v5309_v28 = vpop.eup %5308 }
 0x4a0   : > { %v5311_v29 = vpop.eup %5310  ;;  %v868_v22 = vmul.f32 %v5309_v28, %v5899_v0 }
 0x4a1   : > { %v639_v21 = vpack.c.bf16 %v634_v19, %v634_v19  ;;  %v867_v24 = vmul.f32 %v5311_v29, %v5891_v41 }
 0x4a2   : > { %v873_v30 = vpack.c.bf16 %v868_v22, %v868_v22 }
 0x4a3   : > { %v649_v25 = vunpack.c.l.b16 %v639_v21  ;;  %v872_v34 = vpack.c.bf16 %v867_v24, %v867_v24 }
 0x4a4   : > { %v858_v32 = vpop.xlane.xlu1 %857  ;;  %v883_v35 = vunpack.c.l.b16 %v873_v30 }
 0x4a5   : > { %v652_v26 = vpack.c.b16 %v649_v25, %v649_v25  ;;  %5312 = vrcp.f32 %v858_v32  ;;  %v882_v36 = vunpack.c.l.b16 %v872_v34 }
 0x4a6   : > { %5314 = vrcp.f32 %v855_v27 }
 0x4a7   : > { %4992 = vmatmul.msk.bf16.gmra.mxu3 %vm579_vm6, %v652_v26  ;;  %v887_v39 = vpack.c.b16 %v883_v35, %v882_v36 }
 0x4aa   : > { %v891_v20 = vpop.permute.xlu0 %890 }
 0x4ab   : > { %917 = vmatpush.bf16.msra.mxu3 %v891_v20  ;;  %v5313_v40 = vpop.eup %5312 }
 0x4ac   : > { %v5315_v3 = vpop.eup %5314  ;;  %v870_v0 = vmul.f32 %v5313_v40, %v5935_v33 }
 0x4ad   : > { %v869_v42 = vmul.f32 %v5315_v3, %v5929_v31 }
 0x4ae   : > { %v875_v43 = vpack.c.bf16 %v870_v0, %v870_v0 }
 0x4af   : > { %v874_v41 = vpack.c.bf16 %v869_v42, %v869_v42 }
 0x4b0   : > { %v885_v44 = vunpack.c.l.b16 %v875_v43 }
 0x4b1   : > { %v884_v45 = vunpack.c.l.b16 %v874_v41 }
 0x4b3   : > { %v888_v46 = vpack.c.b16 %v885_v44, %v884_v45 }
 0x4b7   : > { %4999 = vmatmul.msk.bf16.vlgmr.msra.gmra.mxu3 %vm579_vm6, %v887_v39 }
 0x4bc   : > { %v703_v48 = vpop.permute.xlu1 %702 }
 0x4bd   : > { %v714_v37 = vsel %vm670_vm7, %v703_v48, 0 }
 0x4be   : > { %723 = vmatpush.bf16.msrb.mxu0 %v714_v37 }
 0x4c7   : > { %5000 = vmatmul.msk.bf16.gmra.mxu3 %vm579_vm6, %v888_v46 }
 0x4eb   : > { %v683_v49 = vpop.f32.mrf.mxu3 }
 0x4ec   : > { %v939_v31 = vpop.permute.xlu2 %938 }
 0x4ed   : > { %v950_v58 = vsel %vm670_vm7, %v939_v31, 0 }
 0x4ee   : > { %959 = vmatpush.bf16.msra.mxu2 %v950_v58 }
 0x4f3   : > { %v685_v55 = vpop.f32.mrf.mxu3 }
 0x4f4   : > { %v697_v47 = vpack.c.bf16 %v685_v55, %v683_v49 }
 0x4f6   : > { %4993 = vmatmul.msk.bf16.vlgmr.msrb.gmra.mxu0 %vm537_vm4, %v697_v47 }
 0x4fb   : > { %v688_v56 = vpop.f32.mrf.mxu3 }
 0x503   : > { %v690_v33 = vpop.f32.mrf.mxu3 }
 0x504   : > { %v698_v57 = vpack.c.bf16 %v690_v33, %v688_v56 }
 0x506   : > { %4994 = vmatmul.msk.bf16.gmra.mxu0 %vm537_vm4, %v698_v57 }
 0x50f   : > { %v861_v60 = vpop.xlane.xlu0 %860 }
 0x510   : > { %5316 = vrcp.f32 %v861_v60 }
 0x516   : > { %v5317_v2 = vpop.eup %5316 }
 0x517   : > { %v871_v51 = vmul.f32 %v5317_v2, %v5305_v18 }
 0x519   : > { %v876_v63 = vpack.c.bf16 %v871_v51, %v871_v51 }
 0x51b   : > { %v886_v1 = vunpack.c.l.b16 %v876_v63 }
 0x51d   : > { %v889_v4 = vpack.c.b16 %v886_v1, %v886_v1 }
 0x51f   : > { %5001 = vmatmul.msk.bf16.gmra.mxu3 %vm579_vm6, %v889_v4 }
 0x52a   : > { %v693_v6 = vpop.f32.mrf.mxu3 }
 0x52b   : > { %v699_v7 = vpack.c.bf16 %v693_v6, %v693_v6 }
 0x52d   : > { %4995 = vmatmul.msk.bf16.gmra.mxu0 %vm537_vm4, %v699_v7 }
 0x532   : > { %v695_v9 = vpop.f32.mrf.mxu3 }
 0x53a   : > { %v919_v10 = vpop.f32.mrf.mxu3 }
 0x542   : > { %v921_v54 = vpop.f32.mrf.mxu3 }
 0x543   : > { %v933_v50 = vpack.c.bf16 %v921_v54, %v919_v10 }
 0x545   : > { %5002 = vmatmul.msk.bf16.vlgmr.msra.gmra.mxu2 %vm537_vm4, %v933_v50 }
 0x54a   : > { %v924_v15 = vpop.f32.mrf.mxu3 }
 0x552   : > { %v926_v16 = vpop.f32.mrf.mxu3 }
 0x553   : > { %v934_v17 = vpack.c.bf16 %v926_v16, %v924_v15 }
 0x555   : > { %5003 = vmatmul.msk.bf16.gmra.mxu2 %vm537_vm4, %v934_v17 }
 0x573   : > { %v725_v18 = vpop.f32.mrf.mxu0 }
 0x574   : > { %744 = vrot.lane.b32.xlu0 %v725_v18, %s5625_s16 }
 0x57b   : > { %v727_v14 = vpop.f32.mrf.mxu0 }
 0x57c   : > { %746 = vrot.lane.b32.xlu2 %v727_v14, %s5625_s16 }
 0x583   : > { %v730_v8 = vpop.f32.mrf.mxu0 }
 0x584   : > { %748 = vrot.lane.b32.xlu0 %v730_v8, %s5625_s16 }
 0x58b   : > { %v732_v19 = vpop.f32.mrf.mxu0 }
 0x5a2   : > { %v929_v21 = vpop.f32.mrf.mxu3 }
 0x5a3   : > { %v935_v25 = vpack.c.bf16 %v929_v21, %v929_v21 }
 0x5a5   : > { %5004 = vmatmul.msk.bf16.gmra.mxu2 %vm537_vm4, %v935_v25 }
 0x5aa   : > { %v735_v26 = vpop.f32.mrf.mxu0  ;;  %v931_v28 = vpop.f32.mrf.mxu3 }
 0x5b2   : > { %v737_v23 = vpop.f32.mrf.mxu0 }
 0x5c8   : > { %v961_v29 = vpop.f32.mrf.mxu2 }
 0x5c9   : > { %980 = vrot.lane.b32.xlu1 %v961_v29, %s5625_s16 }
 0x5d0   : > { %v963_v22 = vpop.f32.mrf.mxu2 }
 0x5d1   : > { %750 = vrot.lane.b32.xlu1 %v732_v19, %s5625_s16  ;;  %982 = vrot.lane.b32.xlu2 %v963_v22, %s5625_s16 }
 0x5d6   : > { %v747_v30 = vpop.permute.xlu2 %746 }
 0x5d7   : > { %v760_v27 = vadd.f32 %v5810_v61, %v747_v30 }
 0x5d8   : > { %v966_v20 = vpop.f32.mrf.mxu2 }
 0x5d9   : > { %984 = vrot.lane.b32.xlu2 %v966_v20, %s5625_s16 }
 0x5e0   : > { %v968_v24 = vpop.f32.mrf.mxu2 }
 0x5e1   : > { %986 = vrot.lane.b32.xlu0 %v968_v24, %s5625_s16 }
 0x5e6   : > { %v745_v32 = vpop.permute.xlu0 %744 }
 0x5e7   : > { %v759_v43 = vadd.f32 %v5810_v61, %v745_v32 }
 0x5e9   : > { %752 = vrot.lane.b32.xlu0 %v735_v26, %s5625_s16 }
 0x5f6   : > { %v749_v39 = vpop.permute.xlu0 %748 }
 0x5f7   : > { %v761_v3 = vadd.f32 %v5810_v61, %v749_v39 }
 0x628   : > { %v971_v34 = vpop.f32.mrf.mxu2 }
 0x62b   : > { %v983_v35 = vpop.permute.xlu2 %982 }
 0x62c   : > { %v996_v36 = vadd.f32 %v983_v35, %v760_v27 }
 0x62e   : > { %1007 = vrot.lane.b32.xlu2 %v996_v36, %s5624_s15 }
 0x630   : > { %v973_v40 = vpop.f32.mrf.mxu2 }
 0x633   : > { %v985_v0 = vpop.permute.xlu2 %984 }
 0x634   : > { %v997_v42 = vadd.f32 %v985_v0, %v761_v3 }
 0x636   : > { %1009 = vrot.lane.b32.xlu2 %v997_v42, %s5624_s15 }
 0x63b   : > { %v981_v41 = vpop.permute.xlu1 %980 }
 0x63c   : > { %v995_v44 = vadd.f32 %v981_v41, %v759_v43 }
 0x63e   : > { %1005 = vrot.lane.b32.xlu1 %v995_v44, %s5624_s15 }
 0x643   : > { %v751_v45 = vpop.permute.xlu1 %750 }
 0x644   : > { %v762_v46 = vadd.f32 %v5810_v61, %v751_v45 }
 0x646   : > { %988 = vrot.lane.b32.xlu1 %v971_v34, %s5625_s16 }
 0x653   : > { %v987_v48 = vpop.permute.xlu0 %986 }
 0x654   : > { %v998_v37 = vadd.f32 %v987_v48, %v762_v46 }
 0x656   : > { %1011 = vrot.lane.b32.xlu0 %v998_v37, %s5624_s15 }
 0x65b   : > { %v753_v31 = vpop.permute.xlu0 %752 }
 0x65c   : > { %v763_v58 = vadd.f32 %v5810_v61, %v753_v31 }
 0x688   : > { %v1008_v49 = vpop.permute.xlu2 %1007 }
 0x689   : > { %v1021_v55 = vadd.f32 %v1008_v49, %v5799_v13 }
 0x68b   : > { %v1028_v47 = vsel %vm337_vm2, %v1021_v55, 0.0 }
 0x68c   : > { %1029 = vadd.xlane.f32.xlu2 %v1028_v47 }
 0x690   : > { %v1010_v1 = vpop.permute.xlu2 %1009 }
 0x691   : > { %v1022_v4 = vadd.f32 %v1010_v1, %v5785_v52 }
 0x6b0   : > { %v1006_v56 = vpop.permute.xlu1 %1005 }
 0x6b1   : > { %v1020_v33 = vadd.f32 %v1006_v56, %v5797_v12  ;;  %v1031_v12 = vsel %vm337_vm2, %v1022_v4, 0.0 }
 0x6b3   : > { %v1025_v57 = vsel %vm337_vm2, %v1020_v33, 0.0 }
 0x6b4   : > { %1026 = vadd.xlane.f32.xlu1 %v1025_v57 }
 0x6b8   : > { %v989_v60 = vpop.permute.xlu1 %988 }
 0x6b9   : > { %v999_v2 = vadd.f32 %v989_v60, %v763_v58 }
 0x6bb   : > { %1013 = vrot.lane.b32.xlu0 %v999_v2, %s5624_s15 }
 0x6c8   : > { %v1012_v51 = vpop.permute.xlu0 %1011 }
 0x6c9   : > { %v1023_v63 = vadd.f32 %v1012_v51, %v5787_v53 }
 0x6cb   : > { %v1034_v13 = vsel %vm337_vm2, %v1023_v63, 0.0 }
 0x6cc   : > { %1035 = vadd.xlane.f32.xlu1 %v1034_v13 }
 0x6e5   : > { %1032 = vadd.xlane.f32.xlu0 %v1031_v12 }
 0x6ff   : > { %v1030_v6 = vpop.xlane.xlu2 %1029 }
 0x700   : > { %v1041_v7 = vmul.f32 %v1030_v6, %v5724_v38 }
 0x702   : > { %v6001_v9 = vsub.f32 %v1021_v55, %v1041_v7 }
 0x704   : > { %v1051_v10 = vmul.f32 %v6001_v9, %v6001_v9 }
 0x706   : > { %v1058_v54 = vsel %vm337_vm2, %v1051_v10, 0.0 }
 0x707   : > { %1059 = vadd.xlane.f32.xlu1 %v1058_v54 }
 0x727   : > { %v1027_v53 = vpop.xlane.xlu1 %1026 }
 0x728   : > { %v1040_v50 = vmul.f32 %v1027_v53, %v5724_v38 }
 0x72a   : > { %v6008_v16 = vsub.f32 %v1020_v33, %v1040_v50 }
 0x72c   : > { %v1050_v18 = vmul.f32 %v6008_v16, %v6008_v16 }
 0x72d   : > { %v1014_v15 = vpop.permute.xlu0 %1013 }
 0x72e   : > { %v1024_v52 = vadd.f32 %v1014_v15, %v5795_v11  ;;  %v1055_v14 = vsel %vm337_vm2, %v1050_v18, 0.0 }
 0x730   : > { %v1037_v17 = vsel %vm337_vm2, %v1024_v52, 0.0 }
 0x731   : > { %1038 = vadd.xlane.f32.xlu2 %v1037_v17 }
 0x739   : > { %1056 = vadd.xlane.f32.xlu2 %v1055_v14 }
 0x73f   : > { %v1036_v8 = vpop.xlane.xlu1 %1035 }
 0x740   : > { %v1043_v19 = vmul.f32 %v1036_v8, %v5724_v38 }
 0x742   : > { %v6015_v21 = vsub.f32 %v1023_v63, %v1043_v19 }
 0x744   : > { %v1053_v25 = vmul.f32 %v6015_v21, %v6015_v21 }
 0x746   : > { %v1064_v11 = vsel %vm337_vm2, %v1053_v25, 0.0 }
 0x747   : > { %1065 = vadd.xlane.f32.xlu1 %v1064_v11 }
 0x751   : > { %1135 = vrot.lane.b32.xlu2 %v5810_v61, %s5626_s17 }
 0x758   : > { %v1033_v26 = vpop.xlane.xlu0 %1032 }
 0x759   : > { %v1042_v28 = vmul.f32 %v1033_v26, %v5724_v38  ;;  %1158 = vrot.lane.b32.xlu2 %v5810_v61, %s5627_s18 }
 0x75b   : > { %v6023_v23 = vsub.f32 %v1022_v4, %v1042_v28 }
 0x75d   : > { %v1052_v29 = vmul.f32 %v6023_v23, %v6023_v23 }
 0x75f   : > { %v1061_v22 = vsel %vm337_vm2, %v1052_v29, 0.0 }
 0x760   : > { %1062 = vadd.xlane.f32.xlu0 %v1061_v22  ;;  %1155 = vrot.lane.b32.xlu1 %v5769_v5, %s5626_s17 }
 0x761   : > { %1296 = vrot.lane.b32.xlu2 %v5769_v5, %s5625_s16 }
 0x768   : > { %1299 = vrot.lane.b32.xlu1 %v5810_v61, %s5628_s19 }
 0x774   : > { %1143 = vrot.lane.b32.xlu0 %v5810_v61, %s5625_s16 }
 0x77a   : > { %v1060_v35 = vpop.xlane.xlu1 %1059 }
 0x77b   : > { %v1071_v39 = vmul.f32 %v1060_v35, %v5724_v38 }
 0x77d   : > { %v1076_v3 = vadd.f32 1e-05, %v1071_v39 }
 0x77f   : > { %vm1096_vm12 = vweird.f32 %v1076_v3 }
 0x7a4   : > { %v1039_v20 = vpop.xlane.xlu2 %1038 }
 0x7a5   : > { %v1044_v24 = vmul.f32 %v1039_v20, %v5724_v38 }
 0x7a7   : > { %v6037_v30 = vsub.f32 %v1024_v52, %v1044_v24 }
 0x7a9   : > { %v1054_v32 = vmul.f32 %v6037_v30, %v6037_v30 }
 0x7ab   : > { %v1067_v34 = vsel %vm337_vm2, %v1054_v32, 0.0 }
 0x7ac   : > { %1068 = vadd.xlane.f32.xlu0 %v1067_v34  ;;  %v1057_v27 = vpop.xlane.xlu2 %1056 }
 0x7ad   : > { %v1070_v36 = vmul.f32 %v1057_v27, %v5724_v38 }
 0x7af   : > { %v1075_v40 = vadd.f32 1e-05, %v1070_v36 }
 0x7b1   : > { %5318 = vrsqrt.f32 %v1075_v40  ;;  %vm1086_vm10 = vweird.f32 %v1075_v40 }
 0x7b2   : > { %5320 = vrsqrt.f32 %v1076_v3 }
 0x7b4   : > { %v6047_v10 = vpop.permute.xlu2 %1135 }
 0x7b7   : > { %v5319_v0 = vpop.eup %5318 }
 0x7b8   : > { %v5321_v42 = vpop.eup %5320  ;;  %v1081_v41 = vmul.f32 %v5319_v0, %v1075_v40  ;;  %vm1087_vm8 = vweird.f32 %v5319_v0 }
 0x7b9   : > { %v1091_v44 = vmul.f32 %v5321_v42, %v1076_v3  ;;  %vm1097_vm9 = vweird.f32 %v5321_v42  ;;  %vm1088_vm11 = vmor %vm1086_vm10, %vm1087_vm8 }
 0x7ba   : > { %v1066_v5 = vpop.xlane.xlu1 %1065  ;;  %v1082_v46 = vmul.f32 %v5319_v0, %v1081_v41  ;;  %vm1098_vm13 = vmor %vm1096_vm12, %vm1097_vm9 }
 0x7bb   : > { %v1073_v43 = vmul.f32 %v1066_v5, %v5724_v38  ;;  %v1092_v48 = vmul.f32 %v5321_v42, %v1091_v44 }
 0x7bc   : > { %v1083_v37 = vmul.f32 0.5, %v1082_v46  ;;  %v6087_v44 = vpop.permute.xlu2 %1158 }
 0x7bd   : > { %v1078_v45 = vadd.f32 1e-05, %v1073_v43  ;;  %v1093_v47 = vmul.f32 0.5, %v1092_v48 }
 0x7be   : > { %v1084_v33 = vsub.f32 1.5, %v1083_v37 }
 0x7bf   : > { %5322 = vrsqrt.f32 %v1078_v45  ;;  %v1094_v58 = vsub.f32 1.5, %v1093_v47  ;;  %vm1116_vm3 = vweird.f32 %v1078_v45 }
 0x7c0   : > { %v1085_v60 = vmul.f32 %v5319_v0, %v1084_v33 }
 0x7c1   : > { %v1095_v51 = vmul.f32 %v5321_v42, %v1094_v58 }
 0x7c2   : > { %v1089_v13 = vsel %vm1088_vm11, %v5319_v0, %v1085_v60 }
 0x7c3   : > { %v1099_v12 = vsel %vm1098_vm13, %v5321_v42, %v1095_v51  ;;  %v1130_v6 = vmul.f32 %v1089_v13, %v6008_v16 }
 0x7c4   : > { %v1131_v53 = vmul.f32 %v1099_v12, %v6001_v9 }
 0x7c5   : > { %v5323_v31 = vpop.eup %5322  ;;  %v1138_v52 = vmul.f32 %v6047_v10, %v1130_v6 }
 0x7c6   : > { %v1111_v2 = vmul.f32 %v5323_v31, %v1078_v45  ;;  %v1139_v17 = vmul.f32 %v6047_v10, %v1131_v53  ;;  %vm1117_vm1 = vweird.f32 %v5323_v31 }
 0x7c7   : > { %vm1118_vm5 = vmor %vm1116_vm3, %vm1117_vm1 }
 0x7c8   : > { %v1112_v1 = vmul.f32 %v5323_v31, %v1111_v2 }
 0x7ca   : > { %v1113_v54 = vmul.f32 0.5, %v1112_v1 }
 0x7cc   : > { %v1114_v18 = vsub.f32 1.5, %v1113_v54 }
 0x7ce   : > { %v1115_v25 = vmul.f32 %v5323_v31, %v1114_v18 }
 0x7d0   : > { %v1119_v28 = vsel %vm1118_vm5, %v5323_v31, %v1115_v25 }
 0x7d1   : > { %v1133_v29 = vmul.f32 %v1119_v28, %v6015_v21 }
 0x7d2   : > { %v1156_v49 = vpop.permute.xlu1 %1155 }
 0x7d3   : > { %v1063_v55 = vpop.xlane.xlu0 %1062  ;;  %1177 = vmatpush.bf16.msra.mxu0 %v1156_v49  ;;  %v1141_v20 = vmul.f32 %v6047_v10, %v1133_v29  ;;  %v1297_v49 = vpop.permute.xlu2 %1296 }
 0x7d4   : > { %v1072_v56 = vmul.f32 %v1063_v55, %v5724_v38  ;;  %1318 = vmatpush.bf16.msra.mxu1 %v1297_v49 }
 0x7d6   : > { %v1077_v57 = vadd.f32 1e-05, %v1072_v56 }
 0x7d8   : > { %5324 = vrsqrt.f32 %v1077_v57  ;;  %vm1106_vm15 = vweird.f32 %v1077_v57 }
 0x7de   : > { %v5325_v63 = vpop.eup %5324 }
 0x7df   : > { %v1101_v4 = vmul.f32 %v5325_v63, %v1077_v57  ;;  %vm1107_vm14 = vweird.f32 %v5325_v63 }
 0x7e0   : > { %vm1108_vm0 = vmor %vm1106_vm15, %vm1107_vm14 }
 0x7e1   : > { %v1102_v7 = vmul.f32 %v5325_v63, %v1101_v4 }
 0x7e3   : > { %v1103_v50 = vmul.f32 0.5, %v1102_v7 }
 0x7e5   : > { %v1104_v15 = vsub.f32 1.5, %v1103_v50 }
 0x7e6   : > { %v6052_v14 = vpop.permute.xlu0 %1143 }
 0x7e7   : > { %v1105_v8 = vmul.f32 %v5325_v63, %v1104_v15  ;;  %v6055_v19 = vadd.f32 %v6052_v14, %v1138_v52  ;;  %v6058_v16 = vadd.f32 %v6052_v14, %v1139_v17  ;;  %v6071_v32 = vadd.f32 %v6052_v14, %v1141_v20 }
 0x7e9   : > { %v1151_v9 = vpack.c.bf16 %v6058_v16, %v6055_v19  ;;  %v1109_v11 = vsel %vm1108_vm0, %v5325_v63, %v1105_v8 }
 0x7ea   : > { %v1132_v26 = vmul.f32 %v1109_v11, %v6023_v23 }
 0x7eb   : > { %5005 = vmatmul.msk.bf16.vlgmr.msra.gmra.mxu0 %vm337_vm2, %v1151_v9 }
 0x7ec   : > { %v1140_v22 = vmul.f32 %v6047_v10, %v1132_v26 }
 0x7ee   : > { %v6068_v24 = vadd.f32 %v6052_v14, %v1140_v22 }
 0x7f0   : > { %v1152_v34 = vpack.c.bf16 %v6071_v32, %v6068_v24 }
 0x7fb   : > { %5006 = vmatmul.msk.bf16.gmra.mxu0 %vm337_vm2, %v1152_v34 }
 0x81f   : > { %v1069_v27 = vpop.xlane.xlu0 %1068 }
 0x820   : > { %v1074_v21 = vmul.f32 %v1069_v27, %v5724_v38 }
 0x822   : > { %v1079_v23 = vadd.f32 1e-05, %v1074_v21 }
 0x824   : > { %5326 = vrsqrt.f32 %v1079_v23  ;;  %vm1126_vm9 = vweird.f32 %v1079_v23 }
 0x82a   : > { %v5327_v35 = vpop.eup %5326 }
 0x82b   : > { %v1121_v36 = vmul.f32 %v5327_v35, %v1079_v23  ;;  %vm1127_vm8 = vweird.f32 %v5327_v35 }
 0x82c   : > { %vm1128_vm10 = vmor %vm1126_vm9, %vm1127_vm8 }
 0x82d   : > { %v1122_v39 = vmul.f32 %v5327_v35, %v1121_v36 }
 0x82f   : > { %v1123_v40 = vmul.f32 0.5, %v1122_v39 }
 0x831   : > { %v1124_v3 = vsub.f32 1.5, %v1123_v40 }
 0x833   : > { %v1125_v5 = vmul.f32 %v5327_v35, %v1124_v3 }
 0x835   : > { %v1129_v0 = vsel %vm1128_vm10, %v5327_v35, %v1125_v5 }
 0x836   : > { %v1134_v42 = vmul.f32 %v1129_v0, %v6037_v30 }
 0x838   : > { %v1142_v43 = vmul.f32 %v6047_v10, %v1134_v42 }
 0x83a   : > { %v6082_v61 = vadd.f32 %v6052_v14, %v1142_v43 }
 0x83c   : > { %v1153_v41 = vpack.c.bf16 %v6082_v61, %v6082_v61 }
 0x83e   : > { %5007 = vmatmul.msk.bf16.gmra.mxu0 %vm337_vm2, %v1153_v41 }
 0x868   : > { %v1179_v45 = vpop.f32.mrf.mxu0 }
 0x869   : > { %v1180_v46 = vadd.f32 %v1179_v45, %v6087_v44 }
 0x86b   : > { %v5008_v48 = vmul.f32 -1.442695, %v1180_v46 }
 0x86d   : > { %5328 = vpow2.f32 %v5008_v48 }
 0x870   : > { %v1181_v37 = vpop.f32.mrf.mxu0 }
 0x871   : > { %v1182_v30 = vadd.f32 %v1181_v37, %v6087_v44 }
 0x873   : > { %v5329_v55 = vpop.eup %5328  ;;  %v5009_v47 = vmul.f32 -1.442695, %v1182_v30 }
 0x874   : > { %v1208_v56 = vadd.f32 1.0, %v5329_v55 }
 0x875   : > { %5330 = vpow2.f32 %v5009_v47 }
 0x876   : > { %5332 = vrcp.f32 %v1208_v56  ;;  %v1224_v15 = vand.u32 2147483648, %v1208_v56  ;;  %vm1218_vm12 = vweird.f32 %v1208_v56  ;;  %v1222_v52 = vand.u32 2147483647, %v1208_v56 }
 0x878   : > { %v1184_v33 = vpop.f32.mrf.mxu0  ;;  %v1225_v11 = vor.u32 1.1754944e-38, %v1224_v15  ;;  %vm1223_vm15 = vcmp.eq.f32.partialorder %v1222_v52, 8.507059e+37 }
 0x879   : > { %v6092_v57 = vadd.f32 %v1184_v33, %v6087_v44 }
 0x87b   : > { %v5331_v31 = vpop.eup %5330  ;;  %v5010_v58 = vmul.f32 -1.442695, %v6092_v57 }
 0x87c   : > { %v5333_v60 = vpop.eup %5332  ;;  %v1209_v2 = vadd.f32 1.0, %v5331_v31 }
 0x87d   : > { %v1214_v51 = vmul.f32 %v5333_v60, %v1208_v56  ;;  %5334 = vpow2.f32 %v5010_v58  ;;  %vm1219_vm11 = vweird.f32 %v5333_v60 }
 0x87e   : > { %5336 = vrcp.f32 %v1209_v2  ;;  %vm1220_vm13 = vmor %vm1218_vm12, %vm1219_vm11  ;;  %v1239_v18 = vand.u32 2147483648, %v1209_v2  ;;  %v1237_v25 = vand.u32 2147483647, %v1209_v2  ;;  %vm1233_vm0 = vweird.f32 %v1209_v2 }
 0x87f   : > { %v1215_v63 = vsub.f32 1.0, %v1214_v51 }
 0x880   : > { %v1186_v13 = vpop.f32.mrf.mxu0  ;;  %v1240_v20 = vor.u32 1.1754944e-38, %v1239_v18  ;;  %vm1238_vm3 = vcmp.eq.f32.partialorder %v1237_v25, 8.507059e+37 }
 0x881   : > { %v1216_v1 = vmul.f32 %v5333_v60, %v1215_v63  ;;  %v6096_v4 = vadd.f32 %v1186_v13, %v6087_v44 }
 0x883   : > { %v5335_v12 = vpop.eup %5334  ;;  %v5011_v6 = vmul.f32 -1.442695, %v6096_v4  ;;  %v1217_v53 = vadd.f32 %v5333_v60, %v1216_v1 }
 0x884   : > { %v5337_v7 = vpop.eup %5336  ;;  %v1210_v54 = vadd.f32 1.0, %v5335_v12 }
 0x885   : > { %v1229_v50 = vmul.f32 %v5337_v7, %v1209_v2  ;;  %5338 = vpow2.f32 %v5011_v6  ;;  %v1221_v8 = vsel %vm1220_vm13, %v5333_v60, %v1217_v53  ;;  %vm1234_vm14 = vweird.f32 %v5337_v7 }
 0x886   : > { %5340 = vrcp.f32 %v1210_v54  ;;  %v1226_v22 = vsel %vm1223_vm15, %v1225_v11, %v1221_v8  ;;  %vm1235_vm1 = vmor %vm1233_vm0, %vm1234_vm14  ;;  %v1254_v43 = vand.u32 2147483648, %v1210_v54  ;;  %vm1248_vm8 = vweird.f32 %v1210_v54 }
 0x887   : > { %v1230_v17 = vsub.f32 1.0, %v1229_v50  ;;  %v1288_v35 = vmul.f32 %v1226_v22, %v1180_v46  ;;  %v1252_v41 = vand.u32 2147483647, %v1210_v54 }
 0x889   : > { %v1231_v9 = vmul.f32 %v5337_v7, %v1230_v17  ;;  %vm1253_vm11 = vcmp.eq.f32.partialorder %v1252_v41, 8.507059e+37 }
 0x88b   : > { %v5339_v26 = vpop.eup %5338  ;;  %v1232_v28 = vadd.f32 %v5337_v7, %v1231_v9  ;;  %v1300_v9 = vpop.permute.xlu1 %1299 }
 0x88c   : > { %v5341_v29 = vpop.eup %5340  ;;  %v1211_v34 = vadd.f32 1.0, %v5339_v26 }
 0x88d   : > { %v1236_v27 = vsel %vm1235_vm1, %v5337_v7, %v1232_v28  ;;  %v1244_v21 = vmul.f32 %v5341_v29, %v1210_v54  ;;  %vm1249_vm5 = vweird.f32 %v5341_v29 }
 0x88e   : > { %v1241_v23 = vsel %vm1238_vm3, %v1240_v20, %v1236_v27  ;;  %5342 = vrcp.f32 %v1211_v34  ;;  %vm1250_vm9 = vmor %vm1248_vm8, %vm1249_vm5  ;;  %v1269_v48 = vand.u32 2147483648, %v1211_v34  ;;  %v1267_v46 = vand.u32 2147483647, %v1211_v34 }
 0x88f   : > { %v1289_v36 = vmul.f32 %v1241_v23, %v1182_v30  ;;  %v1245_v39 = vsub.f32 1.0, %v1244_v21  ;;  %v1255_v30 = vor.u32 1.1754944e-38, %v1254_v43  ;;  %vm1263_vm12 = vweird.f32 %v1211_v34 }
 0x890   : > { %v1270_v56 = vor.u32 1.1754944e-38, %v1269_v48  ;;  %vm1268_vm14 = vcmp.eq.f32.partialorder %v1267_v46, 8.507059e+37 }
 0x891   : > { %v1293_v40 = vpack.c.bf16 %v1289_v36, %v1288_v35  ;;  %v1246_v3 = vmul.f32 %v5341_v29, %v1245_v39 }
 0x893   : > { %5013 = vmatmul.msk.bf16.vlgmr.msra.gmra.mxu1 %vm337_vm2, %v1293_v40  ;;  %v1247_v0 = vadd.f32 %v5341_v29, %v1246_v3 }
 0x894   : > { %v5343_v5 = vpop.eup %5342 }
 0x895   : > { %v1259_v42 = vmul.f32 %v5343_v5, %v1211_v34  ;;  %v1251_v37 = vsel %vm1250_vm9, %v5341_v29, %v1247_v0  ;;  %vm1264_vm10 = vweird.f32 %v5343_v5 }
 0x896   : > { %v1256_v47 = vsel %vm1253_vm11, %v1255_v30, %v1251_v37  ;;  %vm1265_vm13 = vmor %vm1263_vm12, %vm1264_vm10 }
 0x897   : > { %v1260_v45 = vsub.f32 1.0, %v1259_v42  ;;  %v1290_v58 = vmul.f32 %v1256_v47, %v6092_v57 }
 0x899   : > { %v1261_v49 = vmul.f32 %v5343_v5, %v1260_v45 }
 0x89b   : > { %v1262_v55 = vadd.f32 %v5343_v5, %v1261_v49 }
 0x89d   : > { %v1266_v33 = vsel %vm1265_vm13, %v5343_v5, %v1262_v55 }
 0x89e   : > { %v1271_v31 = vsel %vm1268_vm14, %v1270_v56, %v1266_v33 }
 0x89f   : > { %v1291_v60 = vmul.f32 %v1271_v31, %v6096_v4 }
 0x8a1   : > { %v1294_v2 = vpack.c.bf16 %v1291_v60, %v1290_v58 }
 0x8a3   : > { %5014 = vmatmul.msk.bf16.gmra.mxu1 %vm337_vm2, %v1294_v2 }
 0x8bb   : > { %v1189_v51 = vpop.f32.mrf.mxu0 }
 0x8bc   : > { %v1190_v63 = vadd.f32 %v1189_v51, %v6087_v44 }
 0x8be   : > { %v5012_v13 = vmul.f32 -1.442695, %v1190_v63 }
 0x8c0   : > { %5344 = vpow2.f32 %v5012_v13 }
 0x8c3   : > { %v1191_v1 = vpop.f32.mrf.mxu0 }
 0x8c6   : > { %v5345_v12 = vpop.eup %5344 }
 0x8c7   : > { %v1212_v6 = vadd.f32 1.0, %v5345_v12 }
 0x8c9   : > { %5346 = vrcp.f32 %v1212_v6  ;;  %v1284_v50 = vand.u32 2147483648, %v1212_v6  ;;  %v1282_v57 = vand.u32 2147483647, %v1212_v6  ;;  %vm1278_vm0 = vweird.f32 %v1212_v6 }
 0x8cb   : > { %v1285_v52 = vor.u32 1.1754944e-38, %v1284_v50  ;;  %vm1283_vm3 = vcmp.eq.f32.partialorder %v1282_v57, 8.507059e+37  ;;  %v6154_v50 = vld [vmem:[%s7618_s3 + $0x18] sm:$0xff] }
 0x8cf   : > { %v5347_v7 = vpop.eup %5346 }
 0x8d0   : > { %v1274_v54 = vmul.f32 %v5347_v7, %v1212_v6  ;;  %vm1279_vm15 = vweird.f32 %v5347_v7 }
 0x8d1   : > { %vm1280_vm1 = vmor %vm1278_vm0, %vm1279_vm15 }
 0x8d2   : > { %v1275_v53 = vsub.f32 1.0, %v1274_v54 }
 0x8d4   : > { %v1276_v15 = vmul.f32 %v5347_v7, %v1275_v53  ;;  %v6149_v53 = vld [vmem:[%s7618_s3 + $0x10] sm:$0xff] }
 0x8d5   : > { %v6158_v57 = vpack.c.bf16 %v6154_v50, %v6149_v53 }
 0x8d6   : > { %v1277_v4 = vadd.f32 %v5347_v7, %v1276_v15 }
 0x8d7   : > { %1487 = vmatpush.bf16.msrb.mxu3 %v6158_v57 }
 0x8d8   : > { %v1281_v17 = vsel %vm1280_vm1, %v5347_v7, %v1277_v4 }
 0x8d9   : > { %v1286_v44 = vsel %vm1283_vm3, %v1285_v52, %v1281_v17 }
 0x8da   : > { %v1292_v18 = vmul.f32 %v1286_v44, %v1190_v63 }
 0x8dc   : > { %v1295_v8 = vpack.c.bf16 %v1292_v18, %v1292_v18 }
 0x8de   : > { %5015 = vmatmul.msk.bf16.gmra.mxu1 %vm337_vm2, %v1295_v8 }
 0x910   : > { %v1320_v25 = vpop.f32.mrf.mxu1 }
 0x911   : > { %v1321_v11 = vadd.f32 %v1320_v25, %v1300_v9 }
 0x913   : > { %v1334_v26 = vadd.f32 %v1321_v11, %v6055_v19 }
 0x915   : > { %v1339_v28 = vsel %vm337_vm2, %v1334_v26, 0.0 }
 0x916   : > { %1340 = vadd.xlane.f32.xlu2 %v1339_v28 }
 0x918   : > { %v1322_v29 = vpop.f32.mrf.mxu1 }
 0x919   : > { %v1323_v22 = vadd.f32 %v1322_v29, %v1300_v9 }
 0x91b   : > { %v1335_v20 = vadd.f32 %v1323_v22, %v6058_v16 }
 0x91d   : > { %v1342_v34 = vsel %vm337_vm2, %v1335_v20, 0.0 }
 0x91e   : > { %1343 = vadd.xlane.f32.xlu1 %v1342_v34 }
 0x920   : > { %v1325_v27 = vpop.f32.mrf.mxu1 }
 0x921   : > { %v1326_v21 = vadd.f32 %v1325_v27, %v1300_v9 }
 0x923   : > { %v1336_v23 = vadd.f32 %v1326_v21, %v6068_v24 }
 0x925   : > { %v1345_v35 = vsel %vm337_vm2, %v1336_v23, 0.0 }
 0x926   : > { %1346 = vadd.xlane.f32.xlu0 %v1345_v35 }
 0x928   : > { %v1327_v36 = vpop.f32.mrf.mxu1 }
 0x929   : > { %v1328_v39 = vadd.f32 %v1327_v36, %v1300_v9 }
 0x92b   : > { %v1337_v19 = vadd.f32 %v1328_v39, %v6071_v32 }
 0x92d   : > { %v1348_v40 = vsel %vm337_vm2, %v1337_v19, 0.0 }
 0x92e   : > { %1349 = vadd.xlane.f32.xlu0 %v1348_v40 }
 0x95b   : > { %v1330_v3 = vpop.f32.mrf.mxu1 }
 0x95c   : > { %v1331_v5 = vadd.f32 %v1330_v3, %v1300_v9 }
 0x95e   : > { %v1338_v16 = vadd.f32 %v1331_v5, %v6082_v61 }
 0x960   : > { %v1351_v0 = vsel %vm337_vm2, %v1338_v16, 0.0 }
 0x961   : > { %1352 = vadd.xlane.f32.xlu2 %v1351_v0 }
 0x963   : > { %v1332_v42 = vpop.f32.mrf.mxu1 }
 0x989   : > { %v1341_v43 = vpop.xlane.xlu2 %1340 }
 0x98a   : > { %v1354_v24 = vmul.f32 %v1341_v43, %v5724_v38 }
 0x98c   : > { %v6116_v41 = vsub.f32 %v1334_v26, %v1354_v24 }
 0x98e   : > { %v1364_v45 = vmul.f32 %v6116_v41, %v6116_v41 }
 0x990   : > { %v1369_v32 = vsel %vm337_vm2, %v1364_v45, 0.0 }
 0x991   : > { %v1344_v48 = vpop.xlane.xlu1 %1343  ;;  %1370 = vadd.xlane.f32.xlu0 %v1369_v32 }
 0x992   : > { %v1355_v37 = vmul.f32 %v1344_v48, %v5724_v38 }
 0x994   : > { %v6122_v49 = vsub.f32 %v1335_v20, %v1355_v37 }
 0x996   : > { %v1365_v61 = vmul.f32 %v6122_v49, %v6122_v49 }
 0x998   : > { %v1372_v46 = vsel %vm337_vm2, %v1365_v61, 0.0 }
 0x999   : > { %v1347_v30 = vpop.xlane.xlu0 %1346  ;;  %1373 = vadd.xlane.f32.xlu1 %v1372_v46 }
 0x99a   : > { %v1356_v55 = vmul.f32 %v1347_v30, %v5724_v38 }
 0x99c   : > { %v6128_v47 = vsub.f32 %v1336_v23, %v1356_v55 }
 0x99e   : > { %v1366_v56 = vmul.f32 %v6128_v47, %v6128_v47 }
 0x9a0   : > { %v1375_v33 = vsel %vm337_vm2, %v1366_v56, 0.0 }
 0x9a1   : > { %v1350_v31 = vpop.xlane.xlu0 %1349  ;;  %1376 = vadd.xlane.f32.xlu2 %v1375_v33 }
 0x9a2   : > { %v1357_v58 = vmul.f32 %v1350_v31, %v5724_v38 }
 0x9a4   : > { %v6134_v60 = vsub.f32 %v1337_v19, %v1357_v58 }
 0x9a6   : > { %v1367_v2 = vmul.f32 %v6134_v60, %v6134_v60 }
 0x9a8   : > { %v1378_v51 = vsel %vm337_vm2, %v1367_v2, 0.0 }
 0x9a9   : > { %1379 = vadd.xlane.f32.xlu0 %v1378_v51 }
 0x9d4   : > { %v1353_v63 = vpop.xlane.xlu2 %1352 }
 0x9d5   : > { %v1358_v13 = vmul.f32 %v1353_v63, %v5724_v38 }
 0x9d7   : > { %v6140_v1 = vsub.f32 %v1338_v16, %v1358_v13 }
 0x9d9   : > { %v1368_v12 = vmul.f32 %v6140_v1, %v6140_v1 }
 0x9db   : > { %v1381_v6 = vsel %vm337_vm2, %v1368_v12, 0.0 }
 0x9dc   : > { %1382 = vadd.xlane.f32.xlu1 %v1381_v6 }
 0xa04   : > { %v1371_v7 = vpop.xlane.xlu0 %1370 }
 0xa05   : > { %v1384_v54 = vmul.f32 %v1371_v7, %v5724_v38 }
 0xa07   : > { %v1389_v15 = vadd.f32 1e-05, %v1384_v54 }
 0xa09   : > { %5348 = vrsqrt.f32 %v1389_v15  ;;  %vm1400_vm8 = vweird.f32 %v1389_v15 }
 0xa0c   : > { %v1374_v4 = vpop.xlane.xlu1 %1373 }
 0xa0d   : > { %v1385_v52 = vmul.f32 %v1374_v4, %v5724_v38 }
 0xa0f   : > { %v5349_v17 = vpop.eup %5348  ;;  %v1390_v44 = vadd.f32 1e-05, %v1385_v52 }
 0xa10   : > { %v1395_v18 = vmul.f32 %v5349_v17, %v1389_v15  ;;  %vm1401_vm5 = vweird.f32 %v5349_v17 }
 0xa11   : > { %5350 = vrsqrt.f32 %v1390_v44  ;;  %vm1402_vm9 = vmor %vm1400_vm8, %vm1401_vm5  ;;  %vm1410_vm11 = vweird.f32 %v1390_v44 }
 0xa12   : > { %v1396_v8 = vmul.f32 %v5349_v17, %v1395_v18 }
 0xa14   : > { %v1397_v9 = vmul.f32 0.5, %v1396_v8  ;;  %v1377_v25 = vpop.xlane.xlu2 %1376 }
 0xa15   : > { %v1386_v11 = vmul.f32 %v1377_v25, %v5724_v38 }
 0xa16   : > { %v1398_v26 = vsub.f32 1.5, %v1397_v9 }
 0xa17   : > { %v5351_v28 = vpop.eup %5350  ;;  %v1391_v29 = vadd.f32 1e-05, %v1386_v11 }
 0xa18   : > { %v1399_v22 = vmul.f32 %v5349_v17, %v1398_v26  ;;  %v1405_v20 = vmul.f32 %v5351_v28, %v1390_v44  ;;  %vm1411_vm10 = vweird.f32 %v5351_v28 }
 0xa19   : > { %5352 = vrsqrt.f32 %v1391_v29  ;;  %vm1412_vm12 = vmor %vm1410_vm11, %vm1411_vm10  ;;  %vm1420_vm14 = vweird.f32 %v1391_v29 }
 0xa1a   : > { %v1406_v34 = vmul.f32 %v5351_v28, %v1405_v20  ;;  %v1403_v27 = vsel %vm1402_vm9, %v5349_v17, %v1399_v22  ;;  %v6202_v20 = vld [vmem:[%s7619_s4 + $0x1] ss:$0 sm:$0xff] }
 0xa1b   : > { %v1444_v19 = vmul.f32 %v1403_v27, %v6116_v41 }
 0xa1c   : > { %v1407_v21 = vmul.f32 0.5, %v1406_v34  ;;  %v1380_v23 = vpop.xlane.xlu0 %1379 }
 0xa1d   : > { %v1387_v35 = vmul.f32 %v1380_v23, %v5724_v38  ;;  %v1449_v42 = vmul.f32 %v1444_v19, %v6047_v10 }
 0xa1e   : > { %v1408_v36 = vsub.f32 1.5, %v1407_v21 }
 0xa1f   : > { %v5353_v39 = vpop.eup %5352  ;;  %v1392_v40 = vadd.f32 1e-05, %v1387_v35  ;;  %v6169_v37 = vadd.f32 %v1449_v42, %v6052_v14 }
 0xa20   : > { %v1409_v3 = vmul.f32 %v5351_v28, %v1408_v36  ;;  %v1415_v5 = vmul.f32 %v5353_v39, %v1391_v29  ;;  %vm1421_vm13 = vweird.f32 %v5353_v39 }
 0xa21   : > { %5354 = vrsqrt.f32 %v1392_v40  ;;  %vm1422_vm15 = vmor %vm1420_vm14, %vm1421_vm13  ;;  %vm1430_vm1 = vweird.f32 %v1392_v40 }
 0xa22   : > { %v1413_v16 = vsel %vm1412_vm12, %v5351_v28, %v1409_v3  ;;  %v1416_v0 = vmul.f32 %v5353_v39, %v1415_v5 }
 0xa23   : > { %v1445_v43 = vmul.f32 %v1413_v16, %v6122_v49 }
 0xa24   : > { %v1417_v24 = vmul.f32 0.5, %v1416_v0 }
 0xa25   : > { %v1450_v45 = vmul.f32 %v1445_v43, %v6047_v10 }
 0xa26   : > { %v1418_v32 = vsub.f32 1.5, %v1417_v24 }
 0xa27   : > { %v5355_v48 = vpop.eup %5354  ;;  %v6172_v41 = vadd.f32 %v1450_v45, %v6052_v14 }
 0xa28   : > { %v1419_v61 = vmul.f32 %v5353_v39, %v1418_v32  ;;  %v1425_v46 = vmul.f32 %v5355_v48, %v1392_v40  ;;  %vm1431_vm0 = vweird.f32 %v5355_v48 }
 0xa29   : > { %v1464_v30 = vpack.c.bf16 %v6172_v41, %v6169_v37  ;;  %vm1432_vm3 = vmor %vm1430_vm1, %vm1431_vm0 }
 0xa2a   : > { %v1426_v55 = vmul.f32 %v5355_v48, %v1425_v46  ;;  %v1423_v49 = vsel %vm1422_vm15, %v5353_v39, %v1419_v61 }
 0xa2b   : > { %5019 = vmatmul.msk.bf16.vlgmr.msrb.gmra.mxu3 %vm337_vm2, %v1464_v30  ;;  %v1446_v31 = vmul.f32 %v1423_v49, %v6128_v47 }
 0xa2c   : > { %v1427_v56 = vmul.f32 0.5, %v1426_v55 }
 0xa2d   : > { %v1451_v63 = vmul.f32 %v1446_v31, %v6047_v10 }
 0xa2e   : > { %v1428_v33 = vsub.f32 1.5, %v1427_v56 }
 0xa2f   : > { %v6182_v12 = vadd.f32 %v1451_v63, %v6052_v14 }
 0xa30   : > { %v1429_v58 = vmul.f32 %v5355_v48, %v1428_v33 }
 0xa32   : > { %v1433_v2 = vsel %vm1432_vm3, %v5355_v48, %v1429_v58 }
 0xa33   : > { %v1447_v51 = vmul.f32 %v1433_v2, %v6134_v60 }
 0xa35   : > { %v1452_v13 = vmul.f32 %v1447_v51, %v6047_v10 }
 0xa37   : > { %v6185_v6 = vadd.f32 %v1452_v13, %v6052_v14 }
 0xa39   : > { %v1465_v7 = vpack.c.bf16 %v6185_v6, %v6182_v12 }
 0xa3b   : > { %5020 = vmatmul.msk.bf16.gmra.mxu3 %vm337_vm2, %v1465_v7 }
 0xa4f   : > { %v1383_v47 = vpop.xlane.xlu1 %1382 }
 0xa50   : > { %v1388_v54 = vmul.f32 %v1383_v47, %v5724_v38 }
 0xa52   : > { %v1393_v15 = vadd.f32 1e-05, %v1388_v54 }
 0xa54   : > { %5356 = vrsqrt.f32 %v1393_v15  ;;  %vm1440_vm8 = vweird.f32 %v1393_v15 }
 0xa5a   : > { %v5357_v60 = vpop.eup %5356 }
 0xa5b   : > { %v1435_v4 = vmul.f32 %v5357_v60, %v1393_v15  ;;  %vm1441_vm5 = vweird.f32 %v5357_v60 }
 0xa5c   : > { %vm1442_vm9 = vmor %vm1440_vm8, %vm1441_vm5 }
 0xa5d   : > { %v1436_v52 = vmul.f32 %v5357_v60, %v1435_v4 }
 0xa5f   : > { %v1437_v17 = vmul.f32 0.5, %v1436_v52 }
 0xa61   : > { %v1438_v44 = vsub.f32 1.5, %v1437_v17 }
 0xa63   : > { %v1439_v18 = vmul.f32 %v5357_v60, %v1438_v44 }
 0xa65   : > { %v1443_v8 = vsel %vm1442_vm9, %v5357_v60, %v1439_v18 }
 0xa66   : > { %v1448_v9 = vmul.f32 %v1443_v8, %v6140_v1 }
 0xa68   : > { %v1453_v25 = vmul.f32 %v1448_v9, %v6047_v10 }
 0xa6a   : > { %v6194_v11 = vadd.f32 %v1453_v25, %v6052_v14 }
 0xa6c   : > { %v1466_v26 = vpack.c.bf16 %v6194_v11, %v6194_v11 }
 0xa6e   : > { %5021 = vmatmul.msk.bf16.gmra.mxu3 %vm337_vm2, %v1466_v26 }
 0xaae   : > { %v1489_v28 = vpop.f32.mrf.mxu3 }
 0xaaf   : > { %v1490_v23 = vadd.f32 %v6202_v20, %v1489_v28 }
 0xab1   : > { %v1503_v40 = vpack.c.bf16 %v1490_v23, %v1490_v23 }
 0xab3   : > { %v1513_v5 = vunpack.c.l.b16 %v1503_v40 }
 0xab6   : > { %v1491_v29 = vpop.f32.mrf.mxu3 }
 0xab7   : > { %v1492_v27 = vadd.f32 %v6202_v20, %v1491_v29 }
 0xab9   : > { %v1504_v39 = vpack.c.bf16 %v1492_v27, %v1492_v27 }
 0xabb   : > { %v1514_v3 = vunpack.c.l.b16 %v1504_v39 }
 0xabd   : > { %v6212_v16 = vpack.c.b16 %v1514_v3, %v1513_v5 }
 0xabe   : > { %v1494_v22 = vpop.f32.mrf.mxu3 }
 0xabf   : > { %v1495_v1 = vadd.f32 %v6202_v20, %v1494_v22 }
 0xac1   : > { %v1505_v10 = vpack.c.bf16 %v1495_v1, %v1495_v1 }
 0xac3   : > { %v1515_v35 = vunpack.c.l.b16 %v1505_v10 }
 0xac6   : > { %v1496_v34 = vpop.f32.mrf.mxu3 }
 0xac7   : > { %v1497_v14 = vadd.f32 %v6202_v20, %v1496_v34 }
 0xac9   : > { %v1506_v21 = vpack.c.bf16 %v1497_v14, %v1497_v14 }
 0xacb   : > { %v1516_v36 = vunpack.c.l.b16 %v1506_v21 }
 0xacd   : > { %v6208_v19 = vpack.c.b16 %v1516_v36, %v1515_v35 }
 0xacf   : > { %1759 = vrot.lane.b32.xlu1 %v6208_v19, %s5619_s11 }
 0xad7   : > { %1521 = vrot.lane.b32.xlu1 %v6212_v16, %s5618_s10 }
 0xaf1   : > { %v1499_v0 = vpop.f32.mrf.mxu3 }
 0xaf2   : > { %v1500_v42 = vadd.f32 %v6202_v20, %v1499_v0 }
 0xaf4   : > { %v1507_v43 = vpack.c.bf16 %v1500_v42, %v1500_v42 }
 0xaf6   : > { %v1517_v24 = vunpack.c.l.b16 %v1507_v43 }
 0xaf8   : > { %v1520_v45 = vpack.c.b16 %v1517_v24, %v1517_v24 }
 0xaf9   : > { %v1501_v32 = vpop.f32.mrf.mxu3 }
 0xafa   : > { %1525 = vrot.lane.b32.xlu0 %v1520_v45, %s5618_s10  ;;  %1761 = vrot.lane.b32.xlu2 %v1520_v45, %s5619_s11 }
 0xafb   : > { %1755 = vrot.lane.b32.xlu1 %v1520_v45, %s5620_s12 }
 0xb02   : > { %1757 = vrot.lane.b32.xlu2 %v6212_v16, %s5619_s11  ;;  %1523 = vrot.lane.b32.xlu0 %v6208_v19, %s5618_s10 }
 0xb03   : > { %1879 = vrot.lane.b32.xlu1 %v6208_v19, %s5623_s14 }
 0xb0a   : > { %1753 = vrot.lane.b32.xlu2 %v6208_v19, %s5620_s12  ;;  %1751 = vrot.lane.b32.xlu0 %v6212_v16, %s5620_s12 }
 0xb12   : > { %1645 = vrot.lane.b32.xlu2 %v1520_v45, %s5622_s13  ;;  %1881 = vrot.lane.b32.xlu0 %v1520_v45, %s5623_s14 }
 0xb41   : > { %v1760_v46 = vpop.permute.xlu1 %1759 }
 0xb42   : > { %v1776_v55 = vsel %vm537_vm4, %v1760_v46, 0 }
 0xb49   : > { %v1522_v13 = vpop.permute.xlu1 %1521 }
 0xb4a   : > { %v1537_v47 = vsel %vm537_vm4, %v1522_v13, 0 }
 0xb54   : > { %v1762_v48 = vpop.permute.xlu2 %1761 }
 0xb55   : > { %v1779_v61 = vsel %vm537_vm4, %v1762_v48, 0 }
 0xb56   : > { %1786 = vmatpush.bf16.xpose.msra.mxu3 %v1779_v61 }
 0xb5c   : > { %v1758_v30 = vpop.permute.xlu2 %1757 }
 0xb5d   : > { %v1773_v56 = vsel %vm537_vm4, %v1758_v30, 0 }
 0xb5e   : > { %1787 = vmatpush.bf16.xpose.msra.mxu3 %v1776_v55 }
 0xb64   : > { %v1754_v49 = vpop.permute.xlu2 %1753 }
 0xb66   : > { %1788 = vmatpush.bf16.xpose.msra.mxu3 %v1773_v56 }
 0xb6c   : > { %v1526_v33 = vpop.permute.xlu0 %1525  ;;  %v1646_v31 = vpop.permute.xlu2 %1645 }
 0xb6d   : > { %v1543_v58 = vsel %vm537_vm4, %v1526_v33, 0  ;;  %v1659_v2 = vsel %vm670_vm7, %v1646_v31, 0  ;;  %v1756_v54 = vpop.permute.xlu1 %1755 }
 0xb6e   : > { %1550 = vmatpush.bf16.xpose.msrb.mxu2 %v1543_v58  ;;  %1666 = vmatpush.bf16.msrb.mxu0 %v1659_v2 }
 0xb74   : > { %v1524_v51 = vpop.permute.xlu0 %1523 }
 0xb75   : > { %v1540_v63 = vsel %vm537_vm4, %v1524_v51, 0  ;;  %v1880_v4 = vpop.permute.xlu1 %1879 }
 0xb76   : > { %1551 = vmatpush.bf16.xpose.msrb.mxu2 %v1540_v63 }
 0xb7c   : > { %v1752_v7 = vpop.permute.xlu0 %1751 }
 0xb7d   : > { %5031 = vmatmul.msk.bf16.vlgmr.msra.gmra.mxu3 %vm537_vm4, %v1752_v7 }
 0xb7e   : > { %1552 = vmatpush.bf16.xpose.msrb.mxu2 %v1537_v47 }
 0xb84   : > { %v1882_v15 = vpop.permute.xlu0 %1881 }
 0xb85   : > { %v1895_v60 = vsel %vm670_vm7, %v1882_v15, 0  ;;  %5022 = vmatmul.msk.bf16.vlgmr.msrb.gmra.mxu2 %vm537_vm4, %v6212_v16 }
 0xb86   : > { %1902 = vmatpush.bf16.msra.mxu2 %v1895_v60 }
 0xb8a   : > { %1903 = vmatpush.bf16.msra.mxu2 %v1880_v4 }
 0xb8d   : > { %5032 = vmatmul.msk.bf16.gmra.mxu3 %vm537_vm4, %v1754_v49 }
 0xb95   : > { %5023 = vmatmul.msk.bf16.gmra.mxu2 %vm537_vm4, %v6208_v19 }
 0xb9d   : > { %5033 = vmatmul.msk.bf16.gmra.mxu3 %vm537_vm4, %v1756_v54 }
 0xba5   : > { %5024 = vmatmul.msk.bf16.gmra.mxu2 %vm537_vm4, %v1520_v45 }
 0xc00   : > { %v1790_v52 = vpop.f32.mrf.mxu3 }
 0xc01   : > { %v1791_v17 = vadd.f32 %v1790_v52, %v5859_v62 }
 0xc03   : > { %v1804_v44 = vsel %vm579_vm6, %v1791_v17, -inf }
 0xc04   : > { %1805 = vmax.xlane.f32.xlu0 %v1804_v44 }
 0xc08   : > { %v1554_v18 = vpop.f32.mrf.mxu2  ;;  %v1792_v8 = vpop.f32.mrf.mxu3 }
 0xc09   : > { %v1555_v9 = vadd.f32 %v1554_v18, %v5859_v62  ;;  %v1793_v25 = vadd.f32 %v1792_v8, %v5859_v62 }
 0xc0b   : > { %v1807_v26 = vsel %vm579_vm6, %v1793_v25, -inf  ;;  %v1568_v28 = vsel %vm579_vm6, %v1555_v9, -inf }
 0xc0c   : > { %1808 = vmax.xlane.f32.xlu2 %v1807_v26  ;;  %1569 = vmax.xlane.f32.xlu1 %v1568_v28 }
 0xc10   : > { %v1556_v29 = vpop.f32.mrf.mxu2  ;;  %v1795_v22 = vpop.f32.mrf.mxu3 }
 0xc11   : > { %v1557_v1 = vadd.f32 %v1556_v29, %v5859_v62  ;;  %v1796_v34 = vadd.f32 %v1795_v22, %v5859_v62 }
 0xc13   : > { %v1810_v10 = vsel %vm579_vm6, %v1796_v34, -inf  ;;  %v1571_v14 = vsel %vm579_vm6, %v1557_v1, -inf }
 0xc14   : > { %1811 = vmax.xlane.f32.xlu2 %v1810_v10  ;;  %1572 = vmax.xlane.f32.xlu0 %v1571_v14 }
 0xc18   : > { %v1559_v27 = vpop.f32.mrf.mxu2  ;;  %v1797_v21 = vpop.f32.mrf.mxu3 }
 0xc19   : > { %v1560_v23 = vadd.f32 %v1559_v27, %v5859_v62  ;;  %v1798_v35 = vadd.f32 %v1797_v21, %v5859_v62 }
 0xc1b   : > { %v1574_v36 = vsel %vm579_vm6, %v1560_v23, -inf  ;;  %v1813_v39 = vsel %vm579_vm6, %v1798_v35, -inf }
 0xc1c   : > { %1575 = vmax.xlane.f32.xlu0 %v1574_v36  ;;  %1814 = vmax.xlane.f32.xlu1 %v1813_v39 }
 0xc20   : > { %v1561_v40 = vpop.f32.mrf.mxu2  ;;  %v1800_v3 = vpop.f32.mrf.mxu3 }
 0xc21   : > { %v1562_v5 = vadd.f32 %v1561_v40, %v5859_v62  ;;  %v1801_v0 = vadd.f32 %v1800_v3, %v5859_v62 }
 0xc23   : > { %v1577_v42 = vsel %vm579_vm6, %v1562_v5, -inf  ;;  %v1816_v43 = vsel %vm579_vm6, %v1801_v0, -inf }
 0xc24   : > { %1578 = vmax.xlane.f32.xlu2 %v1577_v42  ;;  %1817 = vmax.xlane.f32.xlu0 %v1816_v43 }
 0xc28   : > { %v1564_v24 = vpop.f32.mrf.mxu2  ;;  %v1802_v45 = vpop.f32.mrf.mxu3 }
 0xc29   : > { %v1565_v44 = vadd.f32 %v1564_v24, %v5859_v62 }
 0xc2b   : > { %v1580_v29 = vsel %vm579_vm6, %v1565_v44, -inf }
 0xc30   : > { %v1566_v32 = vpop.f32.mrf.mxu2 }
 0xc35   : > { %1877 = vrot.lane.b32.xlu1 %v6212_v16, %s5623_s14 }
 0xc3c   : > { %1643 = vrot.lane.b32.xlu2 %v6208_v19, %s5622_s13 }
 0xc77   : > { %v1806_v48 = vpop.xlane.xlu0 %1805 }
 0xc78   : > { %v1819_v61 = vsub.f32 %v1791_v17, %v1806_v48 }
 0xc7a   : > { %v1824_v46 = vmul.f32 1.442695, %v1819_v61 }
 0xc7c   : > { %5358 = vpow2.f32 %v1824_v46 }
 0xc7f   : > { %v1809_v30 = vpop.xlane.xlu2 %1808  ;;  %v1570_v55 = vpop.xlane.xlu1 %1569 }
 0xc80   : > { %v1820_v49 = vsub.f32 %v1793_v25, %v1809_v30  ;;  %v1583_v56 = vsub.f32 %v1555_v9, %v1570_v55  ;;  %v1687_v30 = vpack.c.bf16 %v6149_v53, %v6149_v53 }
 0xc82   : > { %v6270_v33 = vpop.eup %5358  ;;  %v1826_v31 = vmul.f32 1.442695, %v1820_v49  ;;  %v1588_v58 = vmul.f32 1.442695, %v1583_v56 }
 0xc83   : > { %v1834_v2 = vsel %vm579_vm6, %v6270_v33, 0.0 }
 0xc84   : > { %5360 = vpow2.f32 %v1826_v31  ;;  %1835 = vadd.xlane.f32.xlu1 %v1834_v2 }
 0xc85   : > { %5362 = vpow2.f32 %v1588_v58 }
 0xc87   : > { %v1573_v51 = vpop.xlane.xlu0 %1572  ;;  %v1812_v19 = vpop.xlane.xlu2 %1811 }
 0xc88   : > { %v1584_v63 = vsub.f32 %v1557_v1, %v1573_v51  ;;  %v1821_v54 = vsub.f32 %v1796_v34, %v1812_v19 }
 0xc8a   : > { %v6274_v13 = vpop.eup %5360  ;;  %v1590_v7 = vmul.f32 1.442695, %v1584_v63  ;;  %v1828_v4 = vmul.f32 1.442695, %v1821_v54 }
 0xc8b   : > { %v6276_v47 = vpop.eup %5362  ;;  %v1837_v15 = vsel %vm579_vm6, %v6274_v13, 0.0 }
 0xc8c   : > { %1838 = vadd.xlane.f32.xlu0 %v1837_v15  ;;  %v1598_v60 = vsel %vm579_vm6, %v6276_v47, 0.0  ;;  %5364 = vpow2.f32 %v1590_v7 }
 0xc8d   : > { %1599 = vadd.xlane.f32.xlu2 %v1598_v60  ;;  %5366 = vpow2.f32 %v1828_v4 }
 0xc8f   : > { %v1576_v52 = vpop.xlane.xlu0 %1575  ;;  %v1815_v17 = vpop.xlane.xlu1 %1814 }
 0xc90   : > { %v1585_v18 = vsub.f32 %v1560_v23, %v1576_v52  ;;  %v1822_v8 = vsub.f32 %v1798_v35, %v1815_v17 }
 0xc92   : > { %v1592_v9 = vmul.f32 1.442695, %v1585_v18  ;;  %v1830_v25 = vmul.f32 1.442695, %v1822_v8  ;;  %v6283_v26 = vpop.eup %5364 }
 0xc93   : > { %v1601_v28 = vsel %vm579_vm6, %v6283_v26, 0.0  ;;  %v6288_v14 = vpop.eup %5366 }
 0xc94   : > { %5368 = vpow2.f32 %v1592_v9  ;;  %1602 = vadd.xlane.f32.xlu1 %v1601_v28  ;;  %v1840_v39 = vsel %vm579_vm6, %v6288_v14, 0.0 }
 0xc95   : > { %5370 = vpow2.f32 %v1830_v25  ;;  %1581 = vmax.xlane.f32.xlu2 %v1580_v29 }
 0xc97   : > { %v1579_v22 = vpop.xlane.xlu2 %1578  ;;  %v1818_v1 = vpop.xlane.xlu0 %1817 }
 0xc98   : > { %v1586_v34 = vsub.f32 %v1562_v5, %v1579_v22  ;;  %v1823_v10 = vsub.f32 %v1801_v0, %v1818_v1 }
 0xc9a   : > { %v6290_v27 = vpop.eup %5368  ;;  %v1594_v21 = vmul.f32 1.442695, %v1586_v34  ;;  %v1832_v23 = vmul.f32 1.442695, %v1823_v10 }
 0xc9b   : > { %v5371_v35 = vpop.eup %5370  ;;  %v1604_v36 = vsel %vm579_vm6, %v6290_v27, 0.0 }
 0xc9c   : > { %5372 = vpow2.f32 %v1594_v21  ;;  %v1843_v40 = vsel %vm579_vm6, %v5371_v35, 0.0  ;;  %1841 = vadd.xlane.f32.xlu1 %v1840_v39 }
 0xc9d   : > { %5374 = vpow2.f32 %v1832_v23  ;;  %1605 = vadd.xlane.f32.xlu2 %v1604_v36  ;;  %1844 = vadd.xlane.f32.xlu0 %v1843_v40 }
 0xc9f   : > { %v1644_v3 = vpop.permute.xlu2 %1643 }
 0xca0   : > { %1667 = vmatpush.bf16.msrb.mxu0 %v1644_v3 }
 0xca2   : > { %v6297_v5 = vpop.eup %5372 }
 0xca3   : > { %v6299_v0 = vpop.eup %5374  ;;  %v1607_v42 = vsel %vm579_vm6, %v6297_v5, 0.0 }
 0xca4   : > { %v1846_v43 = vsel %vm579_vm6, %v6299_v0, 0.0  ;;  %1608 = vadd.xlane.f32.xlu1 %v1607_v42 }
 0xca5   : > { %1847 = vadd.xlane.f32.xlu2 %v1846_v43 }
 0xca7   : > { %v1878_v24 = vpop.permute.xlu1 %1877 }
 0xca8   : > { %1904 = vmatpush.bf16.msra.mxu2 %v1878_v24 }
 0xcb1   : > { %1641 = vrot.lane.b32.xlu0 %v6212_v16, %s5622_s13 }
 0xcb9   : > { %1689 = vrot.lane.b32.xlu0 %v1687_v30, %s5624_s15 }
 0xcf7   : > { %v1836_v45 = vpop.xlane.xlu1 %1835 }
 0xcf8   : > { %5376 = vrcp.f32 %v1836_v45 }
 0xcfe   : > { %v5377_v48 = vpop.eup %5376 }
 0xcff   : > { %v1839_v32 = vpop.xlane.xlu0 %1838  ;;  %v1854_v46 = vmul.f32 %v5377_v48, %v6270_v33 }
 0xd00   : > { %5378 = vrcp.f32 %v1839_v32  ;;  %v1600_v61 = vpop.xlane.xlu2 %1599 }
 0xd01   : > { %v1859_v49 = vpack.c.bf16 %v1854_v46, %v1854_v46 }
 0xd03   : > { %v1869_v51 = vunpack.c.l.b16 %v1859_v49 }
 0xd06   : > { %v5379_v55 = vpop.eup %5378 }
 0xd07   : > { %v1855_v56 = vmul.f32 %v5379_v55, %v6274_v13  ;;  %v1603_v58 = vpop.xlane.xlu1 %1602 }
 0xd08   : > { %v1582_v31 = vpop.xlane.xlu2 %1581 }
 0xd09   : > { %v1860_v16 = vpack.c.bf16 %v1855_v56, %v1855_v56  ;;  %v1587_v2 = vsub.f32 %v1565_v44, %v1582_v31  ;;  %v1923_v44 = vpack.c.bf16 %v6154_v50, %v6154_v50 }
 0xd0b   : > { %v1870_v19 = vunpack.c.l.b16 %v1860_v16  ;;  %v1596_v63 = vmul.f32 1.442695, %v1587_v2  ;;  %1925 = vrot.lane.b32.xlu2 %v1923_v44, %s5624_s15 }
 0xd0d   : > { %v1874_v7 = vpack.c.b16 %v1870_v19, %v1869_v51  ;;  %5380 = vpow2.f32 %v1596_v63 }
 0xd0e   : > { %5382 = vrcp.f32 %v1600_v61 }
 0xd0f   : > { %5034 = vmatmul.msk.bf16.vlgmr.msra.gmra.mxu2 %vm579_vm6, %v1874_v7  ;;  %v1842_v53 = vpop.xlane.xlu1 %1841  ;;  %5384 = vrcp.f32 %v1603_v58 }
 0xd10   : > { %v1606_v33 = vpop.xlane.xlu2 %1605  ;;  %v1845_v54 = vpop.xlane.xlu0 %1844 }
 0xd11   : > { %5386 = vrcp.f32 %v1845_v54 }
 0xd12   : > { %5388 = vrcp.f32 %v1842_v53 }
 0xd13   : > { %v5381_v15 = vpop.eup %5380 }
 0xd14   : > { %v1610_v13 = vsel %vm579_vm6, %v5381_v15, 0.0  ;;  %v5383_v60 = vpop.eup %5382 }
 0xd15   : > { %1611 = vadd.xlane.f32.xlu1 %v1610_v13  ;;  %v5385_v4 = vpop.eup %5384  ;;  %v1618_v29 = vmul.f32 %v5383_v60, %v6276_v47 }
 0xd16   : > { %v1619_v9 = vmul.f32 %v5385_v4, %v6283_v26 }
 0xd17   : > { %v5387_v52 = vpop.eup %5386  ;;  %v1609_v10 = vpop.xlane.xlu1 %1608  ;;  %v1623_v23 = vpack.c.bf16 %v1618_v29, %v1618_v29 }
 0xd18   : > { %v1848_v17 = vpop.xlane.xlu2 %1847  ;;  %v5389_v18 = vpop.eup %5388  ;;  %v1857_v8 = vmul.f32 %v5387_v52, %v5371_v35  ;;  %v1624_v34 = vpack.c.bf16 %v1619_v9, %v1619_v9 }
 0xd19   : > { %v1856_v25 = vmul.f32 %v5389_v18, %v6288_v14  ;;  %5390 = vrcp.f32 %v1848_v17  ;;  %v1633_v26 = vunpack.c.l.b16 %v1623_v23 }
 0xd1a   : > { %v1862_v28 = vpack.c.bf16 %v1857_v8, %v1857_v8  ;;  %5392 = vrcp.f32 %v1609_v10  ;;  %v1634_v35 = vunpack.c.l.b16 %v1624_v34 }
 0xd1b   : > { %v1861_v22 = vpack.c.bf16 %v1856_v25, %v1856_v25  ;;  %5394 = vrcp.f32 %v1606_v33 }
 0xd1c   : > { %v1872_v1 = vunpack.c.l.b16 %v1862_v28  ;;  %v1638_v40 = vpack.c.b16 %v1634_v35, %v1633_v26 }
 0xd1d   : > { %v1871_v21 = vunpack.c.l.b16 %v1861_v22 }
 0xd1f   : > { %v1875_v36 = vpack.c.b16 %v1872_v1, %v1871_v21  ;;  %v5391_v50 = vpop.eup %5390 }
 0xd20   : > { %v1858_v14 = vmul.f32 %v5391_v50, %v6299_v0  ;;  %v5393_v47 = vpop.eup %5392 }
 0xd21   : > { %5035 = vmatmul.msk.bf16.gmra.mxu2 %vm579_vm6, %v1875_v36  ;;  %v5395_v42 = vpop.eup %5394  ;;  %v1621_v43 = vmul.f32 %v5393_v47, %v6297_v5 }
 0xd22   : > { %v1863_v3 = vpack.c.bf16 %v1858_v14, %v1858_v14  ;;  %v1620_v45 = vmul.f32 %v5395_v42, %v6290_v27 }
 0xd23   : > { %v1642_v39 = vpop.permute.xlu0 %1641  ;;  %v1626_v32 = vpack.c.bf16 %v1621_v43, %v1621_v43 }
 0xd24   : > { %1668 = vmatpush.bf16.msrb.mxu0 %v1642_v39  ;;  %v1873_v24 = vunpack.c.l.b16 %v1863_v3  ;;  %v1625_v61 = vpack.c.bf16 %v1620_v45, %v1620_v45 }
 0xd25   : > { %v1636_v46 = vunpack.c.l.b16 %v1626_v32 }
 0xd26   : > { %v1876_v48 = vpack.c.b16 %v1873_v24, %v1873_v24  ;;  %v1635_v0 = vunpack.c.l.b16 %v1625_v61 }
 0xd27   : > { %5025 = vmatmul.msk.bf16.vlgmr.msrb.gmra.mxu0 %vm579_vm6, %v1638_v40 }
 0xd28   : > { %v1639_v30 = vpack.c.b16 %v1636_v46, %v1635_v0 }
 0xd2b   : > { %v1690_v56 = vpop.permute.xlu0 %1689 }
 0xd2c   : > { %v1701_v5 = vsel %vm670_vm7, %v1690_v56, 0 }
 0xd2d   : > { %1710 = vmatpush.bf16.msrb.mxu1 %v1701_v5 }
 0xd31   : > { %5036 = vmatmul.msk.bf16.gmra.mxu2 %vm579_vm6, %v1876_v48 }
 0xd37   : > { %5026 = vmatmul.msk.bf16.gmra.mxu0 %vm579_vm6, %v1639_v30 }
 0xd65   : > { %v1926_v55 = vpop.permute.xlu2 %1925 }
 0xd66   : > { %v1937_v49 = vsel %vm670_vm7, %v1926_v55, 0 }
 0xd67   : > { %1946 = vmatpush.bf16.msra.mxu0 %v1937_v49 }
 0xd88   : > { %v1612_v31 = vpop.xlane.xlu1 %1611 }
 0xd89   : > { %5396 = vrcp.f32 %v1612_v31 }
 0xd8f   : > { %v5397_v27 = vpop.eup %5396 }
 0xd90   : > { %v1622_v58 = vmul.f32 %v5397_v27, %v5381_v15 }
 0xd92   : > { %v1906_v16 = vpop.f32.mrf.mxu2  ;;  %v1627_v2 = vpack.c.bf16 %v1622_v58, %v1622_v58 }
 0xd94   : > { %v1637_v51 = vunpack.c.l.b16 %v1627_v2 }
 0xd96   : > { %v1640_v19 = vpack.c.b16 %v1637_v51, %v1637_v51 }
 0xd98   : > { %5027 = vmatmul.msk.bf16.gmra.mxu0 %vm579_vm6, %v1640_v19 }
 0xd9a   : > { %v1908_v63 = vpop.f32.mrf.mxu2 }
 0xd9b   : > { %v1920_v53 = vpack.c.bf16 %v1908_v63, %v1906_v16 }
 0xda4   : > { %v1911_v7 = vpop.f32.mrf.mxu2  ;;  %v1670_v33 = vpop.f32.mrf.mxu0 }
 0xda8   : > { %5037 = vmatmul.msk.bf16.vlgmr.msra.gmra.mxu0 %vm537_vm4, %v1920_v53 }
 0xdac   : > { %v1913_v54 = vpop.f32.mrf.mxu2  ;;  %v1672_v13 = vpop.f32.mrf.mxu0 }
 0xdad   : > { %v1684_v60 = vpack.c.bf16 %v1672_v13, %v1670_v33  ;;  %v1921_v15 = vpack.c.bf16 %v1913_v54, %v1911_v7 }
 0xdaf   : > { %5028 = vmatmul.msk.bf16.vlgmr.msrb.gmra.mxu1 %vm537_vm4, %v1684_v60 }
 0xdb4   : > { %v1916_v4 = vpop.f32.mrf.mxu2  ;;  %v1675_v52 = vpop.f32.mrf.mxu0 }
 0xdb5   : > { %v1922_v8 = vpack.c.bf16 %v1916_v4, %v1916_v4 }
 0xdb8   : > { %5038 = vmatmul.msk.bf16.gmra.mxu0 %vm537_vm4, %v1921_v15 }
 0xdbc   : > { %v1918_v17 = vpop.f32.mrf.mxu2  ;;  %v1677_v44 = vpop.f32.mrf.mxu0 }
 0xdbd   : > { %v1685_v18 = vpack.c.bf16 %v1677_v44, %v1675_v52 }
 0xdbf   : > { %5029 = vmatmul.msk.bf16.gmra.mxu1 %vm537_vm4, %v1685_v18 }
 0xdc8   : > { %5039 = vmatmul.msk.bf16.gmra.mxu0 %vm537_vm4, %v1922_v8 }
 0xe15   : > { %v1680_v9 = vpop.f32.mrf.mxu0 }
 0xe16   : > { %v1686_v25 = vpack.c.bf16 %v1680_v9, %v1680_v9 }
 0xe18   : > { %5030 = vmatmul.msk.bf16.gmra.mxu1 %vm537_vm4, %v1686_v25 }
 0xe1d   : > { %v1682_v28 = vpop.f32.mrf.mxu0 }
 0xe25   : > { %v1948_v29 = vpop.f32.mrf.mxu0 }
 0xe26   : > { %1967 = vrot.lane.b32.xlu0 %v1948_v29, %s5625_s16 }
 0xe2c   : > { %v1712_v22 = vpop.f32.mrf.mxu1 }
 0xe2d   : > { %v1950_v1 = vpop.f32.mrf.mxu0  ;;  %1731 = vrot.lane.b32.xlu1 %v1712_v22, %s5625_s16 }
 0xe34   : > { %v1714_v34 = vpop.f32.mrf.mxu1 }
 0xe35   : > { %v1953_v10 = vpop.f32.mrf.mxu0  ;;  %1733 = vrot.lane.b32.xlu0 %v1714_v34, %s5625_s16 }
 0xe36   : > { %1971 = vrot.lane.b32.xlu1 %v1953_v10, %s5625_s16 }
 0xe3c   : > { %v1717_v21 = vpop.f32.mrf.mxu1 }
 0xe3d   : > { %v1955_v23 = vpop.f32.mrf.mxu0  ;;  %1735 = vrot.lane.b32.xlu2 %v1717_v21, %s5625_s16  ;;  %1969 = vrot.lane.b32.xlu0 %v1950_v1, %s5625_s16 }
 0xe44   : > { %v1719_v36 = vpop.f32.mrf.mxu1 }
 0xe45   : > { %v1958_v50 = vpop.f32.mrf.mxu0  ;;  %1737 = vrot.lane.b32.xlu0 %v1719_v36, %s5625_s16  ;;  %1973 = vrot.lane.b32.xlu2 %v1955_v23, %s5625_s16 }
 0xe4d   : > { %v1960_v35 = vpop.f32.mrf.mxu0 }
 0xe95   : > { %v1722_v26 = vpop.f32.mrf.mxu1 }
 0xe96   : > { %1739 = vrot.lane.b32.xlu2 %v1722_v26, %s5625_s16 }
 0xe97   : > { %v1736_v24 = vpop.permute.xlu2 %1735 }
 0xe98   : > { %v1968_v39 = vpop.permute.xlu0 %1967  ;;  %v1748_v61 = vadd.f32 %v6202_v20, %v1736_v24 }
 0xe9d   : > { %v1724_v14 = vpop.f32.mrf.mxu1 }
 0xe9f   : > { %v1732_v40 = vpop.permute.xlu1 %1731  ;;  %v1974_v55 = vpop.permute.xlu2 %1973 }
 0xea0   : > { %v1746_v47 = vadd.f32 %v6202_v20, %v1732_v40 }
 0xea2   : > { %v1982_v3 = vadd.f32 %v1968_v39, %v1746_v47 }
 0xea4   : > { %1992 = vrot.lane.b32.xlu0 %v1982_v3, %s5624_s15 }
 0xea7   : > { %v1734_v42 = vpop.permute.xlu0 %1733 }
 0xea8   : > { %v1747_v43 = vadd.f32 %v6202_v20, %v1734_v42  ;;  %v1972_v48 = vpop.permute.xlu1 %1971 }
 0xea9   : > { %v1984_v0 = vadd.f32 %v1972_v48, %v1748_v61 }
 0xeac   : > { %1975 = vrot.lane.b32.xlu0 %v1958_v50, %s5625_s16 }
 0xeaf   : > { %v1970_v45 = vpop.permute.xlu0 %1969 }
 0xeb0   : > { %v1983_v32 = vadd.f32 %v1970_v45, %v1747_v43 }
 0xeb2   : > { %1994 = vrot.lane.b32.xlu1 %v1983_v32, %s5624_s15 }
 0xeb7   : > { %v1738_v46 = vpop.permute.xlu0 %1737 }
 0xeb8   : > { %v1749_v30 = vadd.f32 %v6202_v20, %v1738_v46 }
 0xeba   : > { %v1985_v49 = vadd.f32 %v1974_v55, %v1749_v30  ;;  %1996 = vrot.lane.b32.xlu1 %v1984_v0, %s5624_s15 }
 0xebc   : > { %1998 = vrot.lane.b32.xlu2 %v1985_v49, %s5624_s15 }
 0xef0   : > { %v1740_v56 = vpop.permute.xlu2 %1739 }
 0xef1   : > { %v1750_v16 = vadd.f32 %v6202_v20, %v1740_v56 }
 0xf16   : > { %v1993_v5 = vpop.permute.xlu0 %1992  ;;  %v1999_v58 = vpop.permute.xlu2 %1998 }
 0xf17   : > { %v2007_v31 = vadd.f32 %v1993_v5, %v6169_v37  ;;  %v2010_v2 = vadd.f32 %v1999_v58, %v6185_v6 }
 0xf19   : > { %v2012_v27 = vsel %vm337_vm2, %v2007_v31, 0.0  ;;  %v2021_v63 = vsel %vm337_vm2, %v2010_v2, 0.0 }
 0xf1a   : > { %2013 = vadd.xlane.f32.xlu0 %v2012_v27 }
 0xf1e   : > { %v1976_v51 = vpop.permute.xlu0 %1975 }
 0xf1f   : > { %v1986_v19 = vadd.f32 %v1976_v51, %v1750_v16 }
 0xf21   : > { %2000 = vrot.lane.b32.xlu2 %v1986_v19, %s5624_s15 }
 0xf22   : > { %2022 = vadd.xlane.f32.xlu0 %v2021_v63 }
 0xf24   : > { %v1995_v7 = vpop.permute.xlu1 %1994 }
 0xf25   : > { %v2008_v33 = vadd.f32 %v1995_v7, %v6172_v41 }
 0xf27   : > { %v2015_v37 = vsel %vm337_vm2, %v2008_v33, 0.0 }
 0xf28   : > { %2016 = vadd.xlane.f32.xlu1 %v2015_v37 }
 0xf2c   : > { %v1997_v53 = vpop.permute.xlu1 %1996 }
 0xf2d   : > { %v2009_v54 = vadd.f32 %v1997_v53, %v6182_v12 }
 0xf2f   : > { %v2018_v13 = vsel %vm337_vm2, %v2009_v54, 0.0 }
 0xf4a   : > { %2019 = vadd.xlane.f32.xlu2 %v2018_v13 }
 0xf7b   : > { %v2001_v6 = vpop.permute.xlu2 %2000 }
 0xf7c   : > { %v2011_v60 = vadd.f32 %v2001_v6, %v6194_v11 }
 0xf7e   : > { %v2024_v4 = vsel %vm337_vm2, %v2011_v60, 0.0 }
 0xf7f   : > { %2025 = vadd.xlane.f32.xlu1 %v2024_v4 }
 0xf8d   : > { %v2014_v52 = vpop.xlane.xlu0 %2013 }
 0xf8e   : > { %v2027_v15 = vmul.f32 %v2014_v52, %v5724_v38 }
 0xf90   : > { %v6367_v17 = vsub.f32 %v2007_v31, %v2027_v15 }
 0xf92   : > { %v2037_v41 = vmul.f32 %v6367_v17, %v6367_v17 }
 0xf94   : > { %v2042_v44 = vsel %vm337_vm2, %v2037_v41, 0.0 }
 0xf95   : > { %2043 = vadd.xlane.f32.xlu1 %v2042_v44  ;;  %v2023_v12 = vpop.xlane.xlu0 %2022 }
 0xf96   : > { %v2030_v11 = vmul.f32 %v2023_v12, %v5724_v38 }
 0xf98   : > { %v6378_v28 = vsub.f32 %v2010_v2, %v2030_v11 }
 0xf9a   : > { %v2040_v22 = vmul.f32 %v6378_v28, %v6378_v28 }
 0xf9b   : > { %v2017_v18 = vpop.xlane.xlu1 %2016 }
 0xf9c   : > { %v2028_v8 = vmul.f32 %v2017_v18, %v5724_v38  ;;  %v2051_v1 = vsel %vm337_vm2, %v2040_v22, 0.0 }
 0xf9e   : > { %v6374_v9 = vsub.f32 %v2008_v33, %v2028_v8 }
 0xfa0   : > { %v2038_v25 = vmul.f32 %v6374_v9, %v6374_v9 }
 0xfa2   : > { %v2045_v29 = vsel %vm337_vm2, %v2038_v25, 0.0 }
 0xfa3   : > { %2046 = vadd.xlane.f32.xlu0 %v2045_v29 }
 0xfab   : > { %2052 = vadd.xlane.f32.xlu0 %v2051_v1 }
 0xfae   : > { %2122 = vrot.lane.b32.xlu1 %v6202_v20, %s5626_s17 }
 0xfb6   : > { %2145 = vrot.lane.b32.xlu1 %v6202_v20, %s5627_s18 }
 0xfbd   : > { %v2020_v34 = vpop.xlane.xlu2 %2019 }
 0xfbe   : > { %v2029_v10 = vmul.f32 %v2020_v34, %v5724_v38  ;;  %2286 = vrot.lane.b32.xlu1 %v6202_v20, %s5628_s19 }
 0xfbf   : > { %2142 = vrot.lane.b32.xlu0 %v6158_v57, %s5626_s17 }
 0xfc0   : > { %v6393_v21 = vsub.f32 %v2009_v54, %v2029_v10 }
 0xfc2   : > { %v2039_v23 = vmul.f32 %v6393_v21, %v6393_v21 }
 0xfc4   : > { %v2048_v36 = vsel %vm337_vm2, %v2039_v23, 0.0 }
 0xfc5   : > { %2049 = vadd.xlane.f32.xlu2 %v2048_v36 }
 0xfc7   : > { %2283 = vrot.lane.b32.xlu0 %v6158_v57, %s5625_s16 }
 0xfdd   : > { %2130 = vrot.lane.b32.xlu2 %v6202_v20, %s5625_s16 }
 0xff2   : > { %v2026_v50 = vpop.xlane.xlu1 %2025 }
 0xff3   : > { %v2031_v35 = vmul.f32 %v2026_v50, %v5724_v38 }
 0xff5   : > { %v6403_v26 = vsub.f32 %v2011_v60, %v2031_v35 }
 0xff7   : > { %v2041_v14 = vmul.f32 %v6403_v26, %v6403_v26 }
 0xff9   : > { %v2054_v39 = vsel %vm337_vm2, %v2041_v14, 0.0 }
0x1006   : > { %2055 = vadd.xlane.f32.xlu2 %v2054_v39 }
0x1008   : > { %v2044_v40 = vpop.xlane.xlu1 %2043 }
0x1009   : > { %v2057_v47 = vmul.f32 %v2044_v40, %v5724_v38 }
0x100b   : > { %v2062_v3 = vadd.f32 1e-05, %v2057_v47 }
0x100d   : > { %5398 = vrsqrt.f32 %v2062_v3  ;;  %vm2073_vm12 = vweird.f32 %v2062_v3 }
0x1013   : > { %v5399_v20 = vpop.eup %5398 }
0x1014   : > { %v2068_v32 = vmul.f32 %v5399_v20, %v2062_v3  ;;  %vm2074_vm10 = vweird.f32 %v5399_v20 }
0x1015   : > { %vm2075_vm13 = vmor %vm2073_vm12, %vm2074_vm10 }
0x1016   : > { %v2047_v42 = vpop.xlane.xlu0 %2046  ;;  %v2069_v46 = vmul.f32 %v5399_v20, %v2068_v32 }
0x1017   : > { %v2058_v57 = vmul.f32 %v2047_v42, %v5724_v38 }
0x1018   : > { %v2070_v55 = vmul.f32 0.5, %v2069_v46 }
0x1019   : > { %v2063_v43 = vadd.f32 1e-05, %v2058_v57 }
0x101a   : > { %v2071_v56 = vsub.f32 1.5, %v2070_v55 }
0x101b   : > { %5400 = vrsqrt.f32 %v2063_v43  ;;  %vm2083_vm14 = vweird.f32 %v2063_v43 }
0x101c   : > { %v2072_v58 = vmul.f32 %v5399_v20, %v2071_v56 }
0x101e   : > { %v2053_v45 = vpop.xlane.xlu0 %2052  ;;  %v2076_v51 = vsel %vm2075_vm13, %v5399_v20, %v2072_v58 }
0x101f   : > { %v2060_v61 = vmul.f32 %v2053_v45, %v5724_v38  ;;  %v2117_v37 = vmul.f32 %v2076_v51, %v6367_v17 }
0x1020   : > { %v6414_v13 = vpop.permute.xlu1 %2122 }
0x1021   : > { %v5401_v24 = vpop.eup %5400  ;;  %v2065_v30 = vadd.f32 1e-05, %v2060_v61  ;;  %v2125_v60 = vmul.f32 %v6414_v13, %v2117_v37 }
0x1022   : > { %v2078_v48 = vmul.f32 %v5401_v24, %v2063_v43  ;;  %vm2084_vm11 = vweird.f32 %v5401_v24 }
0x1023   : > { %5402 = vrsqrt.f32 %v2065_v30  ;;  %vm2085_vm15 = vmor %vm2083_vm14, %vm2084_vm11  ;;  %vm2103_vm1 = vweird.f32 %v2065_v30 }
0x1024   : > { %v2079_v0 = vmul.f32 %v5401_v24, %v2078_v48 }
0x1026   : > { %v2080_v49 = vmul.f32 0.5, %v2079_v0 }
0x1028   : > { %v2081_v5 = vsub.f32 1.5, %v2080_v49  ;;  %v6451_v61 = vpop.permute.xlu1 %2145 }
0x1029   : > { %v5403_v27 = vpop.eup %5402 }
0x102a   : > { %v2082_v16 = vmul.f32 %v5401_v24, %v2081_v5  ;;  %v2098_v2 = vmul.f32 %v5403_v27, %v2065_v30  ;;  %vm2104_vm0 = vweird.f32 %v5403_v27 }
0x102b   : > { %vm2105_vm3 = vmor %vm2103_vm1, %vm2104_vm0 }
0x102c   : > { %v2086_v19 = vsel %vm2085_vm15, %v5401_v24, %v2082_v16  ;;  %v2099_v33 = vmul.f32 %v5403_v27, %v2098_v2 }
0x102d   : > { %v2118_v53 = vmul.f32 %v2086_v19, %v6374_v9 }
0x102e   : > { %v2100_v6 = vmul.f32 0.5, %v2099_v33 }
0x102f   : > { %v2126_v4 = vmul.f32 %v6414_v13, %v2118_v53 }
0x1030   : > { %v2101_v17 = vsub.f32 1.5, %v2100_v6 }
0x1031   : > { %v2143_v31 = vpop.permute.xlu0 %2142 }
0x1032   : > { %2164 = vmatpush.bf16.msra.mxu1 %v2143_v31  ;;  %v2102_v8 = vmul.f32 %v5403_v27, %v2101_v17 }
0x1034   : > { %v2106_v25 = vsel %vm2105_vm3, %v5403_v27, %v2102_v8 }
0x1035   : > { %v2120_v1 = vmul.f32 %v2106_v25, %v6378_v28 }
0x1037   : > { %v2128_v36 = vmul.f32 %v6414_v13, %v2120_v1 }
0x1038   : > { %v2050_v63 = vpop.xlane.xlu2 %2049 }
0x1039   : > { %v2059_v7 = vmul.f32 %v2050_v63, %v5724_v38  ;;  %v2284_v49 = vpop.permute.xlu0 %2283 }
0x103a   : > { %2305 = vmatpush.bf16.msrb.mxu3 %v2284_v49 }
0x103b   : > { %v2064_v54 = vadd.f32 1e-05, %v2059_v7 }
0x103d   : > { %5404 = vrsqrt.f32 %v2064_v54  ;;  %vm2093_vm8 = vweird.f32 %v2064_v54 }
0x1040   : > { %v6418_v52 = vpop.permute.xlu2 %2130 }
0x1041   : > { %v6421_v15 = vadd.f32 %v6418_v52, %v2125_v60  ;;  %v6424_v41 = vadd.f32 %v6418_v52, %v2126_v4  ;;  %v6437_v35 = vadd.f32 %v6418_v52, %v2128_v36 }
0x1043   : > { %v5405_v44 = vpop.eup %5404  ;;  %v2138_v12 = vpack.c.bf16 %v6424_v41, %v6421_v15 }
0x1044   : > { %v2088_v18 = vmul.f32 %v5405_v44, %v2064_v54  ;;  %vm2094_vm5 = vweird.f32 %v5405_v44 }
0x1045   : > { %5040 = vmatmul.msk.bf16.vlgmr.msra.gmra.mxu1 %vm337_vm2, %v2138_v12  ;;  %vm2095_vm9 = vmor %vm2093_vm8, %vm2094_vm5 }
0x1046   : > { %v2089_v11 = vmul.f32 %v5405_v44, %v2088_v18 }
0x1048   : > { %v2090_v9 = vmul.f32 0.5, %v2089_v11 }
0x104a   : > { %v2091_v29 = vsub.f32 1.5, %v2090_v9 }
0x104c   : > { %v2092_v22 = vmul.f32 %v5405_v44, %v2091_v29 }
0x104e   : > { %v2096_v34 = vsel %vm2095_vm9, %v5405_v44, %v2092_v22 }
0x104f   : > { %v2119_v10 = vmul.f32 %v2096_v34, %v6393_v21 }
0x1051   : > { %v2127_v23 = vmul.f32 %v6414_v13, %v2119_v10 }
0x1053   : > { %v6434_v50 = vadd.f32 %v6418_v52, %v2127_v23 }
0x1055   : > { %v2139_v14 = vpack.c.bf16 %v6437_v35, %v6434_v50 }
0x1057   : > { %5041 = vmatmul.msk.bf16.gmra.mxu1 %vm337_vm2, %v2139_v14 }
0x1079   : > { %v2056_v28 = vpop.xlane.xlu2 %2055 }
0x107a   : > { %v2061_v39 = vmul.f32 %v2056_v28, %v5724_v38 }
0x107c   : > { %v2066_v40 = vadd.f32 1e-05, %v2061_v39 }
0x107e   : > { %5406 = vrsqrt.f32 %v2066_v40  ;;  %vm2113_vm11 = vweird.f32 %v2066_v40 }
0x1084   : > { %v5407_v21 = vpop.eup %5406 }
0x1085   : > { %v2108_v47 = vmul.f32 %v5407_v21, %v2066_v40  ;;  %vm2114_vm10 = vweird.f32 %v5407_v21 }
0x1086   : > { %vm2115_vm12 = vmor %vm2113_vm11, %vm2114_vm10 }
0x1087   : > { %v2109_v3 = vmul.f32 %v5407_v21, %v2108_v47 }
0x1089   : > { %v2110_v42 = vmul.f32 0.5, %v2109_v3 }
0x108b   : > { %v2111_v57 = vsub.f32 1.5, %v2110_v42 }
0x108d   : > { %v2112_v43 = vmul.f32 %v5407_v21, %v2111_v57 }
0x108f   : > { %v2116_v20 = vsel %vm2115_vm12, %v5407_v21, %v2112_v43 }
0x1090   : > { %v2121_v24 = vmul.f32 %v2116_v20, %v6403_v26 }
0x1092   : > { %v2129_v45 = vmul.f32 %v6414_v13, %v2121_v24 }
0x1094   : > { %v6446_v32 = vadd.f32 %v6418_v52, %v2129_v45 }
0x1096   : > { %v2140_v48 = vpack.c.bf16 %v6446_v32, %v6446_v32 }
0x1098   : > { %5042 = vmatmul.msk.bf16.gmra.mxu1 %vm337_vm2, %v2140_v48 }
0x10c2   : > { %v2166_v46 = vpop.f32.mrf.mxu1 }
0x10c3   : > { %v2167_v0 = vadd.f32 %v2166_v46, %v6451_v61 }
0x10c5   : > { %v5043_v30 = vmul.f32 -1.442695, %v2167_v0 }
0x10c7   : > { %5408 = vpow2.f32 %v5043_v30 }
0x10ca   : > { %v2168_v55 = vpop.f32.mrf.mxu1 }
0x10cb   : > { %v2169_v26 = vadd.f32 %v2168_v55, %v6451_v61 }
0x10cd   : > { %v5409_v56 = vpop.eup %5408  ;;  %v5044_v5 = vmul.f32 -1.442695, %v2169_v26 }
0x10ce   : > { %v2195_v31 = vadd.f32 1.0, %v5409_v56 }
0x10cf   : > { %5410 = vpow2.f32 %v5044_v5 }
0x10d0   : > { %5412 = vrcp.f32 %v2195_v31  ;;  %v2211_v44 = vand.u32 2147483648, %v2195_v31  ;;  %vm2205_vm14 = vweird.f32 %v2195_v31  ;;  %v2209_v18 = vand.u32 2147483647, %v2195_v31 }
0x10d2   : > { %v2212_v22 = vor.u32 1.1754944e-38, %v2211_v44  ;;  %vm2210_vm1 = vcmp.eq.f32.partialorder %v2209_v18, 8.507059e+37 }
0x10d4   : > { %v2171_v27 = vpop.f32.mrf.mxu1 }
0x10d5   : > { %v5411_v58 = vpop.eup %5410  ;;  %v6456_v16 = vadd.f32 %v2171_v27, %v6451_v61 }
0x10d6   : > { %v5413_v2 = vpop.eup %5412  ;;  %v2196_v51 = vadd.f32 1.0, %v5411_v58 }
0x10d7   : > { %v2201_v19 = vmul.f32 %v5413_v2, %v2195_v31  ;;  %v5045_v63 = vmul.f32 -1.442695, %v6456_v16  ;;  %vm2206_vm13 = vweird.f32 %v5413_v2 }
0x10d8   : > { %5414 = vrcp.f32 %v2196_v51  ;;  %vm2207_vm15 = vmor %vm2205_vm14, %vm2206_vm13  ;;  %v2226_v11 = vand.u32 2147483648, %v2196_v51  ;;  %v2224_v29 = vand.u32 2147483647, %v2196_v51  ;;  %vm2220_vm3 = vweird.f32 %v2196_v51 }
0x10d9   : > { %v2202_v7 = vsub.f32 1.0, %v2201_v19  ;;  %5416 = vpow2.f32 %v5045_v63 }
0x10da   : > { %v2227_v10 = vor.u32 1.1754944e-38, %v2226_v11  ;;  %vm2225_vm8 = vcmp.eq.f32.partialorder %v2224_v29, 8.507059e+37 }
0x10db   : > { %v2203_v33 = vmul.f32 %v5413_v2, %v2202_v7 }
0x10dc   : > { %v2173_v37 = vpop.f32.mrf.mxu1 }
0x10dd   : > { %v6460_v53 = vadd.f32 %v2173_v37, %v6451_v61  ;;  %v2204_v60 = vadd.f32 %v5413_v2, %v2203_v33 }
0x10de   : > { %v5415_v54 = vpop.eup %5414 }
0x10df   : > { %v5417_v6 = vpop.eup %5416  ;;  %v2216_v4 = vmul.f32 %v5415_v54, %v2196_v51  ;;  %v5046_v17 = vmul.f32 -1.442695, %v6460_v53  ;;  %v2208_v9 = vsel %vm2207_vm15, %v5413_v2, %v2204_v60  ;;  %vm2221_vm0 = vweird.f32 %v5415_v54 }
0x10e0   : > { %v2197_v12 = vadd.f32 1.0, %v5417_v6  ;;  %v2213_v34 = vsel %vm2210_vm1, %v2212_v22, %v2208_v9  ;;  %vm2222_vm5 = vmor %vm2220_vm3, %vm2221_vm0 }
0x10e1   : > { %v2217_v8 = vsub.f32 1.0, %v2216_v4  ;;  %5418 = vpow2.f32 %v5046_v17  ;;  %v2275_v40 = vmul.f32 %v2213_v34, %v2167_v0 }
0x10e2   : > { %5420 = vrcp.f32 %v2197_v12  ;;  %v2241_v45 = vand.u32 2147483648, %v2197_v12  ;;  %vm2235_vm10 = vweird.f32 %v2197_v12  ;;  %v2239_v48 = vand.u32 2147483647, %v2197_v12 }
0x10e3   : > { %v2218_v25 = vmul.f32 %v5415_v54, %v2217_v8 }
0x10e4   : > { %vm2240_vm13 = vcmp.eq.f32.partialorder %v2239_v48, 8.507059e+37 }
0x10e5   : > { %v2219_v1 = vadd.f32 %v5415_v54, %v2218_v25  ;;  %v2287_v25 = vpop.permute.xlu1 %2286 }
0x10e7   : > { %v5419_v23 = vpop.eup %5418  ;;  %v2223_v36 = vsel %vm2222_vm5, %v5415_v54, %v2219_v1 }
0x10e8   : > { %v5421_v14 = vpop.eup %5420  ;;  %v2228_v28 = vsel %vm2225_vm8, %v2227_v10, %v2223_v36  ;;  %v2198_v39 = vadd.f32 1.0, %v5419_v23 }
0x10e9   : > { %v2276_v21 = vmul.f32 %v2228_v28, %v2169_v26  ;;  %v2231_v47 = vmul.f32 %v5421_v14, %v2197_v12  ;;  %vm2236_vm9 = vweird.f32 %v5421_v14  ;;  %v2242_v26 = vor.u32 1.1754944e-38, %v2241_v45 }
0x10ea   : > { %5422 = vrcp.f32 %v2198_v39  ;;  %vm2237_vm11 = vmor %vm2235_vm10, %vm2236_vm9  ;;  %v2256_v30 = vand.u32 2147483648, %v2198_v39  ;;  %v2254_v49 = vand.u32 2147483647, %v2198_v39  ;;  %vm2250_vm14 = vweird.f32 %v2198_v39 }
0x10eb   : > { %v2280_v3 = vpack.c.bf16 %v2276_v21, %v2275_v40  ;;  %v2232_v42 = vsub.f32 1.0, %v2231_v47 }
0x10ec   : > { %v2257_v31 = vor.u32 1.1754944e-38, %v2256_v30  ;;  %vm2255_vm0 = vcmp.eq.f32.partialorder %v2254_v49, 8.507059e+37 }
0x10ed   : > { %v2233_v57 = vmul.f32 %v5421_v14, %v2232_v42  ;;  %5048 = vmatmul.msk.bf16.vlgmr.msrb.gmra.mxu3 %vm337_vm2, %v2280_v3 }
0x10ef   : > { %v2234_v20 = vadd.f32 %v5421_v14, %v2233_v57 }
0x10f0   : > { %v5423_v43 = vpop.eup %5422 }
0x10f1   : > { %v2246_v24 = vmul.f32 %v5423_v43, %v2198_v39  ;;  %v2238_v55 = vsel %vm2237_vm11, %v5421_v14, %v2234_v20  ;;  %vm2251_vm12 = vweird.f32 %v5423_v43 }
0x10f2   : > { %v2243_v5 = vsel %vm2240_vm13, %v2242_v26, %v2238_v55  ;;  %vm2252_vm15 = vmor %vm2250_vm14, %vm2251_vm12 }
0x10f3   : > { %v2247_v46 = vsub.f32 1.0, %v2246_v24  ;;  %v2277_v2 = vmul.f32 %v2243_v5, %v6456_v16 }
0x10f5   : > { %v2248_v0 = vmul.f32 %v5423_v43, %v2247_v46 }
0x10f7   : > { %v2249_v56 = vadd.f32 %v5423_v43, %v2248_v0 }
0x10f9   : > { %v2253_v27 = vsel %vm2252_vm15, %v5423_v43, %v2249_v56 }
0x10fa   : > { %v2258_v58 = vsel %vm2255_vm0, %v2257_v31, %v2253_v27 }
0x10fb   : > { %v2278_v51 = vmul.f32 %v2258_v58, %v6460_v53 }
0x10fd   : > { %v2281_v19 = vpack.c.bf16 %v2278_v51, %v2277_v2 }
0x10ff   : > { %5049 = vmatmul.msk.bf16.gmra.mxu3 %vm337_vm2, %v2281_v19 }
0x1115   : > { %v2176_v63 = vpop.f32.mrf.mxu1 }
0x1116   : > { %v2177_v7 = vadd.f32 %v2176_v63, %v6451_v61 }
0x1118   : > { %v5047_v33 = vmul.f32 -1.442695, %v2177_v7 }
0x111a   : > { %5424 = vpow2.f32 %v5047_v33 }
0x111d   : > { %v2178_v37 = vpop.f32.mrf.mxu1 }
0x1120   : > { %v5425_v54 = vpop.eup %5424 }
0x1121   : > { %v2199_v6 = vadd.f32 1.0, %v5425_v54 }
0x1123   : > { %5426 = vrcp.f32 %v2199_v6  ;;  %v2271_v44 = vand.u32 2147483648, %v2199_v6  ;;  %v2269_v16 = vand.u32 2147483647, %v2199_v6  ;;  %vm2265_vm3 = vweird.f32 %v2199_v6 }
0x1125   : > { %v2272_v18 = vor.u32 1.1754944e-38, %v2271_v44  ;;  %vm2270_vm8 = vcmp.eq.f32.partialorder %v2269_v16, 8.507059e+37  ;;  %v6514_v44 = vld [vmem:[%s7618_s3 + $0x28] sm:$0xff] }
0x1129   : > { %v5427_v60 = vpop.eup %5426 }
0x112a   : > { %v2261_v4 = vmul.f32 %v5427_v60, %v2199_v6  ;;  %vm2266_vm1 = vweird.f32 %v5427_v60 }
0x112b   : > { %vm2267_vm5 = vmor %vm2265_vm3, %vm2266_vm1 }
0x112c   : > { %v2262_v17 = vsub.f32 1.0, %v2261_v4 }
0x112e   : > { %v2263_v12 = vmul.f32 %v5427_v60, %v2262_v17  ;;  %v6509_v17 = vld [vmem:[%s7618_s3 + $0x20] sm:$0xff] }
0x112f   : > { %v6518_v16 = vpack.c.bf16 %v6514_v44, %v6509_v17 }
0x1130   : > { %v2264_v53 = vadd.f32 %v5427_v60, %v2263_v12 }
0x1131   : > { %2474 = vmatpush.bf16.msrb.mxu2 %v6518_v16 }
0x1132   : > { %v2268_v8 = vsel %vm2267_vm5, %v5427_v60, %v2264_v53 }
0x1133   : > { %v2273_v61 = vsel %vm2270_vm8, %v2272_v18, %v2268_v8 }
0x1134   : > { %v2279_v11 = vmul.f32 %v2273_v61, %v2177_v7 }
0x1136   : > { %v2282_v9 = vpack.c.bf16 %v2279_v11, %v2279_v11 }
0x1138   : > { %5050 = vmatmul.msk.bf16.gmra.mxu3 %vm337_vm2, %v2282_v9 }
0x1170   : > { %v2307_v29 = vpop.f32.mrf.mxu3 }
0x1171   : > { %v2308_v22 = vadd.f32 %v2307_v29, %v2287_v25 }
0x1173   : > { %v2321_v1 = vadd.f32 %v2308_v22, %v6421_v15 }
0x1175   : > { %v2326_v34 = vsel %vm337_vm2, %v2321_v1, 0.0 }
0x1176   : > { %2327 = vadd.xlane.f32.xlu0 %v2326_v34 }
0x1178   : > { %v2309_v10 = vpop.f32.mrf.mxu3 }
0x1179   : > { %v2310_v23 = vadd.f32 %v2309_v10, %v2287_v25 }
0x117b   : > { %v2322_v36 = vadd.f32 %v2310_v23, %v6424_v41 }
0x117d   : > { %v2329_v14 = vsel %vm337_vm2, %v2322_v36, 0.0 }
0x117e   : > { %2330 = vadd.xlane.f32.xlu1 %v2329_v14 }
0x1182   : > { %v2312_v28 = vpop.f32.mrf.mxu3 }
0x1183   : > { %v2313_v39 = vadd.f32 %v2312_v28, %v2287_v25 }
0x1185   : > { %v2323_v40 = vadd.f32 %v2313_v39, %v6434_v50 }
0x1187   : > { %v2332_v21 = vsel %vm337_vm2, %v2323_v40, 0.0 }
0x1188   : > { %2333 = vadd.xlane.f32.xlu2 %v2332_v21 }
0x118a   : > { %v2314_v47 = vpop.f32.mrf.mxu3 }
0x118b   : > { %v2315_v3 = vadd.f32 %v2314_v47, %v2287_v25 }
0x118d   : > { %v2324_v15 = vadd.f32 %v2315_v3, %v6437_v35 }
0x118f   : > { %v2335_v42 = vsel %vm337_vm2, %v2324_v15, 0.0 }
0x1190   : > { %2336 = vadd.xlane.f32.xlu2 %v2335_v42 }
0x11bb   : > { %v2317_v57 = vpop.f32.mrf.mxu3 }
0x11bc   : > { %v2318_v43 = vadd.f32 %v2317_v57, %v2287_v25 }
0x11be   : > { %v2325_v41 = vadd.f32 %v2318_v43, %v6446_v32 }
0x11c0   : > { %v2338_v20 = vsel %vm337_vm2, %v2325_v41, 0.0 }
0x11c1   : > { %2339 = vadd.xlane.f32.xlu0 %v2338_v20 }
0x11c3   : > { %v2319_v24 = vpop.f32.mrf.mxu3 }
0x11e9   : > { %v2328_v45 = vpop.xlane.xlu0 %2327 }
0x11ea   : > { %v2341_v50 = vmul.f32 %v2328_v45, %v5724_v38 }
0x11ec   : > { %v2346_v48 = vsub.f32 %v2321_v1, %v2341_v50 }
0x11ee   : > { %v2351_v46 = vmul.f32 %v2346_v48, %v2346_v48 }
0x11f0   : > { %v2356_v30 = vsel %vm337_vm2, %v2351_v46, 0.0 }
0x11f1   : > { %v2331_v55 = vpop.xlane.xlu1 %2330  ;;  %2357 = vadd.xlane.f32.xlu2 %v2356_v30 }
0x11f2   : > { %v2342_v35 = vmul.f32 %v2331_v55, %v5724_v38 }
0x11f4   : > { %v6482_v0 = vsub.f32 %v2322_v36, %v2342_v35 }
0x11f6   : > { %v2352_v32 = vmul.f32 %v6482_v0, %v6482_v0 }
0x11f8   : > { %v2359_v49 = vsel %vm337_vm2, %v2352_v32, 0.0 }
0x11f9   : > { %2360 = vadd.xlane.f32.xlu1 %v2359_v49 }
0x11fb   : > { %v2334_v26 = vpop.xlane.xlu2 %2333 }
0x11fc   : > { %v2343_v56 = vmul.f32 %v2334_v26, %v5724_v38 }
0x11fe   : > { %v6488_v5 = vsub.f32 %v2323_v40, %v2343_v56 }
0x1200   : > { %v2353_v31 = vmul.f32 %v6488_v5, %v6488_v5 }
0x1202   : > { %v2362_v27 = vsel %vm337_vm2, %v2353_v31, 0.0 }
0x1203   : > { %v2337_v58 = vpop.xlane.xlu2 %2336  ;;  %2363 = vadd.xlane.f32.xlu0 %v2362_v27 }
0x1204   : > { %v2344_v2 = vmul.f32 %v2337_v58, %v5724_v38 }
0x1206   : > { %v6494_v51 = vsub.f32 %v2324_v15, %v2344_v2 }
0x1208   : > { %v2354_v19 = vmul.f32 %v6494_v51, %v6494_v51 }
0x120a   : > { %v2365_v63 = vsel %vm337_vm2, %v2354_v19, 0.0 }
0x120b   : > { %2366 = vadd.xlane.f32.xlu2 %v2365_v63 }
0x1234   : > { %v2340_v7 = vpop.xlane.xlu0 %2339 }
0x1235   : > { %v2345_v33 = vmul.f32 %v2340_v7, %v5724_v38 }
0x1237   : > { %v6500_v37 = vsub.f32 %v2325_v41, %v2345_v33 }
0x1239   : > { %v2355_v54 = vmul.f32 %v6500_v37, %v6500_v37 }
0x123b   : > { %v2368_v6 = vsel %vm337_vm2, %v2355_v54, 0.0 }
0x123c   : > { %2369 = vadd.xlane.f32.xlu1 %v2368_v6 }
0x1264   : > { %v2358_v60 = vpop.xlane.xlu2 %2357 }
0x1265   : > { %v2371_v4 = vmul.f32 %v2358_v60, %v5724_v38 }
0x1267   : > { %v2376_v12 = vadd.f32 1e-05, %v2371_v4 }
0x1269   : > { %5428 = vrsqrt.f32 %v2376_v12  ;;  %vm2387_vm10 = vweird.f32 %v2376_v12 }
0x126c   : > { %v2361_v53 = vpop.xlane.xlu1 %2360 }
0x126d   : > { %v2372_v18 = vmul.f32 %v2361_v53, %v5724_v38 }
0x126f   : > { %v5429_v8 = vpop.eup %5428  ;;  %v2377_v61 = vadd.f32 1e-05, %v2372_v18 }
0x1270   : > { %v2382_v11 = vmul.f32 %v5429_v8, %v2376_v12  ;;  %vm2388_vm9 = vweird.f32 %v5429_v8 }
0x1271   : > { %5430 = vrsqrt.f32 %v2377_v61  ;;  %vm2389_vm11 = vmor %vm2387_vm10, %vm2388_vm9  ;;  %vm2397_vm13 = vweird.f32 %v2377_v61 }
0x1272   : > { %v2383_v9 = vmul.f32 %v5429_v8, %v2382_v11 }
0x1274   : > { %v2384_v25 = vmul.f32 0.5, %v2383_v9 }
0x1276   : > { %v2385_v29 = vsub.f32 1.5, %v2384_v25  ;;  %v2364_v22 = vpop.xlane.xlu0 %2363 }
0x1277   : > { %v5431_v1 = vpop.eup %5430  ;;  %v2373_v34 = vmul.f32 %v2364_v22, %v5724_v38 }
0x1278   : > { %v2386_v10 = vmul.f32 %v5429_v8, %v2385_v29  ;;  %v2392_v23 = vmul.f32 %v5431_v1, %v2377_v61  ;;  %vm2398_vm12 = vweird.f32 %v5431_v1 }
0x1279   : > { %v2378_v36 = vadd.f32 1e-05, %v2373_v34  ;;  %vm2399_vm14 = vmor %vm2397_vm13, %vm2398_vm12 }
0x127a   : > { %v2393_v14 = vmul.f32 %v5431_v1, %v2392_v23  ;;  %v2390_v28 = vsel %vm2389_vm11, %v5429_v8, %v2386_v10 }
0x127b   : > { %5432 = vrsqrt.f32 %v2378_v36  ;;  %v2431_v47 = vmul.f32 %v2390_v28, %v2346_v48  ;;  %vm2407_vm0 = vweird.f32 %v2378_v36 }
0x127c   : > { %v2394_v39 = vmul.f32 0.5, %v2393_v14 }
0x127d   : > { %v2436_v20 = vmul.f32 %v2431_v47, %v6414_v13 }
0x127e   : > { %v2395_v40 = vsub.f32 1.5, %v2394_v39  ;;  %v2367_v21 = vpop.xlane.xlu2 %2366 }
0x127f   : > { %v2374_v3 = vmul.f32 %v2367_v21, %v5724_v38  ;;  %v6528_v48 = vadd.f32 %v2436_v20, %v6418_v52 }
0x1280   : > { %v2396_v15 = vmul.f32 %v5431_v1, %v2395_v40 }
0x1281   : > { %v5433_v42 = vpop.eup %5432  ;;  %v2379_v57 = vadd.f32 1e-05, %v2374_v3 }
0x1282   : > { %v2400_v43 = vsel %vm2399_vm14, %v5431_v1, %v2396_v15  ;;  %v2402_v41 = vmul.f32 %v5433_v42, %v2378_v36  ;;  %vm2408_vm15 = vweird.f32 %v5433_v42  ;;  %v6561_v36 = vld [vmem:[%s7619_s4 + $0x2] ss:$0 sm:$0xff] }
0x1283   : > { %v2432_v24 = vmul.f32 %v2400_v43, %v6482_v0  ;;  %5434 = vrsqrt.f32 %v2379_v57  ;;  %vm2409_vm1 = vmor %vm2407_vm0, %vm2408_vm15  ;;  %vm2417_vm5 = vweird.f32 %v2379_v57 }
0x1284   : > { %v2403_v45 = vmul.f32 %v5433_v42, %v2402_v41 }
0x1285   : > { %v2437_v50 = vmul.f32 %v2432_v24, %v6414_v13 }
0x1286   : > { %v2404_v46 = vmul.f32 0.5, %v2403_v45 }
0x1287   : > { %v6531_v30 = vadd.f32 %v2437_v50, %v6418_v52 }
0x1288   : > { %v2405_v55 = vsub.f32 1.5, %v2404_v46 }
0x1289   : > { %v5435_v35 = vpop.eup %5434  ;;  %v2451_v32 = vpack.c.bf16 %v6531_v30, %v6528_v48 }
0x128a   : > { %v2406_v49 = vmul.f32 %v5433_v42, %v2405_v55  ;;  %v2412_v26 = vmul.f32 %v5435_v35, %v2379_v57  ;;  %vm2418_vm3 = vweird.f32 %v5435_v35 }
0x128b   : > { %5054 = vmatmul.msk.bf16.vlgmr.msrb.gmra.mxu2 %vm337_vm2, %v2451_v32  ;;  %vm2419_vm8 = vmor %vm2417_vm5, %vm2418_vm3 }
0x128c   : > { %v2413_v0 = vmul.f32 %v5435_v35, %v2412_v26  ;;  %v2410_v56 = vsel %vm2409_vm1, %v5433_v42, %v2406_v49 }
0x128d   : > { %v2433_v58 = vmul.f32 %v2410_v56, %v6488_v5 }
0x128e   : > { %v2414_v31 = vmul.f32 0.5, %v2413_v0 }
0x128f   : > { %v2438_v7 = vmul.f32 %v2433_v58, %v6414_v13 }
0x1290   : > { %v2415_v27 = vsub.f32 1.5, %v2414_v31 }
0x1291   : > { %v6541_v54 = vadd.f32 %v2438_v7, %v6418_v52 }
0x1292   : > { %v2416_v2 = vmul.f32 %v5435_v35, %v2415_v27 }
0x1294   : > { %v2420_v19 = vsel %vm2419_vm8, %v5435_v35, %v2416_v2 }
0x1295   : > { %v2434_v63 = vmul.f32 %v2420_v19, %v6494_v51 }
0x1297   : > { %v2439_v33 = vmul.f32 %v2434_v63, %v6414_v13 }
0x1299   : > { %v6544_v6 = vadd.f32 %v2439_v33, %v6418_v52 }
0x129b   : > { %v2452_v60 = vpack.c.bf16 %v6544_v6, %v6541_v54 }
0x129d   : > { %5055 = vmatmul.msk.bf16.gmra.mxu2 %vm337_vm2, %v2452_v60 }
0x12af   : > { %v2370_v5 = vpop.xlane.xlu1 %2369 }
0x12b0   : > { %v2375_v4 = vmul.f32 %v2370_v5, %v5724_v38 }
0x12b2   : > { %v2380_v12 = vadd.f32 1e-05, %v2375_v4 }
0x12b4   : > { %5436 = vrsqrt.f32 %v2380_v12  ;;  %vm2427_vm10 = vweird.f32 %v2380_v12 }
0x12ba   : > { %v5437_v51 = vpop.eup %5436 }
0x12bb   : > { %v2422_v53 = vmul.f32 %v5437_v51, %v2380_v12  ;;  %vm2428_vm9 = vweird.f32 %v5437_v51 }
0x12bc   : > { %vm2429_vm11 = vmor %vm2427_vm10, %vm2428_vm9 }
0x12bd   : > { %v2423_v18 = vmul.f32 %v5437_v51, %v2422_v53 }
0x12bf   : > { %v2424_v8 = vmul.f32 0.5, %v2423_v18 }
0x12c1   : > { %v2425_v61 = vsub.f32 1.5, %v2424_v8 }
0x12c3   : > { %v2426_v11 = vmul.f32 %v5437_v51, %v2425_v61 }
0x12c5   : > { %v2430_v9 = vsel %vm2429_vm11, %v5437_v51, %v2426_v11 }
0x12c6   : > { %v2435_v25 = vmul.f32 %v2430_v9, %v6500_v37 }
0x12c8   : > { %v2440_v29 = vmul.f32 %v2435_v25, %v6414_v13 }
0x12ca   : > { %v6553_v22 = vadd.f32 %v2440_v29, %v6418_v52 }
0x12cc   : > { %v2453_v1 = vpack.c.bf16 %v6553_v22, %v6553_v22 }
0x12ce   : > { %5056 = vmatmul.msk.bf16.gmra.mxu2 %vm337_vm2, %v2453_v1 }
0x130e   : > { %v2476_v34 = vpop.f32.mrf.mxu2 }
0x130f   : > { %v2477_v40 = vadd.f32 %v6561_v36, %v2476_v34 }
0x1311   : > { %v2490_v42 = vpack.c.bf16 %v2477_v40, %v2477_v40 }
0x1313   : > { %v2500_v43 = vunpack.c.l.b16 %v2490_v42 }
0x1316   : > { %v2478_v10 = vpop.f32.mrf.mxu2 }
0x1317   : > { %v2479_v28 = vadd.f32 %v6561_v36, %v2478_v10 }
0x1319   : > { %v2491_v3 = vpack.c.bf16 %v2479_v28, %v2479_v28 }
0x131b   : > { %v2501_v57 = vunpack.c.l.b16 %v2491_v3 }
0x131d   : > { %v6571_v41 = vpack.c.b16 %v2501_v57, %v2500_v43 }
0x1320   : > { %v2481_v23 = vpop.f32.mrf.mxu2 }
0x1321   : > { %v2482_v37 = vadd.f32 %v6561_v36, %v2481_v23 }
0x1323   : > { %v2492_v13 = vpack.c.bf16 %v2482_v37, %v2482_v37 }
0x1325   : > { %v2502_v21 = vunpack.c.l.b16 %v2492_v13 }
0x1328   : > { %v2483_v14 = vpop.f32.mrf.mxu2 }
0x1329   : > { %v2484_v52 = vadd.f32 %v6561_v36, %v2483_v14 }
0x132b   : > { %v2493_v39 = vpack.c.bf16 %v2484_v52, %v2484_v52 }
0x132d   : > { %v2503_v47 = vunpack.c.l.b16 %v2493_v39 }
0x132f   : > { %v6567_v15 = vpack.c.b16 %v2503_v47, %v2502_v21 }
0x1331   : > { %2510 = vrot.lane.b32.xlu1 %v6567_v15, %s5618_s10 }
0x1339   : > { %2738 = vrot.lane.b32.xlu1 %v6571_v41, %s5620_s12 }
0x1351   : > { %v2486_v20 = vpop.f32.mrf.mxu2 }
0x1352   : > { %v2487_v24 = vadd.f32 %v6561_v36, %v2486_v20 }
0x1354   : > { %v2494_v45 = vpack.c.bf16 %v2487_v24, %v2487_v24 }
0x1356   : > { %v2504_v50 = vunpack.c.l.b16 %v2494_v45 }
0x1358   : > { %v2507_v46 = vpack.c.b16 %v2504_v50, %v2504_v50 }
0x1359   : > { %v2488_v55 = vpop.f32.mrf.mxu2 }
0x135a   : > { %2748 = vrot.lane.b32.xlu2 %v2507_v46, %s5619_s11  ;;  %2512 = vrot.lane.b32.xlu0 %v2507_v46, %s5618_s10 }
0x135b   : > { %2868 = vrot.lane.b32.xlu1 %v2507_v46, %s5623_s14 }
0x1362   : > { %2508 = vrot.lane.b32.xlu2 %v6571_v41, %s5618_s10  ;;  %2746 = vrot.lane.b32.xlu0 %v6567_v15, %s5619_s11 }
0x136a   : > { %2740 = vrot.lane.b32.xlu2 %v6567_v15, %s5620_s12  ;;  %2744 = vrot.lane.b32.xlu0 %v6571_v41, %s5619_s11 }
0x1372   : > { %2632 = vrot.lane.b32.xlu2 %v2507_v46, %s5622_s13  ;;  %2742 = vrot.lane.b32.xlu0 %v2507_v46, %s5620_s12 }
0x137a   : > { %2630 = vrot.lane.b32.xlu0 %v6567_v15, %s5622_s13 }
0x13a3   : > { %v2511_v0 = vpop.permute.xlu1 %2510 }
0x13a4   : > { %v2527_v63 = vsel %vm537_vm4, %v2511_v0, 0 }
0x13ab   : > { %v2739_v2 = vpop.permute.xlu1 %2738 }
0x13b4   : > { %v2749_v35 = vpop.permute.xlu2 %2748 }
0x13b5   : > { %v2766_v32 = vsel %vm537_vm4, %v2749_v35, 0 }
0x13b6   : > { %2773 = vmatpush.bf16.xpose.msra.mxu2 %v2766_v32 }
0x13bc   : > { %v2509_v49 = vpop.permute.xlu2 %2508 }
0x13bd   : > { %v2524_v5 = vsel %vm537_vm4, %v2509_v49, 0 }
0x13c4   : > { %v2741_v26 = vpop.permute.xlu2 %2740 }
0x13cc   : > { %v2513_v56 = vpop.permute.xlu0 %2512  ;;  %v2633_v31 = vpop.permute.xlu2 %2632 }
0x13cd   : > { %v2530_v27 = vsel %vm537_vm4, %v2513_v56, 0  ;;  %v2646_v58 = vsel %vm670_vm7, %v2633_v31, 0  ;;  %v2869_v33 = vpop.permute.xlu1 %2868 }
0x13ce   : > { %2537 = vmatpush.bf16.xpose.msrb.mxu0 %v2530_v27  ;;  %2653 = vmatpush.bf16.msrb.mxu1 %v2646_v58  ;;  %v2882_v12 = vsel %vm670_vm7, %v2869_v33, 0 }
0x13d4   : > { %v2747_v19 = vpop.permute.xlu0 %2746 }
0x13d5   : > { %v2763_v7 = vsel %vm537_vm4, %v2747_v19, 0 }
0x13d6   : > { %2538 = vmatpush.bf16.xpose.msrb.mxu0 %v2527_v63  ;;  %2774 = vmatpush.bf16.xpose.msra.mxu2 %v2763_v7 }
0x13dc   : > { %v2745_v60 = vpop.permute.xlu0 %2744 }
0x13dd   : > { %v2760_v4 = vsel %vm537_vm4, %v2745_v60, 0 }
0x13de   : > { %2539 = vmatpush.bf16.xpose.msrb.mxu0 %v2524_v5  ;;  %2775 = vmatpush.bf16.xpose.msra.mxu2 %v2760_v4 }
0x13e4   : > { %v2743_v51 = vpop.permute.xlu0 %2742 }
0x13e5   : > { %5057 = vmatmul.msk.bf16.vlgmr.msrb.gmra.mxu0 %vm537_vm4, %v6571_v41  ;;  %5066 = vmatmul.msk.bf16.vlgmr.msra.gmra.mxu2 %vm537_vm4, %v2739_v2 }
0x13e6   : > { %2889 = vmatpush.bf16.msra.mxu0 %v2882_v12 }
0x13ec   : > { %v2631_v53 = vpop.permute.xlu0 %2630 }
0x13ed   : > { %2654 = vmatpush.bf16.msrb.mxu1 %v2631_v53 }
0x13f5   : > { %5058 = vmatmul.msk.bf16.gmra.mxu0 %vm537_vm4, %v6567_v15  ;;  %5067 = vmatmul.msk.bf16.gmra.mxu2 %vm537_vm4, %v2741_v26 }
0x1405   : > { %5059 = vmatmul.msk.bf16.gmra.mxu0 %vm537_vm4, %v2507_v46  ;;  %5068 = vmatmul.msk.bf16.gmra.mxu2 %vm537_vm4, %v2743_v51 }
0x1462   : > { %v2541_v18 = vpop.f32.mrf.mxu0 }
0x1463   : > { %v2542_v8 = vadd.f32 %v2541_v18, %v5859_v62 }
0x1465   : > { %v2555_v61 = vsel %vm579_vm6, %v2542_v8, -inf }
0x1466   : > { %2556 = vmax.xlane.f32.xlu1 %v2555_v61 }
0x1468   : > { %v2777_v11 = vpop.f32.mrf.mxu2 }
0x1469   : > { %v2778_v9 = vadd.f32 %v2777_v11, %v5859_v62 }
0x146a   : > { %v2543_v25 = vpop.f32.mrf.mxu0 }
0x146b   : > { %v2544_v29 = vadd.f32 %v2543_v25, %v5859_v62  ;;  %v2791_v1 = vsel %vm579_vm6, %v2778_v9, -inf }
0x146c   : > { %2792 = vmax.xlane.f32.xlu0 %v2791_v1 }
0x146d   : > { %v2558_v34 = vsel %vm579_vm6, %v2544_v29, -inf }
0x146e   : > { %2559 = vmax.xlane.f32.xlu2 %v2558_v34 }
0x1470   : > { %v2779_v10 = vpop.f32.mrf.mxu2 }
0x1471   : > { %v2780_v23 = vadd.f32 %v2779_v10, %v5859_v62 }
0x1472   : > { %v2546_v37 = vpop.f32.mrf.mxu0 }
0x1473   : > { %v2547_v14 = vadd.f32 %v2546_v37, %v5859_v62  ;;  %v2794_v13 = vsel %vm579_vm6, %v2780_v23, -inf }
0x1474   : > { %2795 = vmax.xlane.f32.xlu1 %v2794_v13 }
0x1475   : > { %v2561_v52 = vsel %vm579_vm6, %v2547_v14, -inf }
0x1476   : > { %2562 = vmax.xlane.f32.xlu2 %v2561_v52 }
0x1478   : > { %v2782_v28 = vpop.f32.mrf.mxu2 }
0x1479   : > { %v2783_v39 = vadd.f32 %v2782_v28, %v5859_v62 }
0x147a   : > { %v2548_v40 = vpop.f32.mrf.mxu0 }
0x147b   : > { %v2549_v21 = vadd.f32 %v2548_v40, %v5859_v62  ;;  %v2797_v47 = vsel %vm579_vm6, %v2783_v39, -inf }
0x147c   : > { %2798 = vmax.xlane.f32.xlu1 %v2797_v47 }
0x147d   : > { %v2564_v3 = vsel %vm579_vm6, %v2549_v21, -inf }
0x147e   : > { %2565 = vmax.xlane.f32.xlu0 %v2564_v3 }
0x1480   : > { %v2784_v42 = vpop.f32.mrf.mxu2 }
0x1481   : > { %v2785_v57 = vadd.f32 %v2784_v42, %v5859_v62 }
0x1482   : > { %v2551_v43 = vpop.f32.mrf.mxu0 }
0x1483   : > { %v6623_v20 = vadd.f32 %v2551_v43, %v5859_v62  ;;  %v2800_v24 = vsel %vm579_vm6, %v2785_v57, -inf }
0x1484   : > { %2801 = vmax.xlane.f32.xlu2 %v2800_v24 }
0x1485   : > { %v2567_v45 = vsel %vm579_vm6, %v6623_v20, -inf }
0x1486   : > { %2568 = vmax.xlane.f32.xlu1 %v2567_v45 }
0x1488   : > { %v6628_v50 = vpop.f32.mrf.mxu2 }
0x1489   : > { %v6669_v45 = vadd.f32 %v6628_v50, %v5859_v62 }
0x148a   : > { %v2553_v46 = vpop.f32.mrf.mxu0 }
0x1490   : > { %v2789_v55 = vpop.f32.mrf.mxu2 }
0x149c   : > { %2628 = vrot.lane.b32.xlu2 %v6571_v41, %s5622_s13 }
0x14d9   : > { %v2557_v35 = vpop.xlane.xlu1 %2556 }
0x14da   : > { %v2570_v32 = vsub.f32 %v2542_v8, %v2557_v35 }
0x14dc   : > { %v2575_v49 = vmul.f32 1.442695, %v2570_v32 }
0x14de   : > { %5438 = vpow2.f32 %v2575_v49 }
0x14df   : > { %v2793_v26 = vpop.xlane.xlu0 %2792 }
0x14e0   : > { %v2806_v0 = vsub.f32 %v2778_v9, %v2793_v26 }
0x14e1   : > { %v2560_v56 = vpop.xlane.xlu2 %2559 }
0x14e2   : > { %v2811_v31 = vmul.f32 1.442695, %v2806_v0  ;;  %v2571_v27 = vsub.f32 %v2544_v29, %v2560_v56 }
0x14e4   : > { %v6632_v58 = vpop.eup %5438  ;;  %5440 = vpow2.f32 %v2811_v31  ;;  %v2577_v2 = vmul.f32 1.442695, %v2571_v27 }
0x14e5   : > { %v2585_v19 = vsel %vm579_vm6, %v6632_v58, 0.0 }
0x14e6   : > { %5442 = vpow2.f32 %v2577_v2  ;;  %2586 = vadd.xlane.f32.xlu0 %v2585_v19 }
0x14e7   : > { %v2796_v63 = vpop.xlane.xlu1 %2795 }
0x14e8   : > { %v2807_v7 = vsub.f32 %v2780_v23, %v2796_v63 }
0x14e9   : > { %v2563_v33 = vpop.xlane.xlu2 %2562 }
0x14ea   : > { %v6636_v60 = vpop.eup %5440  ;;  %v2813_v5 = vmul.f32 1.442695, %v2807_v7  ;;  %v2572_v4 = vsub.f32 %v2547_v14, %v2563_v33 }
0x14eb   : > { %v2821_v18 = vsel %vm579_vm6, %v6636_v60, 0.0 }
0x14ec   : > { %v5443_v12 = vpop.eup %5442  ;;  %5444 = vpow2.f32 %v2813_v5  ;;  %v2579_v51 = vmul.f32 1.442695, %v2572_v4 }
0x14ed   : > { %v2588_v53 = vsel %vm579_vm6, %v5443_v12, 0.0 }
0x14ee   : > { %5446 = vpow2.f32 %v2579_v51  ;;  %2589 = vadd.xlane.f32.xlu1 %v2588_v53  ;;  %2822 = vadd.xlane.f32.xlu0 %v2821_v18 }
0x14ef   : > { %v2799_v8 = vpop.xlane.xlu1 %2798 }
0x14f0   : > { %v2808_v61 = vsub.f32 %v2783_v39, %v2799_v8 }
0x14f1   : > { %v2566_v11 = vpop.xlane.xlu0 %2565 }
0x14f2   : > { %v6641_v9 = vpop.eup %5444  ;;  %v2815_v25 = vmul.f32 1.442695, %v2808_v61  ;;  %v2573_v29 = vsub.f32 %v2549_v21, %v2566_v11 }
0x14f3   : > { %v2824_v10 = vsel %vm579_vm6, %v6641_v9, 0.0 }
0x14f4   : > { %v6643_v1 = vpop.eup %5446  ;;  %5448 = vpow2.f32 %v2815_v25  ;;  %v2581_v23 = vmul.f32 1.442695, %v2573_v29 }
0x14f5   : > { %v2591_v34 = vsel %vm579_vm6, %v6643_v1, 0.0 }
0x14f6   : > { %2592 = vadd.xlane.f32.xlu0 %v2591_v34  ;;  %2825 = vadd.xlane.f32.xlu1 %v2824_v10  ;;  %5450 = vpow2.f32 %v2581_v23 }
0x14f7   : > { %v2802_v37 = vpop.xlane.xlu2 %2801 }
0x14f8   : > { %v2809_v13 = vsub.f32 %v2785_v57, %v2802_v37 }
0x14f9   : > { %v2569_v39 = vpop.xlane.xlu1 %2568 }
0x14fa   : > { %v6649_v14 = vpop.eup %5448  ;;  %v2817_v28 = vmul.f32 1.442695, %v2809_v13  ;;  %v2574_v47 = vsub.f32 %v6623_v20, %v2569_v39 }
0x14fb   : > { %v2827_v52 = vsel %vm579_vm6, %v6649_v14, 0.0 }
0x14fc   : > { %2828 = vadd.xlane.f32.xlu2 %v2827_v52  ;;  %v5451_v21 = vpop.eup %5450  ;;  %5452 = vpow2.f32 %v2817_v28  ;;  %v2583_v42 = vmul.f32 1.442695, %v2574_v47 }
0x14fd   : > { %v2594_v3 = vsel %vm579_vm6, %v5451_v21, 0.0 }
0x14fe   : > { %5454 = vpow2.f32 %v2583_v42 }
0x14ff   : > { %v2629_v40 = vpop.permute.xlu2 %2628 }
0x1500   : > { %2655 = vmatpush.bf16.msrb.mxu1 %v2629_v40 }
0x1502   : > { %v6655_v43 = vpop.eup %5452 }
0x1503   : > { %v2830_v57 = vsel %vm579_vm6, %v6655_v43, 0.0 }
0x1504   : > { %2595 = vadd.xlane.f32.xlu2 %v2594_v3  ;;  %v6663_v24 = vpop.eup %5454 }
0x1505   : > { %v2597_v20 = vsel %vm579_vm6, %v6663_v24, 0.0 }
0x150a   : > { %2864 = vrot.lane.b32.xlu0 %v6571_v41, %s5623_s14  ;;  %v2803_v41 = vsel %vm579_vm6, %v6669_v45, -inf }
0x150c   : > { %2831 = vadd.xlane.f32.xlu2 %v2830_v57 }
0x150f   : > { %2866 = vrot.lane.b32.xlu1 %v6567_v15, %s5623_s14  ;;  %v2674_v15 = vpack.c.bf16 %v6509_v17, %v6509_v17 }
0x1514   : > { %2598 = vadd.xlane.f32.xlu2 %v2597_v20 }
0x1539   : > { %2804 = vmax.xlane.f32.xlu1 %v2803_v41  ;;  %v2910_v41 = vpack.c.bf16 %v6514_v44, %v6514_v44 }
0x153b   : > { %2912 = vrot.lane.b32.xlu2 %v2910_v41, %s5624_s15 }
0x1552   : > { %2676 = vrot.lane.b32.xlu1 %v2674_v15, %s5624_s15 }
0x1559   : > { %v2587_v46 = vpop.xlane.xlu0 %2586 }
0x155a   : > { %5456 = vrcp.f32 %v2587_v46 }
0x1560   : > { %v5457_v35 = vpop.eup %5456 }
0x1561   : > { %v2590_v55 = vpop.xlane.xlu1 %2589  ;;  %v2823_v32 = vpop.xlane.xlu0 %2822  ;;  %v2605_v49 = vmul.f32 %v5457_v35, %v6632_v58 }
0x1562   : > { %5458 = vrcp.f32 %v2590_v55 }
0x1563   : > { %v2610_v50 = vpack.c.bf16 %v2605_v49, %v2605_v49 }
0x1565   : > { %v2620_v31 = vunpack.c.l.b16 %v2610_v50 }
0x1568   : > { %v5459_v26 = vpop.eup %5458 }
0x1569   : > { %v2606_v0 = vmul.f32 %v5459_v26, %v5443_v12  ;;  %v2593_v2 = vpop.xlane.xlu0 %2592  ;;  %v2826_v19 = vpop.xlane.xlu1 %2825 }
0x156a   : > { %5460 = vrcp.f32 %v2593_v2 }
0x156b   : > { %v2611_v56 = vpack.c.bf16 %v2606_v0, %v2606_v0  ;;  %5462 = vrcp.f32 %v2826_v19 }
0x156c   : > { %5464 = vrcp.f32 %v2823_v32 }
0x156d   : > { %v2621_v27 = vunpack.c.l.b16 %v2611_v56 }
0x156f   : > { %v2829_v63 = vpop.xlane.xlu2 %2828  ;;  %v2625_v7 = vpack.c.b16 %v2621_v27, %v2620_v31 }
0x1570   : > { %v5461_v17 = vpop.eup %5460 }
0x1571   : > { %5060 = vmatmul.msk.bf16.vlgmr.msrb.gmra.mxu1 %vm579_vm6, %v2625_v7  ;;  %v5463_v5 = vpop.eup %5462  ;;  %v2607_v4 = vmul.f32 %v5461_v17, %v6643_v1 }
0x1572   : > { %v5465_v58 = vpop.eup %5464  ;;  %v2842_v12 = vmul.f32 %v5463_v5, %v6641_v9 }
0x1573   : > { %v2841_v51 = vmul.f32 %v5465_v58, %v6636_v60  ;;  %v2612_v18 = vpack.c.bf16 %v2607_v4, %v2607_v4 }
0x1574   : > { %v2847_v8 = vpack.c.bf16 %v2842_v12, %v2842_v12 }
0x1575   : > { %v2846_v25 = vpack.c.bf16 %v2841_v51, %v2841_v51  ;;  %v2622_v23 = vunpack.c.l.b16 %v2612_v18 }
0x1576   : > { %v2857_v10 = vunpack.c.l.b16 %v2847_v8 }
0x1577   : > { %v2596_v33 = vpop.xlane.xlu2 %2595  ;;  %v2856_v13 = vunpack.c.l.b16 %v2846_v25 }
0x1578   : > { %5466 = vrcp.f32 %v2596_v33 }
0x1579   : > { %v2861_v9 = vpack.c.b16 %v2857_v10, %v2856_v13 }
0x157c   : > { %v2865_v1 = vpop.permute.xlu0 %2864 }
0x157e   : > { %v5467_v53 = vpop.eup %5466 }
0x157f   : > { %v2608_v61 = vmul.f32 %v5467_v53, %v5451_v21  ;;  %v2832_v11 = vpop.xlane.xlu2 %2831 }
0x1580   : > { %5468 = vrcp.f32 %v2832_v11 }
0x1581   : > { %v2613_v29 = vpack.c.bf16 %v2608_v61, %v2608_v61  ;;  %v2867_v34 = vpop.permute.xlu1 %2866  ;;  %5470 = vrcp.f32 %v2829_v63 }
0x1582   : > { %2890 = vmatpush.bf16.msra.mxu0 %v2867_v34 }
0x1583   : > { %v2623_v37 = vunpack.c.l.b16 %v2613_v29 }
0x1585   : > { %v2626_v52 = vpack.c.b16 %v2623_v37, %v2622_v23 }
0x1586   : > { %2891 = vmatpush.bf16.msra.mxu0 %v2865_v1  ;;  %v5469_v28 = vpop.eup %5468 }
0x1587   : > { %v2599_v60 = vpop.xlane.xlu2 %2598  ;;  %5061 = vmatmul.msk.bf16.gmra.mxu1 %vm579_vm6, %v2626_v52  ;;  %v5471_v39 = vpop.eup %5470  ;;  %v2844_v40 = vmul.f32 %v5469_v28, %v6655_v43 }
0x1588   : > { %5472 = vrcp.f32 %v2599_v60  ;;  %v2843_v21 = vmul.f32 %v5471_v39, %v6649_v14 }
0x1589   : > { %5069 = vmatmul.msk.bf16.vlgmr.msra.gmra.mxu0 %vm579_vm6, %v2861_v9  ;;  %v2849_v3 = vpack.c.bf16 %v2844_v40, %v2844_v40 }
0x158a   : > { %v2848_v57 = vpack.c.bf16 %v2843_v21, %v2843_v21 }
0x158b   : > { %v2859_v55 = vunpack.c.l.b16 %v2849_v3 }
0x158c   : > { %v2858_v35 = vunpack.c.l.b16 %v2848_v57 }
0x158e   : > { %v5473_v47 = vpop.eup %5472  ;;  %v2862_v43 = vpack.c.b16 %v2859_v55, %v2858_v35 }
0x158f   : > { %v2609_v42 = vmul.f32 %v5473_v47, %v6663_v24 }
0x1591   : > { %v2614_v20 = vpack.c.bf16 %v2609_v42, %v2609_v42 }
0x1593   : > { %v2624_v46 = vunpack.c.l.b16 %v2614_v20 }
0x1595   : > { %v2627_v15 = vpack.c.b16 %v2624_v46, %v2624_v46  ;;  %v2913_v0 = vpop.permute.xlu2 %2912 }
0x1596   : > { %v2924_v56 = vsel %vm670_vm7, %v2913_v0, 0 }
0x1597   : > { %5062 = vmatmul.msk.bf16.gmra.mxu1 %vm579_vm6, %v2627_v15 }
0x1598   : > { %2933 = vmatpush.bf16.msra.mxu1 %v2924_v56 }
0x1599   : > { %5070 = vmatmul.msk.bf16.gmra.mxu0 %vm579_vm6, %v2862_v43 }
0x15ac   : > { %v2805_v14 = vpop.xlane.xlu1 %2804 }
0x15ad   : > { %v2810_v32 = vsub.f32 %v6669_v45, %v2805_v14 }
0x15af   : > { %v2819_v24 = vmul.f32 1.442695, %v2810_v32 }
0x15b1   : > { %5474 = vpow2.f32 %v2819_v24 }
0x15b7   : > { %v5475_v49 = vpop.eup %5474 }
0x15b8   : > { %v2833_v26 = vsel %vm579_vm6, %v5475_v49, 0.0 }
0x15b9   : > { %2834 = vadd.xlane.f32.xlu0 %v2833_v26 }
0x15c4   : > { %v2677_v44 = vpop.permute.xlu1 %2676 }
0x15c5   : > { %v2688_v50 = vsel %vm670_vm7, %v2677_v44, 0 }
0x15c6   : > { %2697 = vmatpush.bf16.msra.mxu3 %v2688_v50 }
0x15ee   : > { %v2657_v31 = vpop.f32.mrf.mxu1 }
0x15f6   : > { %v2659_v27 = vpop.f32.mrf.mxu1 }
0x15f7   : > { %v2671_v2 = vpack.c.bf16 %v2659_v27, %v2657_v31 }
0x15f9   : > { %5063 = vmatmul.msk.bf16.vlgmr.msra.gmra.mxu3 %vm537_vm4, %v2671_v2 }
0x1604   : > { %v2662_v45 = vpop.f32.mrf.mxu1 }
0x1606   : > { %v2893_v19 = vpop.f32.mrf.mxu0 }
0x160c   : > { %v2664_v63 = vpop.f32.mrf.mxu1 }
0x160d   : > { %v2672_v7 = vpack.c.bf16 %v2664_v63, %v2662_v45 }
0x160e   : > { %v2895_v17 = vpop.f32.mrf.mxu0 }
0x160f   : > { %v2907_v33 = vpack.c.bf16 %v2895_v17, %v2893_v19  ;;  %5064 = vmatmul.msk.bf16.gmra.mxu3 %vm537_vm4, %v2672_v7 }
0x1611   : > { %5072 = vmatmul.msk.bf16.vlgmr.msra.gmra.mxu1 %vm537_vm4, %v2907_v33 }
0x1614   : > { %v2667_v5 = vpop.f32.mrf.mxu1 }
0x1615   : > { %v2673_v12 = vpack.c.bf16 %v2667_v5, %v2667_v5 }
0x1616   : > { %v2898_v58 = vpop.f32.mrf.mxu0 }
0x161c   : > { %v2669_v4 = vpop.f32.mrf.mxu1 }
0x161e   : > { %v2900_v51 = vpop.f32.mrf.mxu0 }
0x161f   : > { %v2908_v53 = vpack.c.bf16 %v2900_v51, %v2898_v58  ;;  %5065 = vmatmul.msk.bf16.gmra.mxu3 %vm537_vm4, %v2673_v12 }
0x1621   : > { %5073 = vmatmul.msk.bf16.gmra.mxu1 %vm537_vm4, %v2908_v53 }
0x162c   : > { %v2835_v18 = vpop.xlane.xlu0 %2834 }
0x162d   : > { %5476 = vrcp.f32 %v2835_v18 }
0x1633   : > { %v5477_v8 = vpop.eup %5476 }
0x1634   : > { %v2845_v61 = vmul.f32 %v5477_v8, %v5475_v49 }
0x1636   : > { %v2850_v11 = vpack.c.bf16 %v2845_v61, %v2845_v61 }
0x1638   : > { %v2860_v25 = vunpack.c.l.b16 %v2850_v11 }
0x163a   : > { %v2863_v29 = vpack.c.b16 %v2860_v25, %v2860_v25 }
0x163c   : > { %5071 = vmatmul.msk.bf16.gmra.mxu0 %vm579_vm6, %v2863_v29 }
0x167c   : > { %v2699_v34 = vpop.f32.mrf.mxu3 }
0x167d   : > { %2718 = vrot.lane.b32.xlu1 %v2699_v34, %s5625_s16 }
0x1684   : > { %v2701_v10 = vpop.f32.mrf.mxu3 }
0x1685   : > { %2720 = vrot.lane.b32.xlu2 %v2701_v10, %s5625_s16 }
0x168e   : > { %v2935_v23 = vpop.f32.mrf.mxu1 }
0x168f   : > { %2954 = vrot.lane.b32.xlu1 %v2935_v23, %s5625_s16 }
0x1692   : > { %v2704_v37 = vpop.f32.mrf.mxu3 }
0x1693   : > { %2722 = vrot.lane.b32.xlu0 %v2704_v37, %s5625_s16 }
0x1696   : > { %v2937_v13 = vpop.f32.mrf.mxu1 }
0x1697   : > { %2956 = vrot.lane.b32.xlu2 %v2937_v13, %s5625_s16 }
0x169a   : > { %v2706_v1 = vpop.f32.mrf.mxu3 }
0x169b   : > { %2724 = vrot.lane.b32.xlu1 %v2706_v1, %s5625_s16 }
0x169e   : > { %v2940_v52 = vpop.f32.mrf.mxu1 }
0x169f   : > { %2958 = vrot.lane.b32.xlu2 %v2940_v52, %s5625_s16 }
0x16a2   : > { %v2709_v9 = vpop.f32.mrf.mxu3 }
0x16a6   : > { %v2942_v60 = vpop.f32.mrf.mxu1 }
0x16a7   : > { %2960 = vrot.lane.b32.xlu1 %v2942_v60, %s5625_s16 }
0x16aa   : > { %v2711_v28 = vpop.f32.mrf.mxu3 }
0x16b9   : > { %v2903_v39 = vpop.f32.mrf.mxu0 }
0x16ba   : > { %v2909_v40 = vpack.c.bf16 %v2903_v39, %v2903_v39 }
0x16bc   : > { %5074 = vmatmul.msk.bf16.gmra.mxu1 %vm537_vm4, %v2909_v40 }
0x16c1   : > { %v2905_v21 = vpop.f32.mrf.mxu0 }
0x16df   : > { %v2721_v47 = vpop.permute.xlu2 %2720 }
0x16e0   : > { %v2734_v3 = vadd.f32 %v6561_v36, %v2721_v47 }
0x16ef   : > { %v2719_v20 = vpop.permute.xlu1 %2718 }
0x16f0   : > { %v2733_v41 = vadd.f32 %v6561_v36, %v2719_v20 }
0x16f1   : > { %v2957_v42 = vpop.permute.xlu2 %2956 }
0x16f2   : > { %v2970_v57 = vadd.f32 %v2957_v42, %v2734_v3 }
0x16f4   : > { %2981 = vrot.lane.b32.xlu1 %v2970_v57, %s5624_s15 }
0x16f9   : > { %v2959_v43 = vpop.permute.xlu2 %2958 }
0x1701   : > { %v2955_v46 = vpop.permute.xlu1 %2954 }
0x1702   : > { %v2969_v55 = vadd.f32 %v2955_v46, %v2733_v41 }
0x1704   : > { %2979 = vrot.lane.b32.xlu2 %v2969_v55, %s5624_s15 }
0x1705   : > { %v2723_v15 = vpop.permute.xlu0 %2722 }
0x1706   : > { %v2735_v35 = vadd.f32 %v6561_v36, %v2723_v15 }
0x1708   : > { %v2971_v14 = vadd.f32 %v2959_v43, %v2735_v35 }
0x170a   : > { %2983 = vrot.lane.b32.xlu1 %v2971_v14, %s5624_s15 }
0x170c   : > { %2726 = vrot.lane.b32.xlu2 %v2709_v9, %s5625_s16 }
0x170d   : > { %v2725_v32 = vpop.permute.xlu1 %2724 }
0x170e   : > { %v2736_v24 = vadd.f32 %v6561_v36, %v2725_v32 }
0x1719   : > { %v2961_v49 = vpop.permute.xlu1 %2960 }
0x171a   : > { %v2972_v26 = vadd.f32 %v2961_v49, %v2736_v24 }
0x171c   : > { %2985 = vrot.lane.b32.xlu2 %v2972_v26, %s5624_s15 }
0x1739   : > { %v2945_v44 = vpop.f32.mrf.mxu1 }
0x173a   : > { %2962 = vrot.lane.b32.xlu0 %v2945_v44, %s5625_s16 }
0x1741   : > { %v2947_v50 = vpop.f32.mrf.mxu1 }
0x175e   : > { %v2980_v0 = vpop.permute.xlu2 %2979 }
0x175f   : > { %v2994_v56 = vadd.f32 %v2980_v0, %v6528_v48 }
0x1761   : > { %v2999_v31 = vsel %vm337_vm2, %v2994_v56, 0.0 }
0x1764   : > { %3000 = vadd.xlane.f32.xlu0 %v2999_v31 }
0x1766   : > { %v2982_v27 = vpop.permute.xlu1 %2981  ;;  %v2727_v19 = vpop.permute.xlu2 %2726 }
0x1767   : > { %v2995_v2 = vadd.f32 %v2982_v27, %v6531_v30  ;;  %v2737_v33 = vadd.f32 %v6561_v36, %v2727_v19 }
0x1769   : > { %v3002_v45 = vsel %vm337_vm2, %v2995_v2, 0.0 }
0x176a   : > { %3003 = vadd.xlane.f32.xlu1 %v3002_v45 }
0x1776   : > { %v2986_v63 = vpop.permute.xlu2 %2985 }
0x1777   : > { %v2997_v7 = vadd.f32 %v2986_v63, %v6544_v6 }
0x1779   : > { %v3008_v17 = vsel %vm337_vm2, %v2997_v7, 0.0 }
0x177a   : > { %3009 = vadd.xlane.f32.xlu0 %v3008_v17 }
0x177c   : > { %v2984_v58 = vpop.permute.xlu1 %2983 }
0x177d   : > { %v2996_v4 = vadd.f32 %v2984_v58, %v6541_v54 }
0x177f   : > { %v3005_v30 = vsel %vm337_vm2, %v2996_v4, 0.0 }
0x17ac   : > { %v2963_v5 = vpop.permute.xlu0 %2962 }
0x17ad   : > { %v2973_v48 = vadd.f32 %v2963_v5, %v2737_v33 }
0x17af   : > { %2987 = vrot.lane.b32.xlu2 %v2973_v48, %s5624_s15 }
0x17d7   : > { %v3001_v8 = vpop.xlane.xlu0 %3000 }
0x17d8   : > { %3006 = vadd.xlane.f32.xlu2 %v3005_v30  ;;  %v3014_v34 = vmul.f32 %v3001_v8, %v5724_v38 }
0x17da   : > { %v3019_v37 = vsub.f32 %v2994_v56, %v3014_v34 }
0x17dc   : > { %v3024_v1 = vmul.f32 %v3019_v37, %v3019_v37 }
0x17dd   : > { %v3004_v12 = vpop.xlane.xlu1 %3003 }
0x17de   : > { %v3015_v51 = vmul.f32 %v3004_v12, %v5724_v38  ;;  %v3029_v52 = vsel %vm337_vm2, %v3024_v1, 0.0 }
0x17e0   : > { %v6731_v53 = vsub.f32 %v2995_v2, %v3015_v51 }
0x17e2   : > { %v3025_v6 = vmul.f32 %v6731_v53, %v6731_v53 }
0x17e4   : > { %v3032_v18 = vsel %vm337_vm2, %v3025_v6, 0.0 }
0x17e5   : > { %3033 = vadd.xlane.f32.xlu0 %v3032_v18 }
0x17ed   : > { %v3010_v61 = vpop.xlane.xlu0 %3009 }
0x17ee   : > { %v3017_v11 = vmul.f32 %v3010_v61, %v5724_v38 }
0x17f0   : > { %v6737_v25 = vsub.f32 %v2997_v7, %v3017_v11 }
0x17f2   : > { %v3027_v54 = vmul.f32 %v6737_v25, %v6737_v25 }
0x17f4   : > { %v3038_v29 = vsel %vm337_vm2, %v3027_v54, 0.0 }
0x17f5   : > { %3039 = vadd.xlane.f32.xlu0 %v3038_v29 }
0x1809   : > { %v2988_v10 = vpop.permute.xlu2 %2987  ;;  %3129 = vrot.lane.b32.xlu0 %v6518_v16, %s5626_s17 }
0x180a   : > { %v2998_v23 = vadd.f32 %v2988_v10, %v6553_v22 }
0x180c   : > { %v3011_v13 = vsel %vm337_vm2, %v2998_v23, 0.0 }
0x180d   : > { %3012 = vadd.xlane.f32.xlu1 %v3011_v13 }
0x1815   : > { %3030 = vadd.xlane.f32.xlu1 %v3029_v52 }
0x182e   : > { %3109 = vrot.lane.b32.xlu1 %v6561_v36, %s5626_s17 }
0x1836   : > { %3270 = vrot.lane.b32.xlu1 %v6518_v16, %s5625_s16 }
0x184b   : > { %v3007_v9 = vpop.xlane.xlu2 %3006 }
0x184c   : > { %v3016_v60 = vmul.f32 %v3007_v9, %v5724_v38 }
0x184e   : > { %v6753_v28 = vsub.f32 %v2996_v4, %v3016_v60 }
0x1850   : > { %v3026_v22 = vmul.f32 %v6753_v28, %v6753_v28 }
0x1852   : > { %v3035_v39 = vsel %vm337_vm2, %v3026_v22, 0.0 }
0x1853   : > { %3036 = vadd.xlane.f32.xlu2 %v3035_v39 }
0x1858   : > { %v3034_v57 = vpop.xlane.xlu0 %3033 }
0x1859   : > { %v3045_v41 = vmul.f32 %v3034_v57, %v5724_v38 }
0x185b   : > { %v3050_v55 = vadd.f32 1e-05, %v3045_v41 }
0x185d   : > { %vm3070_vm0 = vweird.f32 %v3050_v55 }
0x186b   : > { %3117 = vrot.lane.b32.xlu2 %v6561_v36, %s5625_s16 }
0x1873   : > { %3132 = vrot.lane.b32.xlu2 %v6561_v36, %s5627_s18 }
0x187b   : > { %3273 = vrot.lane.b32.xlu2 %v6561_v36, %s5628_s19  ;;  %v3040_v36 = vpop.xlane.xlu0 %3039 }
0x187c   : > { %v3047_v24 = vmul.f32 %v3040_v36, %v5724_v38 }
0x187e   : > { %v3052_v44 = vadd.f32 1e-05, %v3047_v24 }
0x1880   : > { %v3013_v16 = vpop.xlane.xlu1 %3012  ;;  %vm3090_vm5 = vweird.f32 %v3052_v44 }
0x1881   : > { %v3018_v40 = vmul.f32 %v3013_v16, %v5724_v38 }
0x1883   : > { %v6765_v21 = vsub.f32 %v2998_v23, %v3018_v40  ;;  %v3130_v35 = vpop.permute.xlu0 %3129 }
0x1884   : > { %3151 = vmatpush.bf16.msrb.mxu3 %v3130_v35 }
0x1885   : > { %v3028_v47 = vmul.f32 %v6765_v21, %v6765_v21 }
0x1887   : > { %v3041_v3 = vsel %vm337_vm2, %v3028_v47, 0.0 }
0x1888   : > { %3042 = vadd.xlane.f32.xlu0 %v3041_v3  ;;  %v3031_v42 = vpop.xlane.xlu1 %3030 }
0x1889   : > { %v3044_v20 = vmul.f32 %v3031_v42, %v5724_v38 }
0x188b   : > { %v3049_v46 = vadd.f32 1e-05, %v3044_v20 }
0x188d   : > { %5478 = vrsqrt.f32 %v3049_v46  ;;  %vm3060_vm14 = vweird.f32 %v3049_v46 }
0x188e   : > { %5480 = vrsqrt.f32 %v3050_v55 }
0x188f   : > { %5482 = vrsqrt.f32 %v3052_v44 }
0x1893   : > { %v5479_v15 = vpop.eup %5478 }
0x1894   : > { %v5481_v43 = vpop.eup %5480  ;;  %v3055_v14 = vmul.f32 %v5479_v15, %v3049_v46  ;;  %vm3061_vm12 = vweird.f32 %v5479_v15 }
0x1895   : > { %v3065_v32 = vmul.f32 %v5481_v43, %v3050_v55  ;;  %v5483_v2 = vpop.eup %5482  ;;  %vm3071_vm13 = vweird.f32 %v5481_v43  ;;  %vm3062_vm15 = vmor %vm3060_vm14, %vm3061_vm12 }
0x1896   : > { %v3056_v49 = vmul.f32 %v5479_v15, %v3055_v14  ;;  %v3085_v19 = vmul.f32 %v5483_v2, %v3052_v44  ;;  %vm3072_vm1 = vmor %vm3070_vm0, %vm3071_vm13  ;;  %vm3091_vm3 = vweird.f32 %v5483_v2 }
0x1897   : > { %v3066_v26 = vmul.f32 %v5481_v43, %v3065_v32  ;;  %vm3092_vm9 = vmor %vm3090_vm5, %vm3091_vm3 }
0x1898   : > { %v3057_v50 = vmul.f32 0.5, %v3056_v49  ;;  %v3086_v58 = vmul.f32 %v5483_v2, %v3085_v19 }
0x1899   : > { %v3067_v0 = vmul.f32 0.5, %v3066_v26 }
0x189a   : > { %v3058_v56 = vsub.f32 1.5, %v3057_v50  ;;  %v3087_v6 = vmul.f32 0.5, %v3086_v58 }
0x189b   : > { %v3068_v31 = vsub.f32 1.5, %v3067_v0 }
0x189c   : > { %v3059_v27 = vmul.f32 %v5479_v15, %v3058_v56  ;;  %v3088_v29 = vsub.f32 1.5, %v3087_v6 }
0x189d   : > { %v3069_v45 = vmul.f32 %v5481_v43, %v3068_v31 }
0x189e   : > { %v3063_v63 = vsel %vm3062_vm15, %v5479_v15, %v3059_v27  ;;  %v3089_v10 = vmul.f32 %v5483_v2, %v3088_v29 }
0x189f   : > { %v3073_v33 = vsel %vm3072_vm1, %v5481_v43, %v3069_v45  ;;  %v3104_v5 = vmul.f32 %v3063_v63, %v3019_v37 }
0x18a0   : > { %v6774_v4 = vpop.permute.xlu1 %3109  ;;  %v3105_v30 = vmul.f32 %v3073_v33, %v6731_v53  ;;  %v3093_v13 = vsel %vm3092_vm9, %v5483_v2, %v3089_v10 }
0x18a1   : > { %v3112_v12 = vmul.f32 %v6774_v4, %v3104_v5  ;;  %v3107_v9 = vmul.f32 %v3093_v13, %v6737_v25 }
0x18a2   : > { %v3113_v51 = vmul.f32 %v6774_v4, %v3105_v30 }
0x18a3   : > { %v3115_v39 = vmul.f32 %v6774_v4, %v3107_v9 }
0x18a8   : > { %v3271_v50 = vpop.permute.xlu1 %3270 }
0x18a9   : > { %3292 = vmatpush.bf16.msrb.mxu2 %v3271_v50 }
0x18c6   : > { %v3037_v7 = vpop.xlane.xlu2 %3036 }
0x18c7   : > { %v3046_v17 = vmul.f32 %v3037_v7, %v5724_v38 }
0x18c9   : > { %v3051_v48 = vadd.f32 1e-05, %v3046_v17 }
0x18cb   : > { %5484 = vrsqrt.f32 %v3051_v48  ;;  %vm3080_vm10 = vweird.f32 %v3051_v48 }
0x18ce   : > { %v6779_v18 = vpop.permute.xlu2 %3117 }
0x18cf   : > { %v6782_v8 = vadd.f32 %v6779_v18, %v3112_v12  ;;  %v6785_v61 = vadd.f32 %v6779_v18, %v3113_v51  ;;  %v6798_v40 = vadd.f32 %v6779_v18, %v3115_v39 }
0x18d1   : > { %v5485_v11 = vpop.eup %5484  ;;  %v3125_v54 = vpack.c.bf16 %v6785_v61, %v6782_v8 }
0x18d2   : > { %v3075_v53 = vmul.f32 %v5485_v11, %v3051_v48  ;;  %vm3081_vm8 = vweird.f32 %v5485_v11 }
0x18d3   : > { %5075 = vmatmul.msk.bf16.vlgmr.msrb.gmra.mxu3 %vm337_vm2, %v3125_v54  ;;  %vm3082_vm11 = vmor %vm3080_vm10, %vm3081_vm8 }
0x18d4   : > { %v3076_v34 = vmul.f32 %v5485_v11, %v3075_v53 }
0x18d6   : > { %v3077_v23 = vmul.f32 0.5, %v3076_v34  ;;  %v6812_v32 = vpop.permute.xlu2 %3132 }
0x18d8   : > { %v3078_v37 = vsub.f32 1.5, %v3077_v23 }
0x18da   : > { %v3079_v1 = vmul.f32 %v5485_v11, %v3078_v37 }
0x18dc   : > { %v3083_v52 = vsel %vm3082_vm11, %v5485_v11, %v3079_v1 }
0x18dd   : > { %v3106_v60 = vmul.f32 %v3083_v52, %v6753_v28 }
0x18df   : > { %v3114_v22 = vmul.f32 %v6774_v4, %v3106_v60 }
0x18e1   : > { %v6795_v16 = vadd.f32 %v6779_v18, %v3114_v22 }
0x18e3   : > { %v3126_v47 = vpack.c.bf16 %v6798_v40, %v6795_v16 }
0x18e5   : > { %5076 = vmatmul.msk.bf16.gmra.mxu3 %vm337_vm2, %v3126_v47 }
0x18fb   : > { %v3043_v3 = vpop.xlane.xlu0 %3042 }
0x18fc   : > { %v3048_v25 = vmul.f32 %v3043_v3, %v5724_v38 }
0x18fe   : > { %v3053_v42 = vadd.f32 1e-05, %v3048_v25 }
0x1900   : > { %5486 = vrsqrt.f32 %v3053_v42  ;;  %vm3100_vm13 = vweird.f32 %v3053_v42 }
0x1906   : > { %v5487_v28 = vpop.eup %5486 }
0x1907   : > { %v3095_v57 = vmul.f32 %v5487_v28, %v3053_v42  ;;  %vm3101_vm12 = vweird.f32 %v5487_v28 }
0x1908   : > { %vm3102_vm14 = vmor %vm3100_vm13, %vm3101_vm12 }
0x1909   : > { %v3096_v20 = vmul.f32 %v5487_v28, %v3095_v57 }
0x190b   : > { %v3097_v41 = vmul.f32 0.5, %v3096_v20 }
0x190d   : > { %v3098_v46 = vsub.f32 1.5, %v3097_v41 }
0x190f   : > { %v3099_v55 = vmul.f32 %v5487_v28, %v3098_v46 }
0x1911   : > { %v3103_v36 = vsel %vm3102_vm14, %v5487_v28, %v3099_v55 }
0x1912   : > { %v3108_v15 = vmul.f32 %v3103_v36, %v6765_v21 }
0x1914   : > { %v3116_v35 = vmul.f32 %v6774_v4, %v3108_v15 }
0x1916   : > { %v6807_v43 = vadd.f32 %v6779_v18, %v3116_v35 }
0x1918   : > { %v3127_v14 = vpack.c.bf16 %v6807_v43, %v6807_v43 }
0x191a   : > { %5077 = vmatmul.msk.bf16.gmra.mxu3 %vm337_vm2, %v3127_v14 }
0x1956   : > { %v3153_v24 = vpop.f32.mrf.mxu3 }
0x1957   : > { %v3154_v49 = vadd.f32 %v3153_v24, %v6812_v32 }
0x1959   : > { %v5078_v26 = vmul.f32 -1.442695, %v3154_v49 }
0x195b   : > { %5488 = vpow2.f32 %v5078_v26 }
0x195e   : > { %v3155_v44 = vpop.f32.mrf.mxu3 }
0x195f   : > { %v3156_v21 = vadd.f32 %v3155_v44, %v6812_v32 }
0x1961   : > { %v5489_v0 = vpop.eup %5488  ;;  %v5079_v56 = vmul.f32 -1.442695, %v3156_v21 }
0x1962   : > { %v3182_v31 = vadd.f32 1.0, %v5489_v0 }
0x1963   : > { %5490 = vpow2.f32 %v5079_v56 }
0x1964   : > { %5492 = vrcp.f32 %v3182_v31  ;;  %v3198_v54 = vand.u32 2147483648, %v3182_v31  ;;  %vm3192_vm0 = vweird.f32 %v3182_v31  ;;  %v3196_v53 = vand.u32 2147483647, %v3182_v31 }
0x1966   : > { %v3199_v1 = vor.u32 1.1754944e-38, %v3198_v54  ;;  %vm3197_vm5 = vcmp.eq.f32.partialorder %v3196_v53, 8.507059e+37 }
0x1968   : > { %v3158_v27 = vpop.f32.mrf.mxu3 }
0x1969   : > { %v5491_v2 = vpop.eup %5490  ;;  %v6817_v45 = vadd.f32 %v3158_v27, %v6812_v32 }
0x196a   : > { %v5493_v19 = vpop.eup %5492  ;;  %v3183_v63 = vadd.f32 1.0, %v5491_v2 }
0x196b   : > { %v3188_v7 = vmul.f32 %v5493_v19, %v3182_v31  ;;  %v5080_v17 = vmul.f32 -1.442695, %v6817_v45  ;;  %vm3193_vm15 = vweird.f32 %v5493_v19 }
0x196c   : > { %5494 = vrcp.f32 %v3183_v63  ;;  %vm3194_vm1 = vmor %vm3192_vm0, %vm3193_vm15  ;;  %v3213_v10 = vand.u32 2147483648, %v3183_v63  ;;  %v3211_v13 = vand.u32 2147483647, %v3183_v63  ;;  %vm3207_vm8 = vweird.f32 %v3183_v63 }
0x196d   : > { %v3189_v33 = vsub.f32 1.0, %v3188_v7  ;;  %5496 = vpow2.f32 %v5080_v17 }
0x196e   : > { %v3214_v60 = vor.u32 1.1754944e-38, %v3213_v10  ;;  %vm3212_vm10 = vcmp.eq.f32.partialorder %v3211_v13, 8.507059e+37 }
0x196f   : > { %v3190_v5 = vmul.f32 %v5493_v19, %v3189_v33 }
0x1970   : > { %v3160_v48 = vpop.f32.mrf.mxu3 }
0x1971   : > { %v6821_v58 = vadd.f32 %v3160_v48, %v6812_v32  ;;  %v3191_v51 = vadd.f32 %v5493_v19, %v3190_v5 }
0x1972   : > { %v5495_v30 = vpop.eup %5494 }
0x1973   : > { %v5497_v12 = vpop.eup %5496  ;;  %v3203_v6 = vmul.f32 %v5495_v30, %v3183_v63  ;;  %v5081_v11 = vmul.f32 -1.442695, %v6821_v58  ;;  %v3195_v23 = vsel %vm3194_vm1, %v5493_v19, %v3191_v51  ;;  %vm3208_vm3 = vweird.f32 %v5495_v30 }
0x1974   : > { %v3184_v29 = vadd.f32 1.0, %v5497_v12  ;;  %v3200_v9 = vsel %vm3197_vm5, %v3199_v1, %v3195_v23  ;;  %vm3209_vm9 = vmor %vm3207_vm8, %vm3208_vm3 }
0x1975   : > { %v3204_v34 = vsub.f32 1.0, %v3203_v6  ;;  %5498 = vpow2.f32 %v5081_v11  ;;  %v3262_v42 = vmul.f32 %v3200_v9, %v3154_v49 }
0x1976   : > { %5500 = vrcp.f32 %v3184_v29  ;;  %v3228_v35 = vand.u32 2147483648, %v3184_v29  ;;  %vm3222_vm12 = vweird.f32 %v3184_v29  ;;  %v3226_v14 = vand.u32 2147483647, %v3184_v29 }
0x1977   : > { %v3205_v37 = vmul.f32 %v5495_v30, %v3204_v34 }
0x1978   : > { %vm3227_vm15 = vcmp.eq.f32.partialorder %v3226_v14, 8.507059e+37 }
0x1979   : > { %v3206_v52 = vadd.f32 %v5495_v30, %v3205_v37  ;;  %v3274_v37 = vpop.permute.xlu2 %3273 }
0x197b   : > { %v5499_v22 = vpop.eup %5498  ;;  %v3210_v39 = vsel %vm3209_vm9, %v5495_v30, %v3206_v52 }
0x197c   : > { %v5501_v47 = vpop.eup %5500  ;;  %v3215_v3 = vsel %vm3212_vm10, %v3214_v60, %v3210_v39  ;;  %v3185_v25 = vadd.f32 1.0, %v5499_v22 }
0x197d   : > { %v3263_v28 = vmul.f32 %v3215_v3, %v3156_v21  ;;  %v3218_v57 = vmul.f32 %v5501_v47, %v3184_v29  ;;  %vm3223_vm11 = vweird.f32 %v5501_v47  ;;  %v3229_v21 = vor.u32 1.1754944e-38, %v3228_v35 }
0x197e   : > { %5502 = vrcp.f32 %v3185_v25  ;;  %vm3224_vm13 = vmor %vm3222_vm12, %vm3223_vm11  ;;  %v3243_v26 = vand.u32 2147483648, %v3185_v25  ;;  %v3241_v50 = vand.u32 2147483647, %v3185_v25  ;;  %vm3237_vm0 = vweird.f32 %v3185_v25 }
0x197f   : > { %v3267_v20 = vpack.c.bf16 %v3263_v28, %v3262_v42  ;;  %v3219_v41 = vsub.f32 1.0, %v3218_v57 }
0x1980   : > { %v3244_v31 = vor.u32 1.1754944e-38, %v3243_v26  ;;  %vm3242_vm3 = vcmp.eq.f32.partialorder %v3241_v50, 8.507059e+37 }
0x1981   : > { %v3220_v46 = vmul.f32 %v5501_v47, %v3219_v41  ;;  %5083 = vmatmul.msk.bf16.vlgmr.msrb.gmra.mxu2 %vm337_vm2, %v3267_v20 }
0x1983   : > { %v3221_v36 = vadd.f32 %v5501_v47, %v3220_v46 }
0x1984   : > { %v5503_v55 = vpop.eup %5502 }
0x1985   : > { %v3233_v15 = vmul.f32 %v5503_v55, %v3185_v25  ;;  %v3225_v44 = vsel %vm3224_vm13, %v5501_v47, %v3221_v36  ;;  %vm3238_vm14 = vweird.f32 %v5503_v55 }
0x1986   : > { %v3230_v56 = vsel %vm3227_vm15, %v3229_v21, %v3225_v44  ;;  %vm3239_vm1 = vmor %vm3237_vm0, %vm3238_vm14 }
0x1987   : > { %v3234_v24 = vsub.f32 1.0, %v3233_v15  ;;  %v3264_v19 = vmul.f32 %v3230_v56, %v6817_v45 }
0x1989   : > { %v3235_v49 = vmul.f32 %v5503_v55, %v3234_v24 }
0x198b   : > { %v3236_v0 = vadd.f32 %v5503_v55, %v3235_v49 }
0x198d   : > { %v3240_v27 = vsel %vm3239_vm1, %v5503_v55, %v3236_v0 }
0x198e   : > { %v3245_v2 = vsel %vm3242_vm3, %v3244_v31, %v3240_v27 }
0x198f   : > { %v3265_v63 = vmul.f32 %v3245_v2, %v6821_v58 }
0x1991   : > { %v3268_v7 = vpack.c.bf16 %v3265_v63, %v3264_v19 }
0x1993   : > { %5084 = vmatmul.msk.bf16.gmra.mxu2 %vm337_vm2, %v3268_v7 }
0x199d   : > { %v3163_v17 = vpop.f32.mrf.mxu3 }
0x199e   : > { %v3164_v33 = vadd.f32 %v3163_v17, %v6812_v32 }
0x19a0   : > { %v5082_v5 = vmul.f32 -1.442695, %v3164_v33 }
0x19a2   : > { %5504 = vpow2.f32 %v5082_v5 }
0x19a5   : > { %v3165_v48 = vpop.f32.mrf.mxu3 }
0x19a8   : > { %v5505_v30 = vpop.eup %5504 }
0x19a9   : > { %v3186_v12 = vadd.f32 1.0, %v5505_v30 }
0x19ab   : > { %5506 = vrcp.f32 %v3186_v12  ;;  %v3258_v54 = vand.u32 2147483648, %v3186_v12  ;;  %v3256_v45 = vand.u32 2147483647, %v3186_v12  ;;  %vm3252_vm8 = vweird.f32 %v3186_v12 }
0x19ad   : > { %v3259_v53 = vor.u32 1.1754944e-38, %v3258_v54  ;;  %vm3257_vm10 = vcmp.eq.f32.partialorder %v3256_v45, 8.507059e+37  ;;  %v6875_v54 = vld [vmem:[%s7618_s3 + $0x38] sm:$0xff] }
0x19b1   : > { %v5507_v51 = vpop.eup %5506 }
0x19b2   : > { %v3248_v6 = vmul.f32 %v5507_v51, %v3186_v12  ;;  %vm3253_vm5 = vweird.f32 %v5507_v51 }
0x19b3   : > { %vm3254_vm9 = vmor %vm3252_vm8, %vm3253_vm5 }
0x19b4   : > { %v3249_v11 = vsub.f32 1.0, %v3248_v6 }
0x19b6   : > { %v3250_v29 = vmul.f32 %v5507_v51, %v3249_v11  ;;  %v6870_v11 = vld [vmem:[%s7618_s3 + $0x30] sm:$0xff] }
0x19b7   : > { %v6879_v45 = vpack.c.bf16 %v6875_v54, %v6870_v11 }
0x19b8   : > { %v3251_v58 = vadd.f32 %v5507_v51, %v3250_v29 }
0x19b9   : > { %3461 = vmatpush.bf16.msrb.mxu0 %v6879_v45 }
0x19ba   : > { %v3255_v34 = vsel %vm3254_vm9, %v5507_v51, %v3251_v58 }
0x19bb   : > { %v3260_v32 = vsel %vm3257_vm10, %v3259_v53, %v3255_v34 }
0x19bc   : > { %v3266_v10 = vmul.f32 %v3260_v32, %v3164_v33 }
0x19be   : > { %v3269_v23 = vpack.c.bf16 %v3266_v10, %v3266_v10 }
0x19c0   : > { %5085 = vmatmul.msk.bf16.gmra.mxu2 %vm337_vm2, %v3269_v23 }
0x1a04   : > { %v3294_v13 = vpop.f32.mrf.mxu2 }
0x1a05   : > { %v3295_v1 = vadd.f32 %v3294_v13, %v3274_v37 }
0x1a07   : > { %v3308_v52 = vadd.f32 %v3295_v1, %v6782_v8 }
0x1a09   : > { %v3313_v9 = vsel %vm337_vm2, %v3308_v52, 0.0 }
0x1a0a   : > { %3314 = vadd.xlane.f32.xlu1 %v3313_v9 }
0x1a0c   : > { %v3296_v60 = vpop.f32.mrf.mxu2 }
0x1a0d   : > { %v3297_v22 = vadd.f32 %v3296_v60, %v3274_v37 }
0x1a0f   : > { %v3309_v39 = vadd.f32 %v3297_v22, %v6785_v61 }
0x1a11   : > { %v3316_v47 = vsel %vm337_vm2, %v3309_v39, 0.0 }
0x1a12   : > { %3317 = vadd.xlane.f32.xlu2 %v3316_v47 }
0x1a16   : > { %v3299_v3 = vpop.f32.mrf.mxu2 }
0x1a17   : > { %v3300_v25 = vadd.f32 %v3299_v3, %v3274_v37 }
0x1a19   : > { %v3310_v42 = vadd.f32 %v3300_v25, %v6795_v16 }
0x1a1b   : > { %v3319_v28 = vsel %vm337_vm2, %v3310_v42, 0.0 }
0x1a1c   : > { %3320 = vadd.xlane.f32.xlu0 %v3319_v28 }
0x1a1e   : > { %v3301_v57 = vpop.f32.mrf.mxu2 }
0x1a1f   : > { %v3302_v20 = vadd.f32 %v3301_v57, %v3274_v37 }
0x1a21   : > { %v3311_v8 = vadd.f32 %v3302_v20, %v6798_v40 }
0x1a23   : > { %v3322_v41 = vsel %vm337_vm2, %v3311_v8, 0.0 }
0x1a24   : > { %3323 = vadd.xlane.f32.xlu0 %v3322_v41 }
0x1a43   : > { %v3304_v46 = vpop.f32.mrf.mxu2 }
0x1a44   : > { %v3305_v55 = vadd.f32 %v3304_v46, %v3274_v37 }
0x1a46   : > { %v3312_v61 = vadd.f32 %v3305_v55, %v6807_v43 }
0x1a48   : > { %v3325_v36 = vsel %vm337_vm2, %v3312_v61, 0.0 }
0x1a49   : > { %3326 = vadd.xlane.f32.xlu1 %v3325_v36 }
0x1a4b   : > { %v3306_v15 = vpop.f32.mrf.mxu2 }
0x1a7d   : > { %v3315_v35 = vpop.xlane.xlu1 %3314 }
0x1a7e   : > { %v3328_v16 = vmul.f32 %v3315_v35, %v5724_v38 }
0x1a80   : > { %v3333_v14 = vsub.f32 %v3308_v52, %v3328_v16 }
0x1a82   : > { %v3338_v24 = vmul.f32 %v3333_v14, %v3333_v14 }
0x1a84   : > { %v3343_v26 = vsel %vm337_vm2, %v3338_v24, 0.0 }
0x1a85   : > { %v3318_v44 = vpop.xlane.xlu2 %3317  ;;  %3344 = vadd.xlane.f32.xlu0 %v3343_v26 }
0x1a86   : > { %v3329_v40 = vmul.f32 %v3318_v44, %v5724_v38 }
0x1a88   : > { %v6843_v49 = vsub.f32 %v3309_v39, %v3329_v40 }
0x1a8a   : > { %v3339_v43 = vmul.f32 %v6843_v49, %v6843_v49 }
0x1a8c   : > { %v3346_v50 = vsel %vm337_vm2, %v3339_v43, 0.0 }
0x1a8d   : > { %3347 = vadd.xlane.f32.xlu2 %v3346_v50 }
0x1a8f   : > { %v3321_v21 = vpop.xlane.xlu0 %3320 }
0x1a90   : > { %v3330_v0 = vmul.f32 %v3321_v21, %v5724_v38 }
0x1a92   : > { %v6849_v56 = vsub.f32 %v3310_v42, %v3330_v0 }
0x1a94   : > { %v3340_v31 = vmul.f32 %v6849_v56, %v6849_v56 }
0x1a96   : > { %v3349_v27 = vsel %vm337_vm2, %v3340_v31, 0.0 }
0x1a97   : > { %v3324_v2 = vpop.xlane.xlu0 %3323  ;;  %3350 = vadd.xlane.f32.xlu1 %v3349_v27 }
0x1a98   : > { %v3331_v19 = vmul.f32 %v3324_v2, %v5724_v38 }
0x1a9a   : > { %v6855_v63 = vsub.f32 %v3311_v8, %v3331_v19 }
0x1a9c   : > { %v3341_v7 = vmul.f32 %v6855_v63, %v6855_v63 }
0x1a9e   : > { %v3352_v17 = vsel %vm337_vm2, %v3341_v7, 0.0 }
0x1a9f   : > { %3353 = vadd.xlane.f32.xlu0 %v3352_v17 }
0x1abc   : > { %v3327_v33 = vpop.xlane.xlu1 %3326 }
0x1abd   : > { %v3332_v5 = vmul.f32 %v3327_v33, %v5724_v38 }
0x1abf   : > { %v6861_v48 = vsub.f32 %v3312_v61, %v3332_v5 }
0x1ac1   : > { %v3342_v30 = vmul.f32 %v6861_v48, %v6861_v48 }
0x1ac3   : > { %v3355_v12 = vsel %vm337_vm2, %v3342_v30, 0.0 }
0x1ac4   : > { %3356 = vadd.xlane.f32.xlu2 %v3355_v12 }
0x1af8   : > { %v3345_v51 = vpop.xlane.xlu0 %3344 }
0x1af9   : > { %v3358_v6 = vmul.f32 %v3345_v51, %v5724_v38 }
0x1afb   : > { %v3363_v29 = vadd.f32 1e-05, %v3358_v6 }
0x1afd   : > { %5508 = vrsqrt.f32 %v3363_v29  ;;  %vm3374_vm12 = vweird.f32 %v3363_v29 }
0x1b00   : > { %v3348_v58 = vpop.xlane.xlu2 %3347 }
0x1b01   : > { %v3359_v53 = vmul.f32 %v3348_v58, %v5724_v38 }
0x1b03   : > { %v5509_v34 = vpop.eup %5508  ;;  %v3364_v32 = vadd.f32 1e-05, %v3359_v53 }
0x1b04   : > { %v3369_v10 = vmul.f32 %v5509_v34, %v3363_v29  ;;  %vm3375_vm11 = vweird.f32 %v5509_v34 }
0x1b05   : > { %5510 = vrsqrt.f32 %v3364_v32  ;;  %vm3376_vm13 = vmor %vm3374_vm12, %vm3375_vm11  ;;  %vm3384_vm15 = vweird.f32 %v3364_v32 }
0x1b06   : > { %v3370_v23 = vmul.f32 %v5509_v34, %v3369_v10 }
0x1b08   : > { %v3371_v37 = vmul.f32 0.5, %v3370_v23 }
0x1b0a   : > { %v3372_v13 = vsub.f32 1.5, %v3371_v37  ;;  %v3351_v1 = vpop.xlane.xlu1 %3350 }
0x1b0b   : > { %v5511_v52 = vpop.eup %5510  ;;  %v3360_v9 = vmul.f32 %v3351_v1, %v5724_v38 }
0x1b0c   : > { %v3373_v60 = vmul.f32 %v5509_v34, %v3372_v13  ;;  %v3379_v22 = vmul.f32 %v5511_v52, %v3364_v32  ;;  %vm3385_vm14 = vweird.f32 %v5511_v52 }
0x1b0d   : > { %v3365_v39 = vadd.f32 1e-05, %v3360_v9  ;;  %vm3386_vm0 = vmor %vm3384_vm15, %vm3385_vm14 }
0x1b0e   : > { %v3380_v47 = vmul.f32 %v5511_v52, %v3379_v22  ;;  %v3377_v3 = vsel %vm3376_vm13, %v5509_v34, %v3373_v60 }
0x1b0f   : > { %5512 = vrsqrt.f32 %v3365_v39  ;;  %v3418_v57 = vmul.f32 %v3377_v3, %v3333_v14  ;;  %vm3394_vm3 = vweird.f32 %v3365_v39 }
0x1b10   : > { %v3381_v25 = vmul.f32 0.5, %v3380_v47 }
0x1b11   : > { %v3423_v36 = vmul.f32 %v3418_v57, %v6774_v4 }
0x1b12   : > { %v3382_v42 = vsub.f32 1.5, %v3381_v25  ;;  %v3354_v28 = vpop.xlane.xlu0 %3353 }
0x1b13   : > { %v3361_v20 = vmul.f32 %v3354_v28, %v5724_v38  ;;  %v6889_v14 = vadd.f32 %v3423_v36, %v6779_v18 }
0x1b14   : > { %v3383_v8 = vmul.f32 %v5511_v52, %v3382_v42 }
0x1b15   : > { %v5513_v41 = vpop.eup %5512  ;;  %v3366_v46 = vadd.f32 1e-05, %v3361_v20 }
0x1b16   : > { %v3387_v55 = vsel %vm3386_vm0, %v5511_v52, %v3383_v8  ;;  %v3389_v61 = vmul.f32 %v5513_v41, %v3365_v39  ;;  %vm3395_vm1 = vweird.f32 %v5513_v41  ;;  %v6922_v39 = vld [vmem:[%s7619_s4 + $0x3] ss:$0 sm:$0xff] }
0x1b17   : > { %v3419_v15 = vmul.f32 %v3387_v55, %v6843_v49  ;;  %5514 = vrsqrt.f32 %v3366_v46  ;;  %vm3396_vm5 = vmor %vm3394_vm3, %vm3395_vm1  ;;  %vm3404_vm9 = vweird.f32 %v3366_v46 }
0x1b18   : > { %v3390_v35 = vmul.f32 %v5513_v41, %v3389_v61 }
0x1b19   : > { %v3424_v16 = vmul.f32 %v3419_v15, %v6774_v4 }
0x1b1a   : > { %v3391_v24 = vmul.f32 0.5, %v3390_v35 }
0x1b1b   : > { %v6892_v26 = vadd.f32 %v3424_v16, %v6779_v18 }
0x1b1c   : > { %v3392_v44 = vsub.f32 1.5, %v3391_v24 }
0x1b1d   : > { %v5515_v40 = vpop.eup %5514  ;;  %v3438_v43 = vpack.c.bf16 %v6892_v26, %v6889_v14 }
0x1b1e   : > { %v3393_v50 = vmul.f32 %v5513_v41, %v3392_v44  ;;  %v3399_v21 = vmul.f32 %v5515_v40, %v3366_v46  ;;  %vm3405_vm8 = vweird.f32 %v5515_v40 }
0x1b1f   : > { %5089 = vmatmul.msk.bf16.vlgmr.msrb.gmra.mxu0 %vm337_vm2, %v3438_v43  ;;  %vm3406_vm10 = vmor %vm3404_vm9, %vm3405_vm8 }
0x1b20   : > { %v3400_v49 = vmul.f32 %v5515_v40, %v3399_v21  ;;  %v3397_v0 = vsel %vm3396_vm5, %v5513_v41, %v3393_v50 }
0x1b21   : > { %v3420_v2 = vmul.f32 %v3397_v0, %v6849_v56 }
0x1b22   : > { %v3401_v31 = vmul.f32 0.5, %v3400_v49 }
0x1b23   : > { %v3425_v33 = vmul.f32 %v3420_v2, %v6774_v4 }
0x1b24   : > { %v3402_v27 = vsub.f32 1.5, %v3401_v31 }
0x1b25   : > { %v6902_v30 = vadd.f32 %v3425_v33, %v6779_v18 }
0x1b26   : > { %v3403_v19 = vmul.f32 %v5515_v40, %v3402_v27 }
0x1b28   : > { %v3407_v7 = vsel %vm3406_vm10, %v5515_v40, %v3403_v19 }
0x1b29   : > { %v3421_v17 = vmul.f32 %v3407_v7, %v6855_v63 }
0x1b2b   : > { %v3426_v5 = vmul.f32 %v3421_v17, %v6774_v4 }
0x1b2d   : > { %v6905_v12 = vadd.f32 %v3426_v5, %v6779_v18 }
0x1b2f   : > { %v3439_v51 = vpack.c.bf16 %v6905_v12, %v6902_v30 }
0x1b31   : > { %5090 = vmatmul.msk.bf16.gmra.mxu0 %vm337_vm2, %v3439_v51 }
0x1b37   : > { %v3357_v56 = vpop.xlane.xlu2 %3356 }
0x1b38   : > { %v3362_v6 = vmul.f32 %v3357_v56, %v5724_v38 }
0x1b3a   : > { %v3367_v29 = vadd.f32 1e-05, %v3362_v6 }
0x1b3c   : > { %5516 = vrsqrt.f32 %v3367_v29  ;;  %vm3414_vm12 = vweird.f32 %v3367_v29 }
0x1b42   : > { %v5517_v63 = vpop.eup %5516 }
0x1b43   : > { %v3409_v58 = vmul.f32 %v5517_v63, %v3367_v29  ;;  %vm3415_vm11 = vweird.f32 %v5517_v63 }
0x1b44   : > { %vm3416_vm13 = vmor %vm3414_vm12, %vm3415_vm11 }
0x1b45   : > { %v3410_v53 = vmul.f32 %v5517_v63, %v3409_v58 }
0x1b47   : > { %v3411_v34 = vmul.f32 0.5, %v3410_v53 }
0x1b49   : > { %v3412_v32 = vsub.f32 1.5, %v3411_v34 }
0x1b4b   : > { %v3413_v10 = vmul.f32 %v5517_v63, %v3412_v32 }
0x1b4d   : > { %v3417_v23 = vsel %vm3416_vm13, %v5517_v63, %v3413_v10 }
0x1b4e   : > { %v3422_v37 = vmul.f32 %v3417_v23, %v6861_v48 }
0x1b50   : > { %v3427_v13 = vmul.f32 %v3422_v37, %v6774_v4 }
0x1b52   : > { %v6914_v1 = vadd.f32 %v3427_v13, %v6779_v18 }
0x1b54   : > { %v3440_v52 = vpack.c.bf16 %v6914_v1, %v6914_v1 }
0x1b56   : > { %5091 = vmatmul.msk.bf16.gmra.mxu0 %vm337_vm2, %v3440_v52 }
0x1b9c   : > { %v3463_v9 = vpop.f32.mrf.mxu0 }
0x1b9d   : > { %v3464_v42 = vadd.f32 %v6922_v39, %v3463_v9 }
0x1b9f   : > { %v3477_v41 = vpack.c.bf16 %v3464_v42, %v3464_v42 }
0x1ba1   : > { %v3487_v55 = vunpack.c.l.b16 %v3477_v41 }
0x1ba4   : > { %v3465_v60 = vpop.f32.mrf.mxu0 }
0x1ba5   : > { %v3466_v3 = vadd.f32 %v6922_v39, %v3465_v60 }
0x1ba7   : > { %v3478_v20 = vpack.c.bf16 %v3466_v3, %v3466_v3 }
0x1ba9   : > { %v3488_v46 = vunpack.c.l.b16 %v3478_v20 }
0x1bab   : > { %v6932_v61 = vpack.c.b16 %v3488_v46, %v3487_v55 }
0x1bae   : > { %v3468_v22 = vpop.f32.mrf.mxu0 }
0x1baf   : > { %v3469_v48 = vadd.f32 %v6922_v39, %v3468_v22 }
0x1bb1   : > { %v3479_v4 = vpack.c.bf16 %v3469_v48, %v3469_v48 }
0x1bb3   : > { %v3489_v28 = vunpack.c.l.b16 %v3479_v4 }
0x1bb6   : > { %v3470_v47 = vpop.f32.mrf.mxu0 }
0x1bb7   : > { %v3471_v18 = vadd.f32 %v6922_v39, %v3470_v47 }
0x1bb9   : > { %v3480_v25 = vpack.c.bf16 %v3471_v18, %v3471_v18 }
0x1bbb   : > { %v3490_v57 = vunpack.c.l.b16 %v3480_v25 }
0x1bbd   : > { %v6928_v8 = vpack.c.b16 %v3490_v57, %v3489_v28 }
0x1bbf   : > { %3497 = vrot.lane.b32.xlu0 %v6928_v8, %s5618_s10 }
0x1bc7   : > { %3495 = vrot.lane.b32.xlu0 %v6932_v61, %s5618_s10 }
0x1bcf   : > { %3725 = vrot.lane.b32.xlu0 %v6932_v61, %s5620_s12 }
0x1bd3   : > { %v3473_v36 = vpop.f32.mrf.mxu0 }
0x1bd4   : > { %v3474_v15 = vadd.f32 %v6922_v39, %v3473_v36 }
0x1bd6   : > { %v3481_v35 = vpack.c.bf16 %v3474_v15, %v3474_v15 }
0x1bd8   : > { %v3491_v16 = vunpack.c.l.b16 %v3481_v35 }
0x1bda   : > { %v6939_v24 = vpack.c.b16 %v3491_v16, %v3491_v16 }
0x1bdb   : > { %v3475_v44 = vpop.f32.mrf.mxu0 }
0x1bdc   : > { %3735 = vrot.lane.b32.xlu2 %v6939_v24, %s5619_s11  ;;  %3499 = vrot.lane.b32.xlu1 %v6939_v24, %s5618_s10  ;;  %s5629_s10 = smov 127  }
0x1be4   : > { %3731 = vrot.lane.b32.xlu2 %v6932_v61, %s5619_s11  ;;  %3733 = vrot.lane.b32.xlu1 %v6928_v8, %s5619_s11 }
0x1bec   : > { %3729 = vrot.lane.b32.xlu2 %v6939_v24, %s5620_s12  ;;  %3727 = vrot.lane.b32.xlu1 %v6928_v8, %s5620_s12 }
0x1bf4   : > { %3619 = vrot.lane.b32.xlu1 %v6939_v24, %s5622_s13 }
0x1c31   : > { %v3498_v49 = vpop.permute.xlu0 %3497 }
0x1c32   : > { %v3514_v31 = vsel %vm537_vm4, %v3498_v49, 0 }
0x1c36   : > { %v3736_v40 = vpop.permute.xlu2 %3735 }
0x1c37   : > { %v3753_v43 = vsel %vm537_vm4, %v3736_v40, 0 }
0x1c38   : > { %3760 = vmatpush.bf16.xpose.msra.mxu0 %v3753_v43 }
0x1c39   : > { %v3496_v2 = vpop.permute.xlu0 %3495 }
0x1c3a   : > { %v3511_v17 = vsel %vm537_vm4, %v3496_v2, 0 }
0x1c3e   : > { %v3732_v19 = vpop.permute.xlu2 %3731 }
0x1c3f   : > { %v3747_v33 = vsel %vm537_vm4, %v3732_v19, 0 }
0x1c41   : > { %v3726_v5 = vpop.permute.xlu0 %3725 }
0x1c46   : > { %v3730_v6 = vpop.permute.xlu2 %3729 }
0x1c4e   : > { %v3500_v50 = vpop.permute.xlu1 %3499 }
0x1c4f   : > { %v3517_v21 = vsel %vm537_vm4, %v3500_v50, 0 }
0x1c50   : > { %3524 = vmatpush.bf16.xpose.msrb.mxu1 %v3517_v21 }
0x1c56   : > { %v3734_v0 = vpop.permute.xlu1 %3733 }
0x1c57   : > { %v3750_v27 = vsel %vm537_vm4, %v3734_v0, 0 }
0x1c58   : > { %3525 = vmatpush.bf16.xpose.msrb.mxu1 %v3514_v31  ;;  %3761 = vmatpush.bf16.xpose.msra.mxu0 %v3750_v27 }
0x1c5e   : > { %v3728_v7 = vpop.permute.xlu1 %3727 }
0x1c60   : > { %3526 = vmatpush.bf16.xpose.msrb.mxu1 %v3511_v17  ;;  %3762 = vmatpush.bf16.xpose.msra.mxu0 %v3747_v33 }
0x1c66   : > { %v3620_v51 = vpop.permute.xlu1 %3619 }
0x1c67   : > { %v3633_v56 = vsel %vm670_vm7, %v3620_v51, 0  ;;  %5092 = vmatmul.msk.bf16.vlgmr.msrb.gmra.mxu1 %vm537_vm4, %v6932_v61  ;;  %5101 = vmatmul.msk.bf16.vlgmr.msra.gmra.mxu0 %vm537_vm4, %v3726_v5 }
0x1c68   : > { %3640 = vmatpush.bf16.msra.mxu3 %v3633_v56 }
0x1c77   : > { %5093 = vmatmul.msk.bf16.gmra.mxu1 %vm537_vm4, %v6928_v8  ;;  %5102 = vmatmul.msk.bf16.gmra.mxu0 %vm537_vm4, %v3728_v7 }
0x1c87   : > { %5094 = vmatmul.msk.bf16.gmra.mxu1 %vm537_vm4, %v6939_v24  ;;  %5103 = vmatmul.msk.bf16.gmra.mxu0 %vm537_vm4, %v3730_v6 }
0x1ce4   : > { %v3528_v29 = vpop.f32.mrf.mxu1  ;;  %v3764_v63 = vpop.f32.mrf.mxu0 }
0x1ce5   : > { %v3529_v58 = vadd.f32 %v3528_v29, %v5859_v62  ;;  %v3765_v53 = vadd.f32 %v3764_v63, %v5859_v62 }
0x1ce7   : > { %v3542_v34 = vsel %vm579_vm6, %v3529_v58, -inf  ;;  %v3778_v32 = vsel %vm579_vm6, %v3765_v53, -inf }
0x1ce8   : > { %3543 = vmax.xlane.f32.xlu0 %v3542_v34  ;;  %3779 = vmax.xlane.f32.xlu2 %v3778_v32 }
0x1cec   : > { %v3530_v10 = vpop.f32.mrf.mxu1  ;;  %v3766_v23 = vpop.f32.mrf.mxu0 }
0x1ced   : > { %v3531_v37 = vadd.f32 %v3530_v10, %v5859_v62  ;;  %v3767_v13 = vadd.f32 %v3766_v23, %v5859_v62 }
0x1cef   : > { %v3545_v52 = vsel %vm579_vm6, %v3531_v37, -inf  ;;  %v3781_v9 = vsel %vm579_vm6, %v3767_v13, -inf }
0x1cf0   : > { %3546 = vmax.xlane.f32.xlu1 %v3545_v52  ;;  %3782 = vmax.xlane.f32.xlu0 %v3781_v9 }
0x1cf4   : > { %v3533_v60 = vpop.f32.mrf.mxu1  ;;  %v3769_v22 = vpop.f32.mrf.mxu0 }
0x1cf5   : > { %v3534_v48 = vadd.f32 %v3533_v60, %v5859_v62  ;;  %v3770_v47 = vadd.f32 %v3769_v22, %v5859_v62 }
0x1cf7   : > { %v3548_v4 = vsel %vm579_vm6, %v3534_v48, -inf  ;;  %v3784_v18 = vsel %vm579_vm6, %v3770_v47, -inf }
0x1cf8   : > { %3549 = vmax.xlane.f32.xlu1 %v3548_v4  ;;  %3785 = vmax.xlane.f32.xlu0 %v3784_v18 }
0x1cfc   : > { %v3535_v3 = vpop.f32.mrf.mxu1  ;;  %v3771_v25 = vpop.f32.mrf.mxu0 }
0x1cfd   : > { %v3536_v42 = vadd.f32 %v3535_v3, %v5859_v62  ;;  %v6999_v15 = vadd.f32 %v3771_v25, %v5859_v62 }
0x1cff   : > { %v3551_v28 = vsel %vm579_vm6, %v3536_v42, -inf  ;;  %v3787_v35 = vsel %vm579_vm6, %v6999_v15, -inf }
0x1d00   : > { %3552 = vmax.xlane.f32.xlu2 %v3551_v28 }
0x1d04   : > { %v3538_v57 = vpop.f32.mrf.mxu1  ;;  %v6985_v20 = vpop.f32.mrf.mxu0 }
0x1d05   : > { %v6994_v55 = vadd.f32 %v3538_v57, %v5859_v62  ;;  %v7036_v57 = vadd.f32 %v6985_v20, %v5859_v62 }
0x1d07   : > { %v3554_v36 = vsel %vm579_vm6, %v6994_v55, -inf }
0x1d0c   : > { %v3540_v41 = vpop.f32.mrf.mxu1  ;;  %v3776_v46 = vpop.f32.mrf.mxu0  ;;  %3855 = vrot.lane.b32.xlu0 %v6939_v24, %s5623_s14 }
0x1d11   : > { %3615 = vrot.lane.b32.xlu1 %v6932_v61, %s5622_s13 }
0x1d18   : > { %3617 = vrot.lane.b32.xlu2 %v6928_v8, %s5622_s13 }
0x1d36   : > { %3555 = vmax.xlane.f32.xlu0 %v3554_v36 }
0x1d3b   : > { %3788 = vmax.xlane.f32.xlu1 %v3787_v35  ;;  %v3790_v35 = vsel %vm579_vm6, %v7036_v57, -inf }
0x1d5b   : > { %v3544_v16 = vpop.xlane.xlu0 %3543  ;;  %v3780_v24 = vpop.xlane.xlu2 %3779 }
0x1d5c   : > { %v3557_v44 = vsub.f32 %v3529_v58, %v3544_v16  ;;  %v3793_v43 = vsub.f32 %v3765_v53, %v3780_v24 }
0x1d5e   : > { %v3562_v40 = vmul.f32 1.442695, %v3557_v44  ;;  %v3798_v50 = vmul.f32 1.442695, %v3793_v43 }
0x1d60   : > { %5518 = vpow2.f32 %v3562_v40  ;;  %v3661_v40 = vpack.c.bf16 %v6870_v11, %v6870_v11 }
0x1d61   : > { %5520 = vpow2.f32 %v3798_v50 }
0x1d63   : > { %v3547_v21 = vpop.xlane.xlu1 %3546  ;;  %v3783_v49 = vpop.xlane.xlu0 %3782 }
0x1d64   : > { %v3558_v0 = vsub.f32 %v3531_v37, %v3547_v21  ;;  %v3794_v27 = vsub.f32 %v3767_v13, %v3783_v49 }
0x1d66   : > { %v3564_v31 = vmul.f32 1.442695, %v3558_v0  ;;  %v7003_v2 = vpop.eup %5518  ;;  %v3800_v7 = vmul.f32 1.442695, %v3794_v27 }
0x1d67   : > { %v3572_v19 = vsel %vm579_vm6, %v7003_v2, 0.0  ;;  %v7007_v56 = vpop.eup %5520 }
0x1d68   : > { %5522 = vpow2.f32 %v3564_v31  ;;  %3573 = vadd.xlane.f32.xlu2 %v3572_v19  ;;  %v3808_v53 = vsel %vm579_vm6, %v7007_v56, 0.0 }
0x1d69   : > { %5524 = vpow2.f32 %v3800_v7 }
0x1d6b   : > { %v3550_v17 = vpop.xlane.xlu1 %3549  ;;  %v3786_v33 = vpop.xlane.xlu0 %3785 }
0x1d6c   : > { %v3559_v5 = vsub.f32 %v3534_v48, %v3550_v17  ;;  %v3795_v51 = vsub.f32 %v3770_v47, %v3786_v33 }
0x1d6e   : > { %v7009_v6 = vpop.eup %5522  ;;  %v3566_v29 = vmul.f32 1.442695, %v3559_v5  ;;  %v3802_v63 = vmul.f32 1.442695, %v3795_v51 }
0x1d6f   : > { %v3575_v58 = vsel %vm579_vm6, %v7009_v6, 0.0  ;;  %v7015_v32 = vpop.eup %5524 }
0x1d70   : > { %5526 = vpow2.f32 %v3566_v29  ;;  %3576 = vadd.xlane.f32.xlu0 %v3575_v58  ;;  %3809 = vadd.xlane.f32.xlu2 %v3808_v53  ;;  %v3811_v9 = vsel %vm579_vm6, %v7015_v32, 0.0 }
0x1d71   : > { %5528 = vpow2.f32 %v3802_v63 }
0x1d73   : > { %v3553_v34 = vpop.xlane.xlu2 %3552 }
0x1d74   : > { %v3560_v10 = vsub.f32 %v3536_v42, %v3553_v34 }
0x1d76   : > { %v7017_v23 = vpop.eup %5526  ;;  %v3568_v37 = vmul.f32 1.442695, %v3560_v10 }
0x1d77   : > { %v7019_v13 = vpop.eup %5528  ;;  %v3578_v52 = vsel %vm579_vm6, %v7017_v23, 0.0 }
0x1d78   : > { %5530 = vpow2.f32 %v3568_v37  ;;  %3579 = vadd.xlane.f32.xlu1 %v3578_v52  ;;  %3812 = vadd.xlane.f32.xlu0 %v3811_v9  ;;  %v3814_v60 = vsel %vm579_vm6, %v7019_v13, 0.0 }
0x1d79   : > { %3815 = vadd.xlane.f32.xlu2 %v3814_v60 }
0x1d7b   : > { %v3618_v22 = vpop.permute.xlu2 %3617 }
0x1d7c   : > { %3641 = vmatpush.bf16.msra.mxu3 %v3618_v22 }
0x1d7e   : > { %v5531_v48 = vpop.eup %5530  ;;  %v3856_v47 = vpop.permute.xlu0 %3855 }
0x1d7f   : > { %v3869_v4 = vsel %vm670_vm7, %v3856_v47, 0  ;;  %v3581_v18 = vsel %vm579_vm6, %v5531_v48, 0.0 }
0x1d80   : > { %3876 = vmatpush.bf16.msra.mxu1 %v3869_v4 }
0x1d81   : > { %3582 = vadd.xlane.f32.xlu2 %v3581_v18 }
0x1d83   : > { %v3616_v3 = vpop.permute.xlu1 %3615 }
0x1d84   : > { %3642 = vmatpush.bf16.msra.mxu3 %v3616_v3 }
0x1d8c   : > { %3853 = vrot.lane.b32.xlu0 %v6928_v8, %s5623_s14 }
0x1d91   : > { %3851 = vrot.lane.b32.xlu1 %v6932_v61, %s5623_s14 }
0x1d99   : > { %3663 = vrot.lane.b32.xlu1 %v3661_v40, %s5624_s15 }
0x1da9   : > { %v3556_v25 = vpop.xlane.xlu0 %3555 }
0x1daa   : > { %v3561_v41 = vsub.f32 %v6994_v55, %v3556_v25 }
0x1dac   : > { %v3570_v36 = vmul.f32 1.442695, %v3561_v41 }
0x1dae   : > { %v3789_v42 = vpop.xlane.xlu1 %3788 }
0x1daf   : > { %v3796_v28 = vsub.f32 %v6999_v15, %v3789_v42 }
0x1db1   : > { %v3804_v46 = vmul.f32 1.442695, %v3796_v28 }
0x1db3   : > { %5532 = vpow2.f32 %v3804_v46 }
0x1db4   : > { %5534 = vpow2.f32 %v3570_v36 }
0x1db6   : > { %3791 = vmax.xlane.f32.xlu0 %v3790_v35 }
0x1db9   : > { %v7041_v8 = vpop.eup %5532 }
0x1dba   : > { %v3817_v61 = vsel %vm579_vm6, %v7041_v8, 0.0  ;;  %v7045_v15 = vpop.eup %5534 }
0x1dbb   : > { %3818 = vadd.xlane.f32.xlu2 %v3817_v61  ;;  %v3584_v62 = vsel %vm579_vm6, %v7045_v15, 0.0 }
0x1dc3   : > { %3585 = vadd.xlane.f32.xlu2 %v3584_v62 }
0x1ddb   : > { %v3574_v20 = vpop.xlane.xlu2 %3573 }
0x1ddc   : > { %5536 = vrcp.f32 %v3574_v20 }
0x1de2   : > { %v5537_v16 = vpop.eup %5536 }
0x1de3   : > { %v3577_v55 = vpop.xlane.xlu0 %3576  ;;  %v3810_v24 = vpop.xlane.xlu2 %3809  ;;  %v3592_v44 = vmul.f32 %v5537_v16, %v7003_v2 }
0x1de4   : > { %5538 = vrcp.f32 %v3577_v55 }
0x1de5   : > { %v3597_v50 = vpack.c.bf16 %v3592_v44, %v3592_v44 }
0x1de7   : > { %v3607_v19 = vunpack.c.l.b16 %v3597_v50 }
0x1dea   : > { %v5539_v43 = vpop.eup %5538 }
0x1deb   : > { %v3593_v21 = vmul.f32 %v5539_v43, %v7009_v6  ;;  %v3580_v49 = vpop.xlane.xlu1 %3579  ;;  %v3813_v27 = vpop.xlane.xlu0 %3812 }
0x1dec   : > { %v3816_v0 = vpop.xlane.xlu2 %3815  ;;  %5540 = vrcp.f32 %v3580_v49 }
0x1ded   : > { %v3598_v31 = vpack.c.bf16 %v3593_v21, %v3593_v21  ;;  %5542 = vrcp.f32 %v3813_v27 }
0x1dee   : > { %5544 = vrcp.f32 %v3810_v24 }
0x1def   : > { %v3608_v7 = vunpack.c.l.b16 %v3598_v31 }
0x1df1   : > { %v3612_v17 = vpack.c.b16 %v3608_v7, %v3607_v19 }
0x1df2   : > { %v5541_v11 = vpop.eup %5540 }
0x1df3   : > { %5095 = vmatmul.msk.bf16.vlgmr.msra.gmra.mxu3 %vm579_vm6, %v3612_v17  ;;  %v5543_v33 = vpop.eup %5542  ;;  %v3594_v51 = vmul.f32 %v5541_v11, %v7017_v23 }
0x1df4   : > { %v3583_v2 = vpop.xlane.xlu2 %3582  ;;  %v5545_v5 = vpop.eup %5544  ;;  %v3829_v6 = vmul.f32 %v5543_v33, %v7015_v32 }
0x1df5   : > { %5546 = vrcp.f32 %v3583_v2  ;;  %v3828_v63 = vmul.f32 %v5545_v5, %v7007_v56  ;;  %v3599_v58 = vpack.c.bf16 %v3594_v51, %v3594_v51  ;;  %v3897_v56 = vpack.c.bf16 %v6875_v54, %v6875_v54 }
0x1df6   : > { %v3834_v34 = vpack.c.bf16 %v3829_v6, %v3829_v6  ;;  %5548 = vrcp.f32 %v3816_v0 }
0x1df7   : > { %v3833_v52 = vpack.c.bf16 %v3828_v63, %v3828_v63  ;;  %v3609_v9 = vunpack.c.l.b16 %v3599_v58  ;;  %3899 = vrot.lane.b32.xlu2 %v3897_v56, %s5624_s15 }
0x1df8   : > { %v3844_v22 = vunpack.c.l.b16 %v3834_v34 }
0x1df9   : > { %v3843_v4 = vunpack.c.l.b16 %v3833_v52 }
0x1dfb   : > { %v5547_v29 = vpop.eup %5546  ;;  %v3848_v32 = vpack.c.b16 %v3844_v22, %v3843_v4 }
0x1dfc   : > { %v3595_v53 = vmul.f32 %v5547_v29, %v5531_v48  ;;  %v5549_v42 = vpop.eup %5548 }
0x1dfd   : > { %v3830_v28 = vmul.f32 %v5549_v42, %v7019_v13 }
0x1dfe   : > { %v3600_v10 = vpack.c.bf16 %v3595_v53, %v3595_v53  ;;  %v3854_v37 = vpop.permute.xlu0 %3853 }
0x1dff   : > { %3877 = vmatpush.bf16.msra.mxu1 %v3854_v37  ;;  %v3835_v35 = vpack.c.bf16 %v3830_v28, %v3830_v28 }
0x1e00   : > { %v3610_v60 = vunpack.c.l.b16 %v3600_v10 }
0x1e01   : > { %v3845_v20 = vunpack.c.l.b16 %v3835_v35 }
0x1e02   : > { %v3613_v47 = vpack.c.b16 %v3610_v60, %v3609_v9 }
0x1e03   : > { %v3852_v18 = vpop.permute.xlu1 %3851 }
0x1e04   : > { %5096 = vmatmul.msk.bf16.gmra.mxu3 %vm579_vm6, %v3613_v47  ;;  %3878 = vmatpush.bf16.msra.mxu1 %v3852_v18 }
0x1e07   : > { %5104 = vmatmul.msk.bf16.vlgmr.msra.gmra.mxu1 %vm579_vm6, %v3848_v32 }
0x1e0b   : > { %v3664_v43 = vpop.permute.xlu1 %3663 }
0x1e29   : > { %v3792_v23 = vpop.xlane.xlu0 %3791 }
0x1e2a   : > { %v3797_v48 = vsub.f32 %v7036_v57, %v3792_v23 }
0x1e2c   : > { %v3806_v3 = vmul.f32 1.442695, %v3797_v48 }
0x1e2e   : > { %5550 = vpow2.f32 %v3806_v3  ;;  %v3819_v25 = vpop.xlane.xlu2 %3818 }
0x1e2f   : > { %5552 = vrcp.f32 %v3819_v25 }
0x1e34   : > { %v5551_v41 = vpop.eup %5550 }
0x1e35   : > { %v5553_v46 = vpop.eup %5552  ;;  %v3820_v36 = vsel %vm579_vm6, %v5551_v41, 0.0 }
0x1e36   : > { %v3831_v54 = vmul.f32 %v5553_v46, %v7041_v8  ;;  %v3586_v61 = vpop.xlane.xlu2 %3585  ;;  %3821 = vadd.xlane.f32.xlu0 %v3820_v36  ;;  %v3675_v8 = vsel %vm670_vm7, %v3664_v43, 0 }
0x1e37   : > { %5554 = vrcp.f32 %v3586_v61  ;;  %3684 = vmatpush.bf16.msra.mxu2 %v3675_v8 }
0x1e38   : > { %v3836_v62 = vpack.c.bf16 %v3831_v54, %v3831_v54 }
0x1e3a   : > { %v3846_v57 = vunpack.c.l.b16 %v3836_v62 }
0x1e3c   : > { %v3849_v55 = vpack.c.b16 %v3846_v57, %v3845_v20 }
0x1e3d   : > { %v5555_v16 = vpop.eup %5554 }
0x1e3e   : > { %v3596_v24 = vmul.f32 %v5555_v16, %v7045_v15  ;;  %5105 = vmatmul.msk.bf16.gmra.mxu1 %vm579_vm6, %v3849_v55 }
0x1e40   : > { %v3601_v13 = vpack.c.bf16 %v3596_v24, %v3596_v24 }
0x1e42   : > { %v3611_v44 = vunpack.c.l.b16 %v3601_v13 }
0x1e44   : > { %v3614_v40 = vpack.c.b16 %v3611_v44, %v3611_v44 }
0x1e46   : > { %5097 = vmatmul.msk.bf16.gmra.mxu3 %vm579_vm6, %v3614_v40 }
0x1e51   : > { %v3900_v50 = vpop.permute.xlu2 %3899 }
0x1e52   : > { %v3911_v21 = vsel %vm670_vm7, %v3900_v50, 0 }
0x1e53   : > { %3920 = vmatpush.bf16.msrb.mxu3 %v3911_v21 }
0x1e76   : > { %v3644_v49 = vpop.f32.mrf.mxu3 }
0x1e7e   : > { %v3646_v0 = vpop.f32.mrf.mxu3 }
0x1e7f   : > { %v3658_v31 = vpack.c.bf16 %v3646_v0, %v3644_v49 }
0x1e81   : > { %5098 = vmatmul.msk.bf16.vlgmr.msra.gmra.mxu2 %vm537_vm4, %v3658_v31 }
0x1e84   : > { %v3880_v15 = vpop.f32.mrf.mxu1 }
0x1e87   : > { %v3649_v27 = vpop.f32.mrf.mxu3 }
0x1e8c   : > { %v3882_v19 = vpop.f32.mrf.mxu1 }
0x1e8d   : > { %v3894_v7 = vpack.c.bf16 %v3882_v19, %v3880_v15 }
0x1e8f   : > { %v3651_v17 = vpop.f32.mrf.mxu3  ;;  %5107 = vmatmul.msk.bf16.vlgmr.msrb.gmra.mxu3 %vm537_vm4, %v3894_v7 }
0x1e90   : > { %v3659_v2 = vpack.c.bf16 %v3651_v17, %v3649_v27 }
0x1e92   : > { %5099 = vmatmul.msk.bf16.gmra.mxu2 %vm537_vm4, %v3659_v2 }
0x1ea9   : > { %v3822_v11 = vpop.xlane.xlu0 %3821 }
0x1eaa   : > { %5556 = vrcp.f32 %v3822_v11 }
0x1eb0   : > { %v5557_v33 = vpop.eup %5556 }
0x1eb1   : > { %v3832_v5 = vmul.f32 %v5557_v33, %v5551_v41 }
0x1eb3   : > { %v3837_v51 = vpack.c.bf16 %v3832_v5, %v3832_v5 }
0x1eb5   : > { %v3847_v6 = vunpack.c.l.b16 %v3837_v51 }
0x1eb7   : > { %v3850_v29 = vpack.c.b16 %v3847_v6, %v3847_v6 }
0x1eb9   : > { %5106 = vmatmul.msk.bf16.gmra.mxu1 %vm579_vm6, %v3850_v29 }
0x1ebb   : > { %v3885_v63 = vpop.f32.mrf.mxu1 }
0x1ec3   : > { %v3887_v58 = vpop.f32.mrf.mxu1 }
0x1ec4   : > { %v3895_v53 = vpack.c.bf16 %v3887_v58, %v3885_v63 }
0x1ec6   : > { %5108 = vmatmul.msk.bf16.gmra.mxu3 %vm537_vm4, %v3895_v53 }
0x1ec9   : > { %v3654_v34 = vpop.f32.mrf.mxu3 }
0x1eca   : > { %v3660_v10 = vpack.c.bf16 %v3654_v34, %v3654_v34 }
0x1ecc   : > { %5100 = vmatmul.msk.bf16.gmra.mxu2 %vm537_vm4, %v3660_v10 }
0x1ed1   : > { %v3656_v37 = vpop.f32.mrf.mxu3 }
0x1f04   : > { %v3686_v52 = vpop.f32.mrf.mxu2 }
0x1f05   : > { %3705 = vrot.lane.b32.xlu0 %v3686_v52, %s5625_s16 }
0x1f0c   : > { %v3688_v9 = vpop.f32.mrf.mxu2 }
0x1f0d   : > { %3707 = vrot.lane.b32.xlu1 %v3688_v9, %s5625_s16 }
0x1f12   : > { %v3922_v60 = vpop.f32.mrf.mxu3 }
0x1f15   : > { %v3691_v22 = vpop.f32.mrf.mxu2  ;;  %3941 = vrot.lane.b32.xlu1 %v3922_v60, %s5625_s16 }
0x1f1a   : > { %v3924_v47 = vpop.f32.mrf.mxu3 }
0x1f1b   : > { %3943 = vrot.lane.b32.xlu0 %v3924_v47, %s5625_s16 }
0x1f1d   : > { %v3693_v4 = vpop.f32.mrf.mxu2  ;;  %3709 = vrot.lane.b32.xlu1 %v3691_v22, %s5625_s16 }
0x1f1e   : > { %3711 = vrot.lane.b32.xlu2 %v3693_v4, %s5625_s16 }
0x1f36   : > { %v3890_v18 = vpop.f32.mrf.mxu1 }
0x1f37   : > { %v3896_v32 = vpack.c.bf16 %v3890_v18, %v3890_v18 }
0x1f39   : > { %5109 = vmatmul.msk.bf16.gmra.mxu3 %vm537_vm4, %v3896_v32 }
0x1f3e   : > { %v3892_v56 = vpop.f32.mrf.mxu1 }
0x1f49   : > { %v3927_v23 = vpop.f32.mrf.mxu3 }
0x1f4a   : > { %3945 = vrot.lane.b32.xlu0 %v3927_v23, %s5625_s16 }
0x1f4f   : > { %v3696_v48 = vpop.f32.mrf.mxu2 }
0x1f51   : > { %v3929_v3 = vpop.f32.mrf.mxu3 }
0x1f52   : > { %3947 = vrot.lane.b32.xlu1 %v3929_v3, %s5625_s16 }
0x1f57   : > { %v3698_v25 = vpop.f32.mrf.mxu2 }
0x1f5a   : > { %3713 = vrot.lane.b32.xlu1 %v3696_v48, %s5625_s16 }
0x1f77   : > { %v3706_v28 = vpop.permute.xlu0 %3705 }
0x1f78   : > { %v3720_v41 = vadd.f32 %v6922_v39, %v3706_v28  ;;  %v3712_v24 = vpop.permute.xlu2 %3711 }
0x1f79   : > { %v3723_v13 = vadd.f32 %v6922_v39, %v3712_v24 }
0x1f7f   : > { %v3708_v42 = vpop.permute.xlu1 %3707 }
0x1f80   : > { %v3721_v35 = vadd.f32 %v6922_v39, %v3708_v42 }
0x1f87   : > { %v3942_v46 = vpop.permute.xlu1 %3941 }
0x1f88   : > { %v3956_v36 = vadd.f32 %v3942_v46, %v3720_v41 }
0x1f8a   : > { %3966 = vrot.lane.b32.xlu2 %v3956_v36, %s5624_s15 }
0x1f8d   : > { %v3944_v54 = vpop.permute.xlu0 %3943 }
0x1f8e   : > { %v3957_v61 = vadd.f32 %v3944_v54, %v3721_v35 }
0x1f8f   : > { %v3710_v62 = vpop.permute.xlu1 %3709 }
0x1f90   : > { %3968 = vrot.lane.b32.xlu0 %v3957_v61, %s5624_s15  ;;  %v3722_v20 = vadd.f32 %v6922_v39, %v3710_v62 }
0x1fbc   : > { %v3932_v57 = vpop.f32.mrf.mxu3  ;;  %v3946_v55 = vpop.permute.xlu0 %3945 }
0x1fbd   : > { %v3958_v16 = vadd.f32 %v3946_v55, %v3722_v20  ;;  %3949 = vrot.lane.b32.xlu2 %v3932_v57, %s5625_s16 }
0x1fbf   : > { %3970 = vrot.lane.b32.xlu0 %v3958_v16, %s5624_s15 }
0x1fc4   : > { %v3948_v44 = vpop.permute.xlu1 %3947  ;;  %v3934_v40 = vpop.f32.mrf.mxu3 }
0x1fc5   : > { %v3959_v43 = vadd.f32 %v3948_v44, %v3723_v13 }
0x1fc7   : > { %3972 = vrot.lane.b32.xlu1 %v3959_v43, %s5624_s15 }
0x1fcc   : > { %v3714_v15 = vpop.permute.xlu1 %3713 }
0x1fcd   : > { %v3724_v27 = vadd.f32 %v6922_v39, %v3714_v15 }
0x1fe4   : > { %v3967_v8 = vpop.permute.xlu2 %3966 }
0x1fe5   : > { %v3981_v50 = vadd.f32 %v3967_v8, %v6889_v14 }
0x1fe7   : > { %v3986_v21 = vsel %vm337_vm2, %v3981_v50, 0.0 }
0x1fe8   : > { %3987 = vadd.xlane.f32.xlu2 %v3986_v21 }
0x2002   : > { %v3969_v49 = vpop.permute.xlu0 %3968 }
0x2003   : > { %v3982_v0 = vadd.f32 %v3969_v49, %v6892_v26 }
0x2005   : > { %v3989_v31 = vsel %vm337_vm2, %v3982_v0, 0.0 }
0x2006   : > { %3990 = vadd.xlane.f32.xlu0 %v3989_v31 }
0x2017   : > { %v3950_v19 = vpop.permute.xlu2 %3949 }
0x2018   : > { %v3960_v7 = vadd.f32 %v3950_v19, %v3724_v27 }
0x201a   : > { %3974 = vrot.lane.b32.xlu1 %v3960_v7, %s5624_s15 }
0x2031   : > { %v3971_v14 = vpop.permute.xlu0 %3970 }
0x2032   : > { %v3983_v33 = vadd.f32 %v3971_v14, %v6902_v30 }
0x2034   : > { %v3992_v26 = vsel %vm337_vm2, %v3983_v33, 0.0 }
0x2039   : > { %v3973_v17 = vpop.permute.xlu1 %3972 }
0x203a   : > { %v3984_v2 = vadd.f32 %v3973_v17, %v6905_v12 }
0x203c   : > { %v3995_v11 = vsel %vm337_vm2, %v3984_v2, 0.0 }
0x203d   : > { %3996 = vadd.xlane.f32.xlu2 %v3995_v11 }
0x2044   : > { %3993 = vadd.xlane.f32.xlu1 %v3992_v26 }
0x205b   : > { %v3988_v12 = vpop.xlane.xlu2 %3987 }
0x205c   : > { %v4001_v58 = vmul.f32 %v3988_v12, %v5724_v38 }
0x205e   : > { %v7115_v34 = vsub.f32 %v3981_v50, %v4001_v58 }
0x2060   : > { %v4011_v37 = vmul.f32 %v7115_v34, %v7115_v34 }
0x2062   : > { %v4016_v52 = vsel %vm337_vm2, %v4011_v37, 0.0 }
0x2079   : > { %v3991_v5 = vpop.xlane.xlu0 %3990 }
0x207a   : > { %v4002_v51 = vmul.f32 %v3991_v5, %v5724_v38 }
0x207c   : > { %v7108_v6 = vsub.f32 %v3982_v0, %v4002_v51 }
0x207e   : > { %v4012_v29 = vmul.f32 %v7108_v6, %v7108_v6 }
0x2080   : > { %v4019_v63 = vsel %vm337_vm2, %v4012_v29, 0.0 }
0x2081   : > { %4020 = vadd.xlane.f32.xlu2 %v4019_v63 }
0x208c   : > { %v3975_v53 = vpop.permute.xlu1 %3974 }
0x208d   : > { %v3985_v30 = vadd.f32 %v3975_v53, %v6914_v1 }
0x208f   : > { %v3998_v10 = vsel %vm337_vm2, %v3985_v30, 0.0 }
0x2090   : > { %3999 = vadd.xlane.f32.xlu0 %v3998_v10 }
0x2098   : > { %4017 = vadd.xlane.f32.xlu0 %v4016_v52 }
0x20ac   : > { %4096 = vrot.lane.b32.xlu0 %v6922_v39, %s5626_s17 }
0x20b0   : > { %v3997_v9 = vpop.xlane.xlu2 %3996 }
0x20b1   : > { %v4004_v60 = vmul.f32 %v3997_v9, %v5724_v38 }
0x20b3   : > { %v7124_v22 = vsub.f32 %v3984_v2, %v4004_v60 }
0x20b5   : > { %v4014_v1 = vmul.f32 %v7124_v22, %v7124_v22 }
0x20b7   : > { %v3994_v47 = vpop.xlane.xlu1 %3993  ;;  %v4025_v4 = vsel %vm337_vm2, %v4014_v1, 0.0 }
0x20b8   : > { %v4003_v18 = vmul.f32 %v3994_v47, %v5724_v38  ;;  %4026 = vadd.xlane.f32.xlu2 %v4025_v4 }
0x20ba   : > { %v7130_v32 = vsub.f32 %v3983_v33, %v4003_v18 }
0x20bc   : > { %v4013_v56 = vmul.f32 %v7130_v32, %v7130_v32 }
0x20be   : > { %v4022_v23 = vsel %vm337_vm2, %v4013_v56, 0.0 }
0x20bf   : > { %4023 = vadd.xlane.f32.xlu1 %v4022_v23 }
0x20d0   : > { %4116 = vrot.lane.b32.xlu2 %v6879_v45, %s5626_s17 }
0x20d8   : > { %4104 = vrot.lane.b32.xlu1 %v6922_v39, %s5625_s16  ;;  %4119 = vrot.lane.b32.xlu2 %v6922_v39, %s5627_s18 }
0x20e0   : > { %4257 = vrot.lane.b32.xlu1 %v6879_v45, %s5625_s16  ;;  %4260 = vrot.lane.b32.xlu2 %v6922_v39, %s5628_s19 }
0x20f4   : > { %v4021_v46 = vpop.xlane.xlu2 %4020 }
0x20f5   : > { %v4032_v45 = vmul.f32 %v4021_v46, %v5724_v38 }
0x20f7   : > { %v4037_v54 = vadd.f32 1e-05, %v4032_v45 }
0x20f9   : > { %vm4057_vm15 = vweird.f32 %v4037_v54 }
0x2103   : > { %v4000_v48 = vpop.xlane.xlu0 %3999 }
0x2104   : > { %v4005_v3 = vmul.f32 %v4000_v48, %v5724_v38 }
0x2106   : > { %v7146_v25 = vsub.f32 %v3985_v30, %v4005_v3 }
0x2108   : > { %v4015_v42 = vmul.f32 %v7146_v25, %v7146_v25 }
0x210a   : > { %v4028_v28 = vsel %vm337_vm2, %v4015_v42, 0.0 }
0x210b   : > { %4029 = vadd.xlane.f32.xlu0 %v4028_v28  ;;  %v4018_v41 = vpop.xlane.xlu0 %4017 }
0x210c   : > { %v4031_v36 = vmul.f32 %v4018_v41, %v5724_v38 }
0x210e   : > { %v4036_v35 = vadd.f32 1e-05, %v4031_v36 }
0x2110   : > { %5558 = vrsqrt.f32 %v4036_v35  ;;  %vm4047_vm7 = vweird.f32 %v4036_v35 }
0x2111   : > { %5560 = vrsqrt.f32 %v4037_v54 }
0x2116   : > { %v5559_v39 = vpop.eup %5558 }
0x2117   : > { %v5561_v62 = vpop.eup %5560  ;;  %v4042_v57 = vmul.f32 %v5559_v39, %v4036_v35  ;;  %vm4048_vm4 = vweird.f32 %v5559_v39 }
0x2118   : > { %v4052_v55 = vmul.f32 %v5561_v62, %v4037_v54  ;;  %vm4058_vm6 = vweird.f32 %v5561_v62  ;;  %vm4049_vm14 = vmor %vm4047_vm7, %vm4048_vm4 }
0x2119   : > { %v4043_v24 = vmul.f32 %v5559_v39, %v4042_v57  ;;  %vm4059_vm0 = vmor %vm4057_vm15, %vm4058_vm6 }
0x211a   : > { %v4053_v43 = vmul.f32 %v5561_v62, %v4052_v55 }
0x211b   : > { %v4044_v50 = vmul.f32 0.5, %v4043_v24 }
0x211c   : > { %v4054_v21 = vmul.f32 0.5, %v4053_v43 }
0x211d   : > { %v4045_v49 = vsub.f32 1.5, %v4044_v50 }
0x211e   : > { %v4055_v31 = vsub.f32 1.5, %v4054_v21  ;;  %v7156_v51 = vpop.permute.xlu0 %4096 }
0x211f   : > { %v4046_v27 = vmul.f32 %v5559_v39, %v4045_v49 }
0x2120   : > { %v4056_v17 = vmul.f32 %v5561_v62, %v4055_v31 }
0x2121   : > { %v4050_v14 = vsel %vm4049_vm14, %v5559_v39, %v4046_v27 }
0x2122   : > { %v4060_v26 = vsel %vm4059_vm0, %v5561_v62, %v4056_v17  ;;  %v4091_v5 = vmul.f32 %v4050_v14, %v7115_v34 }
0x2123   : > { %v4092_v12 = vmul.f32 %v4060_v26, %v7108_v6 }
0x2124   : > { %v4099_v58 = vmul.f32 %v7156_v51, %v4091_v5 }
0x2125   : > { %v4100_v53 = vmul.f32 %v7156_v51, %v4092_v12 }
0x212b   : > { %v4027_v61 = vpop.xlane.xlu2 %4026 }
0x212c   : > { %v4034_v20 = vmul.f32 %v4027_v61, %v5724_v38 }
0x212e   : > { %v4039_v16 = vadd.f32 1e-05, %v4034_v20 }
0x2130   : > { %5562 = vrsqrt.f32 %v4039_v16  ;;  %vm4077_vm9 = vweird.f32 %v4039_v16 }
0x2132   : > { %v4024_v13 = vpop.xlane.xlu1 %4023 }
0x2133   : > { %v4033_v44 = vmul.f32 %v4024_v13, %v5724_v38  ;;  %v4117_v40 = vpop.permute.xlu2 %4116 }
0x2134   : > { %4138 = vmatpush.bf16.msrb.mxu2 %v4117_v40 }
0x2135   : > { %v4038_v8 = vadd.f32 1e-05, %v4033_v44 }
0x2136   : > { %v5563_v0 = vpop.eup %5562 }
0x2137   : > { %5564 = vrsqrt.f32 %v4038_v8  ;;  %v4072_v19 = vmul.f32 %v5563_v0, %v4039_v16  ;;  %vm4067_vm3 = vweird.f32 %v4038_v8  ;;  %vm4078_vm8 = vweird.f32 %v5563_v0 }
0x2138   : > { %vm4079_vm10 = vmor %vm4077_vm9, %vm4078_vm8 }
0x2139   : > { %v4073_v11 = vmul.f32 %v5563_v0, %v4072_v19 }
0x213b   : > { %v4074_v29 = vmul.f32 0.5, %v4073_v11  ;;  %v7194_v57 = vpop.permute.xlu2 %4119 }
0x213d   : > { %v5565_v15 = vpop.eup %5564  ;;  %v4075_v30 = vsub.f32 1.5, %v4074_v29 }
0x213e   : > { %v4062_v7 = vmul.f32 %v5565_v15, %v4038_v8  ;;  %vm4068_vm1 = vweird.f32 %v5565_v15 }
0x213f   : > { %vm4069_vm5 = vmor %vm4067_vm3, %vm4068_vm1  ;;  %v4076_v9 = vmul.f32 %v5563_v0, %v4075_v30 }
0x2140   : > { %v4063_v2 = vmul.f32 %v5565_v15, %v4062_v7 }
0x2141   : > { %v4080_v47 = vsel %vm4079_vm10, %v5563_v0, %v4076_v9 }
0x2142   : > { %v4064_v33 = vmul.f32 0.5, %v4063_v2  ;;  %v4094_v4 = vmul.f32 %v4080_v47, %v7124_v22 }
0x2144   : > { %v4065_v63 = vsub.f32 1.5, %v4064_v33  ;;  %v4102_v56 = vmul.f32 %v7156_v51, %v4094_v4 }
0x2146   : > { %v4066_v10 = vmul.f32 %v5565_v15, %v4065_v63 }
0x2148   : > { %v4070_v60 = vsel %vm4069_vm5, %v5565_v15, %v4066_v10 }
0x2149   : > { %v4093_v1 = vmul.f32 %v4070_v60, %v7130_v32 }
0x214a   : > { %v7161_v37 = vpop.permute.xlu1 %4104 }
0x214b   : > { %v7164_v52 = vadd.f32 %v7161_v37, %v4099_v58  ;;  %v7167_v34 = vadd.f32 %v7161_v37, %v4100_v53  ;;  %v4101_v18 = vmul.f32 %v7156_v51, %v4093_v1  ;;  %v7180_v48 = vadd.f32 %v7161_v37, %v4102_v56 }
0x214d   : > { %v4112_v6 = vpack.c.bf16 %v7167_v34, %v7164_v52  ;;  %v7177_v23 = vadd.f32 %v7161_v37, %v4101_v18 }
0x214f   : > { %5110 = vmatmul.msk.bf16.vlgmr.msrb.gmra.mxu2 %vm337_vm2, %v4112_v6  ;;  %v4113_v3 = vpack.c.bf16 %v7180_v48, %v7177_v23 }
0x2152   : > { %v4258_v44 = vpop.permute.xlu1 %4257 }
0x2153   : > { %4279 = vmatpush.bf16.msrb.mxu0 %v4258_v44 }
0x215f   : > { %5111 = vmatmul.msk.bf16.gmra.mxu2 %vm337_vm2, %v4113_v3 }
0x217e   : > { %v4030_v42 = vpop.xlane.xlu0 %4029 }
0x217f   : > { %v4035_v32 = vmul.f32 %v4030_v42, %v5724_v38 }
0x2181   : > { %v4040_v28 = vadd.f32 1e-05, %v4035_v32 }
0x2183   : > { %5566 = vrsqrt.f32 %v4040_v28  ;;  %vm4087_vm12 = vweird.f32 %v4040_v28 }
0x2189   : > { %v5567_v22 = vpop.eup %5566 }
0x218a   : > { %v4082_v41 = vmul.f32 %v5567_v22, %v4040_v28  ;;  %vm4088_vm11 = vweird.f32 %v5567_v22 }
0x218b   : > { %vm4089_vm13 = vmor %vm4087_vm12, %vm4088_vm11 }
0x218c   : > { %v4083_v46 = vmul.f32 %v5567_v22, %v4082_v41 }
0x218e   : > { %v4084_v36 = vmul.f32 0.5, %v4083_v46 }
0x2190   : > { %v4085_v45 = vsub.f32 1.5, %v4084_v36 }
0x2192   : > { %v4086_v35 = vmul.f32 %v5567_v22, %v4085_v45 }
0x2194   : > { %v4090_v54 = vsel %vm4089_vm13, %v5567_v22, %v4086_v35 }
0x2195   : > { %v4095_v39 = vmul.f32 %v4090_v54, %v7146_v25 }
0x2197   : > { %v4103_v61 = vmul.f32 %v7156_v51, %v4095_v39 }
0x2199   : > { %v7189_v62 = vadd.f32 %v7161_v37, %v4103_v61 }
0x219b   : > { %v4114_v20 = vpack.c.bf16 %v7189_v62, %v7189_v62 }
0x219d   : > { %5112 = vmatmul.msk.bf16.gmra.mxu2 %vm337_vm2, %v4114_v20 }
0x21d2   : > { %v4140_v55 = vpop.f32.mrf.mxu2 }
0x21d3   : > { %v4141_v16 = vadd.f32 %v4140_v55, %v7194_v57 }
0x21d5   : > { %v5113_v24 = vmul.f32 -1.442695, %v4141_v16 }
0x21d7   : > { %5568 = vpow2.f32 %v5113_v24 }
0x21da   : > { %v4142_v13 = vpop.f32.mrf.mxu2 }
0x21db   : > { %v4143_v25 = vadd.f32 %v4142_v13, %v7194_v57 }
0x21dd   : > { %v5569_v40 = vpop.eup %5568  ;;  %v5114_v43 = vmul.f32 -1.442695, %v4143_v25 }
0x21de   : > { %v4169_v8 = vadd.f32 1.0, %v5569_v40 }
0x21df   : > { %5570 = vpow2.f32 %v5114_v43 }
0x21e0   : > { %5572 = vrcp.f32 %v4169_v8  ;;  %v4185_v63 = vand.u32 2147483648, %v4169_v8  ;;  %vm4179_vm6 = vweird.f32 %v4169_v8  ;;  %v4183_v12 = vand.u32 2147483647, %v4169_v8 }
0x21e2   : > { %v4145_v50 = vpop.f32.mrf.mxu2  ;;  %v4186_v9 = vor.u32 1.1754944e-38, %v4185_v63  ;;  %vm4184_vm15 = vcmp.eq.f32.partialorder %v4183_v12, 8.507059e+37 }
0x21e3   : > { %v7199_v21 = vadd.f32 %v4145_v50, %v7194_v57 }
0x21e5   : > { %v5571_v49 = vpop.eup %5570  ;;  %v5115_v0 = vmul.f32 -1.442695, %v7199_v21 }
0x21e6   : > { %v5573_v31 = vpop.eup %5572  ;;  %v4170_v15 = vadd.f32 1.0, %v5571_v49 }
0x21e7   : > { %v4175_v27 = vmul.f32 %v5573_v31, %v4169_v8  ;;  %5574 = vpow2.f32 %v5115_v0  ;;  %vm4180_vm4 = vweird.f32 %v5573_v31 }
0x21e8   : > { %5576 = vrcp.f32 %v4170_v15  ;;  %vm4181_vm7 = vmor %vm4179_vm6, %vm4180_vm4  ;;  %v4200_v53 = vand.u32 2147483648, %v4170_v15  ;;  %v4198_v6 = vand.u32 2147483647, %v4170_v15  ;;  %vm4194_vm0 = vweird.f32 %v4170_v15 }
0x21e9   : > { %v4176_v19 = vsub.f32 1.0, %v4175_v27 }
0x21ea   : > { %v4147_v7 = vpop.f32.mrf.mxu2  ;;  %v4201_v18 = vor.u32 1.1754944e-38, %v4200_v53  ;;  %vm4199_vm3 = vcmp.eq.f32.partialorder %v4198_v6, 8.507059e+37 }
0x21eb   : > { %v4177_v17 = vmul.f32 %v5573_v31, %v4176_v19  ;;  %v7203_v2 = vadd.f32 %v4147_v7, %v7194_v57 }
0x21ed   : > { %v5575_v14 = vpop.eup %5574  ;;  %v5116_v11 = vmul.f32 -1.442695, %v7203_v2  ;;  %v4178_v5 = vadd.f32 %v5573_v31, %v4177_v17 }
0x21ee   : > { %v5577_v33 = vpop.eup %5576  ;;  %v4171_v26 = vadd.f32 1.0, %v5575_v14 }
0x21ef   : > { %v4190_v29 = vmul.f32 %v5577_v33, %v4170_v15  ;;  %5578 = vpow2.f32 %v5116_v11  ;;  %v4182_v30 = vsel %vm4181_vm7, %v5573_v31, %v4178_v5  ;;  %vm4195_vm14 = vweird.f32 %v5577_v33 }
0x21f0   : > { %5580 = vrcp.f32 %v4171_v26  ;;  %v4187_v4 = vsel %vm4184_vm15, %v4186_v9, %v4182_v30  ;;  %vm4196_vm1 = vmor %vm4194_vm0, %vm4195_vm14  ;;  %v4215_v39 = vand.u32 2147483648, %v4171_v26  ;;  %vm4209_vm8 = vweird.f32 %v4171_v26  ;;  %v4261_v30 = vpop.permute.xlu2 %4260 }
0x21f1   : > { %v4191_v58 = vsub.f32 1.0, %v4190_v29  ;;  %v4249_v28 = vmul.f32 %v4187_v4, %v4141_v16  ;;  %v4213_v61 = vand.u32 2147483647, %v4171_v26 }
0x21f3   : > { %v4192_v10 = vmul.f32 %v5577_v33, %v4191_v58  ;;  %vm4214_vm11 = vcmp.eq.f32.partialorder %v4213_v61, 8.507059e+37 }
0x21f5   : > { %v5579_v60 = vpop.eup %5578  ;;  %v4193_v1 = vadd.f32 %v5577_v33, %v4192_v10 }
0x21f6   : > { %v5581_v47 = vpop.eup %5580  ;;  %v4172_v56 = vadd.f32 1.0, %v5579_v60 }
0x21f7   : > { %v4197_v3 = vsel %vm4196_vm1, %v5577_v33, %v4193_v1  ;;  %v4205_v42 = vmul.f32 %v5581_v47, %v4171_v26  ;;  %vm4210_vm5 = vweird.f32 %v5581_v47 }
0x21f8   : > { %v4202_v32 = vsel %vm4199_vm3, %v4201_v18, %v4197_v3  ;;  %5582 = vrcp.f32 %v4172_v56  ;;  %vm4211_vm9 = vmor %vm4209_vm8, %vm4210_vm5  ;;  %v4230_v55 = vand.u32 2147483648, %v4172_v56  ;;  %v4228_v16 = vand.u32 2147483647, %v4172_v56 }
0x21f9   : > { %v4250_v22 = vmul.f32 %v4202_v32, %v4143_v25  ;;  %v4206_v41 = vsub.f32 1.0, %v4205_v42  ;;  %v4216_v25 = vor.u32 1.1754944e-38, %v4215_v39  ;;  %vm4224_vm12 = vweird.f32 %v4172_v56 }
0x21fa   : > { %v4231_v43 = vor.u32 1.1754944e-38, %v4230_v55  ;;  %vm4229_vm4 = vcmp.eq.f32.partialorder %v4228_v16, 8.507059e+37 }
0x21fb   : > { %v4254_v46 = vpack.c.bf16 %v4250_v22, %v4249_v28  ;;  %v4207_v36 = vmul.f32 %v5581_v47, %v4206_v41 }
0x21fd   : > { %5118 = vmatmul.msk.bf16.vlgmr.msrb.gmra.mxu0 %vm337_vm2, %v4254_v46  ;;  %v4208_v35 = vadd.f32 %v5581_v47, %v4207_v36 }
0x21fe   : > { %v5583_v45 = vpop.eup %5582 }
0x21ff   : > { %v4220_v54 = vmul.f32 %v5583_v45, %v4172_v56  ;;  %v4212_v24 = vsel %vm4211_vm9, %v5581_v47, %v4208_v35  ;;  %vm4225_vm10 = vweird.f32 %v5583_v45 }
0x2200   : > { %v4217_v40 = vsel %vm4214_vm11, %v4216_v25, %v4212_v24  ;;  %vm4226_vm13 = vmor %vm4224_vm12, %vm4225_vm10 }
0x2201   : > { %v4221_v20 = vsub.f32 1.0, %v4220_v54  ;;  %v4251_v49 = vmul.f32 %v4217_v40, %v7199_v21 }
0x2203   : > { %v4222_v13 = vmul.f32 %v5583_v45, %v4221_v20 }
0x2205   : > { %v4223_v44 = vadd.f32 %v5583_v45, %v4222_v13 }
0x2207   : > { %v4227_v8 = vsel %vm4226_vm13, %v5583_v45, %v4223_v44 }
0x2208   : > { %v4232_v50 = vsel %vm4229_vm4, %v4231_v43, %v4227_v8 }
0x2209   : > { %v4252_v0 = vmul.f32 %v4232_v50, %v7203_v2 }
0x220b   : > { %v4255_v31 = vpack.c.bf16 %v4252_v0, %v4251_v49 }
0x220d   : > { %5119 = vmatmul.msk.bf16.gmra.mxu0 %vm337_vm2, %v4255_v31 }
0x2220   : > { %v4150_v15 = vpop.f32.mrf.mxu2 }
0x2221   : > { %v4151_v27 = vadd.f32 %v4150_v15, %v7194_v57  ;;  %v7247_v15 = vld [vmem:[%s5697_s9] sm:$0xff] }
0x2223   : > { %v5117_v19 = vmul.f32 -1.442695, %v4151_v27 }
0x2225   : > { %5584 = vpow2.f32 %v5117_v19  ;;  %v7255_v19 = vld [vmem:[%s5697_s9 + $0x20] sm:$0xff] }
0x2228   : > { %v4152_v7 = vpop.f32.mrf.mxu2 }
0x2229   : > { %v7259_v7 = vld [vmem:[%s5697_s9 + $0x18] sm:$0xff] }
0x222b   : > { %v5585_v17 = vpop.eup %5584 }
0x222c   : > { %v4173_v14 = vadd.f32 1.0, %v5585_v17 }
0x222e   : > { %5586 = vrcp.f32 %v4173_v14  ;;  %v4245_v5 = vand.u32 2147483648, %v4173_v14  ;;  %v4243_v21 = vand.u32 2147483647, %v4173_v14  ;;  %vm4239_vm7 = vweird.f32 %v4173_v14 }
0x2230   : > { %v4246_v63 = vor.u32 1.1754944e-38, %v4245_v5  ;;  %vm4244_vm15 = vcmp.eq.f32.partialorder %v4243_v21, 8.507059e+37  ;;  %v7269_v5 = vld [vmem:[%s5697_s9 + $0x10] sm:$0xff] }
0x2234   : > { %v5587_v11 = vpop.eup %5586 }
0x2235   : > { %v4235_v33 = vmul.f32 %v5587_v11, %v4173_v14  ;;  %vm4240_vm6 = vweird.f32 %v5587_v11 }
0x2236   : > { %vm4241_vm14 = vmor %vm4239_vm7, %vm4240_vm6 }
0x2237   : > { %v4236_v26 = vsub.f32 1.0, %v4235_v33 }
0x2239   : > { %v4237_v29 = vmul.f32 %v5587_v11, %v4236_v26 }
0x223b   : > { %v4238_v2 = vadd.f32 %v5587_v11, %v4237_v29 }
0x223d   : > { %v4242_v12 = vsel %vm4241_vm14, %v5587_v11, %v4238_v2 }
0x223e   : > { %v4247_v57 = vsel %vm4244_vm15, %v4246_v63, %v4242_v12  ;;  %v4423_v63 = vld [vmem:[%s7620_s5] sm:$0xff]  ;;  %v4424_v12 = vld [vmem:[%s7620_s5 + $0x8] sm:$0xff] }
0x223f   : > { %v4253_v58 = vmul.f32 %v4247_v57, %v4151_v27  ;;  %v7251_v27 = vld [vmem:[%s5697_s9 + $0x8] sm:$0xff]  ;;  %v4425_v57 = vpack.c.bf16 %v4424_v12, %v4423_v63 }
0x2241   : > { %v4256_v53 = vpack.c.bf16 %v4253_v58, %v4253_v58  ;;  %4442 = vmatpush.bf16.msrb.mxu1 %v4425_v57 }
0x2243   : > { %5120 = vmatmul.msk.bf16.gmra.mxu0 %vm337_vm2, %v4256_v53 }
0x227a   : > { %v4281_v10 = vpop.f32.mrf.mxu0 }
0x227b   : > { %v4282_v6 = vadd.f32 %v4281_v10, %v4261_v30 }
0x227d   : > { %v4295_v9 = vadd.f32 %v4282_v6, %v7164_v52 }
0x227f   : > { %v4300_v60 = vsel %vm337_vm2, %v4295_v9, 0.0 }
0x2280   : > { %4301 = vadd.xlane.f32.xlu1 %v4300_v60 }
0x2282   : > { %v4283_v1 = vpop.f32.mrf.mxu0 }
0x2283   : > { %v4284_v47 = vadd.f32 %v4283_v1, %v4261_v30 }
0x2285   : > { %v4296_v4 = vadd.f32 %v4284_v47, %v7167_v34 }
0x2287   : > { %v4303_v18 = vsel %vm337_vm2, %v4296_v4, 0.0 }
0x2288   : > { %4304 = vadd.xlane.f32.xlu2 %v4303_v18 }
0x228a   : > { %v4286_v56 = vpop.f32.mrf.mxu0 }
0x228b   : > { %v4287_v3 = vadd.f32 %v4286_v56, %v4261_v30 }
0x228d   : > { %v4297_v42 = vadd.f32 %v4287_v3, %v7177_v23 }
0x228f   : > { %v4306_v32 = vsel %vm337_vm2, %v4297_v42, 0.0 }
0x2290   : > { %4307 = vadd.xlane.f32.xlu0 %v4306_v32 }
0x2292   : > { %v4288_v28 = vpop.f32.mrf.mxu0 }
0x2293   : > { %v4289_v22 = vadd.f32 %v4288_v28, %v4261_v30 }
0x2295   : > { %v4298_v52 = vadd.f32 %v4289_v22, %v7180_v48 }
0x2297   : > { %v4309_v41 = vsel %vm337_vm2, %v4298_v52, 0.0 }
0x2298   : > { %4310 = vadd.xlane.f32.xlu0 %v4309_v41 }
0x22c0   : > { %v4291_v46 = vpop.f32.mrf.mxu0 }
0x22c1   : > { %v4292_v36 = vadd.f32 %v4291_v46, %v4261_v30 }
0x22c3   : > { %v4299_v34 = vadd.f32 %v4292_v36, %v7189_v62 }
0x22c5   : > { %v4312_v45 = vsel %vm337_vm2, %v4299_v34, 0.0 }
0x22c6   : > { %4313 = vadd.xlane.f32.xlu1 %v4312_v45 }
0x22c8   : > { %v4293_v35 = vpop.f32.mrf.mxu0 }
0x22f3   : > { %v4302_v54 = vpop.xlane.xlu1 %4301 }
0x22f4   : > { %v4315_v23 = vmul.f32 %v4302_v54, %v5724_v38 }
0x22f6   : > { %v7223_v39 = vsub.f32 %v4295_v9, %v4315_v23 }
0x22f8   : > { %v4325_v61 = vmul.f32 %v7223_v39, %v7223_v39 }
0x22fa   : > { %v4330_v48 = vsel %vm337_vm2, %v4325_v61, 0.0 }
0x22fb   : > { %v4305_v20 = vpop.xlane.xlu2 %4304  ;;  %4331 = vadd.xlane.f32.xlu0 %v4330_v48 }
0x22fc   : > { %v4316_v55 = vmul.f32 %v4305_v20, %v5724_v38 }
0x22fe   : > { %v7229_v24 = vsub.f32 %v4296_v4, %v4316_v55 }
0x2300   : > { %v4326_v62 = vmul.f32 %v7229_v24, %v7229_v24 }
0x2302   : > { %v4333_v13 = vsel %vm337_vm2, %v4326_v62, 0.0 }
0x2303   : > { %4334 = vadd.xlane.f32.xlu2 %v4333_v13  ;;  %v4308_v16 = vpop.xlane.xlu0 %4307 }
0x2304   : > { %v4317_v25 = vmul.f32 %v4308_v16, %v5724_v38 }
0x2306   : > { %v7235_v44 = vsub.f32 %v4297_v42, %v4317_v25 }
0x2308   : > { %v4327_v40 = vmul.f32 %v7235_v44, %v7235_v44 }
0x230a   : > { %v4336_v43 = vsel %vm337_vm2, %v4327_v40, 0.0 }
0x230b   : > { %4337 = vadd.xlane.f32.xlu1 %v4336_v43  ;;  %v4311_v8 = vpop.xlane.xlu0 %4310 }
0x230c   : > { %v4318_v50 = vmul.f32 %v4311_v8, %v5724_v38 }
0x230e   : > { %v7241_v49 = vsub.f32 %v4298_v52, %v4318_v50 }
0x2310   : > { %v4328_v0 = vmul.f32 %v7241_v49, %v7241_v49 }
0x2312   : > { %v4339_v31 = vsel %vm337_vm2, %v4328_v0, 0.0 }
0x2313   : > { %4340 = vadd.xlane.f32.xlu0 %v4339_v31 }
0x2324   : > { %4463 = vrot.lane.b32.xlu1 %v7247_v15, %s5629_s10 }
0x2327   : > { %4465 = vrot.lane.b32.xlu0 %v7251_v27, %s5629_s10 }
0x232c   : > { %4471 = vrot.lane.b32.xlu1 %v7255_v19, %s5629_s10 }
0x232f   : > { %4469 = vrot.lane.b32.xlu0 %v7259_v7, %s5629_s10 }
0x2339   : > { %v4314_v17 = vpop.xlane.xlu1 %4313 }
0x233a   : > { %v4319_v14 = vmul.f32 %v4314_v17, %v5724_v38 }
0x233c   : > { %v7263_v11 = vsub.f32 %v4299_v34, %v4319_v14 }
0x233e   : > { %v4329_v33 = vmul.f32 %v7263_v11, %v7263_v11 }
0x2340   : > { %v4342_v26 = vsel %vm337_vm2, %v4329_v33, 0.0 }
0x2341   : > { %4343 = vadd.xlane.f32.xlu2 %v4342_v26 }
0x2359   : > { %4467 = vrot.lane.b32.xlu2 %v7269_v5, %s5629_s10 }
0x236e   : > { %v4332_v29 = vpop.xlane.xlu0 %4331 }
0x236f   : > { %v4345_v21 = vmul.f32 %v4332_v29, %v5724_v38 }
0x2371   : > { %v4350_v2 = vadd.f32 1e-05, %v4345_v21 }
0x2373   : > { %5588 = vrsqrt.f32 %v4350_v2  ;;  %vm4361_vm1 = vweird.f32 %v4350_v2 }
0x2376   : > { %v4335_v58 = vpop.xlane.xlu2 %4334 }
0x2377   : > { %v4346_v53 = vmul.f32 %v4335_v58, %v5724_v38 }
0x2379   : > { %v5589_v30 = vpop.eup %5588  ;;  %v4351_v10 = vadd.f32 1e-05, %v4346_v53 }
0x237a   : > { %v4356_v6 = vmul.f32 %v5589_v30, %v4350_v2  ;;  %vm4362_vm0 = vweird.f32 %v5589_v30 }
0x237b   : > { %5590 = vrsqrt.f32 %v4351_v10  ;;  %vm4363_vm3 = vmor %vm4361_vm1, %vm4362_vm0  ;;  %vm4371_vm8 = vweird.f32 %v4351_v10  ;;  %vm4898_vm0 = vcmask 1040384  }
0x237c   : > { %v4357_v9 = vmul.f32 %v5589_v30, %v4356_v6 }
0x237e   : > { %v4358_v60 = vmul.f32 0.5, %v4357_v9  ;;  %v4338_v1 = vpop.xlane.xlu1 %4337 }
0x237f   : > { %v4347_v47 = vmul.f32 %v4338_v1, %v5724_v38 }
0x2380   : > { %v4359_v4 = vsub.f32 1.5, %v4358_v60 }
0x2381   : > { %v5591_v18 = vpop.eup %5590  ;;  %v4352_v56 = vadd.f32 1e-05, %v4347_v47 }
0x2382   : > { %v4360_v3 = vmul.f32 %v5589_v30, %v4359_v4  ;;  %v4366_v42 = vmul.f32 %v5591_v18, %v4351_v10  ;;  %vm4372_vm5 = vweird.f32 %v5591_v18 }
0x2383   : > { %5592 = vrsqrt.f32 %v4352_v56  ;;  %vm4373_vm9 = vmor %vm4371_vm8, %vm4372_vm5  ;;  %vm4381_vm11 = vweird.f32 %v4352_v56  ;;  %vm4923_vm8 = vcmp.eq.s32.totalorder %v5856_v59, 16 }
0x2384   : > { %v4367_v32 = vmul.f32 %v5591_v18, %v4366_v42  ;;  %v4364_v28 = vsel %vm4363_vm3, %v5589_v30, %v4360_v3  ;;  %v5630_v30 = vmov 0   ;;  %v5631_v42 = vmov 9  }
0x2385   : > { %v4405_v34 = vmul.f32 %v4364_v28, %v7223_v39  ;;  %5211 = vset.pattern.permute.xlu2 %v5630_v30  ;;  %5212 = vset.pattern.permute.xlu1 %v5630_v30 }
0x2386   : > { %v4368_v22 = vmul.f32 0.5, %v4367_v32  ;;  %v4341_v52 = vpop.xlane.xlu0 %4340  ;;  %5210 = vset.pattern.permute.xlu0 %v5630_v30 }
0x2387   : > { %v4348_v41 = vmul.f32 %v4341_v52, %v5724_v38  ;;  %v4410_v48 = vmul.f32 %v4405_v34, %v7156_v51  ;;  %v5636_v34 = vmov 5  }
0x2388   : > { %v4369_v46 = vsub.f32 1.5, %v4368_v22 }
0x2389   : > { %v5593_v36 = vpop.eup %5592  ;;  %v4353_v45 = vadd.f32 1e-05, %v4348_v41  ;;  %v4415_v25 = vadd.f32 %v4410_v48, %v7161_v37 }
0x238a   : > { %v4370_v35 = vmul.f32 %v5591_v18, %v4369_v46  ;;  %v4376_v54 = vmul.f32 %v5593_v36, %v4352_v56  ;;  %vm4382_vm10 = vweird.f32 %v5593_v36 }
0x238b   : > { %5594 = vrsqrt.f32 %v4353_v45  ;;  %vm4383_vm12 = vmor %vm4381_vm11, %vm4382_vm10  ;;  %vm4391_vm4 = vweird.f32 %v4353_v45 }
0x238c   : > { %v4374_v23 = vsel %vm4373_vm9, %v5591_v18, %v4370_v35  ;;  %v4377_v61 = vmul.f32 %v5593_v36, %v4376_v54  ;;  %v5638_v35 = vmov 7  }
0x238d   : > { %v4406_v20 = vmul.f32 %v4374_v23, %v7229_v24 }
0x238e   : > { %v4378_v55 = vmul.f32 0.5, %v4377_v61  ;;  %v5639_v61 = vmov 8  }
0x238f   : > { %v4411_v62 = vmul.f32 %v4406_v20, %v7156_v51 }
0x2390   : > { %v4379_v13 = vsub.f32 1.5, %v4378_v55 }
0x2391   : > { %v5595_v16 = vpop.eup %5594  ;;  %v4416_v39 = vadd.f32 %v4411_v62, %v7161_v37 }
0x2392   : > { %v4380_v40 = vmul.f32 %v5593_v36, %v4379_v13  ;;  %v4386_v43 = vmul.f32 %v5595_v16, %v4353_v45  ;;  %vm4392_vm13 = vweird.f32 %v5595_v16  ;;  %v5637_v45 = vmov 6  }
0x2393   : > { %v4420_v8 = vpack.c.bf16 %v4416_v39, %v4415_v25  ;;  %vm4393_vm6 = vmor %vm4391_vm4, %vm4392_vm13  ;;  %v5125_v39 = vld [vmem:[%s7621_s6 + $0x170] sm:$0xff] }
0x2394   : > { %v4387_v50 = vmul.f32 %v5595_v16, %v4386_v43  ;;  %v4384_v0 = vsel %vm4383_vm12, %v5593_v36, %v4380_v40  ;;  %v5130_v40 = vld [vmem:[%s7621_s6 + $0x198] sm:$0xff] }
0x2395   : > { %5121 = vmatmul.msk.bf16.vlgmr.msrb.gmra.mxu1 %vm337_vm2, %v4420_v8  ;;  %v4407_v17 = vmul.f32 %v4384_v0, %v7235_v44  ;;  %v5124_v0 = vld [vmem:[%s7621_s6 + $0x168] sm:$0xff] }
0x2396   : > { %v4388_v24 = vmul.f32 0.5, %v4387_v50  ;;  %v4464_v58 = vpop.permute.xlu1 %4463 }
0x2397   : > { %v4412_v29 = vmul.f32 %v4407_v17, %v7156_v51  ;;  %v5129_v17 = vld [vmem:[%s7621_s6 + $0x190] sm:$0xff] }
0x2398   : > { %v4389_v31 = vsub.f32 1.5, %v4388_v24 }
0x2399   : > { %v4417_v2 = vadd.f32 %v4412_v29, %v7161_v37  ;;  %v4466_v57 = vpop.permute.xlu0 %4465 }
0x239a   : > { %v4390_v14 = vmul.f32 %v5595_v16, %v4389_v31  ;;  %v4479_v53 = vadd.f32 %v7251_v27, %v4466_v57 }
0x239c   : > { %v4394_v33 = vsel %vm4393_vm6, %v5595_v16, %v4390_v14  ;;  %4496 = vperm.xlu2 %5211, %v4479_v53  }
0x239d   : > { %v4408_v26 = vmul.f32 %v4394_v33, %v7241_v49  ;;  %v4478_v49 = vadd.f32 %v7247_v15, %v4464_v58  ;;  %v4560_v33 = vld [vmem:[%s7621_s6] sm:$0xff]  ;;  %v5139_v58 = vld [vmem:[%s7621_s6 + $0x50] sm:$0xff] }
0x239e   : > { %v4472_v4 = vpop.permute.xlu1 %4471 }
0x239f   : > { %v4413_v21 = vmul.f32 %v4408_v26, %v7156_v51  ;;  %4491 = vperm.xlu0 %5210, %v4478_v49  }
0x23a1   : > { %v4418_v63 = vadd.f32 %v4413_v21, %v7161_v37  ;;  %v4470_v9 = vpop.permute.xlu0 %4469  ;;  %v5134_v21 = vld [vmem:[%s7621_s6 + $0x28] sm:$0xff] }
0x23a2   : > { %v4481_v60 = vadd.f32 %v7259_v7, %v4470_v9 }
0x23a3   : > { %v4421_v12 = vpack.c.bf16 %v4418_v63, %v4417_v2 }
0x23a4   : > { %4506 = vperm.xlu2 %5211, %v4481_v60  }
0x23a5   : > { %5122 = vmatmul.msk.bf16.gmra.mxu1 %vm337_vm2, %v4421_v12 }
0x23b4   : > { %v4344_v44 = vpop.xlane.xlu2 %4343 }
0x23b5   : > { %v4349_v10 = vmul.f32 %v4344_v44, %v5724_v38  ;;  %v4482_v38 = vadd.f32 %v7255_v19, %v4472_v4  ;;  %v5632_v19 = vmov 2   ;;  %v5149_v4 = vld [vmem:[%s7621_s6 + $0xa0] sm:$0xff] }
0x23b6   : > { %5225 = vset.pattern.permute.xlu0 %v5632_v19 }
0x23b7   : > { %v4354_v6 = vadd.f32 1e-05, %v4349_v10  ;;  %4511 = vperm.xlu2 %5211, %v4482_v38  }
0x23b9   : > { %5596 = vrsqrt.f32 %v4354_v6  ;;  %vm4401_vm14 = vweird.f32 %v4354_v6 }
0x23bc   : > { %v4468_v1 = vpop.permute.xlu2 %4467 }
0x23bd   : > { %v4480_v27 = vadd.f32 %v7269_v5, %v4468_v1 }
0x23bf   : > { %v5597_v47 = vpop.eup %5596  ;;  %4501 = vperm.xlu1 %5212, %v4480_v27  }
0x23c0   : > { %v4396_v15 = vmul.f32 %v5597_v47, %v4354_v6  ;;  %vm4402_vm7 = vweird.f32 %v5597_v47  ;;  %v5144_v6 = vld [vmem:[%s7621_s6 + $0x78] sm:$0xff] }
0x23c1   : > { %vm4403_vm15 = vmor %vm4401_vm14, %vm4402_vm7 }
0x23c2   : > { %v4397_v18 = vmul.f32 %v5597_v47, %v4396_v15 }
0x23c4   : > { %v4398_v56 = vmul.f32 0.5, %v4397_v18 }
0x23c6   : > { %v4399_v3 = vsub.f32 1.5, %v4398_v56 }
0x23c7   : > { %5213 = vset.pattern.permute.xlu1 %v5631_v42 }
0x23c8   : > { %v4400_v32 = vmul.f32 %v5597_v47, %v4399_v3 }
0x23ca   : > { %v4404_v7 = vsel %vm4403_vm15, %v5597_v47, %v4400_v32  ;;  %v5154_v32 = vld [vmem:[%s7621_s6 + $0xc8] sm:$0xff] }
0x23cb   : > { %v4409_v5 = vmul.f32 %v4404_v7, %v7263_v11  ;;  %v5633_v11 = vmov 1  }
0x23cd   : > { %v4414_v28 = vmul.f32 %v4409_v5, %v7156_v51  ;;  %v5634_v51 = vmov 3  }
0x23cf   : > { %v4419_v22 = vadd.f32 %v4414_v28, %v7161_v37  ;;  %v5635_v37 = vmov 4  }
0x23d1   : > { %v4422_v52 = vpack.c.bf16 %v4419_v22, %v4419_v22 }
0x23d3   : > { %5123 = vmatmul.msk.bf16.gmra.mxu1 %vm337_vm2, %v4422_v52  ;;  %vm4896_vm2 = vcmp.lt.s32.totalorder %v5856_v59, 16 }
0x23f6   : > { %v4497_v23 = vpop.permute.xlu2 %4496 }
0x23f7   : > { %v4515_v8 = vmul.f32 %v5125_v39, %v4497_v23 }
0x23fe   : > { %v7346_v55 = vpop.permute.xlu2 %4506 }
0x2411   : > { %v7353_v62 = vpop.permute.xlu2 %4511  ;;  %v4492_v24 = vpop.permute.xlu0 %4491 }
0x2412   : > { %v4444_v41 = vpop.f32.mrf.mxu1  ;;  %v4514_v14 = vmul.f32 %v5124_v0, %v4492_v24  ;;  %v5126_v24 = vld [vmem:[%s7621_s6 + $0x178] sm:$0xff] }
0x2413   : > { %4527 = vperm.xlu1 %5213, %v4444_v41   ;;  %4566 = vperm.xlu2 %5211, %v4444_v41  }
0x241a   : > { %v7311_v46 = vpop.f32.mrf.mxu1 }
0x241b   : > { %5215 = vset.pattern.permute.xlu1 %v5632_v19  ;;  %4642 = vperm.xlu0 %5225, %v7311_v46  }
0x241c   : > { %5214 = vset.pattern.permute.xlu2 %v5633_v11  ;;  %4638 = vperm.xlu1 %5215, %v4444_v41  }
0x241d   : > { %4602 = vperm.xlu2 %5214, %v4444_v41  }
0x2422   : > { %v4449_v36 = vpop.f32.mrf.mxu1 }
0x2423   : > { %5226 = vset.pattern.permute.xlu0 %v5634_v51 }
0x2424   : > { %5216 = vset.pattern.permute.xlu1 %v5634_v51  ;;  %4678 = vperm.xlu0 %5226, %v7311_v46  }
0x2425   : > { %5222 = vset.pattern.permute.xlu2 %v5631_v42  ;;  %4674 = vperm.xlu1 %5216, %v4444_v41  }
0x2426   : > { %4532 = vperm.xlu2 %5222, %v7311_v46  }
0x242a   : > { %v7334_v54 = vpop.f32.mrf.mxu1 }
0x242c   : > { %5227 = vset.pattern.permute.xlu0 %v5635_v37 }
0x242d   : > { %5217 = vset.pattern.permute.xlu1 %v5635_v37  ;;  %4714 = vperm.xlu0 %5227, %v7311_v46  }
0x242e   : > { %5234 = vset.pattern.permute.xlu2 %v5633_v11  ;;  %4710 = vperm.xlu1 %5217, %v4444_v41  }
0x242f   : > { %4610 = vperm.xlu2 %5234, %v4449_v36  }
0x2431   : > { %v7367_v25 = vpop.permute.xlu1 %4501 }
0x2435   : > { %5228 = vset.pattern.permute.xlu0 %v5636_v34 }
0x2436   : > { %5218 = vset.pattern.permute.xlu1 %v5636_v34  ;;  %4750 = vperm.xlu0 %5228, %v7311_v46  }
0x2437   : > { %5235 = vset.pattern.permute.xlu2 %v5632_v19  ;;  %4746 = vperm.xlu1 %5218, %v4444_v41  }
0x2438   : > { %4646 = vperm.xlu2 %5235, %v4449_v36  }
0x243e   : > { %5229 = vset.pattern.permute.xlu0 %v5637_v45 }
0x243f   : > { %5219 = vset.pattern.permute.xlu1 %v5637_v45  ;;  %4786 = vperm.xlu0 %5229, %v7311_v46  }
0x2440   : > { %5236 = vset.pattern.permute.xlu2 %v5634_v51  ;;  %4782 = vperm.xlu1 %5219, %v4444_v41  }
0x2441   : > { %4682 = vperm.xlu2 %5236, %v4449_v36  }
0x2447   : > { %5230 = vset.pattern.permute.xlu0 %v5638_v35 }
0x2448   : > { %5220 = vset.pattern.permute.xlu1 %v5638_v35  ;;  %4822 = vperm.xlu0 %5230, %v7311_v46  }
0x2449   : > { %5237 = vset.pattern.permute.xlu2 %v5635_v37  ;;  %4818 = vperm.xlu1 %5220, %v4444_v41  }
0x244a   : > { %4718 = vperm.xlu2 %5237, %v4449_v36  }
0x2450   : > { %5231 = vset.pattern.permute.xlu0 %v5639_v61  ;;  %v7340_v48 = vpop.f32.mrf.mxu1 }
0x2451   : > { %5221 = vset.pattern.permute.xlu1 %v5639_v61  ;;  %4858 = vperm.xlu0 %5231, %v7311_v46  }
0x2452   : > { %5238 = vset.pattern.permute.xlu2 %v5636_v34  ;;  %4854 = vperm.xlu1 %5221, %v4444_v41  }
0x2453   : > { %4754 = vperm.xlu2 %5238, %v4449_v36  }
0x2458   : > { %v4456_v20 = vpop.f32.mrf.mxu1 }
0x2459   : > { %5232 = vset.pattern.permute.xlu0 %v5631_v42 }
0x245a   : > { %5223 = vset.pattern.permute.xlu1 %v5630_v30  ;;  %4537 = vperm.xlu0 %5232, %v4449_v36  }
0x245b   : > { %5239 = vset.pattern.permute.xlu2 %v5637_v45  ;;  %4570 = vperm.xlu1 %5223, %v7311_v46  }
0x245c   : > { %4790 = vperm.xlu2 %5239, %v4449_v36  }
0x2462   : > { %5233 = vset.pattern.permute.xlu0 %v5630_v30 }
0x2463   : > { %5224 = vset.pattern.permute.xlu1 %v5633_v11  ;;  %4574 = vperm.xlu0 %5233, %v4449_v36  }
0x2464   : > { %5240 = vset.pattern.permute.xlu2 %v5638_v35  ;;  %4606 = vperm.xlu1 %5224, %v7311_v46  }
0x2465   : > { %4826 = vperm.xlu2 %5240, %v4449_v36  }
0x246b   : > { %4578 = vperm.xlu0 %5233, %v7334_v54  }
0x246c   : > { %5241 = vset.pattern.permute.xlu1 %v5631_v42 }
0x246d   : > { %5250 = vset.pattern.permute.xlu2 %v5639_v61  ;;  %4542 = vperm.xlu1 %5241, %v7334_v54   ;;  %v4567_v13 = vpop.permute.xlu2 %4566 }
0x246e   : > { %4862 = vperm.xlu2 %5250, %v4449_v36   ;;  %v4585_v2 = vmul.f32 %v4567_v13, %v4560_v33  ;;  %v4516_v33 = vmul.f32 %v5126_v24, %v7367_v25  ;;  %v5141_v25 = vld [vmem:[%s7621_s6 + $0x60] sm:$0xff] }
0x2473   : > { %5258 = vset.pattern.permute.xlu0 %v5639_v61 }
0x2474   : > { %4866 = vperm.xlu0 %5258, %v7334_v54  }
0x2475   : > { %5242 = vset.pattern.permute.xlu1 %v5633_v11 }
0x2476   : > { %5251 = vset.pattern.permute.xlu2 %v5630_v30  ;;  %4614 = vperm.xlu1 %5242, %v7334_v54  }
0x2477   : > { %4582 = vperm.xlu2 %5251, %v7340_v48   ;;  %v4603_v16 = vpop.permute.xlu2 %4602 }
0x2478   : > { %v4621_v12 = vmul.f32 %v5134_v21, %v4603_v16 }
0x247e   : > { %5243 = vset.pattern.permute.xlu1 %v5632_v19 }
0x247f   : > { %5252 = vset.pattern.permute.xlu2 %v5633_v11  ;;  %4650 = vperm.xlu1 %5243, %v7334_v54  }
0x2480   : > { %4618 = vperm.xlu2 %5252, %v7340_v48   ;;  %v4533_v43 = vpop.permute.xlu2 %4532 }
0x2481   : > { %v4551_v50 = vmul.f32 %v5130_v40, %v4533_v43  ;;  %v4561_v40 = vld [vmem:[%s7621_s6 + $0x8] sm:$0xff] }
0x2483   : > { %v7382_v31 = vadd.f32 %v4551_v50, %v4515_v8  ;;  %v5131_v50 = vld [vmem:[%s7621_s6 + $0x1a0] sm:$0xff] }
0x2485   : > { %v4528_v26 = vpop.permute.xlu1 %4527 }
0x2486   : > { %v4550_v29 = vmul.f32 %v5129_v17, %v4528_v26  ;;  %v5135_v26 = vld [vmem:[%s7621_s6 + $0x30] sm:$0xff] }
0x2487   : > { %5244 = vset.pattern.permute.xlu1 %v5634_v51 }
0x2488   : > { %v4555_v63 = vadd.f32 %v4550_v29, %v4514_v14  ;;  %5253 = vset.pattern.permute.xlu2 %v5632_v19  ;;  %4686 = vperm.xlu1 %5244, %v7334_v54   ;;  %v5159_v19 = vld [vmem:[%s7621_s6 + $0xf0] sm:$0xff]  ;;  %v5136_v29 = vld [vmem:[%s7621_s6 + $0x38] sm:$0xff] }
0x2489   : > { %4654 = vperm.xlu2 %5253, %v7340_v48   ;;  %v7411_v27 = vpop.permute.xlu2 %4610  ;;  %v4562_v14 = vld [vmem:[%s7621_s6 + $0x10] sm:$0xff] }
0x248a   : > { %v4590_v57 = vadd.f32 %v4585_v2, %v4555_v63  ;;  %v5140_v2 = vld [vmem:[%s7621_s6 + $0x58] sm:$0xff] }
0x248c   : > { %v4626_v44 = vadd.f32 %v4621_v12, %v4590_v57 }
0x248d   : > { %v7400_v53 = vpop.permute.xlu0 %4642 }
0x248e   : > { %v4639_v30 = vpop.permute.xlu1 %4638 }
0x248f   : > { %v4657_v49 = vmul.f32 %v5139_v58, %v4639_v30  ;;  %v5145_v30 = vld [vmem:[%s7621_s6 + $0x80] sm:$0xff] }
0x2490   : > { %5245 = vset.pattern.permute.xlu1 %v5635_v37 }
0x2491   : > { %v4662_v10 = vadd.f32 %v4657_v49, %v4626_v44  ;;  %5254 = vset.pattern.permute.xlu2 %v5634_v51  ;;  %4722 = vperm.xlu1 %5245, %v7334_v54   ;;  %v4623_v44 = vmul.f32 %v5136_v29, %v7411_v27 }
0x2492   : > { %4690 = vperm.xlu2 %5254, %v7340_v48   ;;  %v7423_v56 = vpop.permute.xlu2 %4646 }
0x2496   : > { %v7409_v9 = vpop.permute.xlu0 %4678 }
0x2497   : > { %v4675_v60 = vpop.permute.xlu1 %4674  ;;  %v4694_v27 = vmul.f32 %v5145_v30, %v7409_v9  ;;  %v5160_v9 = vld [vmem:[%s7621_s6 + $0xf8] sm:$0xff] }
0x2498   : > { %v4693_v1 = vmul.f32 %v5144_v6, %v4675_v60  ;;  %v5146_v6 = vld [vmem:[%s7621_s6 + $0x88] sm:$0xff] }
0x2499   : > { %5246 = vset.pattern.permute.xlu1 %v5636_v34 }
0x249a   : > { %v4698_v47 = vadd.f32 %v4693_v1, %v4662_v10  ;;  %5255 = vset.pattern.permute.xlu2 %v5635_v37  ;;  %4758 = vperm.xlu1 %5246, %v7334_v54   ;;  %v5164_v37 = vld [vmem:[%s7621_s6 + $0x118] sm:$0xff]  ;;  %v4658_v10 = vmul.f32 %v5140_v2, %v7400_v53  ;;  %v4659_v1 = vmul.f32 %v5141_v25, %v7423_v56 }
0x249b   : > { %4726 = vperm.xlu2 %5255, %v7340_v48   ;;  %v4683_v52 = vpop.permute.xlu2 %4682 }
0x249c   : > { %v4695_v53 = vmul.f32 %v5146_v6, %v4683_v52  ;;  %v5137_v6 = vld [vmem:[%s7621_s6 + $0x40] sm:$0xff] }
0x249f   : > { %v7420_v15 = vpop.permute.xlu0 %4714 }
0x24a0   : > { %v4711_v18 = vpop.permute.xlu1 %4710 }
0x24a1   : > { %v4729_v38 = vmul.f32 %v5149_v4, %v4711_v18  ;;  %v5151_v18 = vld [vmem:[%s7621_s6 + $0xb0] sm:$0xff] }
0x24a2   : > { %5247 = vset.pattern.permute.xlu1 %v5637_v45 }
0x24a3   : > { %v4734_v3 = vadd.f32 %v4729_v38, %v4698_v47  ;;  %5256 = vset.pattern.permute.xlu2 %v5636_v34  ;;  %4794 = vperm.xlu1 %5247, %v7334_v54   ;;  %v5150_v47 = vld [vmem:[%s7621_s6 + $0xa8] sm:$0xff] }
0x24a4   : > { %4762 = vperm.xlu2 %5256, %v7340_v48   ;;  %v4730_v56 = vmul.f32 %v5150_v47, %v7420_v15 }
0x24a8   : > { %v7431_v7 = vpop.permute.xlu0 %4750 }
0x24a9   : > { %v4747_v5 = vpop.permute.xlu1 %4746 }
0x24aa   : > { %v4765_v28 = vmul.f32 %v5154_v32, %v4747_v5  ;;  %v5156_v5 = vld [vmem:[%s7621_s6 + $0xd8] sm:$0xff] }
0x24ab   : > { %5248 = vset.pattern.permute.xlu1 %v5631_v42  ;;  %v4719_v42 = vpop.permute.xlu2 %4718 }
0x24ac   : > { %v4770_v22 = vadd.f32 %v4765_v28, %v4734_v3  ;;  %5257 = vset.pattern.permute.xlu2 %v5637_v45  ;;  %4547 = vperm.xlu1 %5248, %v7340_v48   ;;  %v5155_v3 = vld [vmem:[%s7621_s6 + $0xd0] sm:$0xff] }
0x24ad   : > { %4798 = vperm.xlu2 %5257, %v7340_v48   ;;  %v4766_v52 = vmul.f32 %v5155_v3, %v7431_v7  ;;  %v5133_v3 = vld [vmem:[%s7621_s6 + $0x1b0] sm:$0xff] }
0x24b1   : > { %v7440_v41 = vpop.permute.xlu0 %4786 }
0x24b2   : > { %v4783_v46 = vpop.permute.xlu1 %4782 }
0x24b3   : > { %v4801_v11 = vmul.f32 %v5159_v19, %v4783_v46  ;;  %v5161_v46 = vld [vmem:[%s7621_s6 + $0x100] sm:$0xff] }
0x24b4   : > { %5249 = vset.pattern.permute.xlu1 %v5638_v35  ;;  %v4755_v35 = vpop.permute.xlu2 %4754 }
0x24b5   : > { %v4806_v51 = vadd.f32 %v4801_v11, %v4770_v22  ;;  %5259 = vset.pattern.permute.xlu2 %v5639_v61  ;;  %4830 = vperm.xlu1 %5249, %v7334_v54   ;;  %v5169_v61 = vld [vmem:[%s7621_s6 + $0x140] sm:$0xff]  ;;  %v4731_v22 = vmul.f32 %v5151_v18, %v4719_v42  ;;  %v5128_v18 = vld [vmem:[%s7621_s6 + $0x188] sm:$0xff] }
0x24b6   : > { %4870 = vperm.xlu2 %5259, %v7340_v48  }
0x24ba   : > { %v7449_v36 = vpop.permute.xlu0 %4822 }
0x24bb   : > { %v4819_v34 = vpop.permute.xlu1 %4818 }
0x24bc   : > { %v4837_v45 = vmul.f32 %v5164_v37, %v4819_v34  ;;  %v4791_v39 = vpop.permute.xlu2 %4790  ;;  %v4767_v37 = vmul.f32 %v5156_v5, %v4755_v35  ;;  %v5165_v34 = vld [vmem:[%s7621_s6 + $0x120] sm:$0xff] }
0x24bd   : > { %4834 = vperm.xlu1 %5249, %v7340_v48   ;;  %v4838_v35 = vmul.f32 %v5165_v34, %v7449_v36 }
0x24be   : > { %v4842_v23 = vadd.f32 %v4837_v45, %v4806_v51  ;;  %v4802_v45 = vmul.f32 %v5160_v9, %v7440_v41  ;;  %v4518_v9 = vmul.f32 %v5128_v18, %v7353_v62  ;;  %v5143_v62 = vld [vmem:[%s7621_s6 + $0x70] sm:$0xff] }
0x24c3   : > { %v7455_v54 = vpop.permute.xlu0 %4858 }
0x24c4   : > { %v4855_v20 = vpop.permute.xlu1 %4854 }
0x24c5   : > { %v4873_v13 = vmul.f32 %v5169_v61, %v4855_v20  ;;  %v4803_v61 = vmul.f32 %v5161_v46, %v4791_v39  ;;  %v5170_v20 = vld [vmem:[%s7621_s6 + $0x148] sm:$0xff] }
0x24c6   : > { %v5138_v46 = vld [vmem:[%s7621_s6 + $0x48] sm:$0xff] }
0x24c7   : > { %v7457_v16 = vadd.f32 %v4873_v13, %v4842_v23  ;;  %v5166_v23 = vld [vmem:[%s7621_s6 + $0x128] sm:$0xff] }
0x24cc   : > { %v4538_v43 = vpop.permute.xlu0 %4537 }
0x24cd   : > { %v4571_v8 = vpop.permute.xlu1 %4570  ;;  %v4552_v17 = vmul.f32 %v5131_v50, %v4538_v43 }
0x24ce   : > { %v4586_v48 = vmul.f32 %v4571_v8, %v4561_v40  ;;  %v5171_v40 = vld [vmem:[%s7621_s6 + $0x150] sm:$0xff] }
0x24cf   : > { %v4557_v63 = vadd.f32 %v4552_v17, %v4516_v33 }
0x24d0   : > { %v4591_v0 = vadd.f32 %v4586_v48, %v7382_v31  ;;  %v4827_v31 = vpop.permute.xlu2 %4826  ;;  %v4874_v48 = vmul.f32 %v5170_v20, %v7455_v54  ;;  %v5132_v54 = vld [vmem:[%s7621_s6 + $0x1a8] sm:$0xff] }
0x24d1   : > { %v4839_v8 = vmul.f32 %v5166_v23, %v4827_v31 }
0x24d5   : > { %v4575_v21 = vpop.permute.xlu0 %4574 }
0x24d6   : > { %v4587_v12 = vmul.f32 %v4575_v21, %v4562_v14  ;;  %v4607_v57 = vpop.permute.xlu1 %4606 }
0x24d7   : > { %v4622_v58 = vmul.f32 %v5135_v26, %v4607_v57 }
0x24d8   : > { %v4592_v49 = vadd.f32 %v4587_v12, %v4557_v63  ;;  %v4863_v11 = vpop.permute.xlu2 %4862 }
0x24d9   : > { %v4627_v60 = vadd.f32 %v4622_v58, %v4591_v0  ;;  %v4875_v0 = vmul.f32 %v5171_v40, %v4863_v11  ;;  %v5127_v58 = vld [vmem:[%s7621_s6 + $0x180] sm:$0xff] }
0x24da   : > { %v4628_v4 = vadd.f32 %v4623_v44, %v4592_v49  ;;  %v4517_v30 = vmul.f32 %v5127_v58, %v7346_v55  ;;  %v4563_v49 = vld [vmem:[%s7621_s6 + $0x18] sm:$0xff]  ;;  %v5147_v55 = vld [vmem:[%s7621_s6 + $0x90] sm:$0xff] }
0x24db   : > { %v4663_v38 = vadd.f32 %v4658_v10, %v4627_v60 }
0x24dc   : > { %v4664_v32 = vadd.f32 %v4659_v1, %v4628_v4  ;;  %v5142_v1 = vld [vmem:[%s7621_s6 + $0x68] sm:$0xff] }
0x24dd   : > { %v4699_v28 = vadd.f32 %v4694_v27, %v4663_v38  ;;  %v4579_v10 = vpop.permute.xlu0 %4578 }
0x24de   : > { %v4700_v19 = vadd.f32 %v4695_v53, %v4664_v32  ;;  %v4588_v47 = vmul.f32 %v4579_v10, %v4563_v49  ;;  %v5152_v32 = vld [vmem:[%s7621_s6 + $0xb8] sm:$0xff] }
0x24df   : > { %v4735_v51 = vadd.f32 %v4730_v56, %v4699_v28  ;;  %v4543_v15 = vpop.permute.xlu1 %4542  ;;  %v4564_v56 = vld [vmem:[%s7621_s6 + $0x20] sm:$0xff] }
0x24e0   : > { %v4736_v42 = vadd.f32 %v4731_v22, %v4700_v19  ;;  %v4583_v33 = vpop.permute.xlu2 %4582  ;;  %v4553_v44 = vmul.f32 %v5132_v54, %v4543_v15  ;;  %v5157_v19 = vld [vmem:[%s7621_s6 + $0xe0] sm:$0xff] }
0x24e1   : > { %v4771_v7 = vadd.f32 %v4766_v52, %v4735_v51  ;;  %v4589_v15 = vmul.f32 %v4583_v33, %v4564_v56 }
0x24e2   : > { %v4772_v13 = vadd.f32 %v4767_v37, %v4736_v42  ;;  %v4558_v60 = vadd.f32 %v4553_v44, %v4517_v30  ;;  %v5162_v37 = vld [vmem:[%s7621_s6 + $0x108] sm:$0xff]  ;;  %v5168_v44 = vld [vmem:[%s7621_s6 + $0x138] sm:$0xff] }
0x24e3   : > { %v4807_v43 = vadd.f32 %v4802_v45, %v4771_v7 }
0x24e4   : > { %v4808_v41 = vadd.f32 %v4803_v61, %v4772_v13  ;;  %v4593_v38 = vadd.f32 %v4588_v47, %v4558_v60  ;;  %v5148_v61 = vld [vmem:[%s7621_s6 + $0x98] sm:$0xff] }
0x24e5   : > { %v4843_v50 = vadd.f32 %v4838_v35, %v4807_v43 }
0x24e6   : > { %v4844_v24 = vadd.f32 %v4839_v8, %v4808_v41  ;;  %v5167_v8 = vld [vmem:[%s7621_s6 + $0x130] sm:$0xff]  ;;  %v5153_v41 = vld [vmem:[%s7621_s6 + $0xc0] sm:$0xff] }
0x24e7   : > { %v4879_v39 = vadd.f32 %v4874_v48, %v4843_v50  ;;  %v5172_v50 = vld [vmem:[%s7621_s6 + $0x158] sm:$0xff] }
0x24e8   : > { %v4615_v17 = vpop.permute.xlu1 %4614  ;;  %v4880_v14 = vadd.f32 %v4875_v0, %v4844_v24  ;;  %v4619_v21 = vpop.permute.xlu2 %4618 }
0x24e9   : > { %v4883_v26 = vadd.f32 %v4879_v39, %v7457_v16  ;;  %v4624_v4 = vmul.f32 %v5137_v6, %v4615_v17  ;;  %v4625_v23 = vmul.f32 %v5138_v46, %v4619_v21  ;;  %v4867_v0 = vpop.permute.xlu0 %4866 }
0x24eb   : > { %v7531_v29 = vadd.f32 %v4883_v26, %v4880_v14  ;;  %v4629_v5 = vadd.f32 %v4624_v4, %v4593_v38  ;;  %v5158_v14 = vld [vmem:[%s7621_s6 + $0xe8] sm:$0xff] }
0x24f0   : > { %v4655_v63 = vpop.permute.xlu2 %4654 }
0x24f1   : > { %v4651_v36 = vpop.permute.xlu1 %4650  ;;  %v4661_v35 = vmul.f32 %v5143_v62, %v4655_v63  ;;  %v5163_v63 = vld [vmem:[%s7621_s6 + $0x110] sm:$0xff] }
0x24f2   : > { %v4660_v53 = vmul.f32 %v5142_v1, %v4651_v36 }
0x24f4   : > { %v4665_v11 = vadd.f32 %v4660_v53, %v4629_v5 }
0x24f8   : > { %v4691_v31 = vpop.permute.xlu2 %4690 }
0x24f9   : > { %v4697_v24 = vmul.f32 %v5148_v61, %v4691_v31 }
0x24fa   : > { %v4687_v2 = vpop.permute.xlu1 %4686 }
0x24fb   : > { %v4696_v28 = vmul.f32 %v5147_v55, %v4687_v2  ;;  %v4876_v2 = vmul.f32 %v5172_v50, %v4867_v0 }
0x24fd   : > { %v4701_v42 = vadd.f32 %v4696_v28, %v4665_v11 }
0x2500   : > { %v4727_v25 = vpop.permute.xlu2 %4726 }
0x2501   : > { %v4733_v36 = vmul.f32 %v5153_v41, %v4727_v25  ;;  %v5173_v25 = vld [vmem:[%s7621_s6 + $0x160] sm:$0xff] }
0x2503   : > { %v4723_v12 = vpop.permute.xlu1 %4722 }
0x2504   : > { %v4732_v51 = vmul.f32 %v5152_v32, %v4723_v12 }
0x2506   : > { %v4737_v20 = vadd.f32 %v4732_v51, %v4701_v42 }
0x2508   : > { %v4763_v27 = vpop.permute.xlu2 %4762 }
0x250c   : > { %v4759_v57 = vpop.permute.xlu1 %4758 }
0x250d   : > { %v4768_v45 = vmul.f32 %v5157_v19, %v4759_v57  ;;  %v4769_v57 = vmul.f32 %v5158_v14, %v4763_v27 }
0x250f   : > { %v4773_v48 = vadd.f32 %v4768_v45, %v4737_v20 }
0x2510   : > { %v4799_v40 = vpop.permute.xlu2 %4798 }
0x2511   : > { %v4805_v31 = vmul.f32 %v5163_v63, %v4799_v40 }
0x2515   : > { %v4795_v16 = vpop.permute.xlu1 %4794 }
0x2516   : > { %v4804_v13 = vmul.f32 %v5162_v37, %v4795_v16 }
0x2518   : > { %v4809_v33 = vadd.f32 %v4804_v13, %v4773_v48  ;;  %v4871_v49 = vpop.permute.xlu2 %4870 }
0x2519   : > { %v4877_v1 = vmul.f32 %v5173_v25, %v4871_v49 }
0x251e   : > { %v4548_v22 = vpop.permute.xlu1 %4547 }
0x251f   : > { %v4554_v52 = vmul.f32 %v5133_v3, %v4548_v22 }
0x2521   : > { %v4559_v34 = vadd.f32 %v4554_v52, %v4518_v9 }
0x2523   : > { %v4594_v7 = vadd.f32 %v4589_v15, %v4559_v34 }
0x2525   : > { %v4630_v43 = vadd.f32 %v4625_v23, %v4594_v7 }
0x2527   : > { %v4666_v39 = vadd.f32 %v4661_v35, %v4630_v43  ;;  %v4831_v17 = vpop.permute.xlu1 %4830 }
0x2528   : > { %v4840_v26 = vmul.f32 %v5167_v8, %v4831_v17 }
0x2529   : > { %v4702_v21 = vadd.f32 %v4697_v24, %v4666_v39 }
0x252a   : > { %v4845_v12 = vadd.f32 %v4840_v26, %v4809_v33 }
0x252b   : > { %v4738_v54 = vadd.f32 %v4733_v36, %v4702_v21 }
0x252c   : > { %v4881_v58 = vadd.f32 %v4876_v2, %v4845_v12 }
0x252d   : > { %v4774_v16 = vadd.f32 %v4769_v57, %v4738_v54 }
0x252e   : > { %v4885_v30 = vadd.f32 %v7531_v29, %v4881_v58  ;;  %v5174_v29 = vld [vmem:[%s7619_s4 + $0x4] sm:$0x1] }
0x252f   : > { %v4835_v10 = vpop.permute.xlu1 %4834  ;;  %v4810_v6 = vadd.f32 %v4805_v31, %v4774_v16 }
0x2530   : > { %v4841_v60 = vmul.f32 %v5168_v44, %v4835_v10 }
0x2532   : > { %v4846_v47 = vadd.f32 %v4841_v60, %v4810_v6 }
0x2534   : > { %v4882_v4 = vadd.f32 %v4877_v1, %v4846_v47 }
0x2536   : > { %v4886_v55 = vadd.f32 %v4885_v30, %v4882_v4 }
0x2538   : > { %v4887_v27 = vrot.slane %v4886_v55, 4 }
0x253a   : > { %v4888_v18 = vadd.f32 %v4887_v27, %v4886_v55 }
0x253c   : > { %v4889_v38 = vrot.slane %v4888_v18, 2 }
0x253e   : > { %v4890_v53 = vadd.f32 %v4889_v38, %v4888_v18 }
0x2540   : > { %v4891_v3 = vrot.slane %v4890_v53, 1 }
0x2542   : > { %v4892_v32 = vadd.f32 %v4891_v3, %v4890_v53 }
0x2544   : > { %v4895_v56 = vadd.f32 %v5174_v29, %v4892_v32 }
0x2546   : > { %v4897_v5 = vsel %vm4896_vm2, %v4895_v56, -1e+30 }
0x2547   : > { %v4899_v28 = vsel %vm4898_vm0, %v4897_v5, -inf }
0x2548   : > { %4900 = vmax.xlane.f32.xlu1 %v4899_v28 }
0x25bb   : > { %v4901_v22 = vpop.xlane.xlu1 %4900 }
0x25bc   : > { %v4902_v9 = vsub.f32 %v4897_v5, %v4901_v22 }
0x25be   : > { %v4903_v19 = vmul.f32 1.442695, %v4902_v9 }
0x25c0   : > { %5598 = vpow2.f32 %v4903_v19 }
0x25c6   : > { %v5599_v52 = vpop.eup %5598 }
0x25c7   : > { %v4905_v46 = vsel %vm4898_vm0, %v5599_v52, 0.0 }
0x25c8   : > { %4906 = vadd.xlane.f32.xlu0 %v4905_v46 }
0x263b   : > { %v4907_v11 = vpop.xlane.xlu0 %4906 }
0x263c   : > { %5600 = vrcp.f32 %v4907_v11  ;;  %v4919_v34 = vand.u32 2147483648, %v4907_v11  ;;  %v4917_v42 = vand.u32 2147483647, %v4907_v11  ;;  %vm4913_vm3 = vweird.f32 %v4907_v11 }
0x263d   : > { %5602 = vtanh.f32 %v4895_v56 }
0x263e   : > { %v4920_v23 = vor.u32 1.1754944e-38, %v4919_v34  ;;  %vm4918_vm9 = vcmp.eq.f32.partialorder %v4917_v42, 8.507059e+37 }
0x2642   : > { %v5601_v51 = vpop.eup %5600 }
0x2643   : > { %v4909_v15 = vmul.f32 %v5601_v51, %v4907_v11  ;;  %vm4914_vm1 = vweird.f32 %v5601_v51  ;;  %v5603_v7 = vpop.eup %5602 }
0x2644   : > { %vm4915_vm5 = vmor %vm4913_vm3, %vm4914_vm1  ;;  %v4925_v35 = vsel %vm4923_vm8, %v5603_v7, 0.0 }
0x2645   : > { %v4910_v37 = vsub.f32 1.0, %v4909_v15 }
0x2647   : > { %v4911_v62 = vmul.f32 %v5601_v51, %v4910_v37 }
0x2649   : > { %v4912_v45 = vadd.f32 %v5601_v51, %v4911_v62 }
0x264b   : > { %v4916_v61 = vsel %vm4915_vm5, %v5601_v51, %v4912_v45 }
0x264c   : > { %v4921_v20 = vsel %vm4918_vm9, %v4920_v23, %v4916_v61 }
0x264d   : > { %v4922_v13 = vmul.f32 %v5599_v52, %v4921_v20 }
0x264f   : > { %v4926_v40 = vadd.f32 %v4925_v35, %v4922_v13 }
0x2651   : > { %4927 = vst [vmem:[%s276_s21] sm:$0x1] %v4926_v40 }
0x2652 PF: > { %s17_s24 = sadd.s32 1, %s5615_s24  }
0x2653   : > { %p14_p5 = scmp.ge.s32.totalorder %s17_s24, 4  }
0x2655   :  { %16 = sbr.rel (!%p14_p5) target bundleno = 1 (0x1), region = 95 }

</bundles_post_ra>
